<compile_context>
chip_gen: v7x
topology: tpu7x:2x2x1
jax: 0.10.0
libtpu: 0.0.40
codegen_flags: <defaults>
</compile_context>

<pallas_src>
import jax
import jax.numpy as jnp
from jax.experimental import pallas as pl
from jax.experimental.pallas import tpu as pltpu

EPS = 1e-5
HIGHEST = jax.lax.Precision.HIGHEST          # only used by the f32 reference

# Static conv config: (param name, ksize, stride, pad)
_CONV_CFG = (
    ("c1", 3, 1, 1),
    ("c2", 3, 1, 1),
    ("c3", 5, 2, 1),
    ("c4", 3, 1, 1),
    ("c5", 3, 1, 1),
    ("c6", 5, 2, 1),
)

# M-tile: 512 rows keeps the worst-case double-buffered bf16 X tile (~2*512*1664*2B ≈ 3.4 MiB)
# plus resident weights well under the scoped-VMEM budget of every generation (16 MiB default
# on v5e, 32 MiB on v6e/v7x).  Can be raised to 1024-2048 on v6e's 128 MiB VMEM.
_TM = 512
_VMEM_LIMIT = 32 * 1024 * 1024               # explicit; safe on v5e/v6e/v7x


def _round_up(x, m):
    return (x + m - 1) // m * m


# ---------------------------------------------------------------------------
# Pallas kernel 1: fused conv matmul  ->  BN(ReLU(X @ W + bias))
#   x_ref  : (TM, Kp)  bf16
#   w_ref  : (Kp, Np)  bf16   (VMEM-resident across the M grid)
#   bst_ref: (3,  Np)  f32    rows = [bias, bn_scale, bn_shift]
#   o_ref  : (TM, Np)  bf16
# ---------------------------------------------------------------------------
def _conv_matmul_kernel(x_ref, w_ref, bst_ref, o_ref):
    acc = jnp.dot(x_ref[...], w_ref[...], preferred_element_type=jnp.float32)
    acc = acc + bst_ref[0:1, :]                       # conv bias
    acc = jnp.maximum(acc, 0.0)                       # ReLU comes BEFORE BatchNorm in the module
    acc = acc * bst_ref[1:2, :] + bst_ref[2:3, :]     # folded BatchNorm (eval / running stats)
    o_ref[...] = acc.astype(o_ref.dtype)


def conv_matmul(patches, w, bst, *, out_dtype=jnp.bfloat16, tm=_TM):
    """patches: (M, K) bf16, w: (K, N) bf16, bst: (3, N) f32 -> (M, N) out_dtype."""
    M, K = patches.shape
    Kw, N = w.shape
    assert Kw == K
    Kp = _round_up(K, 128)
    Np = _round_up(N, 128)
    tm = min(tm, _round_up(M, 8))
    Mp = _round_up(M, tm)

    xp = jnp.pad(patches, ((0, Mp - M), (0, Kp - K))).astype(jnp.bfloat16)
    wp = jnp.pad(w, ((0, Kp - K), (0, Np - N))).astype(jnp.bfloat16)
    bstp = jnp.pad(bst, ((0, 0), (0, Np - N))).astype(jnp.float32)

    out = pl.pallas_call(
        _conv_matmul_kernel,
        out_shape=jax.ShapeDtypeStruct((Mp, Np), out_dtype),
        grid=(Mp // tm,),
        in_specs=[
            pl.BlockSpec((tm, Kp), lambda i: (i, 0)),   # X: streamed, double-buffered
            pl.BlockSpec((Kp, Np), lambda i: (0, 0)),   # W: resident
            pl.BlockSpec((3, Np), lambda i: (0, 0)),    # bias/scale/shift: resident
        ],
        out_specs=pl.BlockSpec((tm, Np), lambda i: (i, 0)),
        compiler_params=pltpu.CompilerParams(
            dimension_semantics=("parallel",),
            vmem_limit_bytes=_VMEM_LIMIT,
        ),
    )(xp, wp, bstp)
    return out[:M, :N]


# ---------------------------------------------------------------------------
# Pallas kernel 2: fused classifier head
#   logits = (BN1d(ReLU(X @ W1 + b1))) @ W2 + b2
# ---------------------------------------------------------------------------
def _fc_head_kernel(x_ref, w1_ref, bst1_ref, w2_ref, b2_ref, o_ref):
    h = jnp.dot(x_ref[...], w1_ref[...], preferred_element_type=jnp.float32)
    h = h + bst1_ref[0:1, :]                          # fc1 bias
    h = jnp.maximum(h, 0.0)                           # ReLU
    h = h * bst1_ref[1:2, :] + bst1_ref[2:3, :]       # folded BatchNorm1d (eval)
    logits = jnp.dot(h.astype(jnp.bfloat16), w2_ref[...],
                     preferred_element_type=jnp.float32)
    o_ref[...] = logits + b2_ref[...]


def fc_head(x, w1, bst1, w2, b2, *, tm=256):
    """x: (B, K) bf16, w1: (K, N1) bf16, bst1: (3, N1) f32, w2: (N1, N2) bf16, b2: (N2,)."""
    B, K = x.shape
    K1, N1 = w1.shape
    N1b, N2 = w2.shape
    assert K1 == K and N1b == N1 and K % 128 == 0 and N1 % 128 == 0
    N2p = _round_up(N2, 128)
    tm = min(tm, _round_up(B, 8))
    Bp = _round_up(B, tm)

    xp = jnp.pad(x, ((0, Bp - B), (0, 0))).astype(jnp.bfloat16)
    w2p = jnp.pad(w2, ((0, 0), (0, N2p - N2))).astype(jnp.bfloat16)
    b2p = jnp.pad(b2, (0, N2p - N2)).reshape(1, N2p).astype(jnp.float32)

    out = pl.pallas_call(
        _fc_head_kernel,
        out_shape=jax.ShapeDtypeStruct((Bp, N2p), jnp.float32),
        grid=(Bp // tm,),
        in_specs=[
            pl.BlockSpec((tm, K), lambda i: (i, 0)),    # X: streamed
            pl.BlockSpec((K, N1), lambda i: (0, 0)),    # W1: resident
            pl.BlockSpec((3, N1), lambda i: (0, 0)),    # fc1 bias/scale/shift
            pl.BlockSpec((N1, N2p), lambda i: (0, 0)),  # W2: resident
            pl.BlockSpec((1, N2p), lambda i: (0, 0)),   # fc2 bias
        ],
        out_specs=pl.BlockSpec((tm, N2p), lambda i: (i, 0)),
        compiler_params=pltpu.CompilerParams(
            dimension_semantics=("parallel",),
            vmem_limit_bytes=_VMEM_LIMIT,
        ),
    )(xp, w1.astype(jnp.bfloat16), bst1.astype(jnp.float32), w2p, b2p)
    return out[:B, :N2]


# ---------------------------------------------------------------------------
# im2col (pure slicing / reshaping glue, zero MACs; emitted in bf16)
# ---------------------------------------------------------------------------
def _im2col(x_nhwc, kh, kw, stride, pad):
    B, H, W, C = x_nhwc.shape
    xp = jnp.pad(x_nhwc, ((0, 0), (pad, pad), (pad, pad), (0, 0)))
    Ho = (H + 2 * pad - kh) // stride + 1
    Wo = (W + 2 * pad - kw) // stride + 1
    cols = [xp[:, i:i + stride * Ho:stride, j:j + stride * Wo:stride, :]
            for i in range(kh) for j in range(kw)]
    patches = jnp.stack(cols, axis=3)                 # (B, Ho, Wo, kh*kw, C)
    return patches.reshape(B * Ho * Wo, kh * kw * C), B, Ho, Wo


# ---------------------------------------------------------------------------
# One-time parameter preparation: fold BN, pre-transpose / pre-permute weights, cast bf16
# ---------------------------------------------------------------------------
def prepare_params(params):
    prep = {}
    for name, _, _, _ in _CONV_CFG:
        w, b, gamma, beta, mean, var = params[name]       # w: (Cout, Cin, kh, kw) torch layout
        cout, cin, kh, kw = w.shape
        wm = jnp.transpose(w, (2, 3, 1, 0)).reshape(kh * kw * cin, cout).astype(jnp.bfloat16)
        scale = gamma / jnp.sqrt(var + EPS)
        shift = beta - mean * scale
        bst = jnp.stack([b, scale, shift], axis=0).astype(jnp.float32)   # (3, Cout)
        prep[name] = (wm, bst)

    # fc1: permute columns from torch NCHW-flatten order to NHWC-flatten order so the
    # conv output can be flattened directly (no transpose of the activation).
    w1, b1, g1, be1, m1, v1 = params["fc1"]               # w1: (128, 64*6*6)
    w1p = w1.reshape(128, 64, 6, 6).transpose(0, 2, 3, 1).reshape(128, 6 * 6 * 64)
    scale1 = g1 / jnp.sqrt(v1 + EPS)
    shift1 = be1 - m1 * scale1
    prep["fc1"] = (w1p.T.astype(jnp.bfloat16),            # (2304, 128)
                   jnp.stack([b1, scale1, shift1], axis=0).astype(jnp.float32))

    w2, b2 = params["fc2"]
    prep["fc2"] = (w2.T.astype(jnp.bfloat16), b2.astype(jnp.float32))    # (128, 10), (10,)
    return prep


# ---------------------------------------------------------------------------
# Full forward (Pallas version; eval mode, Dropout = identity)
# ---------------------------------------------------------------------------
def cnn_kaggle_forward(x_nchw, prep):
    B = x_nchw.shape[0]
    x = jnp.transpose(x_nchw, (0, 2, 3, 1)).astype(jnp.bfloat16)    # -> NHWC bf16
    for name, k, stride, pad in _CONV_CFG:
        w, bst = prep[name]
        patches, b_, ho, wo = _im2col(x, k, k, stride, pad)
        y = conv_matmul(patches, w, bst)                            # bf16 activations out
        x = y.reshape(b_, ho, wo, w.shape[1])
    x = x.reshape(B, -1)                                            # NHWC flatten (fc1 pre-permuted)
    w1, bst1 = prep["fc1"]
    w2, b2 = prep["fc2"]
    return fc_head(x, w1, bst1, w2, b2)                             # (B, 10) f32 logits


# ---------------------------------------------------------------------------
# Deterministic parameter init (synthetic, matches module shapes)
# ---------------------------------------------------------------------------
def _conv_params(key, cout, cin, k):
    ks = jax.random.split(key, 6)
    w = jax.random.normal(ks[0], (cout, cin, k, k), jnp.float32) * 0.05
    b = jax.random.normal(ks[1], (cout,), jnp.float32) * 0.05
    gamma = 1.0 + 0.1 * jax.random.normal(ks[2], (cout,), jnp.float32)
    beta = 0.1 * jax.random.normal(ks[3], (cout,), jnp.float32)
    mean = 0.1 * jax.random.normal(ks[4], (cout,), jnp.float32)
    var = jax.random.uniform(ks[5], (cout,), jnp.float32, minval=0.5, maxval=1.5)
    return (w, b, gamma, beta, mean, var)


def init_params(key):
    ks = jax.random.split(key, 8)
    params = {
        "c1": _conv_params(ks[0], 32, 1, 3),
        "c2": _conv_params(ks[1], 32, 32, 3),
        "c3": _conv_params(ks[2], 32, 32, 5),
        "c4": _conv_params(ks[3], 64, 32, 3),
        "c5": _conv_params(ks[4], 64, 64, 3),
        "c6": _conv_params(ks[5], 64, 64, 5),
    }
    k1 = jax.random.split(ks[6], 6)
    params["fc1"] = (
        jax.random.normal(k1[0], (128, 64 * 6 * 6), jnp.float32) * 0.02,
        jax.random.normal(k1[1], (128,), jnp.float32) * 0.05,
        1.0 + 0.1 * jax.random.normal(k1[2], (128,), jnp.float32),
        0.1 * jax.random.normal(k1[3], (128,), jnp.float32),
        0.1 * jax.random.normal(k1[4], (128,), jnp.float32),
        jax.random.uniform(k1[5], (128,), jnp.float32, minval=0.5, maxval=1.5),
    )
    k2 = jax.random.split(ks[7], 2)
    params["fc2"] = (
        jax.random.normal(k2[0], (10, 128), jnp.float32) * 0.05,
        jax.random.normal(k2[1], (10,), jnp.float32) * 0.05,
    )
    return params


# ---------------------------------------------------------------------------
# Plain-JAX f32 reference (for a numerical cross-check)
# ---------------------------------------------------------------------------
def reference_forward(x_nchw, params):
    def conv(x, p, stride, pad):
        w, b, gamma, beta, mean, var = p
        y = jax.lax.conv_general_dilated(
            x, w, (stride, stride), [(pad, pad), (pad, pad)],
            dimension_numbers=("NCHW", "OIHW", "NCHW"), precision=HIGHEST)
        y = y + b[None, :, None, None]
        y = jnp.maximum(y, 0.0)
        y = ((y - mean[None, :, None, None])
             / jnp.sqrt(var[None, :, None, None] + EPS)
             * gamma[None, :, None, None] + beta[None, :, None, None])
        return y

    B = x_nchw.shape[0]
    x = conv(x_nchw, params["c1"], 1, 1)
    x = conv(x, params["c2"], 1, 1)
    x = conv(x, params["c3"], 2, 1)
    x = conv(x, params["c4"], 1, 1)
    x = conv(x, params["c5"], 1, 1)
    x = conv(x, params["c6"], 2, 1)
    x = x.reshape(B, 64 * 6 * 6)
    w1, b1, g1, be1, m1, v1 = params["fc1"]
    x = jnp.dot(x, w1.T, precision=HIGHEST) + b1
    x = jnp.maximum(x, 0.0)
    x = (x - m1) / jnp.sqrt(v1 + EPS) * g1 + be1
    w2, b2 = params["fc2"]
    return jnp.dot(x, w2.T, precision=HIGHEST) + b2


if __name__ == "__main__":
    key = jax.random.PRNGKey(0)
    k_x, k_p = jax.random.split(key)
    # Input: MNIST-style, B=2, C=1, 28x28 (required so the 64*6*6 flatten matches).
    x = jax.random.normal(k_x, (2, 1, 28, 28), jnp.float32)
    params = init_params(k_p)
    prep = prepare_params(params)

    fwd = jax.jit(cnn_kaggle_forward)
    logits = jax.block_until_ready(fwd(x, prep))
    assert logits.shape == (2, 10), logits.shape

    ref = jax.block_until_ready(reference_forward(x, params))
    err = float(jnp.max(jnp.abs(logits - ref)))
    # bf16 activations/weights through 8 layers -> a loose but bug-catching tolerance.
    assert err < 1e-1, f"mismatch: max abs err {err}"

    print("KERNEL_OK")
</pallas_src>

<mosaic_0001>
module attributes {stable_mosaic.version = 11 : i64} {
  func.func @_conv_matmul_kernel(%arg0: i32, %arg1: memref<512x128xbf16, #tpu.memory_space<vmem>>, %arg2: memref<128x128xbf16, #tpu.memory_space<vmem>>, %arg3: memref<3x128xf32, #tpu.memory_space<vmem>>, %arg4: memref<512x128xbf16, #tpu.memory_space<vmem>>) attributes {dimension_semantics = [#tpu.dimension_semantics<parallel>], iteration_bounds = array<i64: 4>, scalar_prefetch = 0 : i64, scratch_operands = 0 : i64, tpu.core_type = #tpu.core_type<tc>, window_params = [{transform_indices = @transform_0, window_bounds = array<i64: 512, 128>}, {pipeline_mode = #tpu.pipeline_mode<synchronous>, transform_indices = @transform_1, window_bounds = array<i64: 128, 128>}, {pipeline_mode = #tpu.pipeline_mode<synchronous>, transform_indices = @transform_2, window_bounds = array<i64: 3, 128>}, {transform_indices = @transform_3, window_bounds = array<i64: 512, 128>}]} {
    %c0 = arith.constant 0 : index
    %c0_0 = arith.constant 0 : index
    %0 = vector.load %arg1[%c0, %c0_0] : memref<512x128xbf16, #tpu.memory_space<vmem>>, vector<512x128xbf16>
    %c0_1 = arith.constant 0 : index
    %c0_2 = arith.constant 0 : index
    %1 = vector.load %arg2[%c0_1, %c0_2] : memref<128x128xbf16, #tpu.memory_space<vmem>>, vector<128x128xbf16>
    %cst = arith.constant dense<0.000000e+00> : vector<512x128xf32>
    %2 = tpu.matmul %0, %1, %cst {dimension_numbers = #tpu.dot_dimension_numbers<[1], [0], [0], [1], [0, 0, 1, 1], [], []>} : vector<512x128xbf16>, vector<128x128xbf16>, vector<512x128xf32> -> vector<512x128xf32>
    %c0_3 = arith.constant 0 : index
    %c0_4 = arith.constant 0 : index
    %3 = vector.load %arg3[%c0_3, %c0_4] : memref<3x128xf32, #tpu.memory_space<vmem>>, vector<1x128xf32>
    %4 = vector.broadcast %3 : vector<1x128xf32> to vector<512x128xf32>
    %5 = arith.addf %2, %4 : vector<512x128xf32>
    %cst_5 = arith.constant 0.000000e+00 : f32
    %6 = vector.broadcast %cst_5 : f32 to vector<512x128xf32>
    %7 = arith.maximumf %5, %6 : vector<512x128xf32>
    %c1 = arith.constant 1 : index
    %c0_6 = arith.constant 0 : index
    %8 = vector.load %arg3[%c1, %c0_6] : memref<3x128xf32, #tpu.memory_space<vmem>>, vector<1x128xf32>
    %9 = vector.broadcast %8 : vector<1x128xf32> to vector<512x128xf32>
    %10 = arith.mulf %7, %9 : vector<512x128xf32>
    %c2 = arith.constant 2 : index
    %c0_7 = arith.constant 0 : index
    %11 = vector.load %arg3[%c2, %c0_7] : memref<3x128xf32, #tpu.memory_space<vmem>>, vector<1x128xf32>
    %12 = vector.broadcast %11 : vector<1x128xf32> to vector<512x128xf32>
    %13 = arith.addf %10, %12 : vector<512x128xf32>
    %14 = arith.truncf %13 : vector<512x128xf32> to vector<512x128xbf16>
    %c0_8 = arith.constant 0 : index
    %c0_9 = arith.constant 0 : index
    %15 = vector.load %arg4[%c0_8, %c0_9] : memref<512x128xbf16, #tpu.memory_space<vmem>>, vector<512x128xbf16>
    tpu.vector_store %arg4[%c0_8, %c0_9], %14 {strides = array<i32>} : memref<512x128xbf16, #tpu.memory_space<vmem>>, vector<512x128xbf16>,
    return
  }
  func.func @transform_0(%arg0: i32) -> (i32, i32) {
    %c0_i32 = arith.constant 0 : i32
    %c0_i32_0 = arith.constant 0 : i32
    return %arg0, %c0_i32 : i32, i32
  }
  func.func @transform_1(%arg0: i32) -> (i32, i32) {
    %c0_i32 = arith.constant 0 : i32
    %c0_i32_0 = arith.constant 0 : i32
    %c0_i32_1 = arith.constant 0 : i32
    return %c0_i32, %c0_i32_0 : i32, i32
  }
  func.func @transform_2(%arg0: i32) -> (i32, i32) {
    %c0_i32 = arith.constant 0 : i32
    %c0_i32_0 = arith.constant 0 : i32
    %c0_i32_1 = arith.constant 0 : i32
    return %c0_i32, %c0_i32_0 : i32, i32
  }
  func.func @transform_3(%arg0: i32) -> (i32, i32) {
    %c0_i32 = arith.constant 0 : i32
    %c0_i32_0 = arith.constant 0 : i32
    return %arg0, %c0_i32 : i32, i32
  }
}

module attributes {stable_mosaic.version = 11 : i64} {
  func.func @_conv_matmul_kernel(%arg0: i32, %arg1: memref<512x384xbf16, #tpu.memory_space<vmem>>, %arg2: memref<384x128xbf16, #tpu.memory_space<vmem>>, %arg3: memref<3x128xf32, #tpu.memory_space<vmem>>, %arg4: memref<512x128xbf16, #tpu.memory_space<vmem>>) attributes {dimension_semantics = [#tpu.dimension_semantics<parallel>], iteration_bounds = array<i64: 4>, scalar_prefetch = 0 : i64, scratch_operands = 0 : i64, tpu.core_type = #tpu.core_type<tc>, window_params = [{transform_indices = @transform_0, window_bounds = array<i64: 512, 384>}, {pipeline_mode = #tpu.pipeline_mode<synchronous>, transform_indices = @transform_1, window_bounds = array<i64: 384, 128>}, {pipeline_mode = #tpu.pipeline_mode<synchronous>, transform_indices = @transform_2, window_bounds = array<i64: 3, 128>}, {transform_indices = @transform_3, window_bounds = array<i64: 512, 128>}]} {
    %c0 = arith.constant 0 : index
    %c0_0 = arith.constant 0 : index
    %0 = vector.load %arg1[%c0, %c0_0] : memref<512x384xbf16, #tpu.memory_space<vmem>>, vector<512x384xbf16>
    %c0_1 = arith.constant 0 : index
    %c0_2 = arith.constant 0 : index
    %1 = vector.load %arg2[%c0_1, %c0_2] : memref<384x128xbf16, #tpu.memory_space<vmem>>, vector<384x128xbf16>
    %cst = arith.constant dense<0.000000e+00> : vector<512x128xf32>
    %2 = tpu.matmul %0, %1, %cst {dimension_numbers = #tpu.dot_dimension_numbers<[1], [0], [0], [1], [0, 0, 1, 1], [], []>} : vector<512x384xbf16>, vector<384x128xbf16>, vector<512x128xf32> -> vector<512x128xf32>
    %c0_3 = arith.constant 0 : index
    %c0_4 = arith.constant 0 : index
    %3 = vector.load %arg3[%c0_3, %c0_4] : memref<3x128xf32, #tpu.memory_space<vmem>>, vector<1x128xf32>
    %4 = vector.broadcast %3 : vector<1x128xf32> to vector<512x128xf32>
    %5 = arith.addf %2, %4 : vector<512x128xf32>
    %cst_5 = arith.constant 0.000000e+00 : f32
    %6 = vector.broadcast %cst_5 : f32 to vector<512x128xf32>
    %7 = arith.maximumf %5, %6 : vector<512x128xf32>
    %c1 = arith.constant 1 : index
    %c0_6 = arith.constant 0 : index
    %8 = vector.load %arg3[%c1, %c0_6] : memref<3x128xf32, #tpu.memory_space<vmem>>, vector<1x128xf32>
    %9 = vector.broadcast %8 : vector<1x128xf32> to vector<512x128xf32>
    %10 = arith.mulf %7, %9 : vector<512x128xf32>
    %c2 = arith.constant 2 : index
    %c0_7 = arith.constant 0 : index
    %11 = vector.load %arg3[%c2, %c0_7] : memref<3x128xf32, #tpu.memory_space<vmem>>, vector<1x128xf32>
    %12 = vector.broadcast %11 : vector<1x128xf32> to vector<512x128xf32>
    %13 = arith.addf %10, %12 : vector<512x128xf32>
    %14 = arith.truncf %13 : vector<512x128xf32> to vector<512x128xbf16>
    %c0_8 = arith.constant 0 : index
    %c0_9 = arith.constant 0 : index
    %15 = vector.load %arg4[%c0_8, %c0_9] : memref<512x128xbf16, #tpu.memory_space<vmem>>, vector<512x128xbf16>
    tpu.vector_store %arg4[%c0_8, %c0_9], %14 {strides = array<i32>} : memref<512x128xbf16, #tpu.memory_space<vmem>>, vector<512x128xbf16>,
    return
  }
  func.func @transform_0(%arg0: i32) -> (i32, i32) {
    %c0_i32 = arith.constant 0 : i32
    %c0_i32_0 = arith.constant 0 : i32
    return %arg0, %c0_i32 : i32, i32
  }
  func.func @transform_1(%arg0: i32) -> (i32, i32) {
    %c0_i32 = arith.constant 0 : i32
    %c0_i32_0 = arith.constant 0 : i32
    %c0_i32_1 = arith.constant 0 : i32
    return %c0_i32, %c0_i32_0 : i32, i32
  }
  func.func @transform_2(%arg0: i32) -> (i32, i32) {
    %c0_i32 = arith.constant 0 : i32
    %c0_i32_0 = arith.constant 0 : i32
    %c0_i32_1 = arith.constant 0 : i32
    return %c0_i32, %c0_i32_0 : i32, i32
  }
  func.func @transform_3(%arg0: i32) -> (i32, i32) {
    %c0_i32 = arith.constant 0 : i32
    %c0_i32_0 = arith.constant 0 : i32
    return %arg0, %c0_i32 : i32, i32
  }
}

module attributes {stable_mosaic.version = 11 : i64} {
  func.func @_conv_matmul_kernel(%arg0: i32, %arg1: memref<344x896xbf16, #tpu.memory_space<vmem>>, %arg2: memref<896x128xbf16, #tpu.memory_space<vmem>>, %arg3: memref<3x128xf32, #tpu.memory_space<vmem>>, %arg4: memref<344x128xbf16, #tpu.memory_space<vmem>>) attributes {dimension_semantics = [#tpu.dimension_semantics<parallel>], iteration_bounds = array<i64: 1>, scalar_prefetch = 0 : i64, scratch_operands = 0 : i64, tpu.core_type = #tpu.core_type<tc>, window_params = [{transform_indices = @transform_0, window_bounds = array<i64: 344, 896>}, {pipeline_mode = #tpu.pipeline_mode<synchronous>, transform_indices = @transform_1, window_bounds = array<i64: 896, 128>}, {pipeline_mode = #tpu.pipeline_mode<synchronous>, transform_indices = @transform_2, window_bounds = array<i64: 3, 128>}, {transform_indices = @transform_3, window_bounds = array<i64: 344, 128>}]} {
    %c0 = arith.constant 0 : index
    %c0_0 = arith.constant 0 : index
    %0 = vector.load %arg1[%c0, %c0_0] : memref<344x896xbf16, #tpu.memory_space<vmem>>, vector<344x896xbf16>
    %c0_1 = arith.constant 0 : index
    %c0_2 = arith.constant 0 : index
    %1 = vector.load %arg2[%c0_1, %c0_2] : memref<896x128xbf16, #tpu.memory_space<vmem>>, vector<896x128xbf16>
    %cst = arith.constant dense<0.000000e+00> : vector<344x128xf32>
    %2 = tpu.matmul %0, %1, %cst {dimension_numbers = #tpu.dot_dimension_numbers<[1], [0], [0], [1], [0, 0, 1, 1], [], []>} : vector<344x896xbf16>, vector<896x128xbf16>, vector<344x128xf32> -> vector<344x128xf32>
    %c0_3 = arith.constant 0 : index
    %c0_4 = arith.constant 0 : index
    %3 = vector.load %arg3[%c0_3, %c0_4] : memref<3x128xf32, #tpu.memory_space<vmem>>, vector<1x128xf32>
    %4 = vector.broadcast %3 : vector<1x128xf32> to vector<344x128xf32>
    %5 = arith.addf %2, %4 : vector<344x128xf32>
    %cst_5 = arith.constant 0.000000e+00 : f32
    %6 = vector.broadcast %cst_5 : f32 to vector<344x128xf32>
    %7 = arith.maximumf %5, %6 : vector<344x128xf32>
    %c1 = arith.constant 1 : index
    %c0_6 = arith.constant 0 : index
    %8 = vector.load %arg3[%c1, %c0_6] : memref<3x128xf32, #tpu.memory_space<vmem>>, vector<1x128xf32>
    %9 = vector.broadcast %8 : vector<1x128xf32> to vector<344x128xf32>
    %10 = arith.mulf %7, %9 : vector<344x128xf32>
    %c2 = arith.constant 2 : index
    %c0_7 = arith.constant 0 : index
    %11 = vector.load %arg3[%c2, %c0_7] : memref<3x128xf32, #tpu.memory_space<vmem>>, vector<1x128xf32>
    %12 = vector.broadcast %11 : vector<1x128xf32> to vector<344x128xf32>
    %13 = arith.addf %10, %12 : vector<344x128xf32>
    %14 = arith.truncf %13 : vector<344x128xf32> to vector<344x128xbf16>
    %c0_8 = arith.constant 0 : index
    %c0_9 = arith.constant 0 : index
    %15 = vector.load %arg4[%c0_8, %c0_9] : memref<344x128xbf16, #tpu.memory_space<vmem>>, vector<344x128xbf16>
    tpu.vector_store %arg4[%c0_8, %c0_9], %14 {strides = array<i32>} : memref<344x128xbf16, #tpu.memory_space<vmem>>, vector<344x128xbf16>,
    return
  }
  func.func @transform_0(%arg0: i32) -> (i32, i32) {
    %c0_i32 = arith.constant 0 : i32
    %c0_i32_0 = arith.constant 0 : i32
    return %arg0, %c0_i32 : i32, i32
  }
  func.func @transform_1(%arg0: i32) -> (i32, i32) {
    %c0_i32 = arith.constant 0 : i32
    %c0_i32_0 = arith.constant 0 : i32
    %c0_i32_1 = arith.constant 0 : i32
    return %c0_i32, %c0_i32_0 : i32, i32
  }
  func.func @transform_2(%arg0: i32) -> (i32, i32) {
    %c0_i32 = arith.constant 0 : i32
    %c0_i32_0 = arith.constant 0 : i32
    %c0_i32_1 = arith.constant 0 : i32
    return %c0_i32, %c0_i32_0 : i32, i32
  }
  func.func @transform_3(%arg0: i32) -> (i32, i32) {
    %c0_i32 = arith.constant 0 : i32
    %c0_i32_0 = arith.constant 0 : i32
    return %arg0, %c0_i32 : i32, i32
  }
}

module attributes {stable_mosaic.version = 11 : i64} {
  func.func @_conv_matmul_kernel(%arg0: i32, %arg1: memref<344x384xbf16, #tpu.memory_space<vmem>>, %arg2: memref<384x128xbf16, #tpu.memory_space<vmem>>, %arg3: memref<3x128xf32, #tpu.memory_space<vmem>>, %arg4: memref<344x128xbf16, #tpu.memory_space<vmem>>) attributes {dimension_semantics = [#tpu.dimension_semantics<parallel>], iteration_bounds = array<i64: 1>, scalar_prefetch = 0 : i64, scratch_operands = 0 : i64, tpu.core_type = #tpu.core_type<tc>, window_params = [{transform_indices = @transform_0, window_bounds = array<i64: 344, 384>}, {pipeline_mode = #tpu.pipeline_mode<synchronous>, transform_indices = @transform_1, window_bounds = array<i64: 384, 128>}, {pipeline_mode = #tpu.pipeline_mode<synchronous>, transform_indices = @transform_2, window_bounds = array<i64: 3, 128>}, {transform_indices = @transform_3, window_bounds = array<i64: 344, 128>}]} {
    %c0 = arith.constant 0 : index
    %c0_0 = arith.constant 0 : index
    %0 = vector.load %arg1[%c0, %c0_0] : memref<344x384xbf16, #tpu.memory_space<vmem>>, vector<344x384xbf16>
    %c0_1 = arith.constant 0 : index
    %c0_2 = arith.constant 0 : index
    %1 = vector.load %arg2[%c0_1, %c0_2] : memref<384x128xbf16, #tpu.memory_space<vmem>>, vector<384x128xbf16>
    %cst = arith.constant dense<0.000000e+00> : vector<344x128xf32>
    %2 = tpu.matmul %0, %1, %cst {dimension_numbers = #tpu.dot_dimension_numbers<[1], [0], [0], [1], [0, 0, 1, 1], [], []>} : vector<344x384xbf16>, vector<384x128xbf16>, vector<344x128xf32> -> vector<344x128xf32>
    %c0_3 = arith.constant 0 : index
    %c0_4 = arith.constant 0 : index
    %3 = vector.load %arg3[%c0_3, %c0_4] : memref<3x128xf32, #tpu.memory_space<vmem>>, vector<1x128xf32>
    %4 = vector.broadcast %3 : vector<1x128xf32> to vector<344x128xf32>
    %5 = arith.addf %2, %4 : vector<344x128xf32>
    %cst_5 = arith.constant 0.000000e+00 : f32
    %6 = vector.broadcast %cst_5 : f32 to vector<344x128xf32>
    %7 = arith.maximumf %5, %6 : vector<344x128xf32>
    %c1 = arith.constant 1 : index
    %c0_6 = arith.constant 0 : index
    %8 = vector.load %arg3[%c1, %c0_6] : memref<3x128xf32, #tpu.memory_space<vmem>>, vector<1x128xf32>
    %9 = vector.broadcast %8 : vector<1x128xf32> to vector<344x128xf32>
    %10 = arith.mulf %7, %9 : vector<344x128xf32>
    %c2 = arith.constant 2 : index
    %c0_7 = arith.constant 0 : index
    %11 = vector.load %arg3[%c2, %c0_7] : memref<3x128xf32, #tpu.memory_space<vmem>>, vector<1x128xf32>
    %12 = vector.broadcast %11 : vector<1x128xf32> to vector<344x128xf32>
    %13 = arith.addf %10, %12 : vector<344x128xf32>
    %14 = arith.truncf %13 : vector<344x128xf32> to vector<344x128xbf16>
    %c0_8 = arith.constant 0 : index
    %c0_9 = arith.constant 0 : index
    %15 = vector.load %arg4[%c0_8, %c0_9] : memref<344x128xbf16, #tpu.memory_space<vmem>>, vector<344x128xbf16>
    tpu.vector_store %arg4[%c0_8, %c0_9], %14 {strides = array<i32>} : memref<344x128xbf16, #tpu.memory_space<vmem>>, vector<344x128xbf16>,
    return
  }
  func.func @transform_0(%arg0: i32) -> (i32, i32) {
    %c0_i32 = arith.constant 0 : i32
    %c0_i32_0 = arith.constant 0 : i32
    return %arg0, %c0_i32 : i32, i32
  }
  func.func @transform_1(%arg0: i32) -> (i32, i32) {
    %c0_i32 = arith.constant 0 : i32
    %c0_i32_0 = arith.constant 0 : i32
    %c0_i32_1 = arith.constant 0 : i32
    return %c0_i32, %c0_i32_0 : i32, i32
  }
  func.func @transform_2(%arg0: i32) -> (i32, i32) {
    %c0_i32 = arith.constant 0 : i32
    %c0_i32_0 = arith.constant 0 : i32
    %c0_i32_1 = arith.constant 0 : i32
    return %c0_i32, %c0_i32_0 : i32, i32
  }
  func.func @transform_3(%arg0: i32) -> (i32, i32) {
    %c0_i32 = arith.constant 0 : i32
    %c0_i32_0 = arith.constant 0 : i32
    return %arg0, %c0_i32 : i32, i32
  }
}

module attributes {stable_mosaic.version = 11 : i64} {
  func.func @_conv_matmul_kernel(%arg0: i32, %arg1: memref<344x640xbf16, #tpu.memory_space<vmem>>, %arg2: memref<640x128xbf16, #tpu.memory_space<vmem>>, %arg3: memref<3x128xf32, #tpu.memory_space<vmem>>, %arg4: memref<344x128xbf16, #tpu.memory_space<vmem>>) attributes {dimension_semantics = [#tpu.dimension_semantics<parallel>], iteration_bounds = array<i64: 1>, scalar_prefetch = 0 : i64, scratch_operands = 0 : i64, tpu.core_type = #tpu.core_type<tc>, window_params = [{transform_indices = @transform_0, window_bounds = array<i64: 344, 640>}, {pipeline_mode = #tpu.pipeline_mode<synchronous>, transform_indices = @transform_1, window_bounds = array<i64: 640, 128>}, {pipeline_mode = #tpu.pipeline_mode<synchronous>, transform_indices = @transform_2, window_bounds = array<i64: 3, 128>}, {transform_indices = @transform_3, window_bounds = array<i64: 344, 128>}]} {
    %c0 = arith.constant 0 : index
    %c0_0 = arith.constant 0 : index
    %0 = vector.load %arg1[%c0, %c0_0] : memref<344x640xbf16, #tpu.memory_space<vmem>>, vector<344x640xbf16>
    %c0_1 = arith.constant 0 : index
    %c0_2 = arith.constant 0 : index
    %1 = vector.load %arg2[%c0_1, %c0_2] : memref<640x128xbf16, #tpu.memory_space<vmem>>, vector<640x128xbf16>
    %cst = arith.constant dense<0.000000e+00> : vector<344x128xf32>
    %2 = tpu.matmul %0, %1, %cst {dimension_numbers = #tpu.dot_dimension_numbers<[1], [0], [0], [1], [0, 0, 1, 1], [], []>} : vector<344x640xbf16>, vector<640x128xbf16>, vector<344x128xf32> -> vector<344x128xf32>
    %c0_3 = arith.constant 0 : index
    %c0_4 = arith.constant 0 : index
    %3 = vector.load %arg3[%c0_3, %c0_4] : memref<3x128xf32, #tpu.memory_space<vmem>>, vector<1x128xf32>
    %4 = vector.broadcast %3 : vector<1x128xf32> to vector<344x128xf32>
    %5 = arith.addf %2, %4 : vector<344x128xf32>
    %cst_5 = arith.constant 0.000000e+00 : f32
    %6 = vector.broadcast %cst_5 : f32 to vector<344x128xf32>
    %7 = arith.maximumf %5, %6 : vector<344x128xf32>
    %c1 = arith.constant 1 : index
    %c0_6 = arith.constant 0 : index
    %8 = vector.load %arg3[%c1, %c0_6] : memref<3x128xf32, #tpu.memory_space<vmem>>, vector<1x128xf32>
    %9 = vector.broadcast %8 : vector<1x128xf32> to vector<344x128xf32>
    %10 = arith.mulf %7, %9 : vector<344x128xf32>
    %c2 = arith.constant 2 : index
    %c0_7 = arith.constant 0 : index
    %11 = vector.load %arg3[%c2, %c0_7] : memref<3x128xf32, #tpu.memory_space<vmem>>, vector<1x128xf32>
    %12 = vector.broadcast %11 : vector<1x128xf32> to vector<344x128xf32>
    %13 = arith.addf %10, %12 : vector<344x128xf32>
    %14 = arith.truncf %13 : vector<344x128xf32> to vector<344x128xbf16>
    %c0_8 = arith.constant 0 : index
    %c0_9 = arith.constant 0 : index
    %15 = vector.load %arg4[%c0_8, %c0_9] : memref<344x128xbf16, #tpu.memory_space<vmem>>, vector<344x128xbf16>
    tpu.vector_store %arg4[%c0_8, %c0_9], %14 {strides = array<i32>} : memref<344x128xbf16, #tpu.memory_space<vmem>>, vector<344x128xbf16>,
    return
  }
  func.func @transform_0(%arg0: i32) -> (i32, i32) {
    %c0_i32 = arith.constant 0 : i32
    %c0_i32_0 = arith.constant 0 : i32
    return %arg0, %c0_i32 : i32, i32
  }
  func.func @transform_1(%arg0: i32) -> (i32, i32) {
    %c0_i32 = arith.constant 0 : i32
    %c0_i32_0 = arith.constant 0 : i32
    %c0_i32_1 = arith.constant 0 : i32
    return %c0_i32, %c0_i32_0 : i32, i32
  }
  func.func @transform_2(%arg0: i32) -> (i32, i32) {
    %c0_i32 = arith.constant 0 : i32
    %c0_i32_0 = arith.constant 0 : i32
    %c0_i32_1 = arith.constant 0 : i32
    return %c0_i32, %c0_i32_0 : i32, i32
  }
  func.func @transform_3(%arg0: i32) -> (i32, i32) {
    %c0_i32 = arith.constant 0 : i32
    %c0_i32_0 = arith.constant 0 : i32
    return %arg0, %c0_i32 : i32, i32
  }
}

module attributes {stable_mosaic.version = 11 : i64} {
  func.func @_conv_matmul_kernel(%arg0: i32, %arg1: memref<72x1664xbf16, #tpu.memory_space<vmem>>, %arg2: memref<1664x128xbf16, #tpu.memory_space<vmem>>, %arg3: memref<3x128xf32, #tpu.memory_space<vmem>>, %arg4: memref<72x128xbf16, #tpu.memory_space<vmem>>) attributes {dimension_semantics = [#tpu.dimension_semantics<parallel>], iteration_bounds = array<i64: 1>, scalar_prefetch = 0 : i64, scratch_operands = 0 : i64, tpu.core_type = #tpu.core_type<tc>, window_params = [{transform_indices = @transform_0, window_bounds = array<i64: 72, 1664>}, {pipeline_mode = #tpu.pipeline_mode<synchronous>, transform_indices = @transform_1, window_bounds = array<i64: 1664, 128>}, {pipeline_mode = #tpu.pipeline_mode<synchronous>, transform_indices = @transform_2, window_bounds = array<i64: 3, 128>}, {transform_indices = @transform_3, window_bounds = array<i64: 72, 128>}]} {
    %c0 = arith.constant 0 : index
    %c0_0 = arith.constant 0 : index
    %0 = vector.load %arg1[%c0, %c0_0] : memref<72x1664xbf16, #tpu.memory_space<vmem>>, vector<72x1664xbf16>
    %c0_1 = arith.constant 0 : index
    %c0_2 = arith.constant 0 : index
    %1 = vector.load %arg2[%c0_1, %c0_2] : memref<1664x128xbf16, #tpu.memory_space<vmem>>, vector<1664x128xbf16>
    %cst = arith.constant dense<0.000000e+00> : vector<72x128xf32>
    %2 = tpu.matmul %0, %1, %cst {dimension_numbers = #tpu.dot_dimension_numbers<[1], [0], [0], [1], [0, 0, 1, 1], [], []>} : vector<72x1664xbf16>, vector<1664x128xbf16>, vector<72x128xf32> -> vector<72x128xf32>
    %c0_3 = arith.constant 0 : index
    %c0_4 = arith.constant 0 : index
    %3 = vector.load %arg3[%c0_3, %c0_4] : memref<3x128xf32, #tpu.memory_space<vmem>>, vector<1x128xf32>
    %4 = vector.broadcast %3 : vector<1x128xf32> to vector<72x128xf32>
    %5 = arith.addf %2, %4 : vector<72x128xf32>
    %cst_5 = arith.constant 0.000000e+00 : f32
    %6 = vector.broadcast %cst_5 : f32 to vector<72x128xf32>
    %7 = arith.maximumf %5, %6 : vector<72x128xf32>
    %c1 = arith.constant 1 : index
    %c0_6 = arith.constant 0 : index
    %8 = vector.load %arg3[%c1, %c0_6] : memref<3x128xf32, #tpu.memory_space<vmem>>, vector<1x128xf32>
    %9 = vector.broadcast %8 : vector<1x128xf32> to vector<72x128xf32>
    %10 = arith.mulf %7, %9 : vector<72x128xf32>
    %c2 = arith.constant 2 : index
    %c0_7 = arith.constant 0 : index
    %11 = vector.load %arg3[%c2, %c0_7] : memref<3x128xf32, #tpu.memory_space<vmem>>, vector<1x128xf32>
    %12 = vector.broadcast %11 : vector<1x128xf32> to vector<72x128xf32>
    %13 = arith.addf %10, %12 : vector<72x128xf32>
    %14 = arith.truncf %13 : vector<72x128xf32> to vector<72x128xbf16>
    %c0_8 = arith.constant 0 : index
    %c0_9 = arith.constant 0 : index
    %15 = vector.load %arg4[%c0_8, %c0_9] : memref<72x128xbf16, #tpu.memory_space<vmem>>, vector<72x128xbf16>
    tpu.vector_store %arg4[%c0_8, %c0_9], %14 {strides = array<i32>} : memref<72x128xbf16, #tpu.memory_space<vmem>>, vector<72x128xbf16>,
    return
  }
  func.func @transform_0(%arg0: i32) -> (i32, i32) {
    %c0_i32 = arith.constant 0 : i32
    %c0_i32_0 = arith.constant 0 : i32
    return %arg0, %c0_i32 : i32, i32
  }
  func.func @transform_1(%arg0: i32) -> (i32, i32) {
    %c0_i32 = arith.constant 0 : i32
    %c0_i32_0 = arith.constant 0 : i32
    %c0_i32_1 = arith.constant 0 : i32
    return %c0_i32, %c0_i32_0 : i32, i32
  }
  func.func @transform_2(%arg0: i32) -> (i32, i32) {
    %c0_i32 = arith.constant 0 : i32
    %c0_i32_0 = arith.constant 0 : i32
    %c0_i32_1 = arith.constant 0 : i32
    return %c0_i32, %c0_i32_0 : i32, i32
  }
  func.func @transform_3(%arg0: i32) -> (i32, i32) {
    %c0_i32 = arith.constant 0 : i32
    %c0_i32_0 = arith.constant 0 : i32
    return %arg0, %c0_i32 : i32, i32
  }
}

module attributes {stable_mosaic.version = 11 : i64} {
  func.func @_fc_head_kernel(%arg0: i32, %arg1: memref<8x2304xbf16, #tpu.memory_space<vmem>>, %arg2: memref<2304x128xbf16, #tpu.memory_space<vmem>>, %arg3: memref<3x128xf32, #tpu.memory_space<vmem>>, %arg4: memref<128x128xbf16, #tpu.memory_space<vmem>>, %arg5: memref<1x128xf32, #tpu.memory_space<vmem>>, %arg6: memref<8x128xf32, #tpu.memory_space<vmem>>) attributes {dimension_semantics = [#tpu.dimension_semantics<parallel>], iteration_bounds = array<i64: 1>, scalar_prefetch = 0 : i64, scratch_operands = 0 : i64, tpu.core_type = #tpu.core_type<tc>, window_params = [{transform_indices = @transform_0, window_bounds = array<i64: 8, 2304>}, {pipeline_mode = #tpu.pipeline_mode<synchronous>, transform_indices = @transform_1, window_bounds = array<i64: 2304, 128>}, {pipeline_mode = #tpu.pipeline_mode<synchronous>, transform_indices = @transform_2, window_bounds = array<i64: 3, 128>}, {pipeline_mode = #tpu.pipeline_mode<synchronous>, transform_indices = @transform_3, window_bounds = array<i64: 128, 128>}, {pipeline_mode = #tpu.pipeline_mode<synchronous>, transform_indices = @transform_4, window_bounds = array<i64: 1, 128>}, {transform_indices = @transform_5, window_bounds = array<i64: 8, 128>}]} {
    %c0 = arith.constant 0 : index
    %c0_0 = arith.constant 0 : index
    %0 = vector.load %arg1[%c0, %c0_0] : memref<8x2304xbf16, #tpu.memory_space<vmem>>, vector<8x2304xbf16>
    %c0_1 = arith.constant 0 : index
    %c0_2 = arith.constant 0 : index
    %1 = vector.load %arg2[%c0_1, %c0_2] : memref<2304x128xbf16, #tpu.memory_space<vmem>>, vector<2304x128xbf16>
    %cst = arith.constant dense<0.000000e+00> : vector<8x128xf32>
    %2 = tpu.matmul %0, %1, %cst {dimension_numbers = #tpu.dot_dimension_numbers<[1], [0], [0], [1], [0, 0, 1, 1], [], []>} : vector<8x2304xbf16>, vector<2304x128xbf16>, vector<8x128xf32> -> vector<8x128xf32>
    %c0_3 = arith.constant 0 : index
    %c0_4 = arith.constant 0 : index
    %3 = vector.load %arg3[%c0_3, %c0_4] : memref<3x128xf32, #tpu.memory_space<vmem>>, vector<1x128xf32>
    %4 = vector.broadcast %3 : vector<1x128xf32> to vector<8x128xf32>
    %5 = arith.addf %2, %4 : vector<8x128xf32>
    %cst_5 = arith.constant 0.000000e+00 : f32
    %6 = vector.broadcast %cst_5 : f32 to vector<8x128xf32>
    %7 = arith.maximumf %5, %6 : vector<8x128xf32>
    %c1 = arith.constant 1 : index
    %c0_6 = arith.constant 0 : index
    %8 = vector.load %arg3[%c1, %c0_6] : memref<3x128xf32, #tpu.memory_space<vmem>>, vector<1x128xf32>
    %9 = vector.broadcast %8 : vector<1x128xf32> to vector<8x128xf32>
    %10 = arith.mulf %7, %9 : vector<8x128xf32>
    %c2 = arith.constant 2 : index
    %c0_7 = arith.constant 0 : index
    %11 = vector.load %arg3[%c2, %c0_7] : memref<3x128xf32, #tpu.memory_space<vmem>>, vector<1x128xf32>
    %12 = vector.broadcast %11 : vector<1x128xf32> to vector<8x128xf32>
    %13 = arith.addf %10, %12 : vector<8x128xf32>
    %14 = arith.truncf %13 : vector<8x128xf32> to vector<8x128xbf16>
    %c0_8 = arith.constant 0 : index
    %c0_9 = arith.constant 0 : index
    %15 = vector.load %arg4[%c0_8, %c0_9] : memref<128x128xbf16, #tpu.memory_space<vmem>>, vector<128x128xbf16>
    %cst_10 = arith.constant dense<0.000000e+00> : vector<8x128xf32>
    %16 = tpu.matmul %14, %15, %cst_10 {dimension_numbers = #tpu.dot_dimension_numbers<[1], [0], [0], [1], [0, 0, 1, 1], [], []>} : vector<8x128xbf16>, vector<128x128xbf16>, vector<8x128xf32> -> vector<8x128xf32>
    %c0_11 = arith.constant 0 : index
    %c0_12 = arith.constant 0 : index
    %17 = vector.load %arg5[%c0_11, %c0_12] : memref<1x128xf32, #tpu.memory_space<vmem>>, vector<1x128xf32>
    %18 = vector.broadcast %17 : vector<1x128xf32> to vector<8x128xf32>
    %19 = arith.addf %16, %18 : vector<8x128xf32>
    %c0_13 = arith.constant 0 : index
    %c0_14 = arith.constant 0 : index
    %20 = vector.load %arg6[%c0_13, %c0_14] : memref<8x128xf32, #tpu.memory_space<vmem>>, vector<8x128xf32>
    tpu.vector_store %arg6[%c0_13, %c0_14], %19 {strides = array<i32>} : memref<8x128xf32, #tpu.memory_space<vmem>>, vector<8x128xf32>,
    return
  }
  func.func @transform_0(%arg0: i32) -> (i32, i32) {
    %c0_i32 = arith.constant 0 : i32
    %c0_i32_0 = arith.constant 0 : i32
    return %arg0, %c0_i32 : i32, i32
  }
  func.func @transform_1(%arg0: i32) -> (i32, i32) {
    %c0_i32 = arith.constant 0 : i32
    %c0_i32_0 = arith.constant 0 : i32
    %c0_i32_1 = arith.constant 0 : i32
    return %c0_i32, %c0_i32_0 : i32, i32
  }
  func.func @transform_2(%arg0: i32) -> (i32, i32) {
    %c0_i32 = arith.constant 0 : i32
    %c0_i32_0 = arith.constant 0 : i32
    %c0_i32_1 = arith.constant 0 : i32
    return %c0_i32, %c0_i32_0 : i32, i32
  }
  func.func @transform_3(%arg0: i32) -> (i32, i32) {
    %c0_i32 = arith.constant 0 : i32
    %c0_i32_0 = arith.constant 0 : i32
    %c0_i32_1 = arith.constant 0 : i32
    return %c0_i32, %c0_i32_0 : i32, i32
  }
  func.func @transform_4(%arg0: i32) -> (i32, i32) {
    %c0_i32 = arith.constant 0 : i32
    %c0_i32_0 = arith.constant 0 : i32
    %c0_i32_1 = arith.constant 0 : i32
    return %c0_i32, %c0_i32_0 : i32, i32
  }
  func.func @transform_5(%arg0: i32) -> (i32, i32) {
    %c0_i32 = arith.constant 0 : i32
    %c0_i32_0 = arith.constant 0 : i32
    return %arg0, %c0_i32 : i32, i32
  }
}

</mosaic_0001>

<bundles_post_ra>
// kernel: cnn_kaggle_forward.7
= control target key start
LH: loop header
LB: loop body
LE: loop exit
PB: predicated region body
PF: predicated region fallthrough
CT: control target
= control target key end

     0   :  { %s1952_s12 = smov 0   ;;  %s2275_s0 = inlined_call_operand.vmem [shape: bf16[2048,128], index: 0, kind: input, shape index: {}]   ;;  %s2276_s1 = inlined_call_operand.vmem [shape: bf16[128,128], index: 1, kind: input, shape index: {}]   ;;  %s2277_s2 = inlined_call_operand.vmem [shape: f32[3,128], index: 2, kind: input, shape index: {}]   ;;  %s2278_s3 = inlined_call_operand.vmem [shape: bf16[2048,128], index: 3, kind: output, shape index: {}]  }
   0x1 LB: > { %s1367_s13 = sadd.s32 4294967295, %s1930_s12   ;;  %p1371_p0 = scmp.ge.s32.totalorder %s1930_s12, 1  ;;  %s1930_s12 = sphi %s1952_s12, %s13_s12  }
   0x2   : > { %p138_p1 = scmp.lt.s32.totalorder %s1930_s12, 5 }
   0x4   : > { %p139_p2 = pnand %p1371_p0, %p138_p1 }
   0x5   : > { %v1884_v0 = vld [vmem:[%s2276_s1] sm:$0xff] (!%p139_p2)   ;;  %s1372_s16 = sshll.u32 (!%p139_p2), %s1367_s13, 6  ;;  %v1885_v1 = vld [vmem:[%s2276_s1 + $0x8] sm:$0xff] (!%p139_p2)   ;;  %v1886_v2 = vld [vmem:[%s2276_s1 + $0x10] sm:$0xff] (!%p139_p2)  }
   0x6   : > { %142 = sbr.rel (%p139_p2) target bundleno = 330 (0x14a), region = 32  ;;  %p163_p3 = scmp.lt.s32.totalorder (!%p139_p2), %s1372_s16, 255  ;;  %1780 = vmatprep.subr.bf16.mxu0 (!%p139_p2), %v1884_v0  ;;  %1860 = vmatprep.subr.bf16.mxu1 (!%p139_p2), %v1884_v0  ;;  %v1887_v3 = vld [vmem:[%s2276_s1 + $0x18] sm:$0xff] (!%p139_p2)   ;;  %v1888_v6 = vld [vmem:[%s2276_s1 + $0x20] sm:$0xff] (!%p139_p2)   ;;  %v1889_v7 = vld [vmem:[%s2276_s1 + $0x28] sm:$0xff] (!%p139_p2)  }
   0x7   : > { %1781 = vmatpush3.bf16.msra.mxu0 (!%p139_p2), %v1884_v0  ;;  %1868 = vmatpush3.bf16.msra.mxu1 (!%p139_p2), %v1884_v0  ;;  %v1890_v8 = vld [vmem:[%s2276_s1 + $0x30] sm:$0xff] (!%p139_p2)   ;;  %v1891_v9 = vld [vmem:[%s2276_s1 + $0x38] sm:$0xff] (!%p139_p2)   ;;  %v2029_v40 = vld [vmem:[%s2277_s2] ss:$0 sm:$0xff] (!%p139_p2) }
   0x8   : > { %1782 = vmatprep.subr.bf16.mxu0 (!%p139_p2), %v1885_v1  ;;  %1861 = vmatprep.subr.bf16.mxu1 (!%p139_p2), %v1885_v1  ;;  %v2036_v47 = vld [vmem:[%s2277_s2 + $0x1] ss:$0 sm:$0xff] (!%p139_p2)  ;;  %v2045_v58 = vld [vmem:[%s2277_s2 + $0x2] ss:$0 sm:$0xff] (!%p139_p2) }
   0xb   : > { %1783 = vmatpush3.bf16.msra.mxu0 (!%p139_p2), %v1885_v1  ;;  %1869 = vmatpush3.bf16.msra.mxu1 (!%p139_p2), %v1885_v1 }
   0xc   : > { %1784 = vmatprep.subr.bf16.mxu0 (!%p139_p2), %v1886_v2  ;;  %1862 = vmatprep.subr.bf16.mxu1 (!%p139_p2), %v1886_v2 }
   0xd   : > { %s2280_s16 = smov (!%p163_p3, %s1372_s16), 255 }
   0xe   : > { %s1373_s21 = sshll.u32 %s2280_s16, 2 }
   0xf   : > { %s1977_s24 = scalar_lea.vmem %s2275_s0, %s1373_s21  ;;  %1785 = vmatpush3.bf16.msra.mxu0 %v1886_v2  ;;  %1870 = vmatpush3.bf16.msra.mxu1 %v1886_v2  ;;  %s2070_s18 = scalar_lea.vmem %s2278_s3, %s1373_s21 }
  0x10   : > { %v1892_v4 = vld [vmem:[%s1977_s24] sm:$0xff]   ;;  %1786 = vmatprep.subr.bf16.mxu0 %v1887_v3  ;;  %1863 = vmatprep.subr.bf16.mxu1 %v1887_v3  ;;  %v1894_v10 = vld [vmem:[%s1977_s24 + $0x8] sm:$0xff]   ;;  %v1896_v12 = vld [vmem:[%s1977_s24 + $0x10] sm:$0xff]  }
  0x11   : > { %v1893_v5 = vld [vmem:[%s1977_s24 + $0x80] sm:$0xff]   ;;  %1796 = vmatprep.mubr.bf16.mxu0 %v1892_v4  ;;  %v1895_v11 = vld [vmem:[%s1977_s24 + $0x88] sm:$0xff]   ;;  %v1897_v13 = vld [vmem:[%s1977_s24 + $0x90] sm:$0xff]  }
  0x12   : > { %1828 = vmatprep.mubr.bf16.mxu1 %v1893_v5  ;;  %v1898_v14 = vld [vmem:[%s1977_s24 + $0x18] sm:$0xff]   ;;  %v1900_v16 = vld [vmem:[%s1977_s24 + $0x20] sm:$0xff]   ;;  %v1902_v18 = vld [vmem:[%s1977_s24 + $0x28] sm:$0xff]  }
  0x13   : > { %1787 = vmatpush3.bf16.msra.mxu0 %v1887_v3  ;;  %1871 = vmatpush3.bf16.msra.mxu1 %v1887_v3  ;;  %v1899_v15 = vld [vmem:[%s1977_s24 + $0x98] sm:$0xff]   ;;  %v1901_v17 = vld [vmem:[%s1977_s24 + $0xa0] sm:$0xff]   ;;  %v1903_v19 = vld [vmem:[%s1977_s24 + $0xa8] sm:$0xff]  }
  0x14   : > { %1788 = vmatprep.subr.bf16.mxu0 %v1888_v6  ;;  %1864 = vmatprep.subr.bf16.mxu1 %v1888_v6  ;;  %v1904_v20 = vld [vmem:[%s1977_s24 + $0x30] sm:$0xff]   ;;  %v1906_v22 = vld [vmem:[%s1977_s24 + $0x38] sm:$0xff]   ;;  %v1908_v24 = vld [vmem:[%s1977_s24 + $0x40] sm:$0xff]  }
  0x15   : > { %v1905_v21 = vld [vmem:[%s1977_s24 + $0xb0] sm:$0xff]   ;;  %v1907_v23 = vld [vmem:[%s1977_s24 + $0xb8] sm:$0xff]   ;;  %v1909_v25 = vld [vmem:[%s1977_s24 + $0xc0] sm:$0xff]  }
  0x16   : > { %v1910_v26 = vld [vmem:[%s1977_s24 + $0x48] sm:$0xff]   ;;  %v1912_v28 = vld [vmem:[%s1977_s24 + $0x50] sm:$0xff]   ;;  %v1914_v30 = vld [vmem:[%s1977_s24 + $0x58] sm:$0xff]  }
  0x17   : > { %1789 = vmatpush3.bf16.msra.mxu0 %v1888_v6  ;;  %1872 = vmatpush3.bf16.msra.mxu1 %v1888_v6  ;;  %v1911_v27 = vld [vmem:[%s1977_s24 + $0xc8] sm:$0xff]   ;;  %v1913_v29 = vld [vmem:[%s1977_s24 + $0xd0] sm:$0xff]   ;;  %v1915_v31 = vld [vmem:[%s1977_s24 + $0xd8] sm:$0xff]  }
  0x18   : > { %1790 = vmatprep.subr.bf16.mxu0 %v1889_v7  ;;  %1865 = vmatprep.subr.bf16.mxu1 %v1889_v7  ;;  %v1916_v32 = vld [vmem:[%s1977_s24 + $0x60] sm:$0xff]   ;;  %v1918_v34 = vld [vmem:[%s1977_s24 + $0x68] sm:$0xff]   ;;  %v1920_v36 = vld [vmem:[%s1977_s24 + $0x70] sm:$0xff]  }
  0x19   : > { %v1917_v33 = vld [vmem:[%s1977_s24 + $0xe0] sm:$0xff]   ;;  %v1919_v35 = vld [vmem:[%s1977_s24 + $0xe8] sm:$0xff]   ;;  %v1921_v37 = vld [vmem:[%s1977_s24 + $0xf0] sm:$0xff]  }
  0x1a   : > { %v1922_v38 = vld [vmem:[%s1977_s24 + $0x78] sm:$0xff]  }
  0x1b   : > { %1791 = vmatpush3.bf16.msra.mxu0 %v1889_v7  ;;  %1873 = vmatpush3.bf16.msra.mxu1 %v1889_v7  ;;  %v1923_v39 = vld [vmem:[%s1977_s24 + $0xf8] sm:$0xff]  }
  0x1c   : > { %1792 = vmatprep.subr.bf16.mxu0 %v1890_v8  ;;  %1866 = vmatprep.subr.bf16.mxu1 %v1890_v8 }
  0x1f   : > { %1793 = vmatpush3.bf16.msra.mxu0 %v1890_v8  ;;  %1874 = vmatpush3.bf16.msra.mxu1 %v1890_v8 }
  0x20   : > { %1794 = vmatprep.subr.bf16.mxu0 %v1891_v9  ;;  %1867 = vmatprep.subr.bf16.mxu1 %v1891_v9 }
  0x23   : > { %1795 = vmatpush3.bf16.msra.mxu0 %v1891_v9  ;;  %1875 = vmatpush3.bf16.msra.mxu1 %v1891_v9 }
  0x26   : > { %1797 = vmatmul.mubr.bf16.vlgmr.msra.gmra.mrb[0].mxu0 %v1894_v10  ;;  %1829 = vmatmul.mubr.bf16.vlgmr.msra.gmra.mrb[0].mxu1 %v1895_v11 }
  0x27   : > { %1800 = vmatprep.mubr.bf16.mxu0 %v1896_v12  ;;  %1832 = vmatprep.mubr.bf16.mxu1 %v1897_v13 }
  0x2e   : > { %1801 = vmatmul.mubr.bf16.gmra.mrb[4].mxu0 %v1898_v14  ;;  %1833 = vmatmul.mubr.bf16.gmra.mrb[4].mxu1 %v1899_v15 }
  0x2f   : > { %1804 = vmatprep.mubr.bf16.mxu0 %v1900_v16  ;;  %1836 = vmatprep.mubr.bf16.mxu1 %v1901_v17 }
  0x36   : > { %1805 = vmatmul.mubr.bf16.gmra.mrb[8].mxu0 %v1902_v18  ;;  %1837 = vmatmul.mubr.bf16.gmra.mrb[8].mxu1 %v1903_v19 }
  0x37   : > { %1808 = vmatprep.mubr.bf16.mxu0 %v1904_v20  ;;  %1840 = vmatprep.mubr.bf16.mxu1 %v1905_v21 }
  0x3e   : > { %1809 = vmatmul.mubr.bf16.gmra.mrb[12].mxu0 %v1906_v22  ;;  %1841 = vmatmul.mubr.bf16.gmra.mrb[12].mxu1 %v1907_v23 }
  0x3f   : > { %1812 = vmatprep.mubr.bf16.mxu0 %v1908_v24  ;;  %1844 = vmatprep.mubr.bf16.mxu1 %v1909_v25 }
  0x46   : > { %1813 = vmatmul.mubr.bf16.gmra.mrb[16].mxu0 %v1910_v26  ;;  %1845 = vmatmul.mubr.bf16.gmra.mrb[16].mxu1 %v1911_v27 }
  0x47   : > { %1816 = vmatprep.mubr.bf16.mxu0 %v1912_v28  ;;  %1848 = vmatprep.mubr.bf16.mxu1 %v1913_v29 }
  0x4e   : > { %1817 = vmatmul.mubr.bf16.gmra.mrb[20].mxu0 %v1914_v30  ;;  %1849 = vmatmul.mubr.bf16.gmra.mrb[20].mxu1 %v1915_v31 }
  0x4f   : > { %1820 = vmatprep.mubr.bf16.mxu0 %v1916_v32  ;;  %1852 = vmatprep.mubr.bf16.mxu1 %v1917_v33 }
  0x56   : > { %1821 = vmatmul.mubr.bf16.gmra.mrb[24].mxu0 %v1918_v34  ;;  %1853 = vmatmul.mubr.bf16.gmra.mrb[24].mxu1 %v1919_v35 }
  0x57   : > { %1824 = vmatprep.mubr.bf16.mxu0 %v1920_v36  ;;  %1856 = vmatprep.mubr.bf16.mxu1 %v1921_v37 }
  0x5e   : > { %1825 = vmatmul.mubr.bf16.gmra.mrb[28].mxu0 %v1922_v38  ;;  %1857 = vmatmul.mubr.bf16.gmra.mrb[28].mxu1 %v1923_v39 }
  0xf9   : > { %v1798_v41 = vpop.f32.mrb[0].mxu0  ;;  %v1830_v42 = vpop.f32.mrb[0].mxu1 }
  0xfa   : > { %v543_v43 = vadd.f32 %v1798_v41, %v2029_v40  ;;  %v671_v44 = vadd.f32 %v1830_v42, %v2029_v40  ;;  %v534_v45 = vpop.f32.mrb[1].mxu0  ;;  %v662_v46 = vpop.f32.mrb[1].mxu1 }
  0xfb   : > { %v535_v48 = vadd.f32 %v2029_v40, %v534_v45  ;;  %v663_v49 = vadd.f32 %v2029_v40, %v662_v46  ;;  %v1799_v50 = vpop.f32.mrb[2].mxu0  ;;  %v1831_v51 = vpop.f32.mrb[2].mxu1 }
  0xfc   : > { %v791_v52 = vmax.f32 %v543_v43, 0.0  ;;  %v823_v53 = vmax.f32 %v671_v44, 0.0  ;;  %v546_v54 = vadd.f32 %v1799_v50, %v2029_v40  ;;  %v674_v55 = vadd.f32 %v1831_v51, %v2029_v40  ;;  %v537_v56 = vpop.f32.mrb[3].mxu0  ;;  %v665_v57 = vpop.f32.mrb[3].mxu1 }
  0xfd   : > { %v789_v59 = vmax.f32 %v535_v48, 0.0  ;;  %v821_v60 = vmax.f32 %v663_v49, 0.0  ;;  %v538_v61 = vadd.f32 %v2029_v40, %v537_v56  ;;  %v666_v62 = vadd.f32 %v2029_v40, %v665_v57 }
  0xfe   : > { %v860_v63 = vmul.f32 %v2036_v47, %v791_v52  ;;  %v892_v0 = vmul.f32 %v2036_v47, %v823_v53  ;;  %v792_v1 = vmax.f32 %v546_v54, 0.0  ;;  %v824_v2 = vmax.f32 %v674_v55, 0.0 }
  0xff   : > { %v858_v3 = vmul.f32 %v2036_v47, %v789_v59  ;;  %v890_v4 = vmul.f32 %v2036_v47, %v821_v60  ;;  %v790_v5 = vmax.f32 %v538_v61, 0.0  ;;  %v822_v6 = vmax.f32 %v666_v62, 0.0 }
 0x100   : > { %v929_v7 = vadd.f32 %v2045_v58, %v860_v63  ;;  %v961_v8 = vadd.f32 %v2045_v58, %v892_v0  ;;  %v861_v9 = vmul.f32 %v2036_v47, %v792_v1  ;;  %v893_v10 = vmul.f32 %v2036_v47, %v824_v2 }
 0x101   : > { %v927_v11 = vadd.f32 %v2045_v58, %v858_v3  ;;  %v959_v12 = vadd.f32 %v2045_v58, %v890_v4  ;;  %v859_v13 = vmul.f32 %v2036_v47, %v790_v5  ;;  %v891_v14 = vmul.f32 %v2036_v47, %v822_v6  ;;  %v1802_v15 = vpop.f32.mrb[4].mxu0  ;;  %v1834_v16 = vpop.f32.mrb[4].mxu1 }
 0x102   : > { %v930_v17 = vadd.f32 %v2045_v58, %v861_v9  ;;  %v962_v18 = vadd.f32 %v2045_v58, %v893_v10  ;;  %v559_v19 = vadd.f32 %v1802_v15, %v2029_v40  ;;  %v687_v20 = vadd.f32 %v1834_v16, %v2029_v40  ;;  %v550_v21 = vpop.f32.mrb[5].mxu0  ;;  %v678_v22 = vpop.f32.mrb[5].mxu1 }
 0x103   : > { %v928_v23 = vadd.f32 %v2045_v58, %v859_v13  ;;  %v960_v24 = vadd.f32 %v2045_v58, %v891_v14  ;;  %v551_v25 = vadd.f32 %v2029_v40, %v550_v21  ;;  %v679_v26 = vadd.f32 %v2029_v40, %v678_v22  ;;  %v1803_v27 = vpop.f32.mrb[6].mxu0  ;;  %v1835_v28 = vpop.f32.mrb[6].mxu1 }
 0x104   : > { %v1557_v29 = vpack.c.bf16 %v930_v17, %v929_v7  ;;  %v1637_v30 = vpack.c.bf16 %v962_v18, %v961_v8  ;;  %v795_v31 = vmax.f32 %v559_v19, 0.0  ;;  %v827_v32 = vmax.f32 %v687_v20, 0.0  ;;  %v553_v33 = vpop.f32.mrb[7].mxu0  ;;  %v681_v34 = vpop.f32.mrb[7].mxu1 }
 0x105   : > { %v1552_v35 = vpack.c.bf16 %v928_v23, %v927_v11  ;;  %v1632_v36 = vpack.c.bf16 %v960_v24, %v959_v12  ;;  %v793_v37 = vmax.f32 %v551_v25, 0.0  ;;  %v825_v38 = vmax.f32 %v679_v26, 0.0 }
 0x106   : > { %1709 = vst [vmem:[%s2070_s18 + $0x8] sm:$0xff] %v1557_v29   ;;  %1725 = vst [vmem:[%s2070_s18 + $0x88] sm:$0xff] %v1637_v30   ;;  %v864_v39 = vmul.f32 %v2036_v47, %v795_v31  ;;  %v896_v41 = vmul.f32 %v2036_v47, %v827_v32  ;;  %v562_v42 = vadd.f32 %v1803_v27, %v2029_v40 }
 0x107   : > { %v690_v43 = vadd.f32 %v1835_v28, %v2029_v40  ;;  %1553 = vst [vmem:[%s2070_s18] sm:$0xff] %v1552_v35   ;;  %1724 = vst [vmem:[%s2070_s18 + $0x80] sm:$0xff] %v1632_v36   ;;  %v862_v44 = vmul.f32 %v2036_v47, %v793_v37  ;;  %v894_v45 = vmul.f32 %v2036_v47, %v825_v38 }
 0x108   : > { %v554_v46 = vadd.f32 %v2029_v40, %v553_v33  ;;  %v682_v48 = vadd.f32 %v2029_v40, %v681_v34  ;;  %v933_v49 = vadd.f32 %v2045_v58, %v864_v39  ;;  %v965_v50 = vadd.f32 %v2045_v58, %v896_v41 }
 0x109   : > { %v796_v51 = vmax.f32 %v562_v42, 0.0  ;;  %v828_v52 = vmax.f32 %v690_v43, 0.0  ;;  %v931_v53 = vadd.f32 %v2045_v58, %v862_v44  ;;  %v963_v54 = vadd.f32 %v2045_v58, %v894_v45  ;;  %v1806_v57 = vpop.f32.mrb[8].mxu0  ;;  %v1838_v59 = vpop.f32.mrb[8].mxu1 }
 0x10a   : > { %v794_v55 = vmax.f32 %v554_v46, 0.0  ;;  %v826_v56 = vmax.f32 %v682_v48, 0.0  ;;  %v575_v62 = vadd.f32 %v1806_v57, %v2029_v40  ;;  %v703_v63 = vadd.f32 %v1838_v59, %v2029_v40  ;;  %v566_v0 = vpop.f32.mrb[9].mxu0  ;;  %v694_v1 = vpop.f32.mrb[9].mxu1 }
 0x10b   : > { %v865_v60 = vmul.f32 %v2036_v47, %v796_v51  ;;  %v897_v61 = vmul.f32 %v2036_v47, %v828_v52  ;;  %v567_v4 = vadd.f32 %v2029_v40, %v566_v0  ;;  %v695_v5 = vadd.f32 %v2029_v40, %v694_v1  ;;  %v1807_v6 = vpop.f32.mrb[10].mxu0  ;;  %v1839_v7 = vpop.f32.mrb[10].mxu1 }
 0x10c   : > { %v863_v2 = vmul.f32 %v2036_v47, %v794_v55  ;;  %v895_v3 = vmul.f32 %v2036_v47, %v826_v56  ;;  %v799_v10 = vmax.f32 %v575_v62, 0.0  ;;  %v831_v11 = vmax.f32 %v703_v63, 0.0  ;;  %v569_v12 = vpop.f32.mrb[11].mxu0  ;;  %v697_v13 = vpop.f32.mrb[11].mxu1 }
 0x10d   : > { %v934_v8 = vadd.f32 %v2045_v58, %v865_v60  ;;  %v966_v9 = vadd.f32 %v2045_v58, %v897_v61  ;;  %v797_v16 = vmax.f32 %v567_v4, 0.0  ;;  %v829_v17 = vmax.f32 %v695_v5, 0.0 }
 0x10e   : > { %v932_v14 = vadd.f32 %v2045_v58, %v863_v2  ;;  %v964_v15 = vadd.f32 %v2045_v58, %v895_v3  ;;  %v868_v22 = vmul.f32 %v2036_v47, %v799_v10  ;;  %v900_v23 = vmul.f32 %v2036_v47, %v831_v11 }
 0x10f   : > { %v1567_v18 = vpack.c.bf16 %v934_v8, %v933_v49  ;;  %v1647_v19 = vpack.c.bf16 %v966_v9, %v965_v50  ;;  %v578_v24 = vadd.f32 %v1807_v6, %v2029_v40  ;;  %v706_v25 = vadd.f32 %v1839_v7, %v2029_v40 }
 0x110   : > { %v1562_v20 = vpack.c.bf16 %v932_v14, %v931_v53  ;;  %v1642_v21 = vpack.c.bf16 %v964_v15, %v963_v54  ;;  %v866_v26 = vmul.f32 %v2036_v47, %v797_v16  ;;  %v898_v27 = vmul.f32 %v2036_v47, %v829_v17 }
 0x111   : > { %1711 = vst [vmem:[%s2070_s18 + $0x18] sm:$0xff] %v1567_v18   ;;  %1727 = vst [vmem:[%s2070_s18 + $0x98] sm:$0xff] %v1647_v19   ;;  %v570_v28 = vadd.f32 %v2029_v40, %v569_v12  ;;  %v698_v29 = vadd.f32 %v2029_v40, %v697_v13  ;;  %v1810_v30 = vpop.f32.mrb[12].mxu0  ;;  %v1842_v31 = vpop.f32.mrb[12].mxu1  ;;  %v800_v32 = vmax.f32 %v578_v24, 0.0  ;;  %v832_v33 = vmax.f32 %v706_v25, 0.0 }
 0x112   : > { %1710 = vst [vmem:[%s2070_s18 + $0x10] sm:$0xff] %v1562_v20   ;;  %1726 = vst [vmem:[%s2070_s18 + $0x90] sm:$0xff] %v1642_v21   ;;  %v591_v34 = vadd.f32 %v1810_v30, %v2029_v40  ;;  %v719_v35 = vadd.f32 %v1842_v31, %v2029_v40  ;;  %v582_v36 = vpop.f32.mrb[13].mxu0  ;;  %v710_v37 = vpop.f32.mrb[13].mxu1  ;;  %v937_v56 = vadd.f32 %v2045_v58, %v868_v22 }
 0x113   : > { %v798_v38 = vmax.f32 %v570_v28, 0.0  ;;  %v830_v39 = vmax.f32 %v698_v29, 0.0  ;;  %v583_v41 = vadd.f32 %v2029_v40, %v582_v36  ;;  %v711_v42 = vadd.f32 %v2029_v40, %v710_v37  ;;  %v1811_v43 = vpop.f32.mrb[14].mxu0  ;;  %v1843_v44 = vpop.f32.mrb[14].mxu1 }
 0x114   : > { %v869_v45 = vmul.f32 %v2036_v47, %v800_v32  ;;  %v901_v46 = vmul.f32 %v2036_v47, %v832_v33  ;;  %v803_v48 = vmax.f32 %v591_v34, 0.0  ;;  %v835_v49 = vmax.f32 %v719_v35, 0.0  ;;  %v585_v50 = vpop.f32.mrb[15].mxu0  ;;  %v713_v51 = vpop.f32.mrb[15].mxu1 }
 0x115   : > { %v867_v52 = vmul.f32 %v2036_v47, %v798_v38  ;;  %v899_v53 = vmul.f32 %v2036_v47, %v830_v39  ;;  %v801_v54 = vmax.f32 %v583_v41, 0.0  ;;  %v833_v55 = vmax.f32 %v711_v42, 0.0 }
 0x116   : > { %v969_v57 = vadd.f32 %v2045_v58, %v900_v23  ;;  %v938_v59 = vadd.f32 %v2045_v58, %v869_v45  ;;  %v970_v60 = vadd.f32 %v2045_v58, %v901_v46  ;;  %v935_v61 = vadd.f32 %v2045_v58, %v866_v26 }
 0x117   : > { %v967_v62 = vadd.f32 %v2045_v58, %v898_v27  ;;  %v936_v63 = vadd.f32 %v2045_v58, %v867_v52  ;;  %v968_v0 = vadd.f32 %v2045_v58, %v899_v53  ;;  %v872_v3 = vmul.f32 %v2036_v47, %v803_v48 }
 0x118   : > { %v1577_v1 = vpack.c.bf16 %v938_v59, %v937_v56  ;;  %v1657_v2 = vpack.c.bf16 %v970_v60, %v969_v57  ;;  %v904_v4 = vmul.f32 %v2036_v47, %v835_v49  ;;  %v870_v7 = vmul.f32 %v2036_v47, %v801_v54 }
 0x119   : > { %v1572_v5 = vpack.c.bf16 %v936_v63, %v935_v61  ;;  %v1652_v6 = vpack.c.bf16 %v968_v0, %v967_v62  ;;  %v902_v8 = vmul.f32 %v2036_v47, %v833_v55  ;;  %v1814_v9 = vpop.f32.mrb[16].mxu0  ;;  %v1846_v10 = vpop.f32.mrb[16].mxu1  ;;  %v594_v11 = vadd.f32 %v1811_v43, %v2029_v40 }
 0x11a   : > { %1713 = vst [vmem:[%s2070_s18 + $0x28] sm:$0xff] %v1577_v1   ;;  %1729 = vst [vmem:[%s2070_s18 + $0xa8] sm:$0xff] %v1657_v2   ;;  %v722_v12 = vadd.f32 %v1843_v44, %v2029_v40  ;;  %v586_v13 = vadd.f32 %v2029_v40, %v585_v50  ;;  %v714_v14 = vadd.f32 %v2029_v40, %v713_v51  ;;  %v598_v15 = vpop.f32.mrb[17].mxu0  ;;  %v726_v16 = vpop.f32.mrb[17].mxu1 }
 0x11b   : > { %1712 = vst [vmem:[%s2070_s18 + $0x20] sm:$0xff] %v1572_v5   ;;  %1728 = vst [vmem:[%s2070_s18 + $0xa0] sm:$0xff] %v1652_v6   ;;  %v607_v17 = vadd.f32 %v1814_v9, %v2029_v40  ;;  %v735_v18 = vadd.f32 %v1846_v10, %v2029_v40  ;;  %v599_v19 = vadd.f32 %v2029_v40, %v598_v15  ;;  %v1815_v21 = vpop.f32.mrb[18].mxu0  ;;  %v1847_v22 = vpop.f32.mrb[18].mxu1  ;;  %v804_v23 = vmax.f32 %v594_v11, 0.0 }
 0x11c   : > { %v727_v20 = vadd.f32 %v2029_v40, %v726_v16  ;;  %v836_v24 = vmax.f32 %v722_v12, 0.0  ;;  %v802_v25 = vmax.f32 %v586_v13, 0.0  ;;  %v834_v26 = vmax.f32 %v714_v14, 0.0  ;;  %v601_v27 = vpop.f32.mrb[19].mxu0  ;;  %v729_v28 = vpop.f32.mrb[19].mxu1 }
 0x11d   : > { %v807_v29 = vmax.f32 %v607_v17, 0.0  ;;  %v839_v30 = vmax.f32 %v735_v18, 0.0  ;;  %v805_v31 = vmax.f32 %v599_v19, 0.0  ;;  %v873_v33 = vmul.f32 %v2036_v47, %v804_v23 }
 0x11e   : > { %v837_v32 = vmax.f32 %v727_v20, 0.0  ;;  %v905_v34 = vmul.f32 %v2036_v47, %v836_v24  ;;  %v871_v35 = vmul.f32 %v2036_v47, %v802_v25  ;;  %v903_v36 = vmul.f32 %v2036_v47, %v834_v26 }
 0x11f   : > { %v941_v37 = vadd.f32 %v2045_v58, %v872_v3  ;;  %v973_v38 = vadd.f32 %v2045_v58, %v904_v4  ;;  %v939_v39 = vadd.f32 %v2045_v58, %v870_v7  ;;  %v971_v41 = vadd.f32 %v2045_v58, %v902_v8 }
 0x120   : > { %v942_v42 = vadd.f32 %v2045_v58, %v873_v33  ;;  %v974_v43 = vadd.f32 %v2045_v58, %v905_v34  ;;  %v940_v44 = vadd.f32 %v2045_v58, %v871_v35  ;;  %v972_v45 = vadd.f32 %v2045_v58, %v903_v36 }
 0x121   : > { %v876_v46 = vmul.f32 %v2036_v47, %v807_v29  ;;  %v908_v48 = vmul.f32 %v2036_v47, %v839_v30  ;;  %v874_v49 = vmul.f32 %v2036_v47, %v805_v31  ;;  %v906_v50 = vmul.f32 %v2036_v47, %v837_v32  ;;  %v1818_v51 = vpop.f32.mrb[20].mxu0  ;;  %v1850_v52 = vpop.f32.mrb[20].mxu1 }
 0x122   : > { %v1587_v53 = vpack.c.bf16 %v942_v42, %v941_v37  ;;  %v1667_v54 = vpack.c.bf16 %v974_v43, %v973_v38  ;;  %v1582_v55 = vpack.c.bf16 %v940_v44, %v939_v39  ;;  %v1662_v56 = vpack.c.bf16 %v972_v45, %v971_v41  ;;  %v614_v57 = vpop.f32.mrb[21].mxu0  ;;  %v742_v59 = vpop.f32.mrb[21].mxu1 }
 0x123   : > { %v610_v60 = vadd.f32 %v1815_v21, %v2029_v40  ;;  %v738_v61 = vadd.f32 %v1847_v22, %v2029_v40  ;;  %v602_v62 = vadd.f32 %v2029_v40, %v601_v27  ;;  %v730_v63 = vadd.f32 %v2029_v40, %v729_v28  ;;  %v1819_v0 = vpop.f32.mrb[22].mxu0  ;;  %v1851_v1 = vpop.f32.mrb[22].mxu1 }
 0x124   : > { %1715 = vst [vmem:[%s2070_s18 + $0x38] sm:$0xff] %v1587_v53   ;;  %1731 = vst [vmem:[%s2070_s18 + $0xb8] sm:$0xff] %v1667_v54   ;;  %v623_v2 = vadd.f32 %v1818_v51, %v2029_v40  ;;  %v751_v3 = vadd.f32 %v1850_v52, %v2029_v40  ;;  %v615_v4 = vadd.f32 %v2029_v40, %v614_v57  ;;  %v617_v6 = vpop.f32.mrb[23].mxu0  ;;  %v745_v7 = vpop.f32.mrb[23].mxu1 }
 0x125   : > { %1714 = vst [vmem:[%s2070_s18 + $0x30] sm:$0xff] %v1582_v55   ;;  %1730 = vst [vmem:[%s2070_s18 + $0xb0] sm:$0xff] %v1662_v56   ;;  %v743_v5 = vadd.f32 %v2029_v40, %v742_v59  ;;  %v808_v8 = vmax.f32 %v610_v60, 0.0  ;;  %v840_v9 = vmax.f32 %v738_v61, 0.0  ;;  %v806_v10 = vmax.f32 %v602_v62, 0.0 }
 0x126   : > { %v838_v11 = vmax.f32 %v730_v63, 0.0  ;;  %v811_v12 = vmax.f32 %v623_v2, 0.0  ;;  %v843_v13 = vmax.f32 %v751_v3, 0.0  ;;  %v809_v14 = vmax.f32 %v615_v4, 0.0 }
 0x127   : > { %v841_v15 = vmax.f32 %v743_v5, 0.0  ;;  %v877_v16 = vmul.f32 %v2036_v47, %v808_v8  ;;  %v909_v17 = vmul.f32 %v2036_v47, %v840_v9  ;;  %v875_v18 = vmul.f32 %v2036_v47, %v806_v10 }
 0x128   : > { %v907_v19 = vmul.f32 %v2036_v47, %v838_v11  ;;  %v945_v20 = vadd.f32 %v2045_v58, %v876_v46  ;;  %v977_v21 = vadd.f32 %v2045_v58, %v908_v48  ;;  %v943_v22 = vadd.f32 %v2045_v58, %v874_v49 }
 0x129   : > { %v975_v23 = vadd.f32 %v2045_v58, %v906_v50  ;;  %v946_v24 = vadd.f32 %v2045_v58, %v877_v16  ;;  %v978_v25 = vadd.f32 %v2045_v58, %v909_v17  ;;  %v944_v26 = vadd.f32 %v2045_v58, %v875_v18  ;;  %v1822_v28 = vpop.f32.mrb[24].mxu0  ;;  %v1854_v29 = vpop.f32.mrb[24].mxu1 }
 0x12a   : > { %v976_v27 = vadd.f32 %v2045_v58, %v907_v19  ;;  %v880_v30 = vmul.f32 %v2036_v47, %v811_v12  ;;  %v912_v31 = vmul.f32 %v2036_v47, %v843_v13  ;;  %v878_v32 = vmul.f32 %v2036_v47, %v809_v14  ;;  %v630_v34 = vpop.f32.mrb[25].mxu0  ;;  %v758_v35 = vpop.f32.mrb[25].mxu1 }
 0x12b   : > { %v910_v33 = vmul.f32 %v2036_v47, %v841_v15  ;;  %v1597_v36 = vpack.c.bf16 %v946_v24, %v945_v20  ;;  %v1677_v37 = vpack.c.bf16 %v978_v25, %v977_v21  ;;  %v1592_v38 = vpack.c.bf16 %v944_v26, %v943_v22  ;;  %v1823_v41 = vpop.f32.mrb[26].mxu0  ;;  %v1855_v42 = vpop.f32.mrb[26].mxu1 }
 0x12c   : > { %v1672_v39 = vpack.c.bf16 %v976_v27, %v975_v23  ;;  %v626_v43 = vadd.f32 %v1819_v0, %v2029_v40  ;;  %v754_v44 = vadd.f32 %v1851_v1, %v2029_v40  ;;  %v618_v45 = vadd.f32 %v2029_v40, %v617_v6  ;;  %v633_v48 = vpop.f32.mrb[27].mxu0  ;;  %v761_v49 = vpop.f32.mrb[27].mxu1 }
 0x12d   : > { %v746_v46 = vadd.f32 %v2029_v40, %v745_v7  ;;  %1717 = vst [vmem:[%s2070_s18 + $0x48] sm:$0xff] %v1597_v36   ;;  %1733 = vst [vmem:[%s2070_s18 + $0xc8] sm:$0xff] %v1677_v37   ;;  %v639_v50 = vadd.f32 %v1822_v28, %v2029_v40  ;;  %v767_v51 = vadd.f32 %v1854_v29, %v2029_v40 }
 0x12e   : > { %1716 = vst [vmem:[%s2070_s18 + $0x40] sm:$0xff] %v1592_v38   ;;  %1732 = vst [vmem:[%s2070_s18 + $0xc0] sm:$0xff] %v1672_v39   ;;  %v631_v52 = vadd.f32 %v2029_v40, %v630_v34  ;;  %v759_v53 = vadd.f32 %v2029_v40, %v758_v35  ;;  %v812_v54 = vmax.f32 %v626_v43, 0.0  ;;  %v844_v55 = vmax.f32 %v754_v44, 0.0 }
 0x12f   : > { %v810_v56 = vmax.f32 %v618_v45, 0.0  ;;  %v842_v57 = vmax.f32 %v746_v46, 0.0  ;;  %v815_v59 = vmax.f32 %v639_v50, 0.0  ;;  %v847_v60 = vmax.f32 %v767_v51, 0.0 }
 0x130   : > { %v813_v61 = vmax.f32 %v631_v52, 0.0  ;;  %v845_v62 = vmax.f32 %v759_v53, 0.0  ;;  %v881_v63 = vmul.f32 %v2036_v47, %v812_v54  ;;  %v913_v0 = vmul.f32 %v2036_v47, %v844_v55 }
 0x131   : > { %v879_v1 = vmul.f32 %v2036_v47, %v810_v56  ;;  %v911_v2 = vmul.f32 %v2036_v47, %v842_v57  ;;  %v949_v3 = vadd.f32 %v2045_v58, %v880_v30  ;;  %v981_v4 = vadd.f32 %v2045_v58, %v912_v31  ;;  %v1826_v7 = vpop.f32.mrb[28].mxu0  ;;  %v1858_v8 = vpop.f32.mrb[28].mxu1 }
 0x132   : > { %v947_v5 = vadd.f32 %v2045_v58, %v878_v32  ;;  %v979_v6 = vadd.f32 %v2045_v58, %v910_v33  ;;  %v950_v9 = vadd.f32 %v2045_v58, %v881_v63  ;;  %v982_v10 = vadd.f32 %v2045_v58, %v913_v0  ;;  %v646_v13 = vpop.f32.mrb[29].mxu0  ;;  %v774_v14 = vpop.f32.mrb[29].mxu1 }
 0x133   : > { %v948_v11 = vadd.f32 %v2045_v58, %v879_v1  ;;  %v980_v12 = vadd.f32 %v2045_v58, %v911_v2  ;;  %v884_v15 = vmul.f32 %v2036_v47, %v815_v59  ;;  %v916_v16 = vmul.f32 %v2036_v47, %v847_v60  ;;  %v1827_v19 = vpop.f32.mrb[30].mxu0  ;;  %v1859_v20 = vpop.f32.mrb[30].mxu1 }
 0x134   : > { %v882_v17 = vmul.f32 %v2036_v47, %v813_v61  ;;  %v914_v18 = vmul.f32 %v2036_v47, %v845_v62  ;;  %v1607_v21 = vpack.c.bf16 %v950_v9, %v949_v3  ;;  %v1687_v22 = vpack.c.bf16 %v982_v10, %v981_v4  ;;  %v649_v25 = vpop.f32.mrb[31].mxu0  ;;  %v777_v26 = vpop.f32.mrb[31].mxu1 }
 0x135   : > { %v1602_v23 = vpack.c.bf16 %v948_v11, %v947_v5  ;;  %v1682_v24 = vpack.c.bf16 %v980_v12, %v979_v6  ;;  %v642_v27 = vadd.f32 %v1823_v41, %v2029_v40  ;;  %v770_v28 = vadd.f32 %v1855_v42, %v2029_v40 }
 0x136   : > { %v634_v29 = vadd.f32 %v2029_v40, %v633_v48  ;;  %v762_v30 = vadd.f32 %v2029_v40, %v761_v49  ;;  %1719 = vst [vmem:[%s2070_s18 + $0x58] sm:$0xff] %v1607_v21   ;;  %1735 = vst [vmem:[%s2070_s18 + $0xd8] sm:$0xff] %v1687_v22   ;;  %v655_v31 = vadd.f32 %v1826_v7, %v2029_v40 }
 0x137   : > { %1718 = vst [vmem:[%s2070_s18 + $0x50] sm:$0xff] %v1602_v23   ;;  %1734 = vst [vmem:[%s2070_s18 + $0xd0] sm:$0xff] %v1682_v24   ;;  %v783_v32 = vadd.f32 %v1858_v8, %v2029_v40  ;;  %v647_v33 = vadd.f32 %v2029_v40, %v646_v13  ;;  %v775_v34 = vadd.f32 %v2029_v40, %v774_v14  ;;  %v816_v35 = vmax.f32 %v642_v27, 0.0 }
 0x138   : > { %v848_v36 = vmax.f32 %v770_v28, 0.0  ;;  %v814_v37 = vmax.f32 %v634_v29, 0.0  ;;  %v846_v38 = vmax.f32 %v762_v30, 0.0  ;;  %v953_v39 = vadd.f32 %v2045_v58, %v884_v15 }
 0x139   : > { %v985_v41 = vadd.f32 %v2045_v58, %v916_v16  ;;  %v951_v42 = vadd.f32 %v2045_v58, %v882_v17  ;;  %v983_v43 = vadd.f32 %v2045_v58, %v914_v18  ;;  %v885_v44 = vmul.f32 %v2036_v47, %v816_v35 }
 0x13a   : > { %v917_v45 = vmul.f32 %v2036_v47, %v848_v36  ;;  %v883_v46 = vmul.f32 %v2036_v47, %v814_v37  ;;  %v915_v48 = vmul.f32 %v2036_v47, %v846_v38  ;;  %v819_v49 = vmax.f32 %v655_v31, 0.0 }
 0x13b   : > { %v851_v50 = vmax.f32 %v783_v32, 0.0  ;;  %v817_v51 = vmax.f32 %v647_v33, 0.0  ;;  %v849_v52 = vmax.f32 %v775_v34, 0.0  ;;  %v954_v53 = vadd.f32 %v2045_v58, %v885_v44 }
 0x13c   : > { %v986_v54 = vadd.f32 %v2045_v58, %v917_v45  ;;  %v952_v55 = vadd.f32 %v2045_v58, %v883_v46  ;;  %v984_v56 = vadd.f32 %v2045_v58, %v915_v48  ;;  %v658_v62 = vadd.f32 %v1827_v19, %v2029_v40 }
 0x13d   : > { %v1617_v57 = vpack.c.bf16 %v954_v53, %v953_v39  ;;  %v786_v63 = vadd.f32 %v1859_v20, %v2029_v40  ;;  %v650_v0 = vadd.f32 %v2029_v40, %v649_v25  ;;  %v778_v1 = vadd.f32 %v2029_v40, %v777_v26 }
 0x13e   : > { %v1697_v59 = vpack.c.bf16 %v986_v54, %v985_v41  ;;  %v1612_v60 = vpack.c.bf16 %v952_v55, %v951_v42  ;;  %v1692_v61 = vpack.c.bf16 %v984_v56, %v983_v43  ;;  %v888_v2 = vmul.f32 %v2036_v47, %v819_v49 }
 0x13f   : > { %1721 = vst [vmem:[%s2070_s18 + $0x68] sm:$0xff] %v1617_v57   ;;  %v920_v3 = vmul.f32 %v2036_v47, %v851_v50  ;;  %v886_v4 = vmul.f32 %v2036_v47, %v817_v51  ;;  %v918_v5 = vmul.f32 %v2036_v47, %v849_v52  ;;  %v820_v6 = vmax.f32 %v658_v62, 0.0 }
 0x140   : > { %1737 = vst [vmem:[%s2070_s18 + $0xe8] sm:$0xff] %v1697_v59   ;;  %1720 = vst [vmem:[%s2070_s18 + $0x60] sm:$0xff] %v1612_v60   ;;  %v852_v7 = vmax.f32 %v786_v63, 0.0  ;;  %v818_v8 = vmax.f32 %v650_v0, 0.0  ;;  %v850_v9 = vmax.f32 %v778_v1, 0.0  ;;  %v957_v13 = vadd.f32 %v2045_v58, %v888_v2 }
 0x141   : > { %1736 = vst [vmem:[%s2070_s18 + $0xe0] sm:$0xff] %v1692_v61   ;;  %v889_v10 = vmul.f32 %v2036_v47, %v820_v6  ;;  %v989_v14 = vadd.f32 %v2045_v58, %v920_v3  ;;  %v955_v15 = vadd.f32 %v2045_v58, %v886_v4  ;;  %v987_v16 = vadd.f32 %v2045_v58, %v918_v5 }
 0x142   : > { %v921_v40 = vmul.f32 %v2036_v47, %v852_v7  ;;  %v887_v11 = vmul.f32 %v2036_v47, %v818_v8  ;;  %v919_v12 = vmul.f32 %v2036_v47, %v850_v9 }
 0x143   : > { %v958_v17 = vadd.f32 %v2045_v58, %v889_v10 }
 0x144   : > { %v990_v18 = vadd.f32 %v2045_v58, %v921_v40  ;;  %v956_v19 = vadd.f32 %v2045_v58, %v887_v11  ;;  %v988_v20 = vadd.f32 %v2045_v58, %v919_v12 }
 0x145   : > { %v1627_v21 = vpack.c.bf16 %v958_v17, %v957_v13 }
 0x146   : > { %v1707_v22 = vpack.c.bf16 %v990_v18, %v989_v14  ;;  %v1622_v47 = vpack.c.bf16 %v956_v19, %v955_v15  ;;  %v1702_v23 = vpack.c.bf16 %v988_v20, %v987_v16 }
 0x147   : > { %1723 = vst [vmem:[%s2070_s18 + $0x78] sm:$0xff] %v1627_v21  }
 0x148   : > { %1739 = vst [vmem:[%s2070_s18 + $0xf8] sm:$0xff] %v1707_v22   ;;  %1722 = vst [vmem:[%s2070_s18 + $0x70] sm:$0xff] %v1622_v47  }
 0x149   : > { %1738 = vst [vmem:[%s2070_s18 + $0xf0] sm:$0xff] %v1702_v23  }
 0x14a PF: > { %s13_s12 = sadd.s32 1, %s1930_s12  }
 0x14b   : > { %p10_p4 = scmp.ge.s32.totalorder %s13_s12, 6  }
 0x14d   :  { %12 = sbr.rel (!%p10_p4) target bundleno = 1 (0x1), region = 62 }

// kernel: cnn_kaggle_forward.8
= control target key start
LH: loop header
LB: loop body
LE: loop exit
PB: predicated region body
PF: predicated region fallthrough
CT: control target
= control target key end

     0   :  { %s2967_s12 = smov 0   ;;  %s3557_s0 = inlined_call_operand.vmem [shape: bf16[2048,384], index: 0, kind: input, shape index: {}]   ;;  %s3558_s1 = inlined_call_operand.vmem [shape: bf16[384,128], index: 1, kind: input, shape index: {}]   ;;  %s3559_s2 = inlined_call_operand.vmem [shape: f32[3,128], index: 2, kind: input, shape index: {}]   ;;  %s3560_s3 = inlined_call_operand.vmem [shape: bf16[2048,128], index: 3, kind: output, shape index: {}]  }
   0x1 LB: > { %s2171_s13 = sadd.s32 4294967295, %s2944_s12   ;;  %p2175_p0 = scmp.ge.s32.totalorder %s2944_s12, 1  ;;  %s2944_s12 = sphi %s2967_s12, %s13_s12  }
   0x2   : > { %p139_p1 = scmp.lt.s32.totalorder %s2944_s12, 5 }
   0x4   : > { %p140_p2 = pnand %p2175_p0, %p139_p1 }
   0x5   : > { %v2786_v0 = vld [vmem:[%s3558_s1] sm:$0xff] (!%p140_p2)   ;;  %v2946_v1 = vmov (!%p140_p2), 0   ;;  %s2176_s16 = sshll.u32 (!%p140_p2), %s2171_s13, 6  ;;  %v2787_v2 = vld [vmem:[%s3558_s1 + $0x8] sm:$0xff] (!%p140_p2)   ;;  %v2788_v3 = vld [vmem:[%s3558_s1 + $0x10] sm:$0xff] (!%p140_p2)  }
   0x6   : > { %143 = sbr.rel (%p140_p2) target bundleno = 482 (0x1e2), region = 32  ;;  %1015 = vmatprep.subr.bf16.mxu0 (!%p140_p2), %v2946_v1  ;;  %2744 = vmatprep.subr.bf16.mxu1 (!%p140_p2), %v2946_v1  ;;  %p165_p3 = scmp.lt.s32.totalorder (!%p140_p2), %s2176_s16, 255  ;;  %v2789_v4 = vld [vmem:[%s3558_s1 + $0x18] sm:$0xff] (!%p140_p2)   ;;  %v2790_v5 = vld [vmem:[%s3558_s1 + $0x20] sm:$0xff] (!%p140_p2)   ;;  %v2791_v7 = vld [vmem:[%s3558_s1 + $0x28] sm:$0xff] (!%p140_p2)  }
   0x7   : > { %1016 = vmatpush1.bf16.msra.mxu0 (!%p140_p2), %v2786_v0  ;;  %2760 = vmatpush1.bf16.msra.mxu1 (!%p140_p2), %v2786_v0  ;;  %v2792_v9 = vld [vmem:[%s3558_s1 + $0x30] sm:$0xff] (!%p140_p2)   ;;  %v2793_v10 = vld [vmem:[%s3558_s1 + $0x38] sm:$0xff] (!%p140_p2)   ;;  %v2794_v11 = vld [vmem:[%s3558_s1 + $0x40] sm:$0xff] (!%p140_p2)  }
   0x8   : > { %1017 = vmatprep.subr.bf16.mxu0 (!%p140_p2), %v2946_v1  ;;  %2745 = vmatprep.subr.bf16.mxu1 (!%p140_p2), %v2946_v1  ;;  %v2795_v12 = vld [vmem:[%s3558_s1 + $0x48] sm:$0xff] (!%p140_p2)   ;;  %v2796_v13 = vld [vmem:[%s3558_s1 + $0x50] sm:$0xff] (!%p140_p2)   ;;  %v2797_v14 = vld [vmem:[%s3558_s1 + $0x58] sm:$0xff] (!%p140_p2)  }
   0x9   : > { %v2798_v15 = vld [vmem:[%s3558_s1 + $0x60] sm:$0xff] (!%p140_p2)   ;;  %v2799_v16 = vld [vmem:[%s3558_s1 + $0x68] sm:$0xff] (!%p140_p2)   ;;  %v2800_v17 = vld [vmem:[%s3558_s1 + $0x70] sm:$0xff] (!%p140_p2)  }
   0xa   : > { %v2801_v18 = vld [vmem:[%s3558_s1 + $0x78] sm:$0xff] (!%p140_p2)   ;;  %v2808_v19 = vld [vmem:[%s3558_s1 + $0x80] sm:$0xff] (!%p140_p2)   ;;  %v2815_v24 = vld [vmem:[%s3558_s1 + $0x88] sm:$0xff] (!%p140_p2)  }
   0xb   : > { %1018 = vmatpush1.bf16.msra.mxu0 (!%p140_p2), %v2787_v2  ;;  %2761 = vmatpush1.bf16.msra.mxu1 (!%p140_p2), %v2787_v2  ;;  %v2822_v25 = vld [vmem:[%s3558_s1 + $0x90] sm:$0xff] (!%p140_p2)   ;;  %v2829_v30 = vld [vmem:[%s3558_s1 + $0x98] sm:$0xff] (!%p140_p2)   ;;  %v2836_v32 = vld [vmem:[%s3558_s1 + $0xa0] sm:$0xff] (!%p140_p2)  }
   0xc   : > { %1019 = vmatprep.subr.bf16.mxu0 (!%p140_p2), %v2946_v1  ;;  %2746 = vmatprep.subr.bf16.mxu1 (!%p140_p2), %v2946_v1  ;;  %v2843_v36 = vld [vmem:[%s3558_s1 + $0xa8] sm:$0xff] (!%p140_p2)   ;;  %v2850_v41 = vld [vmem:[%s3558_s1 + $0xb0] sm:$0xff] (!%p140_p2)   ;;  %v2857_v42 = vld [vmem:[%s3558_s1 + $0xb8] sm:$0xff] (!%p140_p2)  }
   0xd   : > { %s3562_s16 = smov (!%p165_p3, %s2176_s16), 255 }
   0xe   : > { %s2776_s23 = smul.u32 12, %s3562_s16 }
   0xf   : > { %1020 = vmatpush1.bf16.msra.mxu0 %v2788_v3  ;;  %2762 = vmatpush1.bf16.msra.mxu1 %v2788_v3 }
  0x10   : > { %1021 = vmatprep.subr.bf16.mxu0 %v2946_v1  ;;  %2747 = vmatprep.subr.bf16.mxu1 %v2946_v1  ;;  %s3004_s28 = scalar_lea.vmem %s3557_s0, %s2776_s23  ;;  %s2179_s23 = sshll.u32 %s3562_s16, 2 }
  0x11   : > { %v2804_v6 = vld [vmem:[%s3004_s28 + $0x4] ss:$12 sps:$4 sm:$0xff]   ;;  %v2802_v20 = vld [vmem:[%s3004_s28] ss:$12 sps:$4 sm:$0xff]   ;;  %v2809_v22 = vld [vmem:[%s3004_s28 + $0x1c] ss:$12 sps:$4 sm:$0xff]   ;;  %s3289_s25 = scalar_lea.vmem %s3560_s3, %s2179_s23 }
  0x12   : > { %v2807_v8 = vld [vmem:[%s3004_s28 + $0x244] ss:$12 sps:$4 sm:$0xff]   ;;  %1047 = vmatprep.mubr.bf16.mxu0 %v2804_v6  ;;  %v2805_v21 = vld [vmem:[%s3004_s28 + $0x240] ss:$12 sps:$4 sm:$0xff]   ;;  %v2811_v23 = vld [vmem:[%s3004_s28 + $0x25c] ss:$12 sps:$4 sm:$0xff]  }
  0x13   : > { %1022 = vmatpush1.bf16.msra.mxu0 %v2789_v4  ;;  %2763 = vmatpush1.bf16.msra.mxu1 %v2789_v4  ;;  %v2813_v26 = vld [vmem:[%s3004_s28 + $0x18] ss:$12 sps:$4 sm:$0xff]   ;;  %v2816_v28 = vld [vmem:[%s3004_s28 + $0x34] ss:$12 sps:$4 sm:$0xff]   ;;  %v2820_v31 = vld [vmem:[%s3004_s28 + $0x30] ss:$12 sps:$4 sm:$0xff]  }
  0x14   : > { %1023 = vmatprep.subr.bf16.mxu0 %v2946_v1  ;;  %2748 = vmatprep.subr.bf16.mxu1 %v2946_v1  ;;  %v2814_v27 = vld [vmem:[%s3004_s28 + $0x258] ss:$12 sps:$4 sm:$0xff]   ;;  %v2818_v29 = vld [vmem:[%s3004_s28 + $0x274] ss:$12 sps:$4 sm:$0xff]   ;;  %v2821_v33 = vld [vmem:[%s3004_s28 + $0x270] ss:$12 sps:$4 sm:$0xff]  }
  0x15   : > { %1239 = vmatprep.mubr.bf16.mxu1 %v2807_v8  ;;  %v2823_v34 = vld [vmem:[%s3004_s28 + $0x4c] ss:$12 sps:$4 sm:$0xff]   ;;  %v2827_v37 = vld [vmem:[%s3004_s28 + $0x48] ss:$12 sps:$4 sm:$0xff]   ;;  %v2830_v39 = vld [vmem:[%s3004_s28 + $0x64] ss:$12 sps:$4 sm:$0xff]  }
  0x16   : > { %v2825_v35 = vld [vmem:[%s3004_s28 + $0x28c] ss:$12 sps:$4 sm:$0xff]   ;;  %v2828_v38 = vld [vmem:[%s3004_s28 + $0x288] ss:$12 sps:$4 sm:$0xff]   ;;  %v2832_v40 = vld [vmem:[%s3004_s28 + $0x2a4] ss:$12 sps:$4 sm:$0xff]  }
  0x17   : > { %1024 = vmatpush1.bf16.msra.mxu0 %v2790_v5  ;;  %2764 = vmatpush1.bf16.msra.mxu1 %v2790_v5  ;;  %v2834_v43 = vld [vmem:[%s3004_s28 + $0x60] ss:$12 sps:$4 sm:$0xff]   ;;  %v2837_v45 = vld [vmem:[%s3004_s28 + $0x7c] ss:$12 sps:$4 sm:$0xff]   ;;  %v2841_v47 = vld [vmem:[%s3004_s28 + $0x78] ss:$12 sps:$4 sm:$0xff]  }
  0x18   : > { %1025 = vmatprep.subr.bf16.mxu0 %v2946_v1  ;;  %2749 = vmatprep.subr.bf16.mxu1 %v2946_v1  ;;  %v2835_v44 = vld [vmem:[%s3004_s28 + $0x2a0] ss:$12 sps:$4 sm:$0xff]   ;;  %v2839_v46 = vld [vmem:[%s3004_s28 + $0x2bc] ss:$12 sps:$4 sm:$0xff]   ;;  %v2842_v48 = vld [vmem:[%s3004_s28 + $0x2b8] ss:$12 sps:$4 sm:$0xff]  }
  0x19   : > { %v2844_v49 = vld [vmem:[%s3004_s28 + $0x94] ss:$12 sps:$4 sm:$0xff]   ;;  %v2848_v51 = vld [vmem:[%s3004_s28 + $0x90] ss:$12 sps:$4 sm:$0xff]   ;;  %v2851_v53 = vld [vmem:[%s3004_s28 + $0xac] ss:$12 sps:$4 sm:$0xff]  }
  0x1a   : > { %v2846_v50 = vld [vmem:[%s3004_s28 + $0x2d4] ss:$12 sps:$4 sm:$0xff]   ;;  %v2849_v52 = vld [vmem:[%s3004_s28 + $0x2d0] ss:$12 sps:$4 sm:$0xff]   ;;  %v2853_v54 = vld [vmem:[%s3004_s28 + $0x2ec] ss:$12 sps:$4 sm:$0xff]  }
  0x1b   : > { %1026 = vmatpush1.bf16.msra.mxu0 %v2791_v7  ;;  %2765 = vmatpush1.bf16.msra.mxu1 %v2791_v7  ;;  %v2855_v55 = vld [vmem:[%s3004_s28 + $0xa8] ss:$12 sps:$4 sm:$0xff]   ;;  %v2858_v57 = vld [vmem:[%s3004_s28 + $0xc4] ss:$12 sps:$4 sm:$0xff]   ;;  %v2861_v59 = vld [vmem:[%s3004_s28 + $0xc0] ss:$12 sps:$4 sm:$0xff]  }
  0x1c   : > { %1027 = vmatprep.subr.bf16.mxu0 %v2946_v1  ;;  %2750 = vmatprep.subr.bf16.mxu1 %v2946_v1  ;;  %v2856_v56 = vld [vmem:[%s3004_s28 + $0x2e8] ss:$12 sps:$4 sm:$0xff]   ;;  %v2862_v60 = vld [vmem:[%s3004_s28 + $0x20] ss:$12 sps:$4 sm:$0xff]   ;;  %v2865_v62 = vld [vmem:[%s3004_s28 + $0x38] ss:$12 sps:$4 sm:$0xff]  }
  0x1d   : > { %v2860_v58 = vld [vmem:[%s3004_s28 + $0x8] ss:$12 sps:$4 sm:$0xff]   ;;  %v2866_v63 = vld [vmem:[%s3004_s28 + $0xd8] ss:$12 sps:$4 sm:$0xff]   ;;  %v2867_v0 = vld [vmem:[%s3004_s28 + $0x50] ss:$12 sps:$4 sm:$0xff]  }
  0x1e   : > { %v2863_v61 = vld [vmem:[%s3004_s28 + $0xdc] ss:$12 sps:$4 sm:$0xff]   ;;  %v2872_v4 = vld [vmem:[%s3004_s28 + $0x80] ss:$12 sps:$4 sm:$0xff]   ;;  %v2875_v6 = vld [vmem:[%s3004_s28 + $0x98] ss:$12 sps:$4 sm:$0xff]  }
  0x1f   : > { %1028 = vmatpush1.bf16.msra.mxu0 %v2792_v9  ;;  %2766 = vmatpush1.bf16.msra.mxu1 %v2792_v9  ;;  %v2870_v2 = vld [vmem:[%s3004_s28 + $0x68] ss:$12 sps:$4 sm:$0xff]   ;;  %v2871_v3 = vld [vmem:[%s3004_s28 + $0xf0] ss:$12 sps:$4 sm:$0xff]   ;;  %v2873_v5 = vld [vmem:[%s3004_s28 + $0x10c] ss:$12 sps:$4 sm:$0xff]  }
  0x20   : > { %1029 = vmatprep.subr.bf16.mxu0 %v2946_v1  ;;  %2751 = vmatprep.subr.bf16.mxu1 %v2946_v1  ;;  %v2876_v7 = vld [vmem:[%s3004_s28 + $0x108] ss:$12 sps:$4 sm:$0xff]   ;;  %v2877_v8 = vld [vmem:[%s3004_s28 + $0xb0] ss:$12 sps:$4 sm:$0xff]  }
  0x21   : > { %v2878_v9 = vld [vmem:[%s3004_s28 + $0x124] ss:$12 sps:$4 sm:$0xff]  }
  0x23   : > { %1030 = vmatpush1.bf16.msra.mxu0 %v2793_v10  ;;  %2767 = vmatpush1.bf16.msra.mxu1 %v2793_v10  ;;  %v2880_v10 = vld [vmem:[%s3004_s28 + $0xc8] ss:$12 sps:$4 sm:$0xff]  }
  0x24   : > { %1031 = vmatprep.subr.bf16.mxu0 %v2946_v1  ;;  %2752 = vmatprep.subr.bf16.mxu1 %v2946_v1 }
  0x27   : > { %1032 = vmatpush1.bf16.msra.mxu0 %v2794_v11  ;;  %2768 = vmatpush1.bf16.msra.mxu1 %v2794_v11  ;;  %v2881_v11 = vld [vmem:[%s3004_s28 + $0x120] ss:$12 sps:$4 sm:$0xff]  }
  0x28   : > { %1033 = vmatprep.subr.bf16.mxu0 %v2946_v1  ;;  %2753 = vmatprep.subr.bf16.mxu1 %v2946_v1 }
  0x2b   : > { %1034 = vmatpush1.bf16.msra.mxu0 %v2795_v12  ;;  %2769 = vmatpush1.bf16.msra.mxu1 %v2795_v12  ;;  %v2882_v12 = vld [vmem:[%s3004_s28 + $0xe0] ss:$12 sps:$4 sm:$0xff]  }
  0x2c   : > { %1035 = vmatprep.subr.bf16.mxu0 %v2946_v1  ;;  %2754 = vmatprep.subr.bf16.mxu1 %v2946_v1 }
  0x2f   : > { %1036 = vmatpush1.bf16.msra.mxu0 %v2796_v13  ;;  %2770 = vmatpush1.bf16.msra.mxu1 %v2796_v13  ;;  %v2883_v13 = vld [vmem:[%s3004_s28 + $0x13c] ss:$12 sps:$4 sm:$0xff]  }
  0x30   : > { %1037 = vmatprep.subr.bf16.mxu0 %v2946_v1  ;;  %2755 = vmatprep.subr.bf16.mxu1 %v2946_v1 }
  0x33   : > { %1038 = vmatpush1.bf16.msra.mxu0 %v2797_v14  ;;  %2771 = vmatpush1.bf16.msra.mxu1 %v2797_v14  ;;  %v2885_v14 = vld [vmem:[%s3004_s28 + $0xf8] ss:$12 sps:$4 sm:$0xff]  }
  0x34   : > { %1039 = vmatprep.subr.bf16.mxu0 %v2946_v1  ;;  %2756 = vmatprep.subr.bf16.mxu1 %v2946_v1 }
  0x37   : > { %1040 = vmatpush1.bf16.msra.mxu0 %v2798_v15  ;;  %2772 = vmatpush1.bf16.msra.mxu1 %v2798_v15  ;;  %v2886_v15 = vld [vmem:[%s3004_s28 + $0x138] ss:$12 sps:$4 sm:$0xff]  }
  0x38   : > { %1041 = vmatprep.subr.bf16.mxu0 %v2946_v1  ;;  %2757 = vmatprep.subr.bf16.mxu1 %v2946_v1 }
  0x3b   : > { %1042 = vmatpush1.bf16.msra.mxu0 %v2799_v16  ;;  %2773 = vmatpush1.bf16.msra.mxu1 %v2799_v16  ;;  %v2887_v16 = vld [vmem:[%s3004_s28 + $0x110] ss:$12 sps:$4 sm:$0xff]  }
  0x3c   : > { %1043 = vmatprep.subr.bf16.mxu0 %v2946_v1  ;;  %2758 = vmatprep.subr.bf16.mxu1 %v2946_v1 }
  0x3f   : > { %1044 = vmatpush1.bf16.msra.mxu0 %v2800_v17  ;;  %2774 = vmatpush1.bf16.msra.mxu1 %v2800_v17  ;;  %v2888_v17 = vld [vmem:[%s3004_s28 + $0x154] ss:$12 sps:$4 sm:$0xff]  }
  0x40   : > { %1045 = vmatprep.subr.bf16.mxu0 %v2946_v1  ;;  %2759 = vmatprep.subr.bf16.mxu1 %v2946_v1  ;;  %v2868_v1 = vld [vmem:[%s3004_s28 + $0xf4] ss:$12 sps:$4 sm:$0xff]  }
  0x43   : > { %1046 = vmatpush1.bf16.msra.mxu0 %v2801_v18  ;;  %2775 = vmatpush1.bf16.msra.mxu1 %v2801_v18  ;;  %v2890_v18 = vld [vmem:[%s3004_s28 + $0x128] ss:$12 sps:$4 sm:$0xff]  }
  0x44   : > { %2664 = vmatprep.subr.bf16.mxu1 %v2808_v19 }
  0x46   : > { %1048 = vmatmul.mubr.bf16.vlgmr.msra.gmra.mrb[0].mxu0 %v2802_v20  ;;  %1240 = vmatmul.mubr.bf16.vlgmr.msra.gmra.mrb[0].mxu1 %v2805_v21  ;;  %v2892_v20 = vld [vmem:[%s3004_s28 + $0x140] ss:$12 sps:$4 sm:$0xff]  }
  0x47   : > { %2665 = vmatpush3.bf16.msra.mxu1 %v2808_v19  ;;  %1055 = vmatprep.mubr.bf16.mxu0 %v2809_v22  ;;  %v2891_v19 = vld [vmem:[%s3004_s28 + $0x150] ss:$12 sps:$4 sm:$0xff]   ;;  %v2893_v21 = vld [vmem:[%s3004_s28 + $0x16c] ss:$12 sps:$4 sm:$0xff]  }
  0x48   : > { %1247 = vmatprep.mubr.bf16.mxu1 %v2811_v23  ;;  %2666 = vmatprep.subr.bf16.mxu1 %v2815_v24  ;;  %v2895_v22 = vld [vmem:[%s3004_s28 + $0x158] ss:$12 sps:$4 sm:$0xff]   ;;  %v2896_v23 = vld [vmem:[%s3004_s28 + $0x168] ss:$12 sps:$4 sm:$0xff]  }
  0x4b   : > { %2667 = vmatpush3.bf16.msra.mxu1 %v2815_v24  ;;  %v2897_v24 = vld [vmem:[%s3004_s28 + $0x170] ss:$12 sps:$4 sm:$0xff]  }
  0x4c   : > { %2668 = vmatprep.subr.bf16.mxu1 %v2822_v25 }
  0x4e   : > { %1056 = vmatmul.mubr.bf16.gmra.mrb[4].mxu0 %v2813_v26  ;;  %1248 = vmatmul.mubr.bf16.gmra.mrb[4].mxu1 %v2814_v27  ;;  %v2900_v26 = vld [vmem:[%s3004_s28 + $0x188] ss:$12 sps:$4 sm:$0xff]   ;;  %v2901_v27 = vld [vmem:[%s3004_s28 + $0x180] ss:$12 sps:$4 sm:$0xff]  }
  0x4f   : > { %1063 = vmatprep.mubr.bf16.mxu0 %v2816_v28  ;;  %1255 = vmatprep.mubr.bf16.mxu1 %v2818_v29  ;;  %v2902_v28 = vld [vmem:[%s3004_s28 + $0x1a0] ss:$12 sps:$4 sm:$0xff]   ;;  %v2903_v29 = vld [vmem:[%s3004_s28 + $0x19c] ss:$12 sps:$4 sm:$0xff]  }
  0x50   : > { %2669 = vmatpush3.bf16.msra.mxu1 %v2822_v25  ;;  %v2898_v25 = vld [vmem:[%s3004_s28 + $0x184] ss:$12 sps:$4 sm:$0xff]  }
  0x51   : > { %2670 = vmatprep.subr.bf16.mxu1 %v2829_v30 }
  0x54   : > { %2671 = vmatpush3.bf16.msra.mxu1 %v2829_v30  ;;  %v2905_v30 = vld [vmem:[%s3004_s28 + $0x1b8] ss:$12 sps:$4 sm:$0xff]  }
  0x55   : > { %2672 = vmatprep.subr.bf16.mxu1 %v2836_v32 }
  0x56   : > { %1064 = vmatmul.mubr.bf16.gmra.mrb[8].mxu0 %v2820_v31  ;;  %1256 = vmatmul.mubr.bf16.gmra.mrb[8].mxu1 %v2821_v33  ;;  %v2906_v31 = vld [vmem:[%s3004_s28 + $0x198] ss:$12 sps:$4 sm:$0xff]   ;;  %v2908_v33 = vld [vmem:[%s3004_s28 + $0x1b4] ss:$12 sps:$4 sm:$0xff]  }
  0x57   : > { %1071 = vmatprep.mubr.bf16.mxu0 %v2823_v34  ;;  %1263 = vmatprep.mubr.bf16.mxu1 %v2825_v35  ;;  %v2910_v34 = vld [vmem:[%s3004_s28 + $0x1e8] ss:$12 sps:$4 sm:$0xff]   ;;  %v2911_v35 = vld [vmem:[%s3004_s28 + $0x1b0] ss:$12 sps:$4 sm:$0xff]  }
  0x58   : > { %2673 = vmatpush3.bf16.msra.mxu1 %v2836_v32  ;;  %v2907_v32 = vld [vmem:[%s3004_s28 + $0x1d0] ss:$12 sps:$4 sm:$0xff]  }
  0x59   : > { %2674 = vmatprep.subr.bf16.mxu1 %v2843_v36 }
  0x5c   : > { %2675 = vmatpush3.bf16.msra.mxu1 %v2843_v36  ;;  %v2912_v36 = vld [vmem:[%s3004_s28 + $0x200] ss:$12 sps:$4 sm:$0xff]  }
  0x5d   : > { %2676 = vmatprep.subr.bf16.mxu1 %v2850_v41 }
  0x5e   : > { %1072 = vmatmul.mubr.bf16.gmra.mrb[12].mxu0 %v2827_v37  ;;  %1264 = vmatmul.mubr.bf16.gmra.mrb[12].mxu1 %v2828_v38  ;;  %v2913_v37 = vld [vmem:[%s3004_s28 + $0x1cc] ss:$12 sps:$4 sm:$0xff]  }
  0x5f   : > { %1079 = vmatprep.mubr.bf16.mxu0 %v2830_v39  ;;  %1271 = vmatprep.mubr.bf16.mxu1 %v2832_v40  ;;  %v2915_v38 = vld [vmem:[%s3004_s28 + $0x218] ss:$12 sps:$4 sm:$0xff]   ;;  %v2916_v39 = vld [vmem:[%s3004_s28 + $0x1c8] ss:$12 sps:$4 sm:$0xff]   ;;  %v2917_v40 = vld [vmem:[%s3004_s28 + $0x230] ss:$12 sps:$4 sm:$0xff]  }
  0x60   : > { %2677 = vmatpush3.bf16.msra.mxu1 %v2850_v41  ;;  %v2918_v41 = vld [vmem:[%s3004_s28 + $0x1e4] ss:$12 sps:$4 sm:$0xff]  }
  0x61   : > { %2678 = vmatprep.subr.bf16.mxu1 %v2857_v42 }
  0x64   : > { %2679 = vmatpush3.bf16.msra.mxu1 %v2857_v42  ;;  %v2920_v42 = vld [vmem:[%s3004_s28 + $0x248] ss:$12 sps:$4 sm:$0xff]  }
  0x66   : > { %1080 = vmatmul.mubr.bf16.gmra.mrb[16].mxu0 %v2834_v43  ;;  %1272 = vmatmul.mubr.bf16.gmra.mrb[16].mxu1 %v2835_v44  ;;  %v2921_v43 = vld [vmem:[%s3004_s28 + $0x1e0] ss:$12 sps:$4 sm:$0xff]  }
  0x67   : > { %1087 = vmatprep.mubr.bf16.mxu0 %v2837_v45  ;;  %1279 = vmatprep.mubr.bf16.mxu1 %v2839_v46  ;;  %v2922_v44 = vld [vmem:[%s3004_s28 + $0x260] ss:$12 sps:$4 sm:$0xff]   ;;  %v2923_v45 = vld [vmem:[%s3004_s28 + $0x1fc] ss:$12 sps:$4 sm:$0xff]   ;;  %v2925_v46 = vld [vmem:[%s3004_s28 + $0x278] ss:$12 sps:$4 sm:$0xff]  }
  0x6e   : > { %1088 = vmatmul.mubr.bf16.gmra.mrb[20].mxu0 %v2841_v47  ;;  %1280 = vmatmul.mubr.bf16.gmra.mrb[20].mxu1 %v2842_v48  ;;  %v2926_v47 = vld [vmem:[%s3004_s28 + $0x1f8] ss:$12 sps:$4 sm:$0xff]   ;;  %v2927_v48 = vld [vmem:[%s3004_s28 + $0x290] ss:$12 sps:$4 sm:$0xff]  }
  0x6f   : > { %1095 = vmatprep.mubr.bf16.mxu0 %v2844_v49  ;;  %1287 = vmatprep.mubr.bf16.mxu1 %v2846_v50  ;;  %v2928_v49 = vld [vmem:[%s3004_s28 + $0x214] ss:$12 sps:$4 sm:$0xff]  }
  0x70   : > { %v2930_v50 = vld [vmem:[%s3004_s28 + $0x2a8] ss:$12 sps:$4 sm:$0xff]  }
  0x76   : > { %1096 = vmatmul.mubr.bf16.gmra.mrb[24].mxu0 %v2848_v51  ;;  %1288 = vmatmul.mubr.bf16.gmra.mrb[24].mxu1 %v2849_v52  ;;  %v2931_v51 = vld [vmem:[%s3004_s28 + $0x210] ss:$12 sps:$4 sm:$0xff]   ;;  %v2932_v52 = vld [vmem:[%s3004_s28 + $0x2c0] ss:$12 sps:$4 sm:$0xff]  }
  0x77   : > { %1103 = vmatprep.mubr.bf16.mxu0 %v2851_v53  ;;  %1295 = vmatprep.mubr.bf16.mxu1 %v2853_v54  ;;  %v2933_v53 = vld [vmem:[%s3004_s28 + $0x22c] ss:$12 sps:$4 sm:$0xff]  }
  0x78   : > { %v2935_v54 = vld [vmem:[%s3004_s28 + $0x2d8] ss:$12 sps:$4 sm:$0xff]  }
  0x7e   : > { %1104 = vmatmul.mubr.bf16.gmra.mrb[28].mxu0 %v2855_v55  ;;  %1296 = vmatmul.mubr.bf16.gmra.mrb[28].mxu1 %v2856_v56  ;;  %v2936_v55 = vld [vmem:[%s3004_s28 + $0x228] ss:$12 sps:$4 sm:$0xff]   ;;  %v2937_v56 = vld [vmem:[%s3004_s28 + $0x2f0] ss:$12 sps:$4 sm:$0xff]  }
  0x7f   : > { %1111 = vmatprep.mubr.bf16.mxu0 %v2858_v57  ;;  %2680 = vmatprep.mubr.bf16.mxu1 %v2860_v58 }
  0x86   : > { %1112 = vmatmul.mubr.bf16.gmra.mrb[32].mxu0 %v2861_v59  ;;  %2681 = vmatmul.mubr.bf16.vlgmr.msra.gmra.mrb[32].mxu1 %v2862_v60 }
  0x87   : > { %1119 = vmatprep.mubr.bf16.mxu0 %v2863_v61  ;;  %2684 = vmatprep.mubr.bf16.mxu1 %v2865_v62 }
  0x8e   : > { %1120 = vmatmul.mubr.bf16.gmra.mrb[36].mxu0 %v2866_v63  ;;  %2685 = vmatmul.mubr.bf16.gmra.mrb[36].mxu1 %v2867_v0 }
  0x8f   : > { %1127 = vmatprep.mubr.bf16.mxu0 %v2868_v1  ;;  %2688 = vmatprep.mubr.bf16.mxu1 %v2870_v2 }
  0x96   : > { %1128 = vmatmul.mubr.bf16.gmra.mrb[40].mxu0 %v2871_v3  ;;  %2689 = vmatmul.mubr.bf16.gmra.mrb[40].mxu1 %v2872_v4 }
  0x97   : > { %1135 = vmatprep.mubr.bf16.mxu0 %v2873_v5  ;;  %2692 = vmatprep.mubr.bf16.mxu1 %v2875_v6 }
  0x9e   : > { %1136 = vmatmul.mubr.bf16.gmra.mrb[44].mxu0 %v2876_v7  ;;  %2693 = vmatmul.mubr.bf16.gmra.mrb[44].mxu1 %v2877_v8 }
  0x9f   : > { %1143 = vmatprep.mubr.bf16.mxu0 %v2878_v9  ;;  %2696 = vmatprep.mubr.bf16.mxu1 %v2880_v10 }
  0xa6   : > { %1144 = vmatmul.mubr.bf16.gmra.mrb[48].mxu0 %v2881_v11  ;;  %2697 = vmatmul.mubr.bf16.gmra.mrb[48].mxu1 %v2882_v12 }
  0xa7   : > { %1151 = vmatprep.mubr.bf16.mxu0 %v2883_v13  ;;  %2700 = vmatprep.mubr.bf16.mxu1 %v2885_v14 }
  0xae   : > { %1152 = vmatmul.mubr.bf16.gmra.mrb[52].mxu0 %v2886_v15  ;;  %2701 = vmatmul.mubr.bf16.gmra.mrb[52].mxu1 %v2887_v16 }
  0xaf   : > { %1159 = vmatprep.mubr.bf16.mxu0 %v2888_v17  ;;  %2704 = vmatprep.mubr.bf16.mxu1 %v2890_v18 }
  0xb6   : > { %1160 = vmatmul.mubr.bf16.gmra.mrb[56].mxu0 %v2891_v19  ;;  %2705 = vmatmul.mubr.bf16.gmra.mrb[56].mxu1 %v2892_v20 }
  0xb7   : > { %1167 = vmatprep.mubr.bf16.mxu0 %v2893_v21  ;;  %2708 = vmatprep.mubr.bf16.mxu1 %v2895_v22 }
  0xbe   : > { %1168 = vmatmul.mubr.bf16.gmra.mrb[60].mxu0 %v2896_v23  ;;  %2709 = vmatmul.mubr.bf16.gmra.mrb[60].mxu1 %v2897_v24 }
  0xbf   : > { %1175 = vmatprep.mubr.bf16.mxu0 %v2898_v25  ;;  %2712 = vmatprep.mubr.bf16.mxu1 %v2900_v26 }
  0xc6   : > { %1176 = vmatmul.mubr.bf16.gmra.mrb[64].mxu0 %v2901_v27  ;;  %2713 = vmatmul.mubr.bf16.gmra.mrb[64].mxu1 %v2902_v28 }
  0xc7   : > { %1183 = vmatprep.mubr.bf16.mxu0 %v2903_v29  ;;  %2716 = vmatprep.mubr.bf16.mxu1 %v2905_v30 }
  0xce   : > { %1184 = vmatmul.mubr.bf16.gmra.mrb[68].mxu0 %v2906_v31  ;;  %2717 = vmatmul.mubr.bf16.gmra.mrb[68].mxu1 %v2907_v32 }
  0xcf   : > { %1191 = vmatprep.mubr.bf16.mxu0 %v2908_v33  ;;  %2720 = vmatprep.mubr.bf16.mxu1 %v2910_v34 }
  0xd6   : > { %1192 = vmatmul.mubr.bf16.gmra.mrb[72].mxu0 %v2911_v35  ;;  %2721 = vmatmul.mubr.bf16.gmra.mrb[72].mxu1 %v2912_v36 }
  0xd7   : > { %1199 = vmatprep.mubr.bf16.mxu0 %v2913_v37  ;;  %2724 = vmatprep.mubr.bf16.mxu1 %v2915_v38 }
  0xde   : > { %1200 = vmatmul.mubr.bf16.gmra.mrb[76].mxu0 %v2916_v39  ;;  %2725 = vmatmul.mubr.bf16.gmra.mrb[76].mxu1 %v2917_v40 }
  0xdf   : > { %1207 = vmatprep.mubr.bf16.mxu0 %v2918_v41  ;;  %2728 = vmatprep.mubr.bf16.mxu1 %v2920_v42 }
  0xe6   : > { %1208 = vmatmul.mubr.bf16.gmra.mrb[80].mxu0 %v2921_v43  ;;  %2729 = vmatmul.mubr.bf16.gmra.mrb[80].mxu1 %v2922_v44 }
  0xe7   : > { %1215 = vmatprep.mubr.bf16.mxu0 %v2923_v45  ;;  %2732 = vmatprep.mubr.bf16.mxu1 %v2925_v46 }
  0xee   : > { %1216 = vmatmul.mubr.bf16.gmra.mrb[84].mxu0 %v2926_v47  ;;  %2733 = vmatmul.mubr.bf16.gmra.mrb[84].mxu1 %v2927_v48 }
  0xef   : > { %1223 = vmatprep.mubr.bf16.mxu0 %v2928_v49  ;;  %2736 = vmatprep.mubr.bf16.mxu1 %v2930_v50 }
  0xf6   : > { %1224 = vmatmul.mubr.bf16.gmra.mrb[88].mxu0 %v2931_v51  ;;  %2737 = vmatmul.mubr.bf16.gmra.mrb[88].mxu1 %v2932_v52 }
  0xf7   : > { %1231 = vmatprep.mubr.bf16.mxu0 %v2933_v53  ;;  %2740 = vmatprep.mubr.bf16.mxu1 %v2935_v54 }
  0xfe   : > { %1232 = vmatmul.mubr.bf16.gmra.mrb[92].mxu0 %v2936_v55  ;;  %2741 = vmatmul.mubr.bf16.gmra.mrb[92].mxu1 %v2937_v56 }
 0x119   : > { %v3183_v57 = vpop.f32.mrb[0].mxu0  ;;  %v3185_v58 = vpop.f32.mrb[0].mxu1 }
 0x11a   : > { %v1051_v59 = vpop.f32.mrb[1].mxu0  ;;  %v1243_v60 = vpop.f32.mrb[1].mxu1 }
 0x11b   : > { %v3187_v61 = vpop.f32.mrb[2].mxu0  ;;  %v3189_v62 = vpop.f32.mrb[2].mxu1  ;;  %v3246_v59 = vld [vmem:[%s3559_s2] ss:$0 sm:$0xff] }
 0x11c   : > { %v1054_v63 = vpop.f32.mrb[3].mxu0  ;;  %v1246_v0 = vpop.f32.mrb[3].mxu1 }
 0x11d   : > { %v1050_v63 = vadd.f32 %v3246_v59, %v3183_v57 }
 0x121   : > { %v1057_v1 = vpop.f32.mrb[4].mxu0  ;;  %v3191_v2 = vpop.f32.mrb[4].mxu1 }
 0x122   : > { %v1059_v3 = vpop.f32.mrb[5].mxu0  ;;  %v1251_v4 = vpop.f32.mrb[5].mxu1  ;;  %v1058_v60 = vadd.f32 %v3246_v59, %v1057_v1 }
 0x123   : > { %v1060_v5 = vpop.f32.mrb[6].mxu0  ;;  %v3193_v6 = vpop.f32.mrb[6].mxu1 }
 0x124   : > { %v1062_v7 = vpop.f32.mrb[7].mxu0  ;;  %v1254_v8 = vpop.f32.mrb[7].mxu1  ;;  %v1061_v4 = vadd.f32 %v3246_v59, %v1060_v5 }
 0x129   : > { %v3195_v9 = vpop.f32.mrb[8].mxu0  ;;  %v3197_v10 = vpop.f32.mrb[8].mxu1 }
 0x12a   : > { %v1067_v11 = vpop.f32.mrb[9].mxu0  ;;  %v1259_v12 = vpop.f32.mrb[9].mxu1 }
 0x12b   : > { %v3199_v13 = vpop.f32.mrb[10].mxu0  ;;  %v3201_v14 = vpop.f32.mrb[10].mxu1  ;;  %v1053_v12 = vadd.f32 %v3246_v59, %v3187_v61  ;;  %v3267_v61 = vld [vmem:[%s3559_s2 + $0x2] ss:$0 sm:$0xff] }
 0x12c   : > { %v1070_v15 = vpop.f32.mrb[11].mxu0  ;;  %v1262_v16 = vpop.f32.mrb[11].mxu1 }
 0x12d   : > { %v3259_v15 = vld [vmem:[%s3559_s2 + $0x1] ss:$0 sm:$0xff] }
 0x131   : > { %v3203_v17 = vpop.f32.mrb[12].mxu0  ;;  %v3205_v18 = vpop.f32.mrb[12].mxu1 }
 0x132   : > { %v1075_v19 = vpop.f32.mrb[13].mxu0  ;;  %v1267_v20 = vpop.f32.mrb[13].mxu1 }
 0x133   : > { %v3207_v21 = vpop.f32.mrb[14].mxu0  ;;  %v3209_v22 = vpop.f32.mrb[14].mxu1 }
 0x134   : > { %v1078_v23 = vpop.f32.mrb[15].mxu0  ;;  %v1270_v24 = vpop.f32.mrb[15].mxu1 }
 0x139   : > { %v3211_v25 = vpop.f32.mrb[16].mxu0  ;;  %v3213_v26 = vpop.f32.mrb[16].mxu1 }
 0x13a   : > { %v1083_v27 = vpop.f32.mrb[17].mxu0  ;;  %v1275_v28 = vpop.f32.mrb[17].mxu1 }
 0x13b   : > { %v3215_v29 = vpop.f32.mrb[18].mxu0  ;;  %v3217_v30 = vpop.f32.mrb[18].mxu1 }
 0x13c   : > { %v1086_v31 = vpop.f32.mrb[19].mxu0  ;;  %v1278_v32 = vpop.f32.mrb[19].mxu1 }
 0x141   : > { %v3219_v33 = vpop.f32.mrb[20].mxu0  ;;  %v3221_v34 = vpop.f32.mrb[20].mxu1 }
 0x142   : > { %v1091_v35 = vpop.f32.mrb[21].mxu0  ;;  %v1283_v36 = vpop.f32.mrb[21].mxu1 }
 0x143   : > { %v3223_v37 = vpop.f32.mrb[22].mxu0  ;;  %v3225_v38 = vpop.f32.mrb[22].mxu1  ;;  %v1074_v36 = vadd.f32 %v3246_v59, %v3203_v17 }
 0x144   : > { %v1094_v39 = vpop.f32.mrb[23].mxu0  ;;  %v1286_v40 = vpop.f32.mrb[23].mxu1 }
 0x145   : > { %v1066_v40 = vadd.f32 %v3246_v59, %v3195_v9 }
 0x149   : > { %v3227_v41 = vpop.f32.mrb[24].mxu0  ;;  %v3229_v42 = vpop.f32.mrb[24].mxu1 }
 0x14a   : > { %v1099_v43 = vpop.f32.mrb[25].mxu0  ;;  %v1291_v44 = vpop.f32.mrb[25].mxu1 }
 0x14b   : > { %v3231_v45 = vpop.f32.mrb[26].mxu0  ;;  %v3233_v46 = vpop.f32.mrb[26].mxu1 }
 0x14c   : > { %v1102_v47 = vpop.f32.mrb[27].mxu0  ;;  %v1294_v48 = vpop.f32.mrb[27].mxu1 }
 0x14d   : > { %v1077_v48 = vadd.f32 %v3246_v59, %v3207_v21 }
 0x151   : > { %v3235_v49 = vpop.f32.mrb[28].mxu0  ;;  %v3237_v50 = vpop.f32.mrb[28].mxu1 }
 0x152   : > { %v1107_v51 = vpop.f32.mrb[29].mxu0  ;;  %v1299_v52 = vpop.f32.mrb[29].mxu1 }
 0x153   : > { %v3239_v53 = vpop.f32.mrb[30].mxu0  ;;  %v3241_v54 = vpop.f32.mrb[30].mxu1 }
 0x154   : > { %v1110_v55 = vpop.f32.mrb[31].mxu0  ;;  %v1302_v56 = vpop.f32.mrb[31].mxu1 }
 0x159   : > { %v3251_v0 = vpop.f32.mrb[32].mxu0  ;;  %v2682_v3 = vpop.f32.mrb[32].mxu1 }
 0x15a   : > { %v1347_v7 = vadd.f32 %v2682_v3, %v1058_v60  ;;  %v1115_v8 = vpop.f32.mrb[33].mxu0  ;;  %v1338_v11 = vpop.f32.mrb[33].mxu1  ;;  %v1069_v60 = vadd.f32 %v3246_v59, %v3199_v13 }
 0x15b   : > { %v1339_v1 = vadd.f32 %v1338_v11, %v1050_v63  ;;  %v3261_v16 = vpop.f32.mrb[34].mxu0  ;;  %v2683_v57 = vpop.f32.mrb[34].mxu1 }
 0x15c   : > { %v1595_v19 = vmax.f32 %v1347_v7, 0.0  ;;  %v1350_v20 = vadd.f32 %v2683_v57, %v1061_v4  ;;  %v1118_v23 = vpop.f32.mrb[35].mxu0  ;;  %v1341_v5 = vpop.f32.mrb[35].mxu1 }
 0x15d   : > { %v1593_v24 = vmax.f32 %v1339_v1, 0.0  ;;  %v1342_v27 = vadd.f32 %v1341_v5, %v1053_v12 }
 0x15e   : > { %v1664_v28 = vmul.f32 %v3259_v15, %v1595_v19  ;;  %v1596_v31 = vmax.f32 %v1350_v20, 0.0 }
 0x15f   : > { %v1662_v32 = vmul.f32 %v3259_v15, %v1593_v24  ;;  %v1594_v35 = vmax.f32 %v1342_v27, 0.0  ;;  %v1090_v27 = vadd.f32 %v3246_v59, %v3219_v33 }
 0x160   : > { %v1665_v39 = vmul.f32 %v3259_v15, %v1596_v31  ;;  %v1733_v51 = vadd.f32 %v3267_v61, %v1664_v28  ;;  %v1082_v31 = vadd.f32 %v3246_v59, %v3211_v25 }
 0x161   : > { %v1663_v43 = vmul.f32 %v3259_v15, %v1594_v35  ;;  %v3277_v44 = vpop.f32.mrb[36].mxu0  ;;  %v2686_v47 = vpop.f32.mrb[36].mxu1  ;;  %v1731_v9 = vadd.f32 %v3267_v61, %v1662_v32 }
 0x162   : > { %v1734_v52 = vadd.f32 %v3267_v61, %v1665_v39  ;;  %v1363_v55 = vadd.f32 %v2686_v47, %v1074_v36  ;;  %v1123_v17 = vpop.f32.mrb[37].mxu0  ;;  %v1354_v56 = vpop.f32.mrb[37].mxu1  ;;  %v1093_v39 = vadd.f32 %v3246_v59, %v3223_v37 }
 0x163   : > { %v1732_v21 = vadd.f32 %v3267_v61, %v1663_v43  ;;  %v1355_v63 = vadd.f32 %v1354_v56, %v1066_v40  ;;  %v3292_v3 = vpop.f32.mrb[38].mxu0  ;;  %v2687_v4 = vpop.f32.mrb[38].mxu1 }
 0x164   : > { %v2441_v7 = vpack.c.bf16 %v1734_v52, %v1733_v51  ;;  %v1599_v8 = vmax.f32 %v1363_v55, 0.0  ;;  %v1366_v11 = vadd.f32 %v2687_v4, %v1077_v48  ;;  %v1126_v12 = vpop.f32.mrb[39].mxu0  ;;  %v1357_v13 = vpop.f32.mrb[39].mxu1  ;;  %v1085_v51 = vadd.f32 %v3246_v59, %v3215_v29 }
 0x165   : > { %v2436_v1 = vpack.c.bf16 %v1732_v21, %v1731_v9  ;;  %v1597_v57 = vmax.f32 %v1355_v63, 0.0  ;;  %v1358_v19 = vadd.f32 %v1357_v13, %v1069_v60 }
 0x166   : > { %2593 = vst [vmem:[%s3289_s25 + $0x8] sm:$0xff] %v2441_v7   ;;  %v1668_v20 = vmul.f32 %v3259_v15, %v1599_v8  ;;  %v1600_v23 = vmax.f32 %v1366_v11, 0.0 }
 0x167   : > { %2437 = vst [vmem:[%s3289_s25] sm:$0xff] %v2436_v1   ;;  %v1666_v5 = vmul.f32 %v3259_v15, %v1597_v57  ;;  %v1598_v24 = vmax.f32 %v1358_v19, 0.0  ;;  %v1106_v1 = vadd.f32 %v3246_v59, %v3235_v49  ;;  %v1098_v19 = vadd.f32 %v3246_v59, %v3227_v41 }
 0x168   : > { %v1669_v28 = vmul.f32 %v3259_v15, %v1600_v23  ;;  %v1737_v40 = vadd.f32 %v3267_v61, %v1668_v20 }
 0x169   : > { %v1667_v32 = vmul.f32 %v3259_v15, %v1598_v24  ;;  %v3304_v35 = vpop.f32.mrb[40].mxu0  ;;  %v2690_v36 = vpop.f32.mrb[40].mxu1  ;;  %v1735_v25 = vadd.f32 %v3267_v61, %v1666_v5  ;;  %v1109_v24 = vadd.f32 %v3246_v59, %v3239_v53 }
 0x16a   : > { %v1738_v43 = vadd.f32 %v3267_v61, %v1669_v28  ;;  %v1379_v47 = vadd.f32 %v2690_v36, %v1090_v27  ;;  %v1131_v48 = vpop.f32.mrb[41].mxu0  ;;  %v1370_v33 = vpop.f32.mrb[41].mxu1  ;;  %v1101_v36 = vadd.f32 %v3246_v59, %v3231_v45 }
 0x16b   : > { %v1736_v52 = vadd.f32 %v3267_v61, %v1667_v32  ;;  %v1371_v55 = vadd.f32 %v1370_v33, %v1082_v31  ;;  %v3314_v17 = vpop.f32.mrb[42].mxu0  ;;  %v2691_v37 = vpop.f32.mrb[42].mxu1 }
 0x16c   : > { %v2451_v56 = vpack.c.bf16 %v1738_v43, %v1737_v40  ;;  %v1603_v60 = vmax.f32 %v1379_v47, 0.0  ;;  %v1382_v9 = vadd.f32 %v2691_v37, %v1093_v39  ;;  %v1134_v21 = vpop.f32.mrb[43].mxu0  ;;  %v1373_v63 = vpop.f32.mrb[43].mxu1 }
 0x16d   : > { %v2446_v4 = vpack.c.bf16 %v1736_v52, %v1735_v25  ;;  %v1601_v7 = vmax.f32 %v1371_v55, 0.0  ;;  %v1374_v8 = vadd.f32 %v1373_v63, %v1085_v51  ;;  %v1122_v21 = vadd.f32 %v3246_v59, %v3277_v44 }
 0x16e   : > { %2595 = vst [vmem:[%s3289_s25 + $0x18] sm:$0xff] %v2451_v56   ;;  %v1672_v29 = vmul.f32 %v3259_v15, %v1603_v60  ;;  %v1604_v11 = vmax.f32 %v1382_v9, 0.0 }
 0x16f   : > { %2594 = vst [vmem:[%s3289_s25 + $0x10] sm:$0xff] %v2446_v4   ;;  %v1670_v12 = vmul.f32 %v3259_v15, %v1601_v7  ;;  %v1602_v13 = vmax.f32 %v1374_v8, 0.0  ;;  %v1114_v4 = vadd.f32 %v3246_v59, %v3251_v0 }
 0x170   : > { %v1673_v57 = vmul.f32 %v3259_v15, %v1604_v11  ;;  %v1741_v27 = vadd.f32 %v3267_v61, %v1672_v29  ;;  %v1125_v11 = vadd.f32 %v3246_v59, %v3292_v3 }
 0x171   : > { %v1671_v20 = vmul.f32 %v3259_v15, %v1602_v13  ;;  %v1137_v23 = vpop.f32.mrb[44].mxu0  ;;  %v2694_v5 = vpop.f32.mrb[44].mxu1  ;;  %v1739_v41 = vadd.f32 %v3267_v61, %v1670_v12 }
 0x172   : > { %v1742_v28 = vadd.f32 %v3267_v61, %v1673_v57  ;;  %v1395_v31 = vadd.f32 %v2694_v5, %v1106_v1  ;;  %v1139_v32 = vpop.f32.mrb[45].mxu0  ;;  %v1386_v49 = vpop.f32.mrb[45].mxu1 }
 0x173   : > { %v1740_v39 = vadd.f32 %v3267_v61, %v1671_v20  ;;  %v1387_v40 = vadd.f32 %v1386_v49, %v1098_v19  ;;  %v1140_v43 = vpop.f32.mrb[46].mxu0  ;;  %v2695_v47 = vpop.f32.mrb[46].mxu1  ;;  %v1117_v19 = vadd.f32 %v3246_v59, %v3261_v16 }
 0x174   : > { %v2461_v53 = vpack.c.bf16 %v1742_v28, %v1741_v27  ;;  %v1607_v48 = vmax.f32 %v1395_v31, 0.0  ;;  %v1398_v33 = vadd.f32 %v2695_v47, %v1109_v24  ;;  %v1142_v51 = vpop.f32.mrb[47].mxu0  ;;  %v1389_v25 = vpop.f32.mrb[47].mxu1 }
 0x175   : > { %v2456_v52 = vpack.c.bf16 %v1740_v39, %v1739_v41  ;;  %v1605_v55 = vmax.f32 %v1387_v40, 0.0  ;;  %v1390_v37 = vadd.f32 %v1389_v25, %v1101_v36  ;;  %v1130_v51 = vadd.f32 %v3246_v59, %v3304_v35 }
 0x176   : > { %2597 = vst [vmem:[%s3289_s25 + $0x28] sm:$0xff] %v2461_v53   ;;  %v1676_v56 = vmul.f32 %v3259_v15, %v1607_v48  ;;  %v1608_v45 = vmax.f32 %v1398_v33, 0.0  ;;  %v1138_v48 = vadd.f32 %v3246_v59, %v1137_v23  ;;  %v1133_v23 = vadd.f32 %v3246_v59, %v3314_v17 }
 0x177   : > { %2596 = vst [vmem:[%s3289_s25 + $0x20] sm:$0xff] %v2456_v52   ;;  %v1674_v60 = vmul.f32 %v3259_v15, %v1605_v55  ;;  %v1606_v9 = vmax.f32 %v1390_v37, 0.0  ;;  %v1141_v37 = vadd.f32 %v3246_v59, %v1140_v43 }
 0x178   : > { %v1677_v63 = vmul.f32 %v3259_v15, %v1608_v45  ;;  %v1745_v12 = vadd.f32 %v3267_v61, %v1676_v56 }
 0x179   : > { %v1675_v7 = vmul.f32 %v3259_v15, %v1606_v9  ;;  %v1145_v8 = vpop.f32.mrb[48].mxu0  ;;  %v2698_v29 = vpop.f32.mrb[48].mxu1  ;;  %v1743_v0 = vadd.f32 %v3267_v61, %v1674_v60 }
 0x17a   : > { %v1746_v13 = vadd.f32 %v3267_v61, %v1677_v63  ;;  %v1411_v1 = vadd.f32 %v2698_v29, %v1122_v21  ;;  %v1147_v57 = vpop.f32.mrb[49].mxu0  ;;  %v1402_v44 = vpop.f32.mrb[49].mxu1 }
 0x17b   : > { %v1744_v20 = vadd.f32 %v3267_v61, %v1675_v7  ;;  %v1403_v5 = vadd.f32 %v1402_v44, %v1114_v4  ;;  %v1148_v24 = vpop.f32.mrb[50].mxu0  ;;  %v2699_v27 = vpop.f32.mrb[50].mxu1 }
 0x17c   : > { %v2471_v3 = vpack.c.bf16 %v1746_v13, %v1745_v12  ;;  %v1611_v28 = vmax.f32 %v1411_v1, 0.0  ;;  %v1414_v31 = vadd.f32 %v2699_v27, %v1125_v11  ;;  %v1150_v32 = vpop.f32.mrb[51].mxu0  ;;  %v1405_v49 = vpop.f32.mrb[51].mxu1 }
 0x17d   : > { %v2466_v36 = vpack.c.bf16 %v1744_v20, %v1743_v0  ;;  %v1609_v41 = vmax.f32 %v1403_v5, 0.0  ;;  %v1406_v39 = vadd.f32 %v1405_v49, %v1117_v19 }
 0x17e   : > { %2599 = vst [vmem:[%s3289_s25 + $0x38] sm:$0xff] %v2471_v3   ;;  %v1680_v40 = vmul.f32 %v3259_v15, %v1611_v28  ;;  %v1612_v16 = vmax.f32 %v1414_v31, 0.0  ;;  %v1146_v28 = vadd.f32 %v3246_v59, %v1145_v8 }
 0x17f   : > { %2598 = vst [vmem:[%s3289_s25 + $0x30] sm:$0xff] %v2466_v36   ;;  %v1678_v47 = vmul.f32 %v3259_v15, %v1609_v41  ;;  %v1610_v53 = vmax.f32 %v1406_v39, 0.0 }
 0x180   : > { %v1681_v33 = vmul.f32 %v3259_v15, %v1612_v16  ;;  %v1749_v56 = vadd.f32 %v3267_v61, %v1680_v40 }
 0x181   : > { %v1679_v25 = vmul.f32 %v3259_v15, %v1610_v53  ;;  %v1153_v52 = vpop.f32.mrb[52].mxu0  ;;  %v2702_v55 = vpop.f32.mrb[52].mxu1  ;;  %v1747_v63 = vadd.f32 %v3267_v61, %v1678_v47  ;;  %v1149_v53 = vadd.f32 %v3246_v59, %v1148_v24 }
 0x182   : > { %v1750_v45 = vadd.f32 %v3267_v61, %v1681_v33  ;;  %v1427_v60 = vadd.f32 %v2702_v55, %v1138_v48  ;;  %v1155_v9 = vpop.f32.mrb[53].mxu0  ;;  %v1418_v21 = vpop.f32.mrb[53].mxu1  ;;  %v1154_v27 = vadd.f32 %v3246_v59, %v1153_v52 }
 0x183   : > { %v1748_v35 = vadd.f32 %v3267_v61, %v1679_v25  ;;  %v1419_v4 = vadd.f32 %v1418_v21, %v1130_v51  ;;  %v1156_v7 = vpop.f32.mrb[54].mxu0  ;;  %v2703_v29 = vpop.f32.mrb[54].mxu1 }
 0x184   : > { %v2481_v43 = vpack.c.bf16 %v1750_v45, %v1749_v56  ;;  %v1615_v11 = vmax.f32 %v1427_v60, 0.0  ;;  %v1430_v12 = vadd.f32 %v2703_v29, %v1141_v37  ;;  %v1158_v13 = vpop.f32.mrb[55].mxu0  ;;  %v1421_v1 = vpop.f32.mrb[55].mxu1  ;;  %v1157_v41 = vadd.f32 %v3246_v59, %v1156_v7 }
 0x185   : > { %v2476_v57 = vpack.c.bf16 %v1748_v35, %v1747_v63  ;;  %v1613_v44 = vmax.f32 %v1419_v4, 0.0  ;;  %v1422_v19 = vadd.f32 %v1421_v1, %v1133_v23 }
 0x186   : > { %2601 = vst [vmem:[%s3289_s25 + $0x48] sm:$0xff] %v2481_v43   ;;  %v1684_v0 = vmul.f32 %v3259_v15, %v1615_v11  ;;  %v1616_v17 = vmax.f32 %v1430_v12, 0.0 }
 0x187   : > { %2600 = vst [vmem:[%s3289_s25 + $0x40] sm:$0xff] %v2476_v57   ;;  %v1682_v20 = vmul.f32 %v3259_v15, %v1613_v44  ;;  %v1614_v5 = vmax.f32 %v1422_v19, 0.0 }
 0x188   : > { %v1685_v3 = vmul.f32 %v3259_v15, %v1616_v17  ;;  %v1753_v36 = vadd.f32 %v3267_v61, %v1684_v0 }
 0x189   : > { %v1683_v31 = vmul.f32 %v3259_v15, %v1614_v5  ;;  %v1161_v32 = vpop.f32.mrb[56].mxu0  ;;  %v2706_v49 = vpop.f32.mrb[56].mxu1  ;;  %v1751_v48 = vadd.f32 %v3267_v61, %v1682_v20 }
 0x18a   : > { %v1754_v39 = vadd.f32 %v3267_v61, %v1685_v3  ;;  %v1443_v40 = vadd.f32 %v2706_v49, %v1154_v27  ;;  %v1163_v16 = vpop.f32.mrb[57].mxu0  ;;  %v1434_v47 = vpop.f32.mrb[57].mxu1  ;;  %v1162_v7 = vadd.f32 %v3246_v59, %v1161_v32 }
 0x18b   : > { %v1752_v8 = vadd.f32 %v3267_v61, %v1683_v31  ;;  %v1435_v33 = vadd.f32 %v1434_v47, %v1146_v28  ;;  %v1164_v51 = vpop.f32.mrb[58].mxu0  ;;  %v2707_v25 = vpop.f32.mrb[58].mxu1 }
 0x18c   : > { %v2491_v52 = vpack.c.bf16 %v1754_v39, %v1753_v36  ;;  %v1619_v55 = vmax.f32 %v1443_v40, 0.0  ;;  %v1446_v37 = vadd.f32 %v2707_v25, %v1157_v41  ;;  %v1166_v56 = vpop.f32.mrb[59].mxu0  ;;  %v1437_v45 = vpop.f32.mrb[59].mxu1  ;;  %v1165_v0 = vadd.f32 %v3246_v59, %v1164_v51 }
 0x18d   : > { %v2486_v60 = vpack.c.bf16 %v1752_v8, %v1751_v48  ;;  %v1617_v9 = vmax.f32 %v1435_v33, 0.0  ;;  %v1438_v21 = vadd.f32 %v1437_v45, %v1149_v53 }
 0x18e   : > { %2603 = vst [vmem:[%s3289_s25 + $0x58] sm:$0xff] %v2491_v52   ;;  %v1688_v23 = vmul.f32 %v3259_v15, %v1619_v55  ;;  %v1620_v24 = vmax.f32 %v1446_v37, 0.0 }
 0x18f   : > { %2602 = vst [vmem:[%s3289_s25 + $0x50] sm:$0xff] %v2486_v60   ;;  %v1686_v63 = vmul.f32 %v3259_v15, %v1617_v9  ;;  %v1618_v35 = vmax.f32 %v1438_v21, 0.0 }
 0x190   : > { %v1689_v4 = vmul.f32 %v3259_v15, %v1620_v24  ;;  %v1757_v12 = vadd.f32 %v3267_v61, %v1688_v23 }
 0x191   : > { %v1687_v29 = vmul.f32 %v3259_v15, %v1618_v35  ;;  %v1169_v43 = vpop.f32.mrb[60].mxu0  ;;  %v2710_v11 = vpop.f32.mrb[60].mxu1  ;;  %v1755_v19 = vadd.f32 %v3267_v61, %v1686_v63 }
 0x192   : > { %v1758_v13 = vadd.f32 %v3267_v61, %v1689_v4  ;;  %v1170_v1 = vadd.f32 %v3246_v59, %v1169_v43  ;;  %v1171_v57 = vpop.f32.mrb[61].mxu0  ;;  %v1450_v44 = vpop.f32.mrb[61].mxu1 }
 0x193   : > { %v1756_v17 = vadd.f32 %v3267_v61, %v1687_v29  ;;  %v1451_v20 = vadd.f32 %v1450_v44, %v1162_v7  ;;  %v1172_v5 = vpop.f32.mrb[62].mxu0  ;;  %v2711_v27 = vpop.f32.mrb[62].mxu1 }
 0x194   : > { %v2501_v3 = vpack.c.bf16 %v1758_v13, %v1757_v12  ;;  %v1459_v28 = vadd.f32 %v2710_v11, %v1170_v1  ;;  %v1173_v31 = vadd.f32 %v3246_v59, %v1172_v5  ;;  %v1174_v32 = vpop.f32.mrb[63].mxu0  ;;  %v1453_v49 = vpop.f32.mrb[63].mxu1 }
 0x195   : > { %v2496_v36 = vpack.c.bf16 %v1756_v17, %v1755_v19  ;;  %v1621_v41 = vmax.f32 %v1451_v20, 0.0  ;;  %v1454_v39 = vadd.f32 %v1453_v49, %v1165_v0 }
 0x196   : > { %2605 = vst [vmem:[%s3289_s25 + $0x68] sm:$0xff] %v2501_v3   ;;  %v1623_v40 = vmax.f32 %v1459_v28, 0.0  ;;  %v1462_v16 = vadd.f32 %v2711_v27, %v1173_v31 }
 0x197   : > { %2604 = vst [vmem:[%s3289_s25 + $0x60] sm:$0xff] %v2496_v36   ;;  %v1690_v47 = vmul.f32 %v3259_v15, %v1621_v41  ;;  %v1622_v53 = vmax.f32 %v1454_v39, 0.0 }
 0x198   : > { %v1692_v48 = vmul.f32 %v3259_v15, %v1623_v40  ;;  %v1624_v8 = vmax.f32 %v1462_v16, 0.0 }
 0x199   : > { %v1691_v33 = vmul.f32 %v3259_v15, %v1622_v53  ;;  %v1177_v51 = vpop.f32.mrb[64].mxu0  ;;  %v2714_v25 = vpop.f32.mrb[64].mxu1  ;;  %v1759_v45 = vadd.f32 %v3267_v61, %v1690_v47 }
 0x19a   : > { %v1693_v52 = vmul.f32 %v3259_v15, %v1624_v8  ;;  %v1178_v55 = vadd.f32 %v3246_v59, %v1177_v51  ;;  %v1179_v37 = vpop.f32.mrb[65].mxu0  ;;  %v1466_v56 = vpop.f32.mrb[65].mxu1  ;;  %v1761_v23 = vadd.f32 %v3267_v61, %v1692_v48 }
 0x19b   : > { %v1760_v60 = vadd.f32 %v3267_v61, %v1691_v33  ;;  %v1180_v9 = vpop.f32.mrb[66].mxu0  ;;  %v2715_v21 = vpop.f32.mrb[66].mxu1 }
 0x19c   : > { %v1762_v24 = vadd.f32 %v3267_v61, %v1693_v52  ;;  %v1467_v63 = vadd.f32 %v1466_v56, %v1178_v55  ;;  %v1181_v35 = vadd.f32 %v3246_v59, %v1180_v9  ;;  %v1182_v4 = vpop.f32.mrb[67].mxu0  ;;  %v1469_v7 = vpop.f32.mrb[67].mxu1 }
 0x19d   : > { %v2506_v29 = vpack.c.bf16 %v1760_v60, %v1759_v45 }
 0x19e   : > { %v2511_v43 = vpack.c.bf16 %v1762_v24, %v1761_v23  ;;  %v1625_v11 = vmax.f32 %v1467_v63, 0.0  ;;  %v1470_v12 = vadd.f32 %v1469_v7, %v1181_v35 }
 0x19f   : > { %2606 = vst [vmem:[%s3289_s25 + $0x70] sm:$0xff] %v2506_v29  }
 0x1a0   : > { %2607 = vst [vmem:[%s3289_s25 + $0x78] sm:$0xff] %v2511_v43   ;;  %v1694_v13 = vmul.f32 %v3259_v15, %v1625_v11  ;;  %v1626_v1 = vmax.f32 %v1470_v12, 0.0 }
 0x1a1   : > { %v1185_v57 = vpop.f32.mrb[68].mxu0  ;;  %v2718_v44 = vpop.f32.mrb[68].mxu1 }
 0x1a2   : > { %v1695_v19 = vmul.f32 %v3259_v15, %v1626_v1  ;;  %v1186_v0 = vadd.f32 %v3246_v59, %v1185_v57  ;;  %v1187_v17 = vpop.f32.mrb[69].mxu0  ;;  %v1482_v20 = vpop.f32.mrb[69].mxu1  ;;  %v1763_v3 = vadd.f32 %v3267_v61, %v1694_v13 }
 0x1a3   : > { %v1188_v5 = vpop.f32.mrb[70].mxu0  ;;  %v2719_v27 = vpop.f32.mrb[70].mxu1 }
 0x1a4   : > { %v1764_v28 = vadd.f32 %v3267_v61, %v1695_v19  ;;  %v1475_v31 = vadd.f32 %v2714_v25, %v1186_v0  ;;  %v1189_v32 = vadd.f32 %v3246_v59, %v1188_v5  ;;  %v1190_v49 = vpop.f32.mrb[71].mxu0  ;;  %v1485_v36 = vpop.f32.mrb[71].mxu1 }
 0x1a5   : > { %v1250_v49 = vadd.f32 %v3246_v59, %v3191_v2  ;;  %v1253_v2 = vadd.f32 %v3246_v59, %v3193_v6 }
 0x1a6   : > { %v2516_v41 = vpack.c.bf16 %v1764_v28, %v1763_v3  ;;  %v1627_v39 = vmax.f32 %v1475_v31, 0.0  ;;  %v1478_v40 = vadd.f32 %v2715_v21, %v1189_v32 }
 0x1a8   : > { %2608 = vst [vmem:[%s3289_s25 + $0x80] sm:$0xff] %v2516_v41   ;;  %v1696_v16 = vmul.f32 %v3259_v15, %v1627_v39  ;;  %v1628_v47 = vmax.f32 %v1478_v40, 0.0  ;;  %v1242_v39 = vadd.f32 %v3246_v59, %v3185_v58 }
 0x1a9   : > { %v1193_v53 = vpop.f32.mrb[72].mxu0  ;;  %v3418_v48 = vpop.f32.mrb[72].mxu1 }
 0x1aa   : > { %v1697_v8 = vmul.f32 %v3259_v15, %v1628_v47  ;;  %v1194_v33 = vadd.f32 %v3246_v59, %v1193_v53  ;;  %v1195_v51 = vpop.f32.mrb[73].mxu0  ;;  %v1498_v25 = vpop.f32.mrb[73].mxu1  ;;  %v1765_v37 = vadd.f32 %v3267_v61, %v1696_v16 }
 0x1ab   : > { %v1196_v52 = vpop.f32.mrb[74].mxu0  ;;  %v3422_v55 = vpop.f32.mrb[74].mxu1 }
 0x1ac   : > { %v1766_v56 = vadd.f32 %v3267_v61, %v1697_v8  ;;  %v1483_v45 = vadd.f32 %v1482_v20, %v1194_v33  ;;  %v1197_v60 = vadd.f32 %v3246_v59, %v1196_v52  ;;  %v1198_v9 = vpop.f32.mrb[75].mxu0  ;;  %v1501_v21 = vpop.f32.mrb[75].mxu1 }
 0x1ae   : > { %v2521_v23 = vpack.c.bf16 %v1766_v56, %v1765_v37  ;;  %v1629_v24 = vmax.f32 %v1483_v45, 0.0  ;;  %v1486_v63 = vadd.f32 %v1485_v36, %v1197_v60 }
 0x1b0   : > { %2609 = vst [vmem:[%s3289_s25 + $0x88] sm:$0xff] %v2521_v23   ;;  %v1698_v35 = vmul.f32 %v3259_v15, %v1629_v24  ;;  %v1630_v4 = vmax.f32 %v1486_v63, 0.0 }
 0x1b1   : > { %v1201_v7 = vpop.f32.mrb[76].mxu0  ;;  %v3429_v29 = vpop.f32.mrb[76].mxu1 }
 0x1b2   : > { %v1699_v43 = vmul.f32 %v3259_v15, %v1630_v4  ;;  %v1202_v11 = vadd.f32 %v3246_v59, %v1201_v7  ;;  %v1203_v12 = vpop.f32.mrb[77].mxu0  ;;  %v3433_v13 = vpop.f32.mrb[77].mxu1  ;;  %v1767_v19 = vadd.f32 %v3267_v61, %v1698_v35 }
 0x1b3   : > { %v1204_v1 = vpop.f32.mrb[78].mxu0  ;;  %v3435_v57 = vpop.f32.mrb[78].mxu1 }
 0x1b4   : > { %v1768_v0 = vadd.f32 %v3267_v61, %v1699_v43  ;;  %v1491_v17 = vadd.f32 %v2718_v44, %v1202_v11  ;;  %v1205_v20 = vadd.f32 %v3246_v59, %v1204_v1  ;;  %v1206_v5 = vpop.f32.mrb[79].mxu0  ;;  %v3440_v3 = vpop.f32.mrb[79].mxu1 }
 0x1b6   : > { %v2526_v28 = vpack.c.bf16 %v1768_v0, %v1767_v19  ;;  %v1631_v31 = vmax.f32 %v1491_v17, 0.0  ;;  %v1494_v32 = vadd.f32 %v2719_v27, %v1205_v20  ;;  %v1245_v27 = vadd.f32 %v3246_v59, %v3189_v62 }
 0x1b7   : > { %v1258_v62 = vadd.f32 %v3246_v59, %v3197_v10  ;;  %v1266_v0 = vadd.f32 %v3246_v59, %v3205_v18  ;;  %v1269_v10 = vadd.f32 %v3246_v59, %v3209_v22 }
 0x1b8   : > { %2610 = vst [vmem:[%s3289_s25 + $0x90] sm:$0xff] %v2526_v28   ;;  %v1700_v36 = vmul.f32 %v3259_v15, %v1631_v31  ;;  %v1632_v41 = vmax.f32 %v1494_v32, 0.0 }
 0x1b9   : > { %v1209_v40 = vpop.f32.mrb[80].mxu0  ;;  %v2730_v44 = vpop.f32.mrb[80].mxu1 }
 0x1ba   : > { %v1701_v16 = vmul.f32 %v3259_v15, %v1632_v41  ;;  %v1210_v47 = vadd.f32 %v3246_v59, %v1209_v40  ;;  %v1539_v53 = vadd.f32 %v2730_v44, %v1250_v49  ;;  %v1211_v8 = vpop.f32.mrb[81].mxu0  ;;  %v1530_v33 = vpop.f32.mrb[81].mxu1  ;;  %v1769_v51 = vadd.f32 %v3267_v61, %v1700_v36 }
 0x1bb   : > { %v1531_v52 = vadd.f32 %v1530_v33, %v1242_v39  ;;  %v1212_v37 = vpop.f32.mrb[82].mxu0  ;;  %v2731_v58 = vpop.f32.mrb[82].mxu1 }
 0x1bc   : > { %v1770_v56 = vadd.f32 %v3267_v61, %v1701_v16  ;;  %v1499_v45 = vadd.f32 %v1498_v25, %v1210_v47  ;;  %v1643_v60 = vmax.f32 %v1539_v53, 0.0  ;;  %v1213_v9 = vadd.f32 %v3246_v59, %v1212_v37  ;;  %v1214_v23 = vpop.f32.mrb[83].mxu0  ;;  %v1533_v24 = vpop.f32.mrb[83].mxu1 }
 0x1bd   : > { %v1641_v63 = vmax.f32 %v1531_v52, 0.0  ;;  %v1542_v35 = vadd.f32 %v2731_v58, %v1253_v2  ;;  %v1534_v6 = vadd.f32 %v1533_v24, %v1245_v27  ;;  %v1261_v25 = vadd.f32 %v3246_v59, %v3201_v14 }
 0x1be   : > { %v2531_v4 = vpack.c.bf16 %v1770_v56, %v1769_v51  ;;  %v1633_v7 = vmax.f32 %v1499_v45, 0.0  ;;  %v1712_v43 = vmul.f32 %v3259_v15, %v1643_v60  ;;  %v1502_v11 = vadd.f32 %v1501_v21, %v1213_v9 }
 0x1bf   : > { %v1710_v12 = vmul.f32 %v3259_v15, %v1641_v63  ;;  %v1644_v1 = vmax.f32 %v1542_v35, 0.0  ;;  %v1642_v19 = vmax.f32 %v1534_v6, 0.0  ;;  %v1274_v21 = vadd.f32 %v3246_v59, %v3213_v26 }
 0x1c0   : > { %2611 = vst [vmem:[%s3289_s25 + $0x98] sm:$0xff] %v2531_v4   ;;  %v1702_v17 = vmul.f32 %v3259_v15, %v1633_v7  ;;  %v1634_v20 = vmax.f32 %v1502_v11, 0.0  ;;  %v1781_v5 = vadd.f32 %v3267_v61, %v1712_v43  ;;  %v1282_v6 = vadd.f32 %v3246_v59, %v3221_v34 }
 0x1c1   : > { %v1713_v14 = vmul.f32 %v3259_v15, %v1644_v1  ;;  %v1711_v28 = vmul.f32 %v3259_v15, %v1642_v19  ;;  %v1217_v31 = vpop.f32.mrb[84].mxu0  ;;  %v2734_v32 = vpop.f32.mrb[84].mxu1  ;;  %v1779_v18 = vadd.f32 %v3267_v61, %v1710_v12  ;;  %v1285_v4 = vadd.f32 %v3246_v59, %v3225_v38 }
 0x1c2   : > { %v1703_v49 = vmul.f32 %v3259_v15, %v1634_v20  ;;  %v1218_v22 = vadd.f32 %v3246_v59, %v1217_v31  ;;  %v1555_v36 = vadd.f32 %v2734_v32, %v1266_v0  ;;  %v1219_v41 = vpop.f32.mrb[85].mxu0  ;;  %v1546_v39 = vpop.f32.mrb[85].mxu1  ;;  %v1771_v40 = vadd.f32 %v3267_v61, %v1702_v17 }
 0x1c3   : > { %v1782_v26 = vadd.f32 %v3267_v61, %v1713_v14  ;;  %v1780_v44 = vadd.f32 %v3267_v61, %v1711_v28  ;;  %v1547_v16 = vadd.f32 %v1546_v39, %v1258_v62  ;;  %v1220_v47 = vpop.f32.mrb[86].mxu0  ;;  %v2735_v53 = vpop.f32.mrb[86].mxu1  ;;  %v1277_v62 = vadd.f32 %v3246_v59, %v3217_v30 }
 0x1c4   : > { %v1772_v8 = vadd.f32 %v3267_v61, %v1703_v49  ;;  %v1507_v33 = vadd.f32 %v3418_v48, %v1218_v22  ;;  %v1647_v27 = vmax.f32 %v1555_v36, 0.0  ;;  %v1221_v2 = vadd.f32 %v3246_v59, %v1220_v47  ;;  %v1222_v51 = vpop.f32.mrb[87].mxu0  ;;  %v1549_v52 = vpop.f32.mrb[87].mxu1 }
 0x1c5   : > { %v2561_v37 = vpack.c.bf16 %v1782_v26, %v1781_v5  ;;  %v2556_v58 = vpack.c.bf16 %v1780_v44, %v1779_v18  ;;  %v1645_v56 = vmax.f32 %v1547_v16, 0.0  ;;  %v1558_v45 = vadd.f32 %v2735_v53, %v1269_v10 }
 0x1c6   : > { %v2536_v60 = vpack.c.bf16 %v1772_v8, %v1771_v40  ;;  %v1635_v9 = vmax.f32 %v1507_v33, 0.0  ;;  %v1716_v23 = vmul.f32 %v3259_v15, %v1647_v27  ;;  %v1510_v24 = vadd.f32 %v3422_v55, %v1221_v2 }
 0x1c7   : > { %2617 = vst [vmem:[%s3289_s25 + $0xc8] sm:$0xff] %v2561_v37   ;;  %2616 = vst [vmem:[%s3289_s25 + $0xc0] sm:$0xff] %v2556_v58   ;;  %v1714_v48 = vmul.f32 %v3259_v15, %v1645_v56  ;;  %v1648_v63 = vmax.f32 %v1558_v45, 0.0  ;;  %v1550_v35 = vadd.f32 %v1549_v52, %v1261_v25  ;;  %v1290_v55 = vadd.f32 %v3246_v59, %v3229_v42 }
 0x1c8   : > { %2612 = vst [vmem:[%s3289_s25 + $0xa0] sm:$0xff] %v2536_v60   ;;  %v1704_v7 = vmul.f32 %v3259_v15, %v1635_v9  ;;  %v1636_v43 = vmax.f32 %v1510_v24, 0.0  ;;  %v1785_v30 = vadd.f32 %v3267_v61, %v1716_v23  ;;  %v1293_v2 = vadd.f32 %v3246_v59, %v3233_v46 }
 0x1c9   : > { %v1717_v11 = vmul.f32 %v3259_v15, %v1648_v63  ;;  %v1646_v12 = vmax.f32 %v1550_v35, 0.0  ;;  %v1225_v1 = vpop.f32.mrb[88].mxu0  ;;  %v2738_v25 = vpop.f32.mrb[88].mxu1  ;;  %v1783_v19 = vadd.f32 %v3267_v61, %v1714_v48  ;;  %v1298_v51 = vadd.f32 %v3246_v59, %v3237_v50 }
 0x1ca   : > { %v1705_v34 = vmul.f32 %v3259_v15, %v1636_v43  ;;  %v1226_v38 = vadd.f32 %v3246_v59, %v1225_v1  ;;  %v1571_v0 = vadd.f32 %v2738_v25, %v1282_v6  ;;  %v1227_v10 = vpop.f32.mrb[89].mxu0  ;;  %v1562_v17 = vpop.f32.mrb[89].mxu1  ;;  %v1773_v20 = vadd.f32 %v3267_v61, %v1704_v7 }
 0x1cb   : > { %v1786_v42 = vadd.f32 %v3267_v61, %v1717_v11  ;;  %v1715_v5 = vmul.f32 %v3259_v15, %v1646_v12  ;;  %v1563_v14 = vadd.f32 %v1562_v17, %v1274_v21  ;;  %v1228_v28 = vpop.f32.mrb[90].mxu0  ;;  %v2739_v31 = vpop.f32.mrb[90].mxu1  ;;  %v1301_v58 = vadd.f32 %v3246_v59, %v3241_v54 }
 0x1cc   : > { %v1774_v32 = vadd.f32 %v3267_v61, %v1705_v34  ;;  %v1515_v18 = vadd.f32 %v3433_v13, %v1226_v38  ;;  %v1651_v49 = vmax.f32 %v1571_v0, 0.0  ;;  %v1229_v22 = vadd.f32 %v3246_v59, %v1228_v28  ;;  %v1230_v36 = vpop.f32.mrb[91].mxu0  ;;  %v1565_v41 = vpop.f32.mrb[91].mxu1 }
 0x1cd   : > { %v2571_v39 = vpack.c.bf16 %v1786_v42, %v1785_v30  ;;  %v1784_v40 = vadd.f32 %v3267_v61, %v1715_v5  ;;  %v1649_v26 = vmax.f32 %v1563_v14, 0.0  ;;  %v1574_v44 = vadd.f32 %v2739_v31, %v1285_v4 }
 0x1ce   : > { %v2541_v21 = vpack.c.bf16 %v1774_v32, %v1773_v20  ;;  %v1637_v16 = vmax.f32 %v1515_v18, 0.0  ;;  %v1720_v47 = vmul.f32 %v3259_v15, %v1651_v49  ;;  %v1518_v53 = vadd.f32 %v3440_v3, %v1229_v22 }
 0x1cf   : > { %2619 = vst [vmem:[%s3289_s25 + $0xd8] sm:$0xff] %v2571_v39   ;;  %v2566_v13 = vpack.c.bf16 %v1784_v40, %v1783_v19  ;;  %v1718_v8 = vmul.f32 %v3259_v15, %v1649_v26  ;;  %v1652_v33 = vmax.f32 %v1574_v44, 0.0  ;;  %v1566_v27 = vadd.f32 %v1565_v41, %v1277_v62 }
 0x1d0   : > { %2613 = vst [vmem:[%s3289_s25 + $0xa8] sm:$0xff] %v2541_v21   ;;  %v1706_v52 = vmul.f32 %v3259_v15, %v1637_v16  ;;  %v1638_v37 = vmax.f32 %v1518_v53, 0.0  ;;  %v1789_v3 = vadd.f32 %v3267_v61, %v1720_v47 }
 0x1d1   : > { %2618 = vst [vmem:[%s3289_s25 + $0xd0] sm:$0xff] %v2566_v13   ;;  %v1721_v56 = vmul.f32 %v3259_v15, %v1652_v33  ;;  %v1650_v45 = vmax.f32 %v1566_v27, 0.0  ;;  %v1233_v60 = vpop.f32.mrb[92].mxu0  ;;  %v2742_v9 = vpop.f32.mrb[92].mxu1  ;;  %v1787_v46 = vadd.f32 %v3267_v61, %v1718_v8 }
 0x1d2   : > { %v1707_v23 = vmul.f32 %v3259_v15, %v1638_v37  ;;  %v1234_v50 = vadd.f32 %v3246_v59, %v1233_v60  ;;  %v1587_v24 = vadd.f32 %v2742_v9, %v1298_v51  ;;  %v1235_v62 = vpop.f32.mrb[93].mxu0  ;;  %v1578_v48 = vpop.f32.mrb[93].mxu1  ;;  %v1775_v63 = vadd.f32 %v3267_v61, %v1706_v52 }
 0x1d3   : > { %v1790_v54 = vadd.f32 %v3267_v61, %v1721_v56  ;;  %v1719_v35 = vmul.f32 %v3259_v15, %v1650_v45  ;;  %v1579_v6 = vadd.f32 %v1578_v48, %v1290_v55  ;;  %v1236_v4 = vpop.f32.mrb[94].mxu0  ;;  %v2743_v7 = vpop.f32.mrb[94].mxu1 }
 0x1d4   : > { %v1776_v43 = vadd.f32 %v3267_v61, %v1707_v23  ;;  %v1523_v30 = vadd.f32 %v3429_v29, %v1234_v50  ;;  %v1655_v11 = vmax.f32 %v1587_v24, 0.0  ;;  %v1237_v12 = vadd.f32 %v3246_v59, %v1236_v4  ;;  %v1238_v1 = vpop.f32.mrb[95].mxu0  ;;  %v1581_v25 = vpop.f32.mrb[95].mxu1 }
 0x1d5   : > { %v2581_v19 = vpack.c.bf16 %v1790_v54, %v1789_v3  ;;  %v1788_v34 = vadd.f32 %v3267_v61, %v1719_v35  ;;  %v1653_v38 = vmax.f32 %v1579_v6, 0.0  ;;  %v1590_v0 = vadd.f32 %v2743_v7, %v1301_v58 }
 0x1d6   : > { %v2546_v55 = vpack.c.bf16 %v1776_v43, %v1775_v63  ;;  %v1639_v10 = vmax.f32 %v1523_v30, 0.0  ;;  %v1526_v17 = vadd.f32 %v3435_v57, %v1237_v12  ;;  %v1724_v29 = vmul.f32 %v3259_v15, %v1655_v11 }
 0x1d7   : > { %2621 = vst [vmem:[%s3289_s25 + $0xe8] sm:$0xff] %v2581_v19   ;;  %v2576_v20 = vpack.c.bf16 %v1788_v34, %v1787_v46  ;;  %v1656_v42 = vmax.f32 %v1590_v0, 0.0  ;;  %v1582_v5 = vadd.f32 %v1581_v25, %v1293_v2  ;;  %v1722_v28 = vmul.f32 %v3259_v15, %v1653_v38 }
 0x1d8   : > { %2614 = vst [vmem:[%s3289_s25 + $0xb0] sm:$0xff] %v2546_v55   ;;  %v1708_v59 = vmul.f32 %v3259_v15, %v1639_v10  ;;  %v1640_v14 = vmax.f32 %v1526_v17, 0.0  ;;  %v1793_v18 = vadd.f32 %v3267_v61, %v1724_v29 }
 0x1d9   : > { %2620 = vst [vmem:[%s3289_s25 + $0xe0] sm:$0xff] %v2576_v20   ;;  %v1725_v31 = vmul.f32 %v3259_v15, %v1656_v42  ;;  %v1654_v32 = vmax.f32 %v1582_v5, 0.0  ;;  %v1791_v39 = vadd.f32 %v3267_v61, %v1722_v28 }
 0x1da   : > { %v1709_v57 = vmul.f32 %v3259_v15, %v1640_v14  ;;  %v1777_v36 = vadd.f32 %v3267_v61, %v1708_v59 }
 0x1db   : > { %v1794_v49 = vadd.f32 %v3267_v61, %v1725_v31  ;;  %v1723_v22 = vmul.f32 %v3259_v15, %v1654_v32 }
 0x1dc   : > { %v1778_v41 = vadd.f32 %v3267_v61, %v1709_v57 }
 0x1dd   : > { %v2591_v40 = vpack.c.bf16 %v1794_v49, %v1793_v18  ;;  %v1792_v26 = vadd.f32 %v3267_v61, %v1723_v22 }
 0x1de   : > { %v2551_v44 = vpack.c.bf16 %v1778_v41, %v1777_v36 }
 0x1df   : > { %2623 = vst [vmem:[%s3289_s25 + $0xf8] sm:$0xff] %v2591_v40   ;;  %v2586_v21 = vpack.c.bf16 %v1792_v26, %v1791_v39 }
 0x1e0   : > { %2615 = vst [vmem:[%s3289_s25 + $0xb8] sm:$0xff] %v2551_v44  }
 0x1e1   : > { %2622 = vst [vmem:[%s3289_s25 + $0xf0] sm:$0xff] %v2586_v21  }
 0x1e2 PF: > { %s13_s12 = sadd.s32 1, %s2944_s12  }
 0x1e3   : > { %p10_p4 = scmp.ge.s32.totalorder %s13_s12, 6  }
 0x1e5   :  { %12 = sbr.rel (!%p10_p4) target bundleno = 1 (0x1), region = 62 }

// kernel: cnn_kaggle_forward.9
= control target key start
LH: loop header
LB: loop body
LE: loop exit
PB: predicated region body
PF: predicated region fallthrough
CT: control target
= control target key end

     0   :  { %v3600_v0 = vmov 0   ;;  %s4809_s1 = inlined_call_operand.vmem [shape: bf16[896,128], index: 1, kind: input, shape index: {}]   ;;  %s4810_s0 = inlined_call_operand.vmem [shape: bf16[344,896], index: 0, kind: input, shape index: {}]   ;;  %s4811_s2 = inlined_call_operand.vmem [shape: f32[3,128], index: 2, kind: input, shape index: {}]   ;;  %s4812_s3 = inlined_call_operand.vmem [shape: bf16[344,128], index: 3, kind: output, shape index: {}]  }
   0x1   :  { %1421 = vmatprep.subr.bf16.mxu1 %v3600_v0  ;;  %1629 = vmatprep.subr.bf16.mxu0 %v3600_v0  ;;  %v3327_v1 = vld [vmem:[%s4809_s1] sm:$0xff]   ;;  %v3329_v3 = vld [vmem:[%s4809_s1 + $0x8] sm:$0xff]   ;;  %v3331_v5 = vld [vmem:[%s4809_s1 + $0x10] sm:$0xff]  }
   0x2   :  { %v3629_v2 = vld [vmem:[%s4809_s1 + $0x80] sm:$0xff]   ;;  %1422 = vmatpush1.bf16.msra.mxu1 %v3327_v1  ;;  %v3639_v4 = vld [vmem:[%s4809_s1 + $0x88] sm:$0xff]   ;;  %v3650_v6 = vld [vmem:[%s4809_s1 + $0x90] sm:$0xff]  }
   0x3   :  { %1630 = vmatpush1.bf16.msra.mxu0 %v3629_v2  ;;  %1423 = vmatprep.subr.bf16.mxu1 %v3600_v0  ;;  %v3333_v7 = vld [vmem:[%s4809_s1 + $0x18] sm:$0xff]   ;;  %v3335_v9 = vld [vmem:[%s4809_s1 + $0x20] sm:$0xff]   ;;  %v3337_v11 = vld [vmem:[%s4809_s1 + $0x28] sm:$0xff]  }
   0x4   :  { %1631 = vmatprep.subr.bf16.mxu0 %v3600_v0  ;;  %v3661_v8 = vld [vmem:[%s4809_s1 + $0x98] sm:$0xff]   ;;  %v3672_v10 = vld [vmem:[%s4809_s1 + $0xa0] sm:$0xff]   ;;  %v3683_v12 = vld [vmem:[%s4809_s1 + $0xa8] sm:$0xff]  }
   0x5   :  { %v3339_v13 = vld [vmem:[%s4809_s1 + $0x30] sm:$0xff]   ;;  %v3341_v15 = vld [vmem:[%s4809_s1 + $0x38] sm:$0xff]   ;;  %v3343_v17 = vld [vmem:[%s4809_s1 + $0x40] sm:$0xff]  }
   0x6   :  { %1424 = vmatpush1.bf16.msra.mxu1 %v3329_v3  ;;  %v3694_v14 = vld [vmem:[%s4809_s1 + $0xb0] sm:$0xff]   ;;  %v3705_v16 = vld [vmem:[%s4809_s1 + $0xb8] sm:$0xff]   ;;  %v3716_v18 = vld [vmem:[%s4809_s1 + $0xc0] sm:$0xff]  }
   0x7   :  { %1632 = vmatpush1.bf16.msra.mxu0 %v3639_v4  ;;  %1425 = vmatprep.subr.bf16.mxu1 %v3600_v0  ;;  %v3361_v19 = vld [vmem:[%s4810_s0 + $0x4] ss:$28 sps:$4 sm:$0xff]   ;;  %v3345_v20 = vld [vmem:[%s4809_s1 + $0x48] sm:$0xff]   ;;  %v3347_v23 = vld [vmem:[%s4809_s1 + $0x50] sm:$0xff]  }
   0x8   :  { %1633 = vmatprep.subr.bf16.mxu0 %v3600_v0  ;;  %v3364_v21 = vld [vmem:[%s4810_s0 + $0xc] ss:$28 sps:$4 sm:$0xff]   ;;  %1453 = vmatprep.mubr.bf16.mxu1 %v3361_v19  ;;  %v3744_v24 = vld [vmem:[%s4809_s1 + $0xd0] sm:$0xff]   ;;  %v3349_v25 = vld [vmem:[%s4809_s1 + $0x58] sm:$0xff]  }
   0x9   :  { %v3733_v22 = vld [vmem:[%s4809_s1 + $0xc8] sm:$0xff]   ;;  %1661 = vmatprep.mubr.bf16.mxu0 %v3364_v21  ;;  %v3755_v26 = vld [vmem:[%s4809_s1 + $0xd8] sm:$0xff]   ;;  %v3351_v27 = vld [vmem:[%s4809_s1 + $0x60] sm:$0xff]  }
   0xa   :  { %1426 = vmatpush1.bf16.msra.mxu1 %v3331_v5  ;;  %v3766_v28 = vld [vmem:[%s4809_s1 + $0xe0] sm:$0xff]   ;;  %v3353_v29 = vld [vmem:[%s4809_s1 + $0x68] sm:$0xff]   ;;  %v3355_v31 = vld [vmem:[%s4809_s1 + $0x70] sm:$0xff]  }
   0xb   :  { %1634 = vmatpush1.bf16.msra.mxu0 %v3650_v6  ;;  %1427 = vmatprep.subr.bf16.mxu1 %v3600_v0  ;;  %v3777_v30 = vld [vmem:[%s4809_s1 + $0xe8] sm:$0xff]   ;;  %v3788_v32 = vld [vmem:[%s4809_s1 + $0xf0] sm:$0xff]   ;;  %v3357_v33 = vld [vmem:[%s4809_s1 + $0x78] sm:$0xff]  }
   0xc   :  { %1635 = vmatprep.subr.bf16.mxu0 %v3600_v0  ;;  %v3799_v34 = vld [vmem:[%s4809_s1 + $0xf8] sm:$0xff]   ;;  %v3362_v36 = vld [vmem:[%s4810_s0 + $0x8] ss:$28 sps:$4 sm:$0xff]   ;;  %v3373_v43 = vld [vmem:[%s4810_s0 + $0x74] ss:$28 sps:$4 sm:$0xff]  }
   0xd   :  { %v3359_v35 = vld [vmem:[%s4810_s0] ss:$28 sps:$4 sm:$0xff]   ;;  %v3372_v40 = vld [vmem:[%s4809_s1 + $0x108] sm:$0xff]   ;;  %v3370_v41 = vld [vmem:[%s4810_s0 + $0x38] ss:$28 sps:$4 sm:$0xff]  }
   0xe   :  { %1428 = vmatpush1.bf16.msra.mxu1 %v3333_v7  ;;  %v3366_v37 = vld [vmem:[%s4810_s0 + $0x3c] ss:$28 sps:$4 sm:$0xff]   ;;  %v3365_v38 = vld [vmem:[%s4809_s1 + $0x100] sm:$0xff]   ;;  %v3379_v45 = vld [vmem:[%s4809_s1 + $0x110] sm:$0xff]  }
   0xf   :  { %1636 = vmatpush1.bf16.msra.mxu0 %v3661_v8  ;;  %1429 = vmatprep.subr.bf16.mxu1 %v3600_v0  ;;  %v3368_v39 = vld [vmem:[%s4810_s0 + $0x44] ss:$28 sps:$4 sm:$0xff]   ;;  %v3375_v44 = vld [vmem:[%s4810_s0 + $0x7c] ss:$28 sps:$4 sm:$0xff]   ;;  %v3377_v47 = vld [vmem:[%s4810_s0 + $0x70] ss:$28 sps:$4 sm:$0xff]  }
  0x10   :  { %1637 = vmatprep.subr.bf16.mxu0 %v3600_v0  ;;  %v3371_v42 = vld [vmem:[%s4810_s0 + $0x40] ss:$28 sps:$4 sm:$0xff]   ;;  %v3378_v48 = vld [vmem:[%s4810_s0 + $0x78] ss:$28 sps:$4 sm:$0xff]   ;;  %v3380_v49 = vld [vmem:[%s4810_s0 + $0xac] ss:$28 sps:$4 sm:$0xff]  }
  0x11   :  { %v3386_v46 = vld [vmem:[%s4809_s1 + $0x118] sm:$0xff]   ;;  %v3382_v50 = vld [vmem:[%s4810_s0 + $0xb4] ss:$28 sps:$4 sm:$0xff]   ;;  %v3393_v51 = vld [vmem:[%s4809_s1 + $0x120] sm:$0xff]  }
  0x12   :  { %1430 = vmatpush1.bf16.msra.mxu1 %v3335_v9  ;;  %v3400_v52 = vld [vmem:[%s4809_s1 + $0x128] sm:$0xff]   ;;  %v3387_v55 = vld [vmem:[%s4810_s0 + $0xe4] ss:$28 sps:$4 sm:$0xff]   ;;  %v3407_v57 = vld [vmem:[%s4809_s1 + $0x130] sm:$0xff]  }
  0x13   :  { %1638 = vmatpush1.bf16.msra.mxu0 %v3672_v10  ;;  %1431 = vmatprep.subr.bf16.mxu1 %v3600_v0  ;;  %v3384_v53 = vld [vmem:[%s4810_s0 + $0xa8] ss:$28 sps:$4 sm:$0xff]   ;;  %v3385_v54 = vld [vmem:[%s4810_s0 + $0xb0] ss:$28 sps:$4 sm:$0xff]   ;;  %v3414_v58 = vld [vmem:[%s4809_s1 + $0x138] sm:$0xff]  }
  0x14   :  { %1639 = vmatprep.subr.bf16.mxu0 %v3600_v0  ;;  %v3389_v56 = vld [vmem:[%s4810_s0 + $0xec] ss:$28 sps:$4 sm:$0xff]   ;;  %v3391_v59 = vld [vmem:[%s4810_s0 + $0xe0] ss:$28 sps:$4 sm:$0xff]   ;;  %v3406_v9 = vld [vmem:[%s4810_s0 + $0x158] ss:$28 sps:$4 sm:$0xff]  }
  0x15   :  { %v3392_v60 = vld [vmem:[%s4810_s0 + $0xe8] ss:$28 sps:$4 sm:$0xff]   ;;  %v3394_v61 = vld [vmem:[%s4810_s0 + $0x11c] ss:$28 sps:$4 sm:$0xff]   ;;  %v3405_v7 = vld [vmem:[%s4810_s0 + $0x150] ss:$28 sps:$4 sm:$0xff]  }
  0x16   :  { %1432 = vmatpush1.bf16.msra.mxu1 %v3337_v11  ;;  %v3396_v62 = vld [vmem:[%s4810_s0 + $0x124] ss:$28 sps:$4 sm:$0xff]   ;;  %v3428_v1 = vld [vmem:[%s4809_s1 + $0x148] sm:$0xff]   ;;  %v3403_v5 = vld [vmem:[%s4810_s0 + $0x15c] ss:$28 sps:$4 sm:$0xff]  }
  0x17   :  { %1640 = vmatpush1.bf16.msra.mxu0 %v3683_v12  ;;  %1433 = vmatprep.subr.bf16.mxu1 %v3600_v0  ;;  %v3421_v63 = vld [vmem:[%s4809_s1 + $0x140] sm:$0xff]   ;;  %v3410_v11 = vld [vmem:[%s4810_s0 + $0x194] ss:$28 sps:$4 sm:$0xff]   ;;  %v3476_v19 = vld [vmem:[%s4809_s1 + $0x178] sm:$0xff]  }
  0x18   :  { %1641 = vmatprep.subr.bf16.mxu0 %v3600_v0  ;;  %v3399_v3 = vld [vmem:[%s4810_s0 + $0x120] ss:$28 sps:$4 sm:$0xff]  }
  0x19   :  { %v3997_v21 = vld [vmem:[%s4809_s1 + $0x180] sm:$0xff]  }
  0x1a   :  { %1434 = vmatpush1.bf16.msra.mxu1 %v3339_v13  ;;  %v3412_v13 = vld [vmem:[%s4810_s0 + $0x188] ss:$28 sps:$4 sm:$0xff]  }
  0x1b   :  { %1642 = vmatpush1.bf16.msra.mxu0 %v3694_v14  ;;  %1435 = vmatprep.subr.bf16.mxu1 %v3600_v0 }
  0x1c   :  { %1643 = vmatprep.subr.bf16.mxu0 %v3600_v0 }
  0x1e   :  { %1436 = vmatpush1.bf16.msra.mxu1 %v3341_v15  ;;  %v3413_v15 = vld [vmem:[%s4810_s0 + $0x190] ss:$28 sps:$4 sm:$0xff]  }
  0x1f   :  { %1644 = vmatpush1.bf16.msra.mxu0 %v3705_v16  ;;  %1437 = vmatprep.subr.bf16.mxu1 %v3600_v0 }
  0x20   :  { %1645 = vmatprep.subr.bf16.mxu0 %v3600_v0 }
  0x22   :  { %1438 = vmatpush1.bf16.msra.mxu1 %v3343_v17  ;;  %v3417_v17 = vld [vmem:[%s4810_s0 + $0x1cc] ss:$28 sps:$4 sm:$0xff]  }
  0x23   :  { %1646 = vmatpush1.bf16.msra.mxu0 %v3716_v18  ;;  %1439 = vmatprep.subr.bf16.mxu1 %v3600_v0 }
  0x24   :  { %1647 = vmatprep.subr.bf16.mxu0 %v3600_v0 }
  0x26   :  { %1440 = vmatpush1.bf16.msra.mxu1 %v3345_v20  ;;  %v3419_v20 = vld [vmem:[%s4810_s0 + $0x1c0] ss:$28 sps:$4 sm:$0xff]  }
  0x27   :  { %1648 = vmatpush1.bf16.msra.mxu0 %v3733_v22  ;;  %1441 = vmatprep.subr.bf16.mxu1 %v3600_v0 }
  0x28   :  { %1649 = vmatprep.subr.bf16.mxu0 %v3600_v0 }
  0x2a   :  { %1442 = vmatpush1.bf16.msra.mxu1 %v3347_v23  ;;  %v3422_v23 = vld [vmem:[%s4810_s0 + $0x1fc] ss:$28 sps:$4 sm:$0xff]  }
  0x2b   :  { %1650 = vmatpush1.bf16.msra.mxu0 %v3744_v24  ;;  %1443 = vmatprep.subr.bf16.mxu1 %v3600_v0 }
  0x2c   :  { %1651 = vmatprep.subr.bf16.mxu0 %v3600_v0 }
  0x2e   :  { %1444 = vmatpush1.bf16.msra.mxu1 %v3349_v25  ;;  %v3426_v25 = vld [vmem:[%s4810_s0 + $0x1f8] ss:$28 sps:$4 sm:$0xff]  }
  0x2f   :  { %1652 = vmatpush1.bf16.msra.mxu0 %v3755_v26  ;;  %1445 = vmatprep.subr.bf16.mxu1 %v3600_v0 }
  0x30   :  { %1653 = vmatprep.subr.bf16.mxu0 %v3600_v0 }
  0x32   :  { %1446 = vmatpush1.bf16.msra.mxu1 %v3351_v27  ;;  %v3431_v27 = vld [vmem:[%s4810_s0 + $0x23c] ss:$28 sps:$4 sm:$0xff]  }
  0x33   :  { %1654 = vmatpush1.bf16.msra.mxu0 %v3766_v28  ;;  %1447 = vmatprep.subr.bf16.mxu1 %v3600_v0 }
  0x34   :  { %1655 = vmatprep.subr.bf16.mxu0 %v3600_v0 }
  0x36   :  { %1448 = vmatpush1.bf16.msra.mxu1 %v3353_v29  ;;  %v3434_v29 = vld [vmem:[%s4810_s0 + $0x238] ss:$28 sps:$4 sm:$0xff]  }
  0x37   :  { %1656 = vmatpush1.bf16.msra.mxu0 %v3777_v30  ;;  %1449 = vmatprep.subr.bf16.mxu1 %v3600_v0 }
  0x38   :  { %1657 = vmatprep.subr.bf16.mxu0 %v3600_v0 }
  0x3a   :  { %1450 = vmatpush1.bf16.msra.mxu1 %v3355_v31  ;;  %v3438_v31 = vld [vmem:[%s4810_s0 + $0x274] ss:$28 sps:$4 sm:$0xff]  }
  0x3b   :  { %1658 = vmatpush1.bf16.msra.mxu0 %v3788_v32  ;;  %1451 = vmatprep.subr.bf16.mxu1 %v3600_v0 }
  0x3c   :  { %1659 = vmatprep.subr.bf16.mxu0 %v3600_v0 }
  0x3e   :  { %1452 = vmatpush1.bf16.msra.mxu1 %v3357_v33  ;;  %v3441_v33 = vld [vmem:[%s4810_s0 + $0x270] ss:$28 sps:$4 sm:$0xff]  }
  0x3f   :  { %1660 = vmatpush1.bf16.msra.mxu0 %v3799_v34  ;;  %3126 = vmatprep.subr.bf16.mxu1 %v3600_v0 }
  0x40   :  { %1837 = vmatprep.subr.bf16.mxu0 %v3600_v0 }
  0x41   :  { %1454 = vmatmul.mubr.bf16.vlgmr.msra.gmra.mrb[0].mxu1 %v3359_v35  ;;  %v3444_v35 = vld [vmem:[%s4810_s0 + $0x2ac] ss:$28 sps:$4 sm:$0xff]  }
  0x42   :  { %1662 = vmatmul.mubr.bf16.vlgmr.msra.gmra.mrb[0].mxu0 %v3362_v36  ;;  %1461 = vmatprep.mubr.bf16.mxu1 %v3366_v37  ;;  %v3447_v36 = vld [vmem:[%s4810_s0 + $0x2a0] ss:$28 sps:$4 sm:$0xff]   ;;  %v3448_v37 = vld [vmem:[%s4810_s0 + $0x2a8] ss:$28 sps:$4 sm:$0xff]  }
  0x43   :  { %1838 = vmatpush1.bf16.msra.mxu0 %v3365_v38  ;;  %1669 = vmatprep.mubr.bf16.mxu0 %v3368_v39  ;;  %v3449_v38 = vld [vmem:[%s4810_s0 + $0x2dc] ss:$28 sps:$4 sm:$0xff]   ;;  %v3451_v39 = vld [vmem:[%s4810_s0 + $0x2e4] ss:$28 sps:$4 sm:$0xff]  }
  0x44   :  { %3142 = vmatpush1.bf16.msra.mxu1 %v3629_v2  ;;  %1839 = vmatprep.subr.bf16.mxu0 %v3600_v0  ;;  %v3398_v2 = vld [vmem:[%s4810_s0 + $0x118] ss:$28 sps:$4 sm:$0xff]  }
  0x45   :  { %3127 = vmatprep.subr.bf16.mxu1 %v3600_v0 }
  0x47   :  { %1840 = vmatpush1.bf16.msra.mxu0 %v3372_v40  ;;  %v3454_v40 = vld [vmem:[%s4810_s0 + $0x2d8] ss:$28 sps:$4 sm:$0xff]  }
  0x48   :  { %1841 = vmatprep.subr.bf16.mxu0 %v3600_v0  ;;  %3143 = vmatpush1.bf16.msra.mxu1 %v3639_v4  ;;  %v3401_v4 = vld [vmem:[%s4810_s0 + $0x154] ss:$28 sps:$4 sm:$0xff]  }
  0x49   :  { %1462 = vmatmul.mubr.bf16.gmra.mrb[4].mxu1 %v3370_v41  ;;  %3128 = vmatprep.subr.bf16.mxu1 %v3600_v0  ;;  %v3455_v41 = vld [vmem:[%s4810_s0 + $0x2e0] ss:$28 sps:$4 sm:$0xff]  }
  0x4a   :  { %1670 = vmatmul.mubr.bf16.gmra.mrb[4].mxu0 %v3371_v42  ;;  %1469 = vmatprep.mubr.bf16.mxu1 %v3373_v43  ;;  %v3456_v42 = vld [vmem:[%s4810_s0 + $0x314] ss:$28 sps:$4 sm:$0xff]   ;;  %v3458_v43 = vld [vmem:[%s4810_s0 + $0x31c] ss:$28 sps:$4 sm:$0xff]  }
  0x4b   :  { %1677 = vmatprep.mubr.bf16.mxu0 %v3375_v44  ;;  %1842 = vmatpush1.bf16.msra.mxu0 %v3379_v45  ;;  %v3460_v44 = vld [vmem:[%s4810_s0 + $0x310] ss:$28 sps:$4 sm:$0xff]   ;;  %v3461_v45 = vld [vmem:[%s4810_s0 + $0x318] ss:$28 sps:$4 sm:$0xff]  }
  0x4c   :  { %1843 = vmatprep.subr.bf16.mxu0 %v3600_v0  ;;  %3144 = vmatpush1.bf16.msra.mxu1 %v3650_v6  ;;  %v3435_v6 = vld [vmem:[%s4809_s1 + $0x150] sm:$0xff]  }
  0x4d   :  { %3129 = vmatprep.subr.bf16.mxu1 %v3600_v0 }
  0x4f   :  { %1844 = vmatpush1.bf16.msra.mxu0 %v3386_v46  ;;  %v3463_v46 = vld [vmem:[%s4810_s0 + $0x34c] ss:$28 sps:$4 sm:$0xff]  }
  0x50   :  { %1845 = vmatprep.subr.bf16.mxu0 %v3600_v0  ;;  %3145 = vmatpush1.bf16.msra.mxu1 %v3661_v8  ;;  %v3446_v8 = vld [vmem:[%s4809_s1 + $0x158] sm:$0xff]  }
  0x51   :  { %1470 = vmatmul.mubr.bf16.gmra.mrb[8].mxu1 %v3377_v47  ;;  %3130 = vmatprep.subr.bf16.mxu1 %v3600_v0  ;;  %v3465_v47 = vld [vmem:[%s4810_s0 + $0x354] ss:$28 sps:$4 sm:$0xff]  }
  0x52   :  { %1678 = vmatmul.mubr.bf16.gmra.mrb[8].mxu0 %v3378_v48  ;;  %1477 = vmatprep.mubr.bf16.mxu1 %v3380_v49  ;;  %v3467_v48 = vld [vmem:[%s4810_s0 + $0x348] ss:$28 sps:$4 sm:$0xff]   ;;  %v3468_v49 = vld [vmem:[%s4810_s0 + $0x350] ss:$28 sps:$4 sm:$0xff]  }
  0x53   :  { %1685 = vmatprep.mubr.bf16.mxu0 %v3382_v50  ;;  %1846 = vmatpush1.bf16.msra.mxu0 %v3393_v51  ;;  %v3470_v50 = vld [vmem:[%s4810_s0 + $0x384] ss:$28 sps:$4 sm:$0xff]   ;;  %v3472_v51 = vld [vmem:[%s4810_s0 + $0x38c] ss:$28 sps:$4 sm:$0xff]  }
  0x54   :  { %1847 = vmatprep.subr.bf16.mxu0 %v3600_v0  ;;  %3146 = vmatpush1.bf16.msra.mxu1 %v3672_v10  ;;  %v3408_v10 = vld [vmem:[%s4810_s0 + $0x18c] ss:$28 sps:$4 sm:$0xff]  }
  0x55   :  { %3131 = vmatprep.subr.bf16.mxu1 %v3600_v0 }
  0x57   :  { %1848 = vmatpush1.bf16.msra.mxu0 %v3400_v52  ;;  %v3474_v52 = vld [vmem:[%s4810_s0 + $0x380] ss:$28 sps:$4 sm:$0xff]  }
  0x58   :  { %1849 = vmatprep.subr.bf16.mxu0 %v3600_v0  ;;  %3147 = vmatpush1.bf16.msra.mxu1 %v3683_v12  ;;  %v3453_v12 = vld [vmem:[%s4809_s1 + $0x160] sm:$0xff]  }
  0x59   :  { %1478 = vmatmul.mubr.bf16.gmra.mrb[12].mxu1 %v3384_v53  ;;  %3132 = vmatprep.subr.bf16.mxu1 %v3600_v0  ;;  %v3475_v53 = vld [vmem:[%s4810_s0 + $0x388] ss:$28 sps:$4 sm:$0xff]  }
  0x5a   :  { %1686 = vmatmul.mubr.bf16.gmra.mrb[12].mxu0 %v3385_v54  ;;  %1485 = vmatprep.mubr.bf16.mxu1 %v3387_v55  ;;  %v3477_v54 = vld [vmem:[%s4810_s0 + $0x3bc] ss:$28 sps:$4 sm:$0xff]   ;;  %v3481_v55 = vld [vmem:[%s4810_s0 + $0x14] ss:$28 sps:$4 sm:$0xff]  }
  0x5b   :  { %1693 = vmatprep.mubr.bf16.mxu0 %v3389_v56  ;;  %1850 = vmatpush1.bf16.msra.mxu0 %v3407_v57  ;;  %v3482_v56 = vld [vmem:[%s4810_s0 + $0x3b8] ss:$28 sps:$4 sm:$0xff]   ;;  %v3479_v57 = vld [vmem:[%s4810_s0 + $0x10] ss:$28 sps:$4 sm:$0xff]  }
  0x5c   :  { %1851 = vmatprep.subr.bf16.mxu0 %v3600_v0  ;;  %3148 = vmatpush1.bf16.msra.mxu1 %v3694_v14  ;;  %v3462_v14 = vld [vmem:[%s4809_s1 + $0x168] sm:$0xff]  }
  0x5d   :  { %3133 = vmatprep.subr.bf16.mxu1 %v3600_v0 }
  0x5f   :  { %1852 = vmatpush1.bf16.msra.mxu0 %v3414_v58  ;;  %v3483_v58 = vld [vmem:[%s4810_s0 + $0x3f4] ss:$28 sps:$4 sm:$0xff]  }
  0x60   :  { %1853 = vmatprep.subr.bf16.mxu0 %v3600_v0  ;;  %3149 = vmatpush1.bf16.msra.mxu1 %v3705_v16  ;;  %v3415_v16 = vld [vmem:[%s4810_s0 + $0x1c4] ss:$28 sps:$4 sm:$0xff]  }
  0x61   :  { %1486 = vmatmul.mubr.bf16.gmra.mrb[16].mxu1 %v3391_v59  ;;  %3134 = vmatprep.subr.bf16.mxu1 %v3600_v0  ;;  %v3485_v59 = vld [vmem:[%s4810_s0 + $0x4c] ss:$28 sps:$4 sm:$0xff]  }
  0x62   :  { %1694 = vmatmul.mubr.bf16.gmra.mrb[16].mxu0 %v3392_v60  ;;  %1493 = vmatprep.mubr.bf16.mxu1 %v3394_v61  ;;  %v3487_v60 = vld [vmem:[%s4810_s0 + $0x3f0] ss:$28 sps:$4 sm:$0xff]   ;;  %v3488_v61 = vld [vmem:[%s4810_s0 + $0x48] ss:$28 sps:$4 sm:$0xff]  }
  0x63   :  { %1701 = vmatprep.mubr.bf16.mxu0 %v3396_v62  ;;  %1854 = vmatpush1.bf16.msra.mxu0 %v3421_v63  ;;  %v3489_v62 = vld [vmem:[%s4810_s0 + $0x42c] ss:$28 sps:$4 sm:$0xff]   ;;  %v3491_v63 = vld [vmem:[%s4810_s0 + $0x84] ss:$28 sps:$4 sm:$0xff]  }
  0x64   :  { %1855 = vmatprep.subr.bf16.mxu0 %v3600_v0  ;;  %3150 = vmatpush1.bf16.msra.mxu1 %v3716_v18  ;;  %v3469_v18 = vld [vmem:[%s4809_s1 + $0x170] sm:$0xff]  }
  0x65   :  { %3135 = vmatprep.subr.bf16.mxu1 %v3600_v0 }
  0x67   :  { %1856 = vmatpush1.bf16.msra.mxu0 %v3428_v1  ;;  %v3493_v1 = vld [vmem:[%s4810_s0 + $0x428] ss:$28 sps:$4 sm:$0xff]  }
  0x68   :  { %1857 = vmatprep.subr.bf16.mxu0 %v3600_v0  ;;  %3151 = vmatpush1.bf16.msra.mxu1 %v3733_v22  ;;  %v3420_v22 = vld [vmem:[%s4810_s0 + $0x1c8] ss:$28 sps:$4 sm:$0xff]  }
  0x69   :  { %1494 = vmatmul.mubr.bf16.gmra.mrb[20].mxu1 %v3398_v2  ;;  %3136 = vmatprep.subr.bf16.mxu1 %v3600_v0  ;;  %v3494_v2 = vld [vmem:[%s4810_s0 + $0x80] ss:$28 sps:$4 sm:$0xff]  }
  0x6a   :  { %1702 = vmatmul.mubr.bf16.gmra.mrb[20].mxu0 %v3399_v3  ;;  %1501 = vmatprep.mubr.bf16.mxu1 %v3401_v4  ;;  %v3495_v3 = vld [vmem:[%s4810_s0 + $0x464] ss:$28 sps:$4 sm:$0xff]   ;;  %v3497_v4 = vld [vmem:[%s4810_s0 + $0xbc] ss:$28 sps:$4 sm:$0xff]  }
  0x6b   :  { %1709 = vmatprep.mubr.bf16.mxu0 %v3403_v5  ;;  %1858 = vmatpush1.bf16.msra.mxu0 %v3435_v6  ;;  %v183_v5 = vld [vmem:[%s4810_s0 + $0x498] sm:$0xff] }
  0x6c   :  { %1859 = vmatprep.subr.bf16.mxu0 %v3600_v0  ;;  %3152 = vmatpush1.bf16.msra.mxu1 %v3744_v24  ;;  %v3424_v24 = vld [vmem:[%s4810_s0 + $0x204] ss:$28 sps:$4 sm:$0xff]  }
  0x6d   :  { %3137 = vmatprep.subr.bf16.mxu1 %v3600_v0  ;;  %v3499_v6 = vld [vmem:[%s4810_s0 + $0x460] ss:$28 sps:$4 sm:$0xff]  }
  0x6f   :  { %1860 = vmatpush1.bf16.msra.mxu0 %v3446_v8  ;;  %v2761_v8 = vcombine.high %v183_v5, %v183_v5 }
  0x70   :  { %1861 = vmatprep.subr.bf16.mxu0 %v3600_v0  ;;  %3153 = vmatpush1.bf16.msra.mxu1 %v3755_v26  ;;  %v3427_v26 = vld [vmem:[%s4810_s0 + $0x200] ss:$28 sps:$4 sm:$0xff]  }
  0x71   :  { %1502 = vmatmul.mubr.bf16.gmra.mrb[24].mxu1 %v3405_v7  ;;  %3138 = vmatprep.subr.bf16.mxu1 %v3600_v0  ;;  %v3500_v7 = vld [vmem:[%s4810_s0 + $0xb8] ss:$28 sps:$4 sm:$0xff]  }
  0x72   :  { %1710 = vmatmul.mubr.bf16.gmra.mrb[24].mxu0 %v3406_v9  ;;  %1509 = vmatprep.mubr.bf16.mxu1 %v3408_v10  ;;  %v3502_v9 = vld [vmem:[%s4810_s0 + $0xf4] ss:$28 sps:$4 sm:$0xff]   ;;  %v2760_v10 = vcombine.low %v183_v5, %v183_v5  ;;  %v3561_v5 = vld [vmem:[%s4810_s0 + $0x2e8] ss:$28 sps:$4 sm:$0xff]  }
  0x73   :  { %1717 = vmatprep.mubr.bf16.mxu0 %v3410_v11  ;;  %1862 = vmatpush1.bf16.msra.mxu0 %v3453_v12  ;;  %v3505_v11 = vld [vmem:[%s4810_s0 + $0xf0] ss:$28 sps:$4 sm:$0xff]   ;;  %v3508_v12 = vld [vmem:[%s4810_s0 + $0x3c4] ss:$28 sps:$4 sm:$0xff]  }
  0x74   :  { %1863 = vmatprep.subr.bf16.mxu0 %v3600_v0  ;;  %3154 = vmatpush1.bf16.msra.mxu1 %v3766_v28  ;;  %v3433_v28 = vld [vmem:[%s4810_s0 + $0x230] ss:$28 sps:$4 sm:$0xff]  }
  0x75   :  { %3139 = vmatprep.subr.bf16.mxu1 %v3600_v0 }
  0x77   :  { %1864 = vmatpush1.bf16.msra.mxu0 %v3462_v14  ;;  %v3506_v14 = vld [vmem:[%s4810_s0 + $0x3c0] ss:$28 sps:$4 sm:$0xff]  }
  0x78   :  { %1865 = vmatprep.subr.bf16.mxu0 %v3600_v0  ;;  %3155 = vmatpush1.bf16.msra.mxu1 %v3777_v30  ;;  %v3436_v30 = vld [vmem:[%s4810_s0 + $0x26c] ss:$28 sps:$4 sm:$0xff]  }
  0x79   :  { %1510 = vmatmul.mubr.bf16.gmra.mrb[28].mxu1 %v3412_v13  ;;  %3140 = vmatprep.subr.bf16.mxu1 %v3600_v0  ;;  %v3509_v13 = vld [vmem:[%s4810_s0 + $0x12c] ss:$28 sps:$4 sm:$0xff]  }
  0x7a   :  { %1718 = vmatmul.mubr.bf16.gmra.mrb[28].mxu0 %v3413_v15  ;;  %1517 = vmatprep.mubr.bf16.mxu1 %v3415_v16  ;;  %v3511_v15 = vld [vmem:[%s4810_s0 + $0x128] ss:$28 sps:$4 sm:$0xff]   ;;  %v3512_v16 = vld [vmem:[%s4810_s0 + $0x3fc] ss:$28 sps:$4 sm:$0xff]  }
  0x7b   :  { %1725 = vmatprep.mubr.bf16.mxu0 %v3417_v17  ;;  %1866 = vmatpush1.bf16.msra.mxu0 %v3469_v18  ;;  %v3514_v17 = vld [vmem:[%s4810_s0 + $0x164] ss:$28 sps:$4 sm:$0xff]   ;;  %v3519_v18 = vld [vmem:[%s4809_s1 + $0x188] sm:$0xff]  }
  0x7c   :  { %1867 = vmatprep.subr.bf16.mxu0 %v3600_v0  ;;  %3156 = vmatpush1.bf16.msra.mxu1 %v3788_v32  ;;  %v3440_v32 = vld [vmem:[%s4810_s0 + $0x268] ss:$28 sps:$4 sm:$0xff]  }
  0x7d   :  { %3141 = vmatprep.subr.bf16.mxu1 %v3600_v0  ;;  %v3429_v0 = vld [vmem:[%s4810_s0 + $0x234] ss:$28 sps:$4 sm:$0xff]  }
  0x7f   :  { %1868 = vmatpush1.bf16.msra.mxu0 %v3476_v19  ;;  %v3526_v19 = vld [vmem:[%s4809_s1 + $0x190] sm:$0xff]  }
  0x80   :  { %3157 = vmatpush1.bf16.msra.mxu1 %v3799_v34  ;;  %v3442_v34 = vld [vmem:[%s4810_s0 + $0x2a4] ss:$28 sps:$4 sm:$0xff]  }
  0x81   :  { %1518 = vmatmul.mubr.bf16.gmra.mrb[32].mxu1 %v3419_v20  ;;  %3066 = vmatprep.subr.bf16.mxu1 %v3997_v21  ;;  %v3517_v20 = vld [vmem:[%s4810_s0 + $0x3f8] ss:$28 sps:$4 sm:$0xff]  }
  0x82   :  { %1726 = vmatmul.mubr.bf16.gmra.mrb[32].mxu0 %v3420_v22  ;;  %1525 = vmatprep.mubr.bf16.mxu1 %v3422_v23  ;;  %v3518_v22 = vld [vmem:[%s4810_s0 + $0x160] ss:$28 sps:$4 sm:$0xff]   ;;  %v3520_v23 = vld [vmem:[%s4810_s0 + $0x434] ss:$28 sps:$4 sm:$0xff]  }
  0x83   :  { %1733 = vmatprep.mubr.bf16.mxu0 %v3424_v24  ;;  %v3527_v24 = vld [vmem:[%s4809_s1 + $0x198] sm:$0xff]  }
  0x89   :  { %1526 = vmatmul.mubr.bf16.gmra.mrb[36].mxu1 %v3426_v25  ;;  %v3534_v25 = vld [vmem:[%s4809_s1 + $0x1a0] sm:$0xff]  }
  0x8a   :  { %1734 = vmatmul.mubr.bf16.gmra.mrb[36].mxu0 %v3427_v26  ;;  %1533 = vmatprep.mubr.bf16.mxu1 %v3429_v0  ;;  %v3524_v26 = vld [vmem:[%s4810_s0 + $0x430] ss:$28 sps:$4 sm:$0xff]   ;;  %v3525_v0 = vld [vmem:[%s4810_s0 + $0x198] ss:$28 sps:$4 sm:$0xff]  }
  0x8b   :  { %1741 = vmatprep.mubr.bf16.mxu0 %v3431_v27  ;;  %v3528_v27 = vld [vmem:[%s4810_s0 + $0x46c] ss:$28 sps:$4 sm:$0xff]  }
  0x91   :  { %1534 = vmatmul.mubr.bf16.gmra.mrb[40].mxu1 %v3433_v28  ;;  %v3530_v28 = vld [vmem:[%s4810_s0 + $0x1d4] ss:$28 sps:$4 sm:$0xff]  }
  0x92   :  { %1742 = vmatmul.mubr.bf16.gmra.mrb[40].mxu0 %v3434_v29  ;;  %1541 = vmatprep.mubr.bf16.mxu1 %v3436_v30  ;;  %v3535_v29 = vld [vmem:[%s4809_s1 + $0x1a8] sm:$0xff]   ;;  %v184_v30 = vld [vmem:[%s4810_s0 + $0x4a0] sm:$0xff] }
  0x93   :  { %1749 = vmatprep.mubr.bf16.mxu0 %v3438_v31  ;;  %v3541_v31 = vld [vmem:[%s4809_s1 + $0x1b0] sm:$0xff]  }
  0x99   :  { %1542 = vmatmul.mubr.bf16.gmra.mrb[44].mxu1 %v3440_v32  ;;  %v3532_v32 = vld [vmem:[%s4810_s0 + $0x468] ss:$28 sps:$4 sm:$0xff]  }
  0x9a   :  { %1750 = vmatmul.mubr.bf16.gmra.mrb[44].mxu0 %v3441_v33  ;;  %1549 = vmatprep.mubr.bf16.mxu1 %v3442_v34  ;;  %v3533_v33 = vld [vmem:[%s4810_s0 + $0x1d0] ss:$28 sps:$4 sm:$0xff]   ;;  %v2763_v34 = vcombine.high %v184_v30, %v184_v30 }
  0x9b   :  { %1757 = vmatprep.mubr.bf16.mxu0 %v3444_v35  ;;  %v3537_v35 = vld [vmem:[%s4810_s0 + $0x20c] ss:$28 sps:$4 sm:$0xff]  }
  0xa1   :  { %1550 = vmatmul.mubr.bf16.gmra.mrb[48].mxu1 %v3447_v36  ;;  %v3542_v36 = vld [vmem:[%s4809_s1 + $0x1b8] sm:$0xff]  }
  0xa2   :  { %1758 = vmatmul.mubr.bf16.gmra.mrb[48].mxu0 %v3448_v37  ;;  %1557 = vmatprep.mubr.bf16.mxu1 %v3449_v38  ;;  %v2762_v37 = vcombine.low %v184_v30, %v184_v30  ;;  %v3540_v38 = vld [vmem:[%s4810_s0 + $0x208] ss:$28 sps:$4 sm:$0xff]  }
  0xa3   :  { %1765 = vmatprep.mubr.bf16.mxu0 %v3451_v39  ;;  %v3545_v39 = vld [vmem:[%s4810_s0 + $0x18] ss:$28 sps:$4 sm:$0xff]   ;;  %v3580_v30 = vld [vmem:[%s4810_s0 + $0x328] ss:$28 sps:$4 sm:$0xff]  }
  0xa9   :  { %1558 = vmatmul.mubr.bf16.gmra.mrb[52].mxu1 %v3454_v40  ;;  %v3543_v40 = vld [vmem:[%s4810_s0 + $0x244] ss:$28 sps:$4 sm:$0xff]  }
  0xaa   :  { %1766 = vmatmul.mubr.bf16.gmra.mrb[52].mxu0 %v3455_v41  ;;  %1565 = vmatprep.mubr.bf16.mxu1 %v3456_v42  ;;  %v3547_v42 = vld [vmem:[%s4810_s0 + $0x50] ss:$28 sps:$4 sm:$0xff]  }
  0xab   :  { %1773 = vmatprep.mubr.bf16.mxu0 %v3458_v43 }
  0xb1   :  { %1566 = vmatmul.mubr.bf16.gmra.mrb[56].mxu1 %v3460_v44  ;;  %v3546_v44 = vld [vmem:[%s4810_s0 + $0x240] ss:$28 sps:$4 sm:$0xff]  }
  0xb2   :  { %1774 = vmatmul.mubr.bf16.gmra.mrb[56].mxu0 %v3461_v45  ;;  %1573 = vmatprep.mubr.bf16.mxu1 %v3463_v46  ;;  %v3550_v46 = vld [vmem:[%s4810_s0 + $0x88] ss:$28 sps:$4 sm:$0xff]  }
  0xb3   :  { %1781 = vmatprep.mubr.bf16.mxu0 %v3465_v47 }
  0xb9   :  { %1574 = vmatmul.mubr.bf16.gmra.mrb[60].mxu1 %v3467_v48  ;;  %v3548_v48 = vld [vmem:[%s4810_s0 + $0x27c] ss:$28 sps:$4 sm:$0xff]  }
  0xba   :  { %1782 = vmatmul.mubr.bf16.gmra.mrb[60].mxu0 %v3468_v49  ;;  %1581 = vmatprep.mubr.bf16.mxu1 %v3470_v50  ;;  %v3552_v50 = vld [vmem:[%s4810_s0 + $0xc0] ss:$28 sps:$4 sm:$0xff]  }
  0xbb   :  { %1789 = vmatprep.mubr.bf16.mxu0 %v3472_v51 }
  0xc1   :  { %1582 = vmatmul.mubr.bf16.gmra.mrb[64].mxu1 %v3474_v52  ;;  %v3551_v52 = vld [vmem:[%s4810_s0 + $0x278] ss:$28 sps:$4 sm:$0xff]  }
  0xc2   :  { %1790 = vmatmul.mubr.bf16.gmra.mrb[64].mxu0 %v3475_v53  ;;  %1589 = vmatprep.mubr.bf16.mxu1 %v3477_v54  ;;  %v3555_v54 = vld [vmem:[%s4810_s0 + $0xf8] ss:$28 sps:$4 sm:$0xff]  }
  0xc3   :  { %1869 = vmatprep.mubr.bf16.mxu0 %v3481_v55 }
  0xc9   :  { %1590 = vmatmul.mubr.bf16.gmra.mrb[68].mxu1 %v3482_v56  ;;  %v3553_v56 = vld [vmem:[%s4810_s0 + $0x2b4] ss:$28 sps:$4 sm:$0xff]  }
  0xca   :  { %1870 = vmatmul.mubr.bf16.vlgmr.msra.gmra.mrb[0].mxu0 %v3479_v57  ;;  %1597 = vmatprep.mubr.bf16.mxu1 %v3483_v58  ;;  %v3557_v58 = vld [vmem:[%s4810_s0 + $0x130] ss:$28 sps:$4 sm:$0xff]  }
  0xcb   :  { %1877 = vmatprep.mubr.bf16.mxu0 %v3485_v59 }
  0xd1   :  { %1598 = vmatmul.mubr.bf16.gmra.mrb[72].mxu1 %v3487_v60  ;;  %v3556_v60 = vld [vmem:[%s4810_s0 + $0x2b0] ss:$28 sps:$4 sm:$0xff]  }
  0xd2   :  { %1878 = vmatmul.mubr.bf16.gmra.mrb[4].mxu0 %v3488_v61  ;;  %1605 = vmatprep.mubr.bf16.mxu1 %v3489_v62  ;;  %v3560_v62 = vld [vmem:[%s4810_s0 + $0x168] ss:$28 sps:$4 sm:$0xff]  }
  0xd3   :  { %1885 = vmatprep.mubr.bf16.mxu0 %v3491_v63 }
  0xd9   :  { %1606 = vmatmul.mubr.bf16.gmra.mrb[76].mxu1 %v3493_v1  ;;  %v3558_v1 = vld [vmem:[%s4810_s0 + $0x2ec] ss:$28 sps:$4 sm:$0xff]  }
  0xda   :  { %1886 = vmatmul.mubr.bf16.gmra.mrb[8].mxu0 %v3494_v2  ;;  %1613 = vmatprep.mubr.bf16.mxu1 %v3495_v3  ;;  %v3562_v3 = vld [vmem:[%s4810_s0 + $0x1a0] ss:$28 sps:$4 sm:$0xff]  }
  0xdb   :  { %1893 = vmatprep.mubr.bf16.mxu0 %v3497_v4 }
  0xe1   :  { %1614 = vmatmul.mubr.bf16.gmra.mrb[80].mxu1 %v3499_v6 }
  0xe2   :  { %1894 = vmatmul.mubr.bf16.gmra.mrb[12].mxu0 %v3500_v7  ;;  %1621 = vmatprep.mubr.bf16.mxu1 %v2761_v8  ;;  %v3565_v7 = vld [vmem:[%s4810_s0 + $0x1d8] ss:$28 sps:$4 sm:$0xff]  }
  0xe3   :  { %1901 = vmatprep.mubr.bf16.mxu0 %v3502_v9  ;;  %v3563_v9 = vld [vmem:[%s4810_s0 + $0x324] ss:$28 sps:$4 sm:$0xff]  }
  0xe9   :  { %1622 = vmatmul.mubr.bf16.gmra.mrb[84].mxu1 %v2760_v10 }
  0xea   :  { %1902 = vmatmul.mubr.bf16.gmra.mrb[16].mxu0 %v3505_v11  ;;  %1797 = vmatprep.mubr.bf16.mxu1 %v3508_v12  ;;  %v3567_v11 = vld [vmem:[%s4810_s0 + $0x210] ss:$28 sps:$4 sm:$0xff]  }
  0xeb   :  { %1909 = vmatprep.mubr.bf16.mxu0 %v3509_v13  ;;  %v3566_v13 = vld [vmem:[%s4810_s0 + $0x320] ss:$28 sps:$4 sm:$0xff]  }
  0xf1   :  { %1798 = vmatmul.mubr.bf16.vlgmr.msra.gmra.mrb[68].mxu1 %v3506_v14 }
  0xf2   :  { %1910 = vmatmul.mubr.bf16.gmra.mrb[20].mxu0 %v3511_v15  ;;  %1805 = vmatprep.mubr.bf16.mxu1 %v3512_v16  ;;  %v3570_v15 = vld [vmem:[%s4810_s0 + $0x248] ss:$28 sps:$4 sm:$0xff]  }
  0xf3   :  { %1917 = vmatprep.mubr.bf16.mxu0 %v3514_v17  ;;  %3067 = vmatpush3.bf16.msra.mxu1 %v3997_v21  ;;  %v3522_v21 = vld [vmem:[%s4810_s0 + $0x19c] ss:$28 sps:$4 sm:$0xff]  }
  0xf4   :  { %3068 = vmatprep.subr.bf16.mxu1 %v3519_v18  ;;  %v3568_v17 = vld [vmem:[%s4810_s0 + $0x35c] ss:$28 sps:$4 sm:$0xff]  }
  0xf7   :  { %3069 = vmatpush3.bf16.msra.mxu1 %v3519_v18 }
  0xf8   :  { %3070 = vmatprep.subr.bf16.mxu1 %v3526_v19 }
  0xf9   :  { %1806 = vmatmul.mubr.bf16.gmra.mrb[72].mxu1 %v3517_v20 }
  0xfa   :  { %1918 = vmatmul.mubr.bf16.gmra.mrb[24].mxu0 %v3518_v22  ;;  %1813 = vmatprep.mubr.bf16.mxu1 %v3520_v23  ;;  %v3571_v22 = vld [vmem:[%s4810_s0 + $0x358] ss:$28 sps:$4 sm:$0xff]  }
  0xfb   :  { %1925 = vmatprep.mubr.bf16.mxu0 %v3522_v21  ;;  %3071 = vmatpush3.bf16.msra.mxu1 %v3526_v19  ;;  %v3572_v19 = vld [vmem:[%s4810_s0 + $0x280] ss:$28 sps:$4 sm:$0xff]   ;;  %v3575_v21 = vld [vmem:[%s4810_s0 + $0x2b8] ss:$28 sps:$4 sm:$0xff]  }
  0xfc   :  { %3072 = vmatprep.subr.bf16.mxu1 %v3527_v24 }
  0xff   :  { %3073 = vmatpush3.bf16.msra.mxu1 %v3527_v24 }
 0x100   :  { %3074 = vmatprep.subr.bf16.mxu1 %v3534_v25 }
 0x101   :  { %1814 = vmatmul.mubr.bf16.gmra.mrb[76].mxu1 %v3524_v26 }
 0x102   :  { %1926 = vmatmul.mubr.bf16.gmra.mrb[28].mxu0 %v3525_v0  ;;  %1821 = vmatprep.mubr.bf16.mxu1 %v3528_v27  ;;  %v3577_v0 = vld [vmem:[%s4810_s0 + $0x2f0] ss:$28 sps:$4 sm:$0xff]  }
 0x103   :  { %1933 = vmatprep.mubr.bf16.mxu0 %v3530_v28  ;;  %3075 = vmatpush3.bf16.msra.mxu1 %v3534_v25  ;;  %v3573_v25 = vld [vmem:[%s4810_s0 + $0x394] ss:$28 sps:$4 sm:$0xff]  }
 0x104   :  { %3076 = vmatprep.subr.bf16.mxu1 %v3535_v29  ;;  %v3576_v28 = vld [vmem:[%s4810_s0 + $0x390] ss:$28 sps:$4 sm:$0xff]  }
 0x107   :  { %3077 = vmatpush3.bf16.msra.mxu1 %v3535_v29 }
 0x108   :  { %3078 = vmatprep.subr.bf16.mxu1 %v3541_v31 }
 0x109   :  { %1822 = vmatmul.mubr.bf16.gmra.mrb[80].mxu1 %v3532_v32  ;;  %v3578_v32 = vld [vmem:[%s4810_s0 + $0x3cc] ss:$28 sps:$4 sm:$0xff]  }
 0x10a   :  { %1934 = vmatmul.mubr.bf16.gmra.mrb[32].mxu0 %v3533_v33  ;;  %1829 = vmatprep.mubr.bf16.mxu1 %v2763_v34  ;;  %v3582_v34 = vld [vmem:[%s4810_s0 + $0x360] ss:$28 sps:$4 sm:$0xff]  }
 0x10b   :  { %1941 = vmatprep.mubr.bf16.mxu0 %v3537_v35  ;;  %3079 = vmatpush3.bf16.msra.mxu1 %v3541_v31 }
 0x10c   :  { %3080 = vmatprep.subr.bf16.mxu1 %v3542_v36 }
 0x10f   :  { %3081 = vmatpush3.bf16.msra.mxu1 %v3542_v36  ;;  %v3581_v36 = vld [vmem:[%s4810_s0 + $0x3c8] ss:$28 sps:$4 sm:$0xff]  }
 0x111   :  { %1830 = vmatmul.mubr.bf16.gmra.mrb[88].mxu1 %v2762_v37 }
 0x112   :  { %1942 = vmatmul.mubr.bf16.gmra.mrb[36].mxu0 %v3540_v38  ;;  %3082 = vmatprep.mubr.bf16.mxu1 %v3545_v39  ;;  %v3585_v38 = vld [vmem:[%s4810_s0 + $0x398] ss:$28 sps:$4 sm:$0xff]  }
 0x113   :  { %1949 = vmatprep.mubr.bf16.mxu0 %v3543_v40  ;;  %v3583_v40 = vld [vmem:[%s4810_s0 + $0x404] ss:$28 sps:$4 sm:$0xff]  }
 0x114   :  { %v4245_v41 = vpop.f32.mrb[0].mxu1 }
 0x115   :  { %v1457_v43 = vpop.f32.mrb[1].mxu1 }
 0x116   :  { %v4253_v45 = vpop.f32.mrb[2].mxu1  ;;  %v3587_v43 = vld [vmem:[%s4810_s0 + $0x3d0] ss:$28 sps:$4 sm:$0xff]  }
 0x117   :  { %v1460_v47 = vpop.f32.mrb[3].mxu1 }
 0x119   :  { %3083 = vmatmul.mubr.bf16.vlgmr.msra.gmra.mrb[92].mxu1 %v3547_v42 }
 0x11a   :  { %1950 = vmatmul.mubr.bf16.gmra.mrb[40].mxu0 %v3546_v44  ;;  %3086 = vmatprep.mubr.bf16.mxu1 %v3550_v46  ;;  %v3586_v46 = vld [vmem:[%s4810_s0 + $0x400] ss:$28 sps:$4 sm:$0xff]  }
 0x11b   :  { %1957 = vmatprep.mubr.bf16.mxu0 %v3548_v48  ;;  %v3590_v48 = vld [vmem:[%s4810_s0 + $0x408] ss:$28 sps:$4 sm:$0xff]  }
 0x11c   :  { %v4261_v49 = vpop.f32.mrb[4].mxu1 }
 0x11d   :  { %v1465_v51 = vpop.f32.mrb[5].mxu1 }
 0x11e   :  { %v4269_v53 = vpop.f32.mrb[6].mxu1  ;;  %v3588_v51 = vld [vmem:[%s4810_s0 + $0x43c] ss:$28 sps:$4 sm:$0xff]  }
 0x11f   :  { %v1468_v55 = vpop.f32.mrb[7].mxu1 }
 0x121   :  { %3087 = vmatmul.mubr.bf16.gmra.mrb[96].mxu1 %v3552_v50 }
 0x122   :  { %1958 = vmatmul.mubr.bf16.gmra.mrb[44].mxu0 %v3551_v52  ;;  %3090 = vmatprep.mubr.bf16.mxu1 %v3555_v54  ;;  %v3592_v54 = vld [vmem:[%s4810_s0 + $0x440] ss:$28 sps:$4 sm:$0xff]  }
 0x123   :  { %1965 = vmatprep.mubr.bf16.mxu0 %v3553_v56  ;;  %v3591_v56 = vld [vmem:[%s4810_s0 + $0x438] ss:$28 sps:$4 sm:$0xff]  }
 0x124   :  { %v4277_v57 = vpop.f32.mrb[8].mxu1 }
 0x125   :  { %v1473_v59 = vpop.f32.mrb[9].mxu1 }
 0x126   :  { %v4285_v61 = vpop.f32.mrb[10].mxu1  ;;  %v3596_v59 = vld [vmem:[%s4810_s0 + $0x478] ss:$28 sps:$4 sm:$0xff]  }
 0x127   :  { %v1476_v63 = vpop.f32.mrb[11].mxu1 }
 0x129   :  { %3091 = vmatmul.mubr.bf16.gmra.mrb[100].mxu1 %v3557_v58 }
 0x12a   :  { %1966 = vmatmul.mubr.bf16.gmra.mrb[48].mxu0 %v3556_v60  ;;  %3094 = vmatprep.mubr.bf16.mxu1 %v3560_v62  ;;  %v3593_v62 = vld [vmem:[%s4810_s0 + $0x474] ss:$28 sps:$4 sm:$0xff]  }
 0x12b   :  { %1973 = vmatprep.mubr.bf16.mxu0 %v3558_v1  ;;  %v185_v1 = vld [vmem:[%s4810_s0 + $0x4a8] sm:$0xff] }
 0x12c   :  { %v4293_v2 = vpop.f32.mrb[12].mxu1 }
 0x12d   :  { %v1481_v4 = vpop.f32.mrb[13].mxu1 }
 0x12e   :  { %v4301_v6 = vpop.f32.mrb[14].mxu1  ;;  %v3597_v4 = vld [vmem:[%s4810_s0 + $0x4b0] ss:$0 sps:$4 sm:$0xff]  }
 0x12f   :  { %v1484_v8 = vpop.f32.mrb[15].mxu1 }
 0x131   :  { %3095 = vmatmul.mubr.bf16.gmra.mrb[104].mxu1 %v3562_v3 }
 0x132   :  { %1974 = vmatmul.mubr.bf16.gmra.mrb[52].mxu0 %v3561_v5  ;;  %3098 = vmatprep.mubr.bf16.mxu1 %v3565_v7  ;;  %v3595_v5 = vld [vmem:[%s4810_s0 + $0x470] ss:$28 sps:$4 sm:$0xff]  }
 0x133   :  { %1981 = vmatprep.mubr.bf16.mxu0 %v3563_v9  ;;  %v2765_v9 = vcombine.high %v185_v1, %v185_v1 }
 0x134   :  { %v4309_v10 = vpop.f32.mrb[16].mxu1 }
 0x135   :  { %v1489_v12 = vpop.f32.mrb[17].mxu1 }
 0x136   :  { %v4317_v14 = vpop.f32.mrb[18].mxu1 }
 0x137   :  { %v1492_v16 = vpop.f32.mrb[19].mxu1 }
 0x139   :  { %3099 = vmatmul.mubr.bf16.gmra.mrb[108].mxu1 %v3567_v11 }
 0x13a   :  { %1982 = vmatmul.mubr.bf16.gmra.mrb[56].mxu0 %v3566_v13  ;;  %3102 = vmatprep.mubr.bf16.mxu1 %v3570_v15  ;;  %v2764_v13 = vcombine.low %v185_v1, %v185_v1 }
 0x13b   :  { %1989 = vmatprep.mubr.bf16.mxu0 %v3568_v17 }
 0x13c   :  { %v4325_v18 = vpop.f32.mrb[20].mxu1 }
 0x13d   :  { %v1497_v20 = vpop.f32.mrb[21].mxu1 }
 0x13e   :  { %v4333_v23 = vpop.f32.mrb[22].mxu1 }
 0x13f   :  { %v1500_v24 = vpop.f32.mrb[23].mxu1 }
 0x141   :  { %3103 = vmatmul.mubr.bf16.gmra.mrb[112].mxu1 %v3572_v19 }
 0x142   :  { %1990 = vmatmul.mubr.bf16.gmra.mrb[60].mxu0 %v3571_v22  ;;  %3106 = vmatprep.mubr.bf16.mxu1 %v3575_v21 }
 0x143   :  { %1997 = vmatprep.mubr.bf16.mxu0 %v3573_v25 }
 0x144   :  { %v4341_v26 = vpop.f32.mrb[24].mxu1 }
 0x145   :  { %v1505_v27 = vpop.f32.mrb[25].mxu1 }
 0x146   :  { %v4349_v29 = vpop.f32.mrb[26].mxu1 }
 0x147   :  { %v1508_v31 = vpop.f32.mrb[27].mxu1 }
 0x149   :  { %3107 = vmatmul.mubr.bf16.gmra.mrb[116].mxu1 %v3577_v0 }
 0x14a   :  { %1998 = vmatmul.mubr.bf16.gmra.mrb[64].mxu0 %v3576_v28  ;;  %3110 = vmatprep.mubr.bf16.mxu1 %v3580_v30 }
 0x14b   :  { %2005 = vmatprep.mubr.bf16.mxu0 %v3578_v32 }
 0x14c   :  { %v4357_v33 = vpop.f32.mrb[28].mxu1 }
 0x14d   :  { %v1513_v35 = vpop.f32.mrb[29].mxu1 }
 0x14e   :  { %v4365_v37 = vpop.f32.mrb[30].mxu1 }
 0x14f   :  { %v1516_v39 = vpop.f32.mrb[31].mxu1 }
 0x151   :  { %3111 = vmatmul.mubr.bf16.gmra.mrb[120].mxu1 %v3582_v34 }
 0x152   :  { %2006 = vmatmul.mubr.bf16.gmra.mrb[68].mxu0 %v3581_v36  ;;  %3114 = vmatprep.mubr.bf16.mxu1 %v3585_v38 }
 0x153   :  { %2013 = vmatprep.mubr.bf16.mxu0 %v3583_v40 }
 0x154   :  { %v4373_v42 = vpop.f32.mrb[32].mxu1 }
 0x155   :  { %v1521_v44 = vpop.f32.mrb[33].mxu1 }
 0x156   :  { %v4381_v47 = vpop.f32.mrb[34].mxu1  ;;  %v4445_v44 = vld [vmem:[%s4811_s2] ss:$0 sm:$0xff] }
 0x157   :  { %v1524_v50 = vpop.f32.mrb[35].mxu1  ;;  %v1467_v1 = vadd.f32 %v4445_v44, %v4269_v53 }
 0x158   :  { %v1459_v50 = vadd.f32 %v4445_v44, %v4253_v45 }
 0x159   :  { %3115 = vmatmul.mubr.bf16.gmra.mrb[124].mxu1 %v3587_v43 }
 0x15a   :  { %2014 = vmatmul.mubr.bf16.gmra.mrb[72].mxu0 %v3586_v46  ;;  %3118 = vmatprep.mubr.bf16.mxu1 %v3590_v48  ;;  %v1456_v46 = vadd.f32 %v4445_v44, %v4245_v41 }
 0x15b   :  { %2021 = vmatprep.mubr.bf16.mxu0 %v3588_v51 }
 0x15c   :  { %v4389_v52 = vpop.f32.mrb[36].mxu1 }
 0x15d   :  { %v1529_v55 = vpop.f32.mrb[37].mxu1 }
 0x15e   :  { %v4397_v58 = vpop.f32.mrb[38].mxu1 }
 0x15f   :  { %v1532_v60 = vpop.f32.mrb[39].mxu1 }
 0x160   :  { %v1464_v60 = vadd.f32 %v4445_v44, %v4261_v49 }
 0x161   :  { %3119 = vmatmul.mubr.bf16.gmra.mrb[128].mxu1 %v3592_v54 }
 0x162   :  { %2022 = vmatmul.mubr.bf16.gmra.mrb[76].mxu0 %v3591_v56  ;;  %3122 = vmatprep.mubr.bf16.mxu1 %v3596_v59 }
 0x163   :  { %2029 = vmatprep.mubr.bf16.mxu0 %v3593_v62 }
 0x164   :  { %v4405_v63 = vpop.f32.mrb[40].mxu1 }
 0x165   :  { %v1537_v3 = vpop.f32.mrb[41].mxu1 }
 0x166   :  { %v4416_v7 = vpop.f32.mrb[42].mxu1 }
 0x167   :  { %v1540_v8 = vpop.f32.mrb[43].mxu1 }
 0x168   :  { %v1472_v8 = vadd.f32 %v4445_v44, %v4277_v57 }
 0x169   :  { %3123 = vmatmul.mubr.bf16.gmra.mrb[132].mxu1 %v3597_v4 }
 0x16a   :  { %2030 = vmatmul.mubr.bf16.gmra.mrb[80].mxu0 %v3595_v5 }
 0x16b   :  { %2037 = vmatprep.mubr.bf16.mxu0 %v2765_v9 }
 0x16c   :  { %v4418_v11 = vpop.f32.mrb[44].mxu1 }
 0x16d   :  { %v1545_v12 = vpop.f32.mrb[45].mxu1 }
 0x16e   :  { %v4420_v15 = vpop.f32.mrb[46].mxu1  ;;  %v1475_v12 = vadd.f32 %v4445_v44, %v4285_v61 }
 0x16f   :  { %v1548_v16 = vpop.f32.mrb[47].mxu1 }
 0x172   :  { %2038 = vmatmul.mubr.bf16.gmra.mrb[84].mxu0 %v2764_v13 }
 0x174   :  { %v4422_v17 = vpop.f32.mrb[48].mxu1 }
 0x175   :  { %v1553_v19 = vpop.f32.mrb[49].mxu1 }
 0x176   :  { %v4424_v20 = vpop.f32.mrb[50].mxu1 }
 0x177   :  { %v1556_v22 = vpop.f32.mrb[51].mxu1 }
 0x178   :  { %v1480_v22 = vadd.f32 %v4445_v44, %v4293_v2  ;;  %v1491_v2 = vadd.f32 %v4445_v44, %v4317_v14 }
 0x17c   :  { %v4426_v21 = vpop.f32.mrb[52].mxu1 }
 0x17d   :  { %v1561_v24 = vpop.f32.mrb[53].mxu1 }
 0x17e   :  { %v4428_v25 = vpop.f32.mrb[54].mxu1 }
 0x17f   :  { %v1564_v0 = vpop.f32.mrb[55].mxu1 }
 0x180   :  { %v1483_v0 = vadd.f32 %v4445_v44, %v4301_v6 }
 0x184   :  { %v4430_v27 = vpop.f32.mrb[56].mxu1 }
 0x185   :  { %v1569_v28 = vpop.f32.mrb[57].mxu1 }
 0x186   :  { %v4432_v30 = vpop.f32.mrb[58].mxu1 }
 0x187   :  { %v1572_v31 = vpop.f32.mrb[59].mxu1 }
 0x18c   :  { %v4434_v32 = vpop.f32.mrb[60].mxu1 }
 0x18d   :  { %v1577_v34 = vpop.f32.mrb[61].mxu1 }
 0x18e   :  { %v4436_v35 = vpop.f32.mrb[62].mxu1 }
 0x18f   :  { %v1580_v36 = vpop.f32.mrb[63].mxu1 }
 0x190   :  { %v1488_v36 = vadd.f32 %v4445_v44, %v4309_v10 }
 0x194   :  { %v4438_v38 = vpop.f32.mrb[64].mxu1 }
 0x195   :  { %v1585_v39 = vpop.f32.mrb[65].mxu1 }
 0x196   :  { %v4440_v40 = vpop.f32.mrb[66].mxu1 }
 0x197   :  { %v1588_v43 = vpop.f32.mrb[67].mxu1 }
 0x19d   :  { %v1871_v48 = vpop.f32.mrb[0].mxu0 }
 0x19e   :  { %v4451_v51 = vadd.f32 %v1871_v48, %v1456_v46  ;;  %v1873_v54 = vpop.f32.mrb[1].mxu0 }
 0x19f   :  { %v1874_v55 = vpop.f32.mrb[2].mxu0 }
 0x1a0   :  { %v4453_v56 = vadd.f32 %v1874_v55, %v1459_v50  ;;  %v1876_v59 = vpop.f32.mrb[3].mxu0 }
 0x1a5   :  { %v1879_v62 = vpop.f32.mrb[4].mxu0 }
 0x1a6   :  { %v4459_v3 = vadd.f32 %v1879_v62, %v1464_v60  ;;  %v1881_v41 = vpop.f32.mrb[5].mxu0  ;;  %v1496_v62 = vadd.f32 %v4445_v44, %v4325_v18  ;;  %v1504_v18 = vadd.f32 %v4445_v44, %v4341_v26  ;;  %v1512_v26 = vadd.f32 %v4445_v44, %v4357_v33 }
 0x1a7   :  { %v1882_v4 = vpop.f32.mrb[6].mxu0  ;;  %v1520_v33 = vadd.f32 %v4445_v44, %v4373_v42  ;;  %v1528_v42 = vadd.f32 %v4445_v44, %v4389_v52  ;;  %v1536_v52 = vadd.f32 %v4445_v44, %v4405_v63 }
 0x1a8   :  { %v4461_v5 = vadd.f32 %v1882_v4, %v1467_v1  ;;  %v1884_v45 = vpop.f32.mrb[7].mxu0  ;;  %v1499_v4 = vadd.f32 %v4445_v44, %v4333_v23  ;;  %v1507_v23 = vadd.f32 %v4445_v44, %v4349_v29  ;;  %v1515_v29 = vadd.f32 %v4445_v44, %v4365_v37 }
 0x1a9   :  { %v1523_v37 = vadd.f32 %v4445_v44, %v4381_v47 }
 0x1ad   :  { %v1887_v9 = vpop.f32.mrb[8].mxu0 }
 0x1ae   :  { %v4467_v13 = vadd.f32 %v1887_v9, %v1472_v8  ;;  %v1889_v49 = vpop.f32.mrb[9].mxu0 }
 0x1af   :  { %v1890_v16 = vpop.f32.mrb[10].mxu0 }
 0x1b0   :  { %v4469_v19 = vadd.f32 %v1890_v16, %v1475_v12  ;;  %v1892_v53 = vpop.f32.mrb[11].mxu0 }
 0x1b5   :  { %v1895_v24 = vpop.f32.mrb[12].mxu0 }
 0x1b6   :  { %v4475_v28 = vadd.f32 %v1895_v24, %v1480_v22  ;;  %v1897_v57 = vpop.f32.mrb[13].mxu0 }
 0x1b7   :  { %v1898_v31 = vpop.f32.mrb[14].mxu0 }
 0x1b8   :  { %v4477_v34 = vadd.f32 %v1898_v31, %v1483_v0  ;;  %v1900_v61 = vpop.f32.mrb[15].mxu0 }
 0x1bc   :  { %v1623_v39 = vpop.f32.mrb[84].mxu1 }
 0x1bd   :  { %v1903_v43 = vpop.f32.mrb[16].mxu0  ;;  %v1625_v46 = vpop.f32.mrb[85].mxu1 }
 0x1be   :  { %v4483_v48 = vadd.f32 %v1903_v43, %v1488_v36  ;;  %v1905_v50 = vpop.f32.mrb[17].mxu0  ;;  %v1626_v6 = vpop.f32.mrb[86].mxu1 }
 0x1bf   :  { %v1906_v54 = vpop.f32.mrb[18].mxu0  ;;  %v1627_v55 = vpop.f32.mrb[87].mxu1 }
 0x1c0   :  { %v4485_v59 = vadd.f32 %v1906_v54, %v1491_v2  ;;  %v1908_v60 = vpop.f32.mrb[19].mxu0 }
 0x1c4   :  { %v4489_v1 = vpop.f32.mrb[68].mxu1 }
 0x1c5   :  { %v1911_v10 = vpop.f32.mrb[20].mxu0  ;;  %v1801_v41 = vpop.f32.mrb[69].mxu1 }
 0x1c6   :  { %v4493_v14 = vadd.f32 %v1911_v10, %v1496_v62  ;;  %v1913_v45 = vpop.f32.mrb[21].mxu0  ;;  %v4495_v8 = vpop.f32.mrb[70].mxu1 }
 0x1c7   :  { %v1914_v9 = vpop.f32.mrb[22].mxu0  ;;  %v1804_v12 = vpop.f32.mrb[71].mxu1 }
 0x1c8   :  { %v4497_v49 = vadd.f32 %v1914_v9, %v1499_v4  ;;  %v1916_v16 = vpop.f32.mrb[23].mxu0 }
 0x1cc   :  { %v4501_v53 = vpop.f32.mrb[72].mxu1 }
 0x1cd   :  { %v1919_v22 = vpop.f32.mrb[24].mxu0  ;;  %v1809_v24 = vpop.f32.mrb[73].mxu1 }
 0x1ce   :  { %v4505_v0 = vadd.f32 %v1919_v22, %v1504_v18  ;;  %v1921_v57 = vpop.f32.mrb[25].mxu0  ;;  %v4507_v31 = vpop.f32.mrb[74].mxu1 }
 0x1cf   :  { %v1922_v61 = vpop.f32.mrb[26].mxu0  ;;  %v1812_v36 = vpop.f32.mrb[75].mxu1 }
 0x1d0   :  { %v4509_v43 = vadd.f32 %v1922_v61, %v1507_v23  ;;  %v1924_v46 = vpop.f32.mrb[27].mxu0  ;;  %v1624_v36 = vadd.f32 %v4445_v44, %v1623_v39 }
 0x1d4   :  { %v4513_v2 = vpop.f32.mrb[76].mxu1 }
 0x1d5   :  { %v1927_v50 = vpop.f32.mrb[28].mxu0  ;;  %v1817_v6 = vpop.f32.mrb[77].mxu1 }
 0x1d6   :  { %v4517_v54 = vadd.f32 %v1927_v50, %v1512_v26  ;;  %v1929_v55 = vpop.f32.mrb[29].mxu0  ;;  %v4519_v60 = vpop.f32.mrb[78].mxu1  ;;  %v1531_v6 = vadd.f32 %v4445_v44, %v4397_v58  ;;  %v1539_v58 = vadd.f32 %v4445_v44, %v4416_v7 }
 0x1d7   :  { %v1930_v62 = vpop.f32.mrb[30].mxu0  ;;  %v1820_v10 = vpop.f32.mrb[79].mxu1 }
 0x1d8   :  { %v4521_v41 = vadd.f32 %v1930_v62, %v1515_v29  ;;  %v1932_v4 = vpop.f32.mrb[31].mxu0 }
 0x1dc   :  { %v4525_v45 = vpop.f32.mrb[80].mxu1 }
 0x1dd   :  { %v1935_v9 = vpop.f32.mrb[32].mxu0  ;;  %v1825_v12 = vpop.f32.mrb[81].mxu1 }
 0x1de   :  { %v4529_v16 = vadd.f32 %v1935_v9, %v1520_v33  ;;  %v1937_v18 = vpop.f32.mrb[33].mxu0  ;;  %v4531_v22 = vpop.f32.mrb[82].mxu1 }
 0x1df   :  { %v1938_v24 = vpop.f32.mrb[34].mxu0  ;;  %v1828_v23 = vpop.f32.mrb[83].mxu1 }
 0x1e0   :  { %v4533_v57 = vadd.f32 %v1938_v24, %v1523_v37  ;;  %v1940_v61 = vpop.f32.mrb[35].mxu0  ;;  %v4556_v23 = vld [vmem:[%s4811_s2 + $0x1] ss:$0 sm:$0xff] }
 0x1e4   :  { %v1831_v46 = vpop.f32.mrb[88].mxu1 }
 0x1e5   :  { %v4538_v26 = vadd.f32 %v1831_v46, %v1624_v36  ;;  %v1943_v50 = vpop.f32.mrb[36].mxu0  ;;  %v1833_v47 = vpop.f32.mrb[89].mxu1 }
 0x1e6   :  { %v4542_v29 = vadd.f32 %v1943_v50, %v1528_v42  ;;  %v1945_v55 = vpop.f32.mrb[37].mxu0  ;;  %v1834_v62 = vpop.f32.mrb[90].mxu1 }
 0x1e7   :  { %v1946_v10 = vpop.f32.mrb[38].mxu0  ;;  %v1835_v4 = vpop.f32.mrb[91].mxu1 }
 0x1e8   :  { %v4544_v33 = vadd.f32 %v1946_v10, %v1531_v6  ;;  %v1948_v39 = vpop.f32.mrb[39].mxu0  ;;  %v4567_v4 = vld [vmem:[%s4811_s2 + $0x2] ss:$0 sm:$0xff] }
 0x1ec   :  { %v3084_v9 = vpop.f32.mrb[92].mxu1 }
 0x1ed   :  { %v1951_v12 = vpop.f32.mrb[40].mxu0  ;;  %v2088_v37 = vadd.f32 %v4459_v3, %v3084_v9  ;;  %v2079_v18 = vpop.f32.mrb[93].mxu1 }
 0x1ee   :  { %v4551_v24 = vadd.f32 %v1951_v12, %v1536_v52  ;;  %v1953_v61 = vpop.f32.mrb[41].mxu0  ;;  %v2080_v36 = vadd.f32 %v4451_v51, %v2079_v18  ;;  %v3085_v42 = vpop.f32.mrb[94].mxu1  ;;  %v1544_v52 = vadd.f32 %v4445_v44, %v4418_v11 }
 0x1ef   :  { %v2255_v63 = vmax.f32 %v2088_v37, 0.0  ;;  %v1954_v46 = vpop.f32.mrb[42].mxu0  ;;  %v2091_v50 = vadd.f32 %v4461_v5, %v3085_v42  ;;  %v2082_v3 = vpop.f32.mrb[95].mxu1 }
 0x1f0   :  { %v2253_v47 = vmax.f32 %v2080_v36, 0.0  ;;  %v4560_v6 = vadd.f32 %v1954_v46, %v1539_v58  ;;  %v1956_v7 = vpop.f32.mrb[43].mxu0  ;;  %v2083_v55 = vadd.f32 %v4453_v56, %v2082_v3  ;;  %v1547_v56 = vadd.f32 %v4445_v44, %v4420_v15 }
 0x1f1   :  { %v2303_v62 = vmul.f32 %v4556_v23, %v2255_v63  ;;  %v2256_v10 = vmax.f32 %v2091_v50, 0.0 }
 0x1f2   :  { %v2301_v51 = vmul.f32 %v4556_v23, %v2253_v47  ;;  %v2254_v39 = vmax.f32 %v2083_v55, 0.0 }
 0x1f3   :  { %v2304_v5 = vmul.f32 %v4556_v23, %v2256_v10  ;;  %v2351_v37 = vadd.f32 %v4567_v4, %v2303_v62 }
 0x1f4   :  { %v2302_v9 = vmul.f32 %v4556_v23, %v2254_v39  ;;  %v3088_v12 = vpop.f32.mrb[96].mxu1  ;;  %v2349_v42 = vadd.f32 %v4567_v4, %v2301_v51 }
 0x1f5   :  { %v2352_v18 = vadd.f32 %v4567_v4, %v2304_v5  ;;  %v1959_v58 = vpop.f32.mrb[44].mxu0  ;;  %v2104_v61 = vadd.f32 %v4475_v28, %v3088_v12  ;;  %v2095_v36 = vpop.f32.mrb[97].mxu1 }
 0x1f6   :  { %v2350_v63 = vadd.f32 %v4567_v4, %v2302_v9  ;;  %v4581_v46 = vadd.f32 %v1959_v58, %v1544_v52  ;;  %v1961_v11 = vpop.f32.mrb[45].mxu0  ;;  %v2096_v50 = vadd.f32 %v4467_v13, %v2095_v36  ;;  %v3089_v3 = vpop.f32.mrb[98].mxu1 }
 0x1f7   :  { %v2919_v47 = vpack.c.bf16 %v2352_v18, %v2351_v37  ;;  %v2259_v15 = vmax.f32 %v2104_v61, 0.0  ;;  %v1962_v7 = vpop.f32.mrb[46].mxu0  ;;  %v2107_v55 = vadd.f32 %v4477_v34, %v3089_v3  ;;  %v2098_v62 = vpop.f32.mrb[99].mxu1  ;;  %v1555_v18 = vadd.f32 %v4445_v44, %v4424_v20 }
 0x1f8   :  { %v2914_v10 = vpack.c.bf16 %v2350_v63, %v2349_v42  ;;  %v2257_v39 = vmax.f32 %v2096_v50, 0.0  ;;  %v4585_v28 = vadd.f32 %v1962_v7, %v1547_v56  ;;  %v1964_v5 = vpop.f32.mrb[47].mxu0  ;;  %v2099_v51 = vadd.f32 %v4469_v19, %v2098_v62 }
 0x1f9   :  { %3016 = vst [vmem:[%s4812_s3 + $0x8] sm:$0xff] %v2919_v47   ;;  %v2307_v13 = vmul.f32 %v4556_v23, %v2259_v15  ;;  %v2260_v52 = vmax.f32 %v2107_v55, 0.0  ;;  %v1552_v56 = vadd.f32 %v4445_v44, %v4422_v17 }
 0x1fa   :  { %2915 = vst [vmem:[%s4812_s3] sm:$0xff] %v2914_v10   ;;  %v2305_v34 = vmul.f32 %v4556_v23, %v2257_v39  ;;  %v2258_v9 = vmax.f32 %v2099_v51, 0.0 }
 0x1fb   :  { %v2308_v12 = vmul.f32 %v4556_v23, %v2260_v52  ;;  %v2355_v58 = vadd.f32 %v4567_v4, %v2307_v13 }
 0x1fc   :  { %v2306_v19 = vmul.f32 %v4556_v23, %v2258_v9  ;;  %v3092_v37 = vpop.f32.mrb[100].mxu1  ;;  %v2353_v11 = vadd.f32 %v4567_v4, %v2305_v34 }
 0x1fd   :  { %v2356_v61 = vadd.f32 %v4567_v4, %v2308_v12  ;;  %v1967_v36 = vpop.f32.mrb[48].mxu0  ;;  %v2120_v42 = vadd.f32 %v4493_v14, %v3092_v37  ;;  %v2111_v63 = vpop.f32.mrb[101].mxu1  ;;  %v1560_v12 = vadd.f32 %v4445_v44, %v4426_v21 }
 0x1fe   :  { %v2354_v50 = vadd.f32 %v4567_v4, %v2306_v19  ;;  %v4607_v3 = vadd.f32 %v1967_v36, %v1552_v56  ;;  %v1969_v17 = vpop.f32.mrb[49].mxu0  ;;  %v2112_v47 = vadd.f32 %v4483_v48, %v2111_v63  ;;  %v3093_v15 = vpop.f32.mrb[102].mxu1  ;;  %v1563_v19 = vadd.f32 %v4445_v44, %v4428_v25 }
 0x1ff   :  { %v2929_v7 = vpack.c.bf16 %v2356_v61, %v2355_v58  ;;  %v2263_v20 = vmax.f32 %v2120_v42, 0.0  ;;  %v1970_v55 = vpop.f32.mrb[50].mxu0  ;;  %v2123_v62 = vadd.f32 %v4497_v49, %v3093_v15  ;;  %v2114_v10 = vpop.f32.mrb[103].mxu1 }
 0x200   :  { %v2924_v39 = vpack.c.bf16 %v2354_v50, %v2353_v11  ;;  %v2261_v5 = vmax.f32 %v2112_v47, 0.0  ;;  %v4611_v14 = vadd.f32 %v1970_v55, %v1555_v18  ;;  %v1972_v51 = vpop.f32.mrb[51].mxu0  ;;  %v2115_v13 = vadd.f32 %v4485_v59, %v2114_v10 }
 0x201   :  { %3018 = vst [vmem:[%s4812_s3 + $0x18] sm:$0xff] %v2929_v7   ;;  %v2311_v48 = vmul.f32 %v4556_v23, %v2263_v20  ;;  %v2264_v52 = vmax.f32 %v2123_v62, 0.0 }
 0x202   :  { %3017 = vst [vmem:[%s4812_s3 + $0x10] sm:$0xff] %v2924_v39   ;;  %v2309_v49 = vmul.f32 %v4556_v23, %v2261_v5  ;;  %v2262_v34 = vmax.f32 %v2115_v13, 0.0 }
 0x203   :  { %v2312_v9 = vmul.f32 %v4556_v23, %v2264_v52  ;;  %v2359_v37 = vadd.f32 %v4567_v4, %v2311_v48  ;;  %v1568_v48 = vadd.f32 %v4445_v44, %v4430_v27 }
 0x204   :  { %v2310_v59 = vmul.f32 %v4556_v23, %v2262_v34  ;;  %v3096_v56 = vpop.f32.mrb[104].mxu1  ;;  %v2357_v42 = vadd.f32 %v4567_v4, %v2309_v49  ;;  %v1571_v49 = vadd.f32 %v4445_v44, %v4432_v30 }
 0x205   :  { %v2360_v18 = vadd.f32 %v4567_v4, %v2312_v9  ;;  %v1975_v58 = vpop.f32.mrb[52].mxu0  ;;  %v2136_v61 = vadd.f32 %v4517_v54, %v3096_v56  ;;  %v2127_v36 = vpop.f32.mrb[105].mxu1 }
 0x206   :  { %v2358_v63 = vadd.f32 %v4567_v4, %v2310_v59  ;;  %v4633_v11 = vadd.f32 %v1975_v58, %v1560_v12  ;;  %v1977_v21 = vpop.f32.mrb[53].mxu0  ;;  %v2128_v50 = vadd.f32 %v4505_v0, %v2127_v36  ;;  %v3097_v17 = vpop.f32.mrb[106].mxu1 }
 0x207   :  { %v2939_v47 = vpack.c.bf16 %v2360_v18, %v2359_v37  ;;  %v2267_v25 = vmax.f32 %v2136_v61, 0.0  ;;  %v1978_v15 = vpop.f32.mrb[54].mxu0  ;;  %v2139_v7 = vadd.f32 %v4521_v41, %v3097_v17  ;;  %v2130_v20 = vpop.f32.mrb[107].mxu1 }
 0x208   :  { %v2934_v55 = vpack.c.bf16 %v2358_v63, %v2357_v42  ;;  %v2265_v62 = vmax.f32 %v2128_v50, 0.0  ;;  %v4637_v54 = vadd.f32 %v1978_v15, %v1563_v19  ;;  %v1980_v10 = vpop.f32.mrb[55].mxu0  ;;  %v2131_v39 = vadd.f32 %v4509_v43, %v2130_v20 }
 0x209   :  { %3020 = vst [vmem:[%s4812_s3 + $0x28] sm:$0xff] %v2939_v47   ;;  %v2315_v0 = vmul.f32 %v4556_v23, %v2267_v25  ;;  %v2268_v5 = vmax.f32 %v2139_v7, 0.0  ;;  %v1579_v10 = vadd.f32 %v4445_v44, %v4436_v35 }
 0x20a   :  { %3019 = vst [vmem:[%s4812_s3 + $0x20] sm:$0xff] %v2934_v55   ;;  %v2313_v41 = vmul.f32 %v4556_v23, %v2265_v62  ;;  %v2266_v51 = vmax.f32 %v2131_v39, 0.0  ;;  %v1576_v55 = vadd.f32 %v4445_v44, %v4434_v32 }
 0x20b   :  { %v2316_v13 = vmul.f32 %v4556_v23, %v2268_v5  ;;  %v2363_v34 = vadd.f32 %v4567_v4, %v2315_v0 }
 0x20c   :  { %v2314_v43 = vmul.f32 %v4556_v23, %v2266_v51  ;;  %v3100_v52 = vpop.f32.mrb[108].mxu1  ;;  %v2361_v19 = vadd.f32 %v4567_v4, %v2313_v41 }
 0x20d   :  { %v2364_v9 = vadd.f32 %v4567_v4, %v2316_v13  ;;  %v1983_v12 = vpop.f32.mrb[56].mxu0  ;;  %v2152_v59 = vadd.f32 %v4542_v29, %v3100_v52  ;;  %v2143_v56 = vpop.f32.mrb[109].mxu1 }
 0x20e   :  { %v2362_v37 = vadd.f32 %v4567_v4, %v2314_v43  ;;  %v4659_v18 = vadd.f32 %v1983_v12, %v1568_v48  ;;  %v1985_v27 = vpop.f32.mrb[57].mxu0  ;;  %v2144_v58 = vadd.f32 %v4529_v16, %v2143_v56  ;;  %v3101_v61 = vpop.f32.mrb[110].mxu1 }
 0x20f   :  { %v2949_v36 = vpack.c.bf16 %v2364_v9, %v2363_v34  ;;  %v2271_v30 = vmax.f32 %v2152_v59, 0.0  ;;  %v1986_v42 = vpop.f32.mrb[58].mxu0  ;;  %v2155_v63 = vadd.f32 %v4544_v33, %v3101_v61  ;;  %v2146_v21 = vpop.f32.mrb[111].mxu1 }
 0x210   :  { %v2944_v50 = vpack.c.bf16 %v2362_v37, %v2361_v19  ;;  %v2269_v17 = vmax.f32 %v2144_v58, 0.0  ;;  %v4663_v29 = vadd.f32 %v1986_v42, %v1571_v49  ;;  %v1988_v47 = vpop.f32.mrb[59].mxu0  ;;  %v2147_v25 = vadd.f32 %v4533_v57, %v2146_v21 }
 0x211   :  { %3022 = vst [vmem:[%s4812_s3 + $0x38] sm:$0xff] %v2949_v36   ;;  %v2319_v16 = vmul.f32 %v4556_v23, %v2271_v30  ;;  %v2272_v15 = vmax.f32 %v2155_v63, 0.0  ;;  %v1584_v30 = vadd.f32 %v4445_v44, %v4438_v38  ;;  %v1587_v63 = vadd.f32 %v4445_v44, %v4440_v40 }
 0x212   :  { %3021 = vst [vmem:[%s4812_s3 + $0x30] sm:$0xff] %v2944_v50   ;;  %v2317_v33 = vmul.f32 %v4556_v23, %v2269_v17  ;;  %v2270_v7 = vmax.f32 %v2147_v25, 0.0 }
 0x213   :  { %v2320_v20 = vmul.f32 %v4556_v23, %v2272_v15  ;;  %v2367_v39 = vadd.f32 %v4567_v4, %v2319_v16 }
 0x214   :  { %v2318_v57 = vmul.f32 %v4556_v23, %v2270_v7  ;;  %v3104_v62 = vpop.f32.mrb[112].mxu1  ;;  %v2365_v13 = vadd.f32 %v4567_v4, %v2317_v33 }
 0x215   :  { %v2368_v0 = vadd.f32 %v4567_v4, %v2320_v20  ;;  %v1991_v5 = vpop.f32.mrb[60].mxu0  ;;  %v2168_v41 = vadd.f32 %v4581_v46, %v3104_v62  ;;  %v2159_v51 = vpop.f32.mrb[113].mxu1 }
 0x216   :  { %v2366_v48 = vadd.f32 %v4567_v4, %v2318_v57  ;;  %v3219_v43 = vadd.f32 %v1991_v5, %v1576_v55  ;;  %v1993_v32 = vpop.f32.mrb[61].mxu0  ;;  %v2160_v52 = vadd.f32 %v4551_v24, %v2159_v51  ;;  %v3105_v49 = vpop.f32.mrb[114].mxu1 }
 0x217   :  { %v2959_v34 = vpack.c.bf16 %v2368_v0, %v2367_v39  ;;  %v2275_v9 = vmax.f32 %v2168_v41, 0.0  ;;  %v1994_v35 = vpop.f32.mrb[62].mxu0  ;;  %v2171_v12 = vadd.f32 %v4585_v28, %v3105_v49  ;;  %v2162_v59 = vpop.f32.mrb[115].mxu1  ;;  %v3226_v32 = vadd.f32 %v4445_v44, %v4489_v1 }
 0x218   :  { %v2954_v56 = vpack.c.bf16 %v2366_v48, %v2365_v13  ;;  %v2273_v19 = vmax.f32 %v2160_v52, 0.0  ;;  %v3221_v37 = vadd.f32 %v1994_v35, %v1579_v10  ;;  %v1996_v46 = vpop.f32.mrb[63].mxu0  ;;  %v2163_v27 = vadd.f32 %v4560_v6, %v2162_v59 }
 0x219   :  { %3024 = vst [vmem:[%s4812_s3 + $0x48] sm:$0xff] %v2959_v34   ;;  %v2323_v58 = vmul.f32 %v4556_v23, %v2275_v9  ;;  %v2276_v24 = vmax.f32 %v2171_v12, 0.0  ;;  %v3228_v49 = vadd.f32 %v4445_v44, %v4495_v8 }
 0x21a   :  { %3023 = vst [vmem:[%s4812_s3 + $0x40] sm:$0xff] %v2954_v56   ;;  %v2321_v28 = vmul.f32 %v4556_v23, %v2273_v19  ;;  %v2274_v61 = vmax.f32 %v2163_v27, 0.0 }
 0x21b   :  { %v2324_v36 = vmul.f32 %v4556_v23, %v2276_v24  ;;  %v2371_v21 = vadd.f32 %v4567_v4, %v2323_v58 }
 0x21c   :  { %v2322_v6 = vmul.f32 %v4556_v23, %v2274_v61  ;;  %v3108_v42 = vpop.f32.mrb[116].mxu1  ;;  %v2369_v16 = vadd.f32 %v4567_v4, %v2321_v28 }
 0x21d   :  { %v2372_v50 = vadd.f32 %v4567_v4, %v2324_v36  ;;  %v1999_v17 = vpop.f32.mrb[64].mxu0  ;;  %v2184_v47 = vadd.f32 %v4633_v11, %v3108_v42  ;;  %v2175_v25 = vpop.f32.mrb[117].mxu1 }
 0x21e   :  { %v2370_v15 = vadd.f32 %v4567_v4, %v2322_v6  ;;  %v4707_v33 = vadd.f32 %v1999_v17, %v1584_v30  ;;  %v2001_v38 = vpop.f32.mrb[65].mxu0  ;;  %v2176_v7 = vadd.f32 %v4607_v3, %v2175_v25  ;;  %v3109_v20 = vpop.f32.mrb[118].mxu1 }
 0x21f   :  { %v2969_v55 = vpack.c.bf16 %v2372_v50, %v2371_v21  ;;  %v2279_v40 = vmax.f32 %v2184_v47, 0.0  ;;  %v2002_v57 = vpop.f32.mrb[66].mxu0  ;;  %v2187_v62 = vadd.f32 %v4637_v54, %v3109_v20  ;;  %v2178_v10 = vpop.f32.mrb[119].mxu1  ;;  %v3230_v47 = vadd.f32 %v4445_v44, %v4501_v53 }
 0x220   :  { %v2964_v39 = vpack.c.bf16 %v2370_v15, %v2369_v16  ;;  %v2277_v0 = vmax.f32 %v2176_v7, 0.0  ;;  %v4711_v11 = vadd.f32 %v2002_v57, %v1587_v63  ;;  %v2004_v5 = vpop.f32.mrb[67].mxu0  ;;  %v2179_v41 = vadd.f32 %v4611_v14, %v2178_v10 }
 0x221   :  { %3026 = vst [vmem:[%s4812_s3 + $0x58] sm:$0xff] %v2969_v55   ;;  %v2327_v3 = vmul.f32 %v4556_v23, %v2279_v40  ;;  %v2280_v51 = vmax.f32 %v2187_v62, 0.0  ;;  %v3232_v16 = vadd.f32 %v4445_v44, %v4507_v31 }
 0x222   :  { %3025 = vst [vmem:[%s4812_s3 + $0x50] sm:$0xff] %v2964_v39   ;;  %v2325_v54 = vmul.f32 %v4556_v23, %v2277_v0  ;;  %v2278_v13 = vmax.f32 %v2179_v41, 0.0 }
 0x223   :  { %v2328_v48 = vmul.f32 %v4556_v23, %v2280_v51  ;;  %v2375_v34 = vadd.f32 %v4567_v4, %v2327_v3 }
 0x224   :  { %v2326_v14 = vmul.f32 %v4556_v23, %v2278_v13  ;;  %v3112_v52 = vpop.f32.mrb[120].mxu1  ;;  %v2373_v56 = vadd.f32 %v4567_v4, %v2325_v54 }
 0x225   :  { %v2376_v9 = vadd.f32 %v4567_v4, %v2328_v48  ;;  %v2007_v35 = vpop.f32.mrb[68].mxu0  ;;  %v2200_v12 = vadd.f32 %v3219_v43, %v3112_v52  ;;  %v2191_v59 = vpop.f32.mrb[121].mxu1 }
 0x226   :  { %v2374_v19 = vadd.f32 %v4567_v4, %v2326_v14  ;;  %v3227_v46 = vadd.f32 %v3226_v32, %v2007_v35  ;;  %v2009_v27 = vpop.f32.mrb[69].mxu0  ;;  %v2192_v1 = vadd.f32 %v4659_v18, %v2191_v59  ;;  %v3113_v58 = vpop.f32.mrb[122].mxu1 }
 0x227   :  { %v2979_v24 = vpack.c.bf16 %v2376_v9, %v2375_v34  ;;  %v2283_v28 = vmax.f32 %v2200_v12, 0.0  ;;  %v2010_v61 = vpop.f32.mrb[70].mxu0  ;;  %v2203_v8 = vadd.f32 %v3221_v37, %v3113_v58  ;;  %v2194_v36 = vpop.f32.mrb[123].mxu1  ;;  %v3234_v9 = vadd.f32 %v4445_v44, %v4513_v2 }
 0x228   :  { %v2974_v30 = vpack.c.bf16 %v2374_v19, %v2373_v56  ;;  %v2281_v6 = vmax.f32 %v2192_v1, 0.0  ;;  %v3229_v42 = vadd.f32 %v3228_v49, %v2010_v61  ;;  %v2012_v63 = vpop.f32.mrb[71].mxu0  ;;  %v2195_v43 = vadd.f32 %v4663_v29, %v2194_v36 }
 0x229   :  { %3028 = vst [vmem:[%s4812_s3 + $0x68] sm:$0xff] %v2979_v24   ;;  %v2331_v21 = vmul.f32 %v4556_v23, %v2283_v28  ;;  %v2284_v50 = vmax.f32 %v2203_v8, 0.0  ;;  %v3236_v12 = vadd.f32 %v4445_v44, %v4519_v60 }
 0x22a   :  { %3027 = vst [vmem:[%s4812_s3 + $0x60] sm:$0xff] %v2974_v30   ;;  %v2329_v18 = vmul.f32 %v4556_v23, %v2281_v6  ;;  %v2282_v37 = vmax.f32 %v2195_v43, 0.0 }
 0x22b   :  { %v2332_v17 = vmul.f32 %v4556_v23, %v2284_v50  ;;  %v2379_v15 = vadd.f32 %v4567_v4, %v2331_v21 }
 0x22c   :  { %v2330_v29 = vmul.f32 %v4556_v23, %v2282_v37  ;;  %v3116_v25 = vpop.f32.mrb[124].mxu1  ;;  %v2377_v40 = vadd.f32 %v4567_v4, %v2329_v18 }
 0x22d   :  { %v2380_v38 = vadd.f32 %v4567_v4, %v2332_v17  ;;  %v2015_v7 = vpop.f32.mrb[72].mxu0  ;;  %v2216_v20 = vadd.f32 %v3227_v46, %v3116_v25  ;;  %v2207_v55 = vpop.f32.mrb[125].mxu1  ;;  %v3238_v17 = vadd.f32 %v4445_v44, %v4525_v45 }
 0x22e   :  { %v2378_v57 = vadd.f32 %v4567_v4, %v2330_v29  ;;  %v3231_v62 = vadd.f32 %v3230_v47, %v2015_v7  ;;  %v2017_v10 = vpop.f32.mrb[73].mxu0  ;;  %v2208_v53 = vadd.f32 %v4707_v33, %v2207_v55  ;;  %v3117_v39 = vpop.f32.mrb[126].mxu1  ;;  %v3240_v7 = vadd.f32 %v4445_v44, %v4531_v22 }
 0x22f   :  { %v2989_v0 = vpack.c.bf16 %v2380_v38, %v2379_v15  ;;  %v2287_v5 = vmax.f32 %v2216_v20, 0.0  ;;  %v2018_v41 = vpop.f32.mrb[74].mxu0  ;;  %v2219_v31 = vadd.f32 %v3229_v42, %v3117_v39  ;;  %v2210_v3 = vpop.f32.mrb[127].mxu1 }
 0x230   :  { %v2984_v51 = vpack.c.bf16 %v2378_v57, %v2377_v40  ;;  %v2285_v54 = vmax.f32 %v2208_v53, 0.0  ;;  %v3233_v13 = vadd.f32 %v3232_v16, %v2018_v41  ;;  %v2020_v48 = vpop.f32.mrb[75].mxu0  ;;  %v2211_v32 = vadd.f32 %v4711_v11, %v2210_v3 }
 0x231   :  { %3030 = vst [vmem:[%s4812_s3 + $0x78] sm:$0xff] %v2989_v0   ;;  %v2335_v14 = vmul.f32 %v4556_v23, %v2287_v5  ;;  %v2288_v52 = vmax.f32 %v2219_v31, 0.0 }
 0x232   :  { %3029 = vst [vmem:[%s4812_s3 + $0x70] sm:$0xff] %v2984_v51   ;;  %v2333_v33 = vmul.f32 %v4556_v23, %v2285_v54  ;;  %v2286_v49 = vmax.f32 %v2211_v32, 0.0 }
 0x233   :  { %v2336_v34 = vmul.f32 %v4556_v23, %v2288_v52  ;;  %v2383_v59 = vadd.f32 %v4567_v4, %v2335_v14 }
 0x234   :  { %v2334_v11 = vmul.f32 %v4556_v23, %v2286_v49  ;;  %v3120_v35 = vpop.f32.mrb[128].mxu1  ;;  %v2381_v27 = vadd.f32 %v4567_v4, %v2333_v33 }
 0x235   :  { %v2384_v56 = vadd.f32 %v4567_v4, %v2336_v34  ;;  %v2023_v19 = vpop.f32.mrb[76].mxu0  ;;  %v2223_v46 = vpop.f32.mrb[129].mxu1 }
 0x236   :  { %v2382_v1 = vadd.f32 %v4567_v4, %v2334_v11  ;;  %v3235_v58 = vadd.f32 %v3234_v9, %v2023_v19  ;;  %v2025_v24 = vpop.f32.mrb[77].mxu0  ;;  %v2224_v28 = vadd.f32 %v3231_v62, %v2223_v46  ;;  %v3121_v2 = vpop.f32.mrb[130].mxu1 }
 0x237   :  { %v2999_v61 = vpack.c.bf16 %v2384_v56, %v2383_v59  ;;  %v2026_v8 = vpop.f32.mrb[78].mxu0  ;;  %v2226_v36 = vpop.f32.mrb[131].mxu1 }
 0x238   :  { %v2994_v30 = vpack.c.bf16 %v2382_v1, %v2381_v27  ;;  %v2232_v6 = vadd.f32 %v3235_v58, %v3120_v35  ;;  %v2289_v60 = vmax.f32 %v2224_v28, 0.0  ;;  %v3237_v42 = vadd.f32 %v3236_v12, %v2026_v8  ;;  %v2028_v63 = vpop.f32.mrb[79].mxu0 }
 0x239   :  { %3032 = vst [vmem:[%s4812_s3 + $0x88] sm:$0xff] %v2999_v61   ;;  %v2227_v43 = vadd.f32 %v3233_v13, %v2226_v36 }
 0x23a   :  { %3031 = vst [vmem:[%s4812_s3 + $0x80] sm:$0xff] %v2994_v30   ;;  %v2291_v21 = vmax.f32 %v2232_v6, 0.0  ;;  %v2235_v50 = vadd.f32 %v3237_v42, %v3121_v2  ;;  %v2337_v18 = vmul.f32 %v4556_v23, %v2289_v60 }
 0x23b   :  { %v2290_v37 = vmax.f32 %v2227_v43, 0.0 }
 0x23c   :  { %v2339_v47 = vmul.f32 %v4556_v23, %v2291_v21  ;;  %v2292_v29 = vmax.f32 %v2235_v50, 0.0  ;;  %v3124_v25 = vpop.f32.mrb[132].mxu1  ;;  %v2385_v62 = vadd.f32 %v4567_v4, %v2337_v18 }
 0x23d   :  { %v2338_v16 = vmul.f32 %v4556_v23, %v2290_v37  ;;  %v2031_v15 = vpop.f32.mrb[80].mxu0  ;;  %v2239_v38 = vpop.f32.mrb[133].mxu1 }
 0x23e   :  { %v2340_v20 = vmul.f32 %v4556_v23, %v2292_v29  ;;  %v3239_v55 = vadd.f32 %v3238_v17, %v2031_v15  ;;  %v2033_v40 = vpop.f32.mrb[81].mxu0  ;;  %v3125_v57 = vpop.f32.mrb[134].mxu1  ;;  %v2387_v39 = vadd.f32 %v4567_v4, %v2339_v47 }
 0x23f   :  { %v2386_v45 = vadd.f32 %v4567_v4, %v2338_v16  ;;  %v2034_v10 = vpop.f32.mrb[82].mxu0  ;;  %v2242_v53 = vpop.f32.mrb[135].mxu1 }
 0x240   :  { %v2388_v0 = vadd.f32 %v4567_v4, %v2340_v20  ;;  %v3241_v5 = vadd.f32 %v3240_v7, %v2034_v10  ;;  %v2240_v41 = vadd.f32 %v3239_v55, %v2239_v38  ;;  %v2036_v31 = vpop.f32.mrb[83].mxu0 }
 0x241   :  { %v3004_v3 = vpack.c.bf16 %v2386_v45, %v2385_v62 }
 0x242   :  { %v3009_v44 = vpack.c.bf16 %v2388_v0, %v2387_v39  ;;  %v2293_v22 = vmax.f32 %v2240_v41, 0.0  ;;  %v2243_v51 = vadd.f32 %v3241_v5, %v2242_v53 }
 0x243   :  { %3033 = vst [vmem:[%s4812_s3 + $0x90] sm:$0xff] %v3004_v3  }
 0x244   :  { %3034 = vst [vmem:[%s4812_s3 + $0x98] sm:$0xff] %v3009_v44   ;;  %v2341_v54 = vmul.f32 %v4556_v23, %v2293_v22  ;;  %v2294_v13 = vmax.f32 %v2243_v51, 0.0 }
 0x245   :  { %v2039_v48 = vpop.f32.mrb[84].mxu0 }
 0x246   :  { %v2342_v32 = vmul.f32 %v4556_v23, %v2294_v13  ;;  %v2040_v14 = vadd.f32 %v2039_v48, %v4538_v26  ;;  %v2041_v52 = vpop.f32.mrb[85].mxu0  ;;  %v2389_v49 = vadd.f32 %v4567_v4, %v2341_v54 }
 0x247   :  { %v2042_v33 = vpop.f32.mrb[86].mxu0 }
 0x248   :  { %v2390_v34 = vadd.f32 %v4567_v4, %v2342_v32  ;;  %v2248_v9 = vadd.f32 %v3124_v25, %v2040_v14  ;;  %v2043_v11 = vpop.f32.mrb[87].mxu0 }
 0x24a   :  { %v3014_v35 = vpack.c.bf16 %v2390_v34, %v2389_v49  ;;  %v2295_v12 = vmax.f32 %v2248_v9, 0.0 }
 0x24c   :  { %3035 = vst [vmem:[%s4812_s3 + $0xa0] sm:$0xff] %v3014_v35   ;;  %v2343_v59 = vmul.f32 %v4556_v23, %v2295_v12 }
 0x24e   :  { %v2391_v56 = vadd.f32 %v4567_v4, %v2343_v59 }
 0x250   :  { %v2910_v19 = vpack.c.bf16 %v2391_v56, %v2391_v56 }
 0x252   :  { %2607 = vst [vmem:[%s4812_s3 + $0xa8] sm:$0xf] %v2910_v19 }

// kernel: cnn_kaggle_forward.10
= control target key start
LH: loop header
LB: loop body
LE: loop exit
PB: predicated region body
PF: predicated region fallthrough
CT: control target
= control target key end

     0   :  { %v1958_v0 = vmov 0   ;;  %s2539_s1 = inlined_call_operand.vmem [shape: bf16[384,128], index: 1, kind: input, shape index: {}]   ;;  %s2540_s0 = inlined_call_operand.vmem [shape: bf16[344,384], index: 0, kind: input, shape index: {}]   ;;  %s2541_s2 = inlined_call_operand.vmem [shape: f32[3,128], index: 2, kind: input, shape index: {}]   ;;  %s2542_s3 = inlined_call_operand.vmem [shape: bf16[344,128], index: 3, kind: output, shape index: {}]  }
   0x1   :  { %645 = vmatprep.subr.bf16.mxu0 %v1958_v0  ;;  %1814 = vmatprep.subr.bf16.mxu1 %v1958_v0  ;;  %v1847_v1 = vld [vmem:[%s2539_s1] sm:$0xff]   ;;  %v1848_v2 = vld [vmem:[%s2539_s1 + $0x8] sm:$0xff]   ;;  %v1849_v3 = vld [vmem:[%s2539_s1 + $0x10] sm:$0xff]  }
   0x2   :  { %646 = vmatpush1.bf16.msra.mxu0 %v1847_v1  ;;  %1830 = vmatpush1.bf16.msra.mxu1 %v1847_v1  ;;  %v1850_v4 = vld [vmem:[%s2539_s1 + $0x18] sm:$0xff]   ;;  %v1851_v5 = vld [vmem:[%s2539_s1 + $0x20] sm:$0xff]   ;;  %v1852_v7 = vld [vmem:[%s2539_s1 + $0x28] sm:$0xff]  }
   0x3   :  { %647 = vmatprep.subr.bf16.mxu0 %v1958_v0  ;;  %1815 = vmatprep.subr.bf16.mxu1 %v1958_v0  ;;  %v1865_v6 = vld [vmem:[%s2540_s0 + $0x4] ss:$12 sps:$4 sm:$0xff]   ;;  %v1868_v8 = vld [vmem:[%s2540_s0 + $0x19c] ss:$12 sps:$4 sm:$0xff]   ;;  %v1863_v20 = vld [vmem:[%s2540_s0] ss:$12 sps:$4 sm:$0xff]  }
   0x4   :  { %677 = vmatprep.mubr.bf16.mxu0 %v1865_v6  ;;  %813 = vmatprep.mubr.bf16.mxu1 %v1868_v8  ;;  %v1853_v9 = vld [vmem:[%s2539_s1 + $0x30] sm:$0xff]   ;;  %v1854_v10 = vld [vmem:[%s2539_s1 + $0x38] sm:$0xff]   ;;  %v1855_v11 = vld [vmem:[%s2539_s1 + $0x40] sm:$0xff]  }
   0x5   :  { %v1856_v12 = vld [vmem:[%s2539_s1 + $0x48] sm:$0xff]   ;;  %v1857_v13 = vld [vmem:[%s2539_s1 + $0x50] sm:$0xff]   ;;  %v1858_v14 = vld [vmem:[%s2539_s1 + $0x58] sm:$0xff]  }
   0x6   :  { %648 = vmatpush1.bf16.msra.mxu0 %v1848_v2  ;;  %1831 = vmatpush1.bf16.msra.mxu1 %v1848_v2  ;;  %v1859_v15 = vld [vmem:[%s2539_s1 + $0x60] sm:$0xff]   ;;  %v1860_v16 = vld [vmem:[%s2539_s1 + $0x68] sm:$0xff]   ;;  %v1861_v17 = vld [vmem:[%s2539_s1 + $0x70] sm:$0xff]  }
   0x7   :  { %649 = vmatprep.subr.bf16.mxu0 %v1958_v0  ;;  %1816 = vmatprep.subr.bf16.mxu1 %v1958_v0  ;;  %v1862_v18 = vld [vmem:[%s2539_s1 + $0x78] sm:$0xff]   ;;  %v1875_v19 = vld [vmem:[%s2539_s1 + $0x80] sm:$0xff]   ;;  %v1876_v24 = vld [vmem:[%s2539_s1 + $0x88] sm:$0xff]  }
   0x8   :  { %v1866_v21 = vld [vmem:[%s2540_s0 + $0x198] ss:$12 sps:$4 sm:$0xff]   ;;  %v1869_v22 = vld [vmem:[%s2540_s0 + $0x1c] ss:$12 sps:$4 sm:$0xff]   ;;  %v1871_v23 = vld [vmem:[%s2540_s0 + $0x1b4] ss:$12 sps:$4 sm:$0xff]  }
   0x9   :  { %v1873_v25 = vld [vmem:[%s2540_s0 + $0x18] ss:$12 sps:$4 sm:$0xff]   ;;  %v1874_v26 = vld [vmem:[%s2540_s0 + $0x1b0] ss:$12 sps:$4 sm:$0xff]   ;;  %v1877_v28 = vld [vmem:[%s2540_s0 + $0x34] ss:$12 sps:$4 sm:$0xff]  }
   0xa   :  { %650 = vmatpush1.bf16.msra.mxu0 %v1849_v3  ;;  %1832 = vmatpush1.bf16.msra.mxu1 %v1849_v3  ;;  %v1883_v27 = vld [vmem:[%s2539_s1 + $0x90] sm:$0xff]   ;;  %v1879_v29 = vld [vmem:[%s2540_s0 + $0x1cc] ss:$12 sps:$4 sm:$0xff]   ;;  %v1891_v31 = vld [vmem:[%s2539_s1 + $0xa0] sm:$0xff]  }
   0xb   :  { %651 = vmatprep.subr.bf16.mxu0 %v1958_v0  ;;  %1817 = vmatprep.subr.bf16.mxu1 %v1958_v0  ;;  %v1884_v30 = vld [vmem:[%s2539_s1 + $0x98] sm:$0xff]   ;;  %v1882_v33 = vld [vmem:[%s2540_s0 + $0x1c8] ss:$12 sps:$4 sm:$0xff]   ;;  %v1887_v35 = vld [vmem:[%s2540_s0 + $0x1e4] ss:$12 sps:$4 sm:$0xff]  }
   0xc   :  { %v1881_v32 = vld [vmem:[%s2540_s0 + $0x30] ss:$12 sps:$4 sm:$0xff]   ;;  %v1885_v34 = vld [vmem:[%s2540_s0 + $0x4c] ss:$12 sps:$4 sm:$0xff]   ;;  %v1889_v39 = vld [vmem:[%s2540_s0 + $0x48] ss:$12 sps:$4 sm:$0xff]  }
   0xd   :  { %v1892_v36 = vld [vmem:[%s2539_s1 + $0xa8] sm:$0xff]   ;;  %v99_v37 = vld [vmem:[%s2540_s0 + $0x1f8] sm:$0xff]  ;;  %v1898_v38 = vld [vmem:[%s2539_s1 + $0xb0] sm:$0xff]  }
   0xe   :  { %652 = vmatpush1.bf16.msra.mxu0 %v1850_v4  ;;  %1833 = vmatpush1.bf16.msra.mxu1 %v1850_v4  ;;  %v1890_v40 = vld [vmem:[%s2540_s0 + $0x1e0] ss:$12 sps:$4 sm:$0xff]   ;;  %v1893_v41 = vld [vmem:[%s2540_s0 + $0x64] ss:$12 sps:$4 sm:$0xff]   ;;  %v1485_v42 = vcombine.high %v99_v37, %v99_v37  ;;  %v1899_v43 = vld [vmem:[%s2539_s1 + $0xb8] sm:$0xff]   ;;  %v1484_v45 = vcombine.low %v99_v37, %v99_v37 }
   0xf   :  { %653 = vmatprep.subr.bf16.mxu0 %v1958_v0  ;;  %1818 = vmatprep.subr.bf16.mxu1 %v1958_v0  ;;  %v1896_v44 = vld [vmem:[%s2540_s0 + $0x60] ss:$12 sps:$4 sm:$0xff]   ;;  %v1900_v46 = vld [vmem:[%s2540_s0 + $0x7c] ss:$12 sps:$4 sm:$0xff]   ;;  %v1903_v48 = vld [vmem:[%s2540_s0 + $0x78] ss:$12 sps:$4 sm:$0xff]  }
  0x10   :  { %v1902_v47 = vld [vmem:[%s2540_s0 + $0x8] ss:$12 sps:$4 sm:$0xff]   ;;  %v1904_v49 = vld [vmem:[%s2540_s0 + $0x20] ss:$12 sps:$4 sm:$0xff]   ;;  %v1907_v51 = vld [vmem:[%s2540_s0 + $0x38] ss:$12 sps:$4 sm:$0xff]  }
  0x11   :  { %v1905_v50 = vld [vmem:[%s2540_s0 + $0x94] ss:$12 sps:$4 sm:$0xff]   ;;  %v1908_v52 = vld [vmem:[%s2540_s0 + $0x90] ss:$12 sps:$4 sm:$0xff]   ;;  %v1910_v54 = vld [vmem:[%s2540_s0 + $0xac] ss:$12 sps:$4 sm:$0xff]  }
  0x12   :  { %654 = vmatpush1.bf16.msra.mxu0 %v1851_v5  ;;  %1834 = vmatpush1.bf16.msra.mxu1 %v1851_v5  ;;  %v1909_v53 = vld [vmem:[%s2540_s0 + $0x50] ss:$12 sps:$4 sm:$0xff]   ;;  %v1912_v55 = vld [vmem:[%s2540_s0 + $0x68] ss:$12 sps:$4 sm:$0xff]   ;;  %v1914_v57 = vld [vmem:[%s2540_s0 + $0x80] ss:$12 sps:$4 sm:$0xff]  }
  0x13   :  { %655 = vmatprep.subr.bf16.mxu0 %v1958_v0  ;;  %1819 = vmatprep.subr.bf16.mxu1 %v1958_v0  ;;  %v1913_v56 = vld [vmem:[%s2540_s0 + $0xa8] ss:$12 sps:$4 sm:$0xff]   ;;  %v1915_v58 = vld [vmem:[%s2540_s0 + $0xc4] ss:$12 sps:$4 sm:$0xff]   ;;  %v1918_v60 = vld [vmem:[%s2540_s0 + $0xc0] ss:$12 sps:$4 sm:$0xff]  }
  0x14   :  { %v1917_v59 = vld [vmem:[%s2540_s0 + $0x98] ss:$12 sps:$4 sm:$0xff]   ;;  %v1919_v61 = vld [vmem:[%s2540_s0 + $0xb0] ss:$12 sps:$4 sm:$0xff]   ;;  %v1922_v63 = vld [vmem:[%s2540_s0 + $0xc8] ss:$12 sps:$4 sm:$0xff]  }
  0x15   :  { %v1920_v62 = vld [vmem:[%s2540_s0 + $0xdc] ss:$12 sps:$4 sm:$0xff]   ;;  %v1924_v1 = vld [vmem:[%s2540_s0 + $0xe0] ss:$12 sps:$4 sm:$0xff]   ;;  %v1927_v3 = vld [vmem:[%s2540_s0 + $0xf8] ss:$12 sps:$4 sm:$0xff]  }
  0x16   :  { %656 = vmatpush1.bf16.msra.mxu0 %v1852_v7  ;;  %1835 = vmatpush1.bf16.msra.mxu1 %v1852_v7  ;;  %v1925_v2 = vld [vmem:[%s2540_s0 + $0xf4] ss:$12 sps:$4 sm:$0xff]   ;;  %v1928_v4 = vld [vmem:[%s2540_s0 + $0xf0] ss:$12 sps:$4 sm:$0xff]   ;;  %v1930_v6 = vld [vmem:[%s2540_s0 + $0x10c] ss:$12 sps:$4 sm:$0xff]  }
  0x17   :  { %657 = vmatprep.subr.bf16.mxu0 %v1958_v0  ;;  %1820 = vmatprep.subr.bf16.mxu1 %v1958_v0  ;;  %v1929_v5 = vld [vmem:[%s2540_s0 + $0x110] ss:$12 sps:$4 sm:$0xff]   ;;  %v1932_v7 = vld [vmem:[%s2540_s0 + $0x128] ss:$12 sps:$4 sm:$0xff]  }
  0x18   :  { %v1933_v8 = vld [vmem:[%s2540_s0 + $0x108] ss:$12 sps:$4 sm:$0xff]  }
  0x1a   :  { %658 = vmatpush1.bf16.msra.mxu0 %v1853_v9  ;;  %1836 = vmatpush1.bf16.msra.mxu1 %v1853_v9  ;;  %v1934_v9 = vld [vmem:[%s2540_s0 + $0x140] ss:$12 sps:$4 sm:$0xff]  }
  0x1b   :  { %659 = vmatprep.subr.bf16.mxu0 %v1958_v0  ;;  %1821 = vmatprep.subr.bf16.mxu1 %v1958_v0 }
  0x1e   :  { %660 = vmatpush1.bf16.msra.mxu0 %v1854_v10  ;;  %1837 = vmatpush1.bf16.msra.mxu1 %v1854_v10  ;;  %v1935_v10 = vld [vmem:[%s2540_s0 + $0x124] ss:$12 sps:$4 sm:$0xff]  }
  0x1f   :  { %661 = vmatprep.subr.bf16.mxu0 %v1958_v0  ;;  %1822 = vmatprep.subr.bf16.mxu1 %v1958_v0 }
  0x22   :  { %662 = vmatpush1.bf16.msra.mxu0 %v1855_v11  ;;  %1838 = vmatpush1.bf16.msra.mxu1 %v1855_v11  ;;  %v1937_v11 = vld [vmem:[%s2540_s0 + $0x158] ss:$12 sps:$4 sm:$0xff]  }
  0x23   :  { %663 = vmatprep.subr.bf16.mxu0 %v1958_v0  ;;  %1823 = vmatprep.subr.bf16.mxu1 %v1958_v0 }
  0x26   :  { %664 = vmatpush1.bf16.msra.mxu0 %v1856_v12  ;;  %1839 = vmatpush1.bf16.msra.mxu1 %v1856_v12  ;;  %v1938_v12 = vld [vmem:[%s2540_s0 + $0x120] ss:$12 sps:$4 sm:$0xff]  }
  0x27   :  { %665 = vmatprep.subr.bf16.mxu0 %v1958_v0  ;;  %1824 = vmatprep.subr.bf16.mxu1 %v1958_v0 }
  0x2a   :  { %666 = vmatpush1.bf16.msra.mxu0 %v1857_v13  ;;  %1840 = vmatpush1.bf16.msra.mxu1 %v1857_v13  ;;  %v1939_v13 = vld [vmem:[%s2540_s0 + $0x170] ss:$12 sps:$4 sm:$0xff]  }
  0x2b   :  { %667 = vmatprep.subr.bf16.mxu0 %v1958_v0  ;;  %1825 = vmatprep.subr.bf16.mxu1 %v1958_v0 }
  0x2e   :  { %668 = vmatpush1.bf16.msra.mxu0 %v1858_v14  ;;  %1841 = vmatpush1.bf16.msra.mxu1 %v1858_v14  ;;  %v1940_v14 = vld [vmem:[%s2540_s0 + $0x13c] ss:$12 sps:$4 sm:$0xff]  }
  0x2f   :  { %669 = vmatprep.subr.bf16.mxu0 %v1958_v0  ;;  %1826 = vmatprep.subr.bf16.mxu1 %v1958_v0 }
  0x32   :  { %670 = vmatpush1.bf16.msra.mxu0 %v1859_v15  ;;  %1842 = vmatpush1.bf16.msra.mxu1 %v1859_v15  ;;  %v1942_v15 = vld [vmem:[%s2540_s0 + $0x188] ss:$12 sps:$4 sm:$0xff]  }
  0x33   :  { %671 = vmatprep.subr.bf16.mxu0 %v1958_v0  ;;  %1827 = vmatprep.subr.bf16.mxu1 %v1958_v0 }
  0x36   :  { %672 = vmatpush1.bf16.msra.mxu0 %v1860_v16  ;;  %1843 = vmatpush1.bf16.msra.mxu1 %v1860_v16  ;;  %v1943_v16 = vld [vmem:[%s2540_s0 + $0x138] ss:$12 sps:$4 sm:$0xff]  }
  0x37   :  { %673 = vmatprep.subr.bf16.mxu0 %v1958_v0  ;;  %1828 = vmatprep.subr.bf16.mxu1 %v1958_v0 }
  0x3a   :  { %674 = vmatpush1.bf16.msra.mxu0 %v1861_v17  ;;  %1844 = vmatpush1.bf16.msra.mxu1 %v1861_v17  ;;  %v1944_v17 = vld [vmem:[%s2540_s0 + $0x1a0] ss:$12 sps:$4 sm:$0xff]  }
  0x3b   :  { %675 = vmatprep.subr.bf16.mxu0 %v1958_v0  ;;  %1829 = vmatprep.subr.bf16.mxu1 %v1958_v0  ;;  %v1923_v0 = vld [vmem:[%s2540_s0 + $0xd8] ss:$12 sps:$4 sm:$0xff]  }
  0x3e   :  { %676 = vmatpush1.bf16.msra.mxu0 %v1862_v18  ;;  %1845 = vmatpush1.bf16.msra.mxu1 %v1862_v18  ;;  %v1945_v18 = vld [vmem:[%s2540_s0 + $0x154] ss:$12 sps:$4 sm:$0xff]  }
  0x3f   :  { %1754 = vmatprep.subr.bf16.mxu1 %v1875_v19 }
  0x41   :  { %678 = vmatmul.mubr.bf16.vlgmr.msra.gmra.mrb[0].mxu0 %v1863_v20  ;;  %814 = vmatmul.mubr.bf16.vlgmr.msra.gmra.mrb[0].mxu1 %v1866_v21  ;;  %v1948_v20 = vld [vmem:[%s2540_s0 + $0x150] ss:$12 sps:$4 sm:$0xff]  }
  0x42   :  { %685 = vmatprep.mubr.bf16.mxu0 %v1869_v22  ;;  %821 = vmatprep.mubr.bf16.mxu1 %v1871_v23  ;;  %v1949_v21 = vld [vmem:[%s2540_s0 + $0x1d0] ss:$12 sps:$4 sm:$0xff]   ;;  %v1950_v22 = vld [vmem:[%s2540_s0 + $0x16c] ss:$12 sps:$4 sm:$0xff]   ;;  %v1952_v23 = vld [vmem:[%s2540_s0 + $0x1e8] ss:$12 sps:$4 sm:$0xff]  }
  0x43   :  { %1755 = vmatpush3.bf16.msra.mxu1 %v1875_v19  ;;  %v1947_v19 = vld [vmem:[%s2540_s0 + $0x1b8] ss:$12 sps:$4 sm:$0xff]  }
  0x44   :  { %1756 = vmatprep.subr.bf16.mxu1 %v1876_v24 }
  0x47   :  { %1757 = vmatpush3.bf16.msra.mxu1 %v1876_v24  ;;  %v1953_v24 = vld [vmem:[%s2540_s0 + $0x168] ss:$12 sps:$4 sm:$0xff]  }
  0x48   :  { %1758 = vmatprep.subr.bf16.mxu1 %v1883_v27 }
  0x49   :  { %686 = vmatmul.mubr.bf16.gmra.mrb[4].mxu0 %v1873_v25  ;;  %822 = vmatmul.mubr.bf16.gmra.mrb[4].mxu1 %v1874_v26  ;;  %v1954_v25 = vld [vmem:[%s2540_s0 + $0x200] ss:$0 sps:$4 sm:$0xff]   ;;  %v1955_v26 = vld [vmem:[%s2540_s0 + $0x184] ss:$12 sps:$4 sm:$0xff]  }
  0x4a   :  { %693 = vmatprep.mubr.bf16.mxu0 %v1877_v28  ;;  %829 = vmatprep.mubr.bf16.mxu1 %v1879_v29 }
  0x4b   :  { %1759 = vmatpush3.bf16.msra.mxu1 %v1883_v27  ;;  %v1957_v27 = vld [vmem:[%s2540_s0 + $0x180] ss:$12 sps:$4 sm:$0xff]  }
  0x4c   :  { %1760 = vmatprep.subr.bf16.mxu1 %v1884_v30 }
  0x4f   :  { %1761 = vmatpush3.bf16.msra.mxu1 %v1884_v30 }
  0x50   :  { %1762 = vmatprep.subr.bf16.mxu1 %v1891_v31 }
  0x51   :  { %694 = vmatmul.mubr.bf16.gmra.mrb[8].mxu0 %v1881_v32  ;;  %830 = vmatmul.mubr.bf16.gmra.mrb[8].mxu1 %v1882_v33 }
  0x52   :  { %701 = vmatprep.mubr.bf16.mxu0 %v1885_v34  ;;  %837 = vmatprep.mubr.bf16.mxu1 %v1887_v35 }
  0x53   :  { %1763 = vmatpush3.bf16.msra.mxu1 %v1891_v31 }
  0x54   :  { %1764 = vmatprep.subr.bf16.mxu1 %v1892_v36 }
  0x57   :  { %1765 = vmatpush3.bf16.msra.mxu1 %v1892_v36 }
  0x58   :  { %1766 = vmatprep.subr.bf16.mxu1 %v1898_v38 }
  0x59   :  { %702 = vmatmul.mubr.bf16.gmra.mrb[12].mxu0 %v1889_v39  ;;  %838 = vmatmul.mubr.bf16.gmra.mrb[12].mxu1 %v1890_v40 }
  0x5a   :  { %709 = vmatprep.mubr.bf16.mxu0 %v1893_v41  ;;  %845 = vmatprep.mubr.bf16.mxu1 %v1485_v42 }
  0x5b   :  { %1767 = vmatpush3.bf16.msra.mxu1 %v1898_v38 }
  0x5c   :  { %1768 = vmatprep.subr.bf16.mxu1 %v1899_v43 }
  0x5f   :  { %1769 = vmatpush3.bf16.msra.mxu1 %v1899_v43 }
  0x61   :  { %710 = vmatmul.mubr.bf16.gmra.mrb[16].mxu0 %v1896_v44  ;;  %846 = vmatmul.mubr.bf16.gmra.mrb[16].mxu1 %v1484_v45 }
  0x62   :  { %717 = vmatprep.mubr.bf16.mxu0 %v1900_v46  ;;  %1770 = vmatprep.mubr.bf16.mxu1 %v1902_v47 }
  0x69   :  { %718 = vmatmul.mubr.bf16.gmra.mrb[20].mxu0 %v1903_v48  ;;  %1771 = vmatmul.mubr.bf16.vlgmr.msra.gmra.mrb[20].mxu1 %v1904_v49 }
  0x6a   :  { %725 = vmatprep.mubr.bf16.mxu0 %v1905_v50  ;;  %1774 = vmatprep.mubr.bf16.mxu1 %v1907_v51 }
  0x71   :  { %726 = vmatmul.mubr.bf16.gmra.mrb[24].mxu0 %v1908_v52  ;;  %1775 = vmatmul.mubr.bf16.gmra.mrb[24].mxu1 %v1909_v53 }
  0x72   :  { %733 = vmatprep.mubr.bf16.mxu0 %v1910_v54  ;;  %1778 = vmatprep.mubr.bf16.mxu1 %v1912_v55 }
  0x79   :  { %734 = vmatmul.mubr.bf16.gmra.mrb[28].mxu0 %v1913_v56  ;;  %1779 = vmatmul.mubr.bf16.gmra.mrb[28].mxu1 %v1914_v57 }
  0x7a   :  { %741 = vmatprep.mubr.bf16.mxu0 %v1915_v58  ;;  %1782 = vmatprep.mubr.bf16.mxu1 %v1917_v59 }
  0x81   :  { %742 = vmatmul.mubr.bf16.gmra.mrb[32].mxu0 %v1918_v60  ;;  %1783 = vmatmul.mubr.bf16.gmra.mrb[32].mxu1 %v1919_v61 }
  0x82   :  { %749 = vmatprep.mubr.bf16.mxu0 %v1920_v62  ;;  %1786 = vmatprep.mubr.bf16.mxu1 %v1922_v63 }
  0x89   :  { %750 = vmatmul.mubr.bf16.gmra.mrb[36].mxu0 %v1923_v0  ;;  %1787 = vmatmul.mubr.bf16.gmra.mrb[36].mxu1 %v1924_v1 }
  0x8a   :  { %757 = vmatprep.mubr.bf16.mxu0 %v1925_v2  ;;  %1790 = vmatprep.mubr.bf16.mxu1 %v1927_v3 }
  0x91   :  { %758 = vmatmul.mubr.bf16.gmra.mrb[40].mxu0 %v1928_v4  ;;  %1791 = vmatmul.mubr.bf16.gmra.mrb[40].mxu1 %v1929_v5  ;;  %v2303_v4 = vld [vmem:[%s2541_s2] ss:$0 sm:$0xff] }
  0x92   :  { %765 = vmatprep.mubr.bf16.mxu0 %v1930_v6  ;;  %1794 = vmatprep.mubr.bf16.mxu1 %v1932_v7 }
  0x99   :  { %766 = vmatmul.mubr.bf16.gmra.mrb[44].mxu0 %v1933_v8  ;;  %1795 = vmatmul.mubr.bf16.gmra.mrb[44].mxu1 %v1934_v9 }
  0x9a   :  { %773 = vmatprep.mubr.bf16.mxu0 %v1935_v10  ;;  %1798 = vmatprep.mubr.bf16.mxu1 %v1937_v11 }
  0xa1   :  { %774 = vmatmul.mubr.bf16.gmra.mrb[48].mxu0 %v1938_v12  ;;  %1799 = vmatmul.mubr.bf16.gmra.mrb[48].mxu1 %v1939_v13 }
  0xa2   :  { %781 = vmatprep.mubr.bf16.mxu0 %v1940_v14  ;;  %1802 = vmatprep.mubr.bf16.mxu1 %v1942_v15  ;;  %v2312_v14 = vld [vmem:[%s2541_s2 + $0x1] ss:$0 sm:$0xff] }
  0xa9   :  { %782 = vmatmul.mubr.bf16.gmra.mrb[52].mxu0 %v1943_v16  ;;  %1803 = vmatmul.mubr.bf16.gmra.mrb[52].mxu1 %v1944_v17 }
  0xaa   :  { %789 = vmatprep.mubr.bf16.mxu0 %v1945_v18  ;;  %1806 = vmatprep.mubr.bf16.mxu1 %v1947_v19 }
  0xb1   :  { %790 = vmatmul.mubr.bf16.gmra.mrb[56].mxu0 %v1948_v20  ;;  %1807 = vmatmul.mubr.bf16.gmra.mrb[56].mxu1 %v1949_v21 }
  0xb2   :  { %797 = vmatprep.mubr.bf16.mxu0 %v1950_v22  ;;  %1810 = vmatprep.mubr.bf16.mxu1 %v1952_v23 }
  0xb9   :  { %798 = vmatmul.mubr.bf16.gmra.mrb[60].mxu0 %v1953_v24  ;;  %1811 = vmatmul.mubr.bf16.gmra.mrb[60].mxu1 %v1954_v25 }
  0xba   :  { %805 = vmatprep.mubr.bf16.mxu0 %v1955_v26  ;;  %v2318_v26 = vld [vmem:[%s2541_s2 + $0x2] ss:$0 sm:$0xff] }
  0xc1   :  { %806 = vmatmul.mubr.bf16.gmra.mrb[64].mxu0 %v1957_v27 }
 0x114   :  { %v679_v28 = vpop.f32.mrb[0].mxu0  ;;  %v2278_v29 = vpop.f32.mrb[0].mxu1 }
 0x115   :  { %v681_v30 = vpop.f32.mrb[1].mxu0  ;;  %v817_v31 = vpop.f32.mrb[1].mxu1  ;;  %v680_v6 = vadd.f32 %v2303_v4, %v679_v28 }
 0x116   :  { %v682_v32 = vpop.f32.mrb[2].mxu0  ;;  %v2280_v33 = vpop.f32.mrb[2].mxu1 }
 0x117   :  { %v684_v34 = vpop.f32.mrb[3].mxu0  ;;  %v820_v35 = vpop.f32.mrb[3].mxu1  ;;  %v683_v13 = vadd.f32 %v2303_v4, %v682_v32 }
 0x11c   :  { %v687_v36 = vpop.f32.mrb[4].mxu0  ;;  %v2282_v37 = vpop.f32.mrb[4].mxu1 }
 0x11d   :  { %v689_v38 = vpop.f32.mrb[5].mxu0  ;;  %v825_v39 = vpop.f32.mrb[5].mxu1  ;;  %v688_v5 = vadd.f32 %v2303_v4, %v687_v36 }
 0x11e   :  { %v690_v40 = vpop.f32.mrb[6].mxu0  ;;  %v2284_v41 = vpop.f32.mrb[6].mxu1 }
 0x11f   :  { %v692_v42 = vpop.f32.mrb[7].mxu0  ;;  %v828_v43 = vpop.f32.mrb[7].mxu1  ;;  %v691_v9 = vadd.f32 %v2303_v4, %v690_v40 }
 0x124   :  { %v695_v44 = vpop.f32.mrb[8].mxu0  ;;  %v2286_v45 = vpop.f32.mrb[8].mxu1 }
 0x125   :  { %v697_v46 = vpop.f32.mrb[9].mxu0  ;;  %v833_v47 = vpop.f32.mrb[9].mxu1  ;;  %v696_v32 = vadd.f32 %v2303_v4, %v695_v44 }
 0x126   :  { %v698_v48 = vpop.f32.mrb[10].mxu0  ;;  %v2288_v49 = vpop.f32.mrb[10].mxu1 }
 0x127   :  { %v700_v50 = vpop.f32.mrb[11].mxu0  ;;  %v836_v51 = vpop.f32.mrb[11].mxu1  ;;  %v699_v47 = vadd.f32 %v2303_v4, %v698_v48 }
 0x12c   :  { %v703_v52 = vpop.f32.mrb[12].mxu0  ;;  %v2290_v53 = vpop.f32.mrb[12].mxu1 }
 0x12d   :  { %v705_v54 = vpop.f32.mrb[13].mxu0  ;;  %v841_v55 = vpop.f32.mrb[13].mxu1  ;;  %v704_v30 = vadd.f32 %v2303_v4, %v703_v52 }
 0x12e   :  { %v706_v56 = vpop.f32.mrb[14].mxu0  ;;  %v2292_v57 = vpop.f32.mrb[14].mxu1 }
 0x12f   :  { %v708_v58 = vpop.f32.mrb[15].mxu0  ;;  %v844_v59 = vpop.f32.mrb[15].mxu1  ;;  %v707_v38 = vadd.f32 %v2303_v4, %v706_v56 }
 0x134   :  { %v2294_v60 = vpop.f32.mrb[16].mxu0  ;;  %v2296_v61 = vpop.f32.mrb[16].mxu1 }
 0x135   :  { %v713_v62 = vpop.f32.mrb[17].mxu0  ;;  %v849_v63 = vpop.f32.mrb[17].mxu1 }
 0x136   :  { %v2298_v0 = vpop.f32.mrb[18].mxu0  ;;  %v850_v1 = vpop.f32.mrb[18].mxu1 }
 0x137   :  { %v716_v2 = vpop.f32.mrb[19].mxu0  ;;  %v851_v3 = vpop.f32.mrb[19].mxu1 }
 0x13c   :  { %v719_v7 = vpop.f32.mrb[20].mxu0  ;;  %v1772_v8 = vpop.f32.mrb[20].mxu1 }
 0x13d   :  { %v896_v10 = vadd.f32 %v1772_v8, %v688_v5  ;;  %v721_v11 = vpop.f32.mrb[21].mxu0  ;;  %v887_v12 = vpop.f32.mrb[21].mxu1  ;;  %v720_v8 = vadd.f32 %v2303_v4, %v719_v7  ;;  %v715_v7 = vadd.f32 %v2303_v4, %v2298_v0 }
 0x13e   :  { %v888_v15 = vadd.f32 %v887_v12, %v680_v6  ;;  %v722_v16 = vpop.f32.mrb[22].mxu0  ;;  %v1773_v17 = vpop.f32.mrb[22].mxu1 }
 0x13f   :  { %v1063_v18 = vmax.f32 %v896_v10, 0.0  ;;  %v899_v19 = vadd.f32 %v1773_v17, %v691_v9  ;;  %v724_v20 = vpop.f32.mrb[23].mxu0  ;;  %v890_v21 = vpop.f32.mrb[23].mxu1  ;;  %v712_v10 = vadd.f32 %v2303_v4, %v2294_v60 }
 0x140   :  { %v1061_v22 = vmax.f32 %v888_v15, 0.0  ;;  %v891_v23 = vadd.f32 %v890_v21, %v683_v13  ;;  %v723_v15 = vadd.f32 %v2303_v4, %v722_v16 }
 0x141   :  { %v1111_v24 = vmul.f32 %v2312_v14, %v1063_v18  ;;  %v1064_v25 = vmax.f32 %v899_v19, 0.0 }
 0x142   :  { %v1109_v27 = vmul.f32 %v2312_v14, %v1061_v22  ;;  %v1062_v28 = vmax.f32 %v891_v23, 0.0 }
 0x143   :  { %v1112_v31 = vmul.f32 %v2312_v14, %v1064_v25  ;;  %v1159_v39 = vadd.f32 %v2318_v26, %v1111_v24 }
 0x144   :  { %v1110_v34 = vmul.f32 %v2312_v14, %v1062_v28  ;;  %v2325_v35 = vpop.f32.mrb[24].mxu0  ;;  %v1776_v36 = vpop.f32.mrb[24].mxu1  ;;  %v1157_v50 = vadd.f32 %v2318_v26, %v1109_v27 }
 0x145   :  { %v1160_v40 = vadd.f32 %v2318_v26, %v1112_v31  ;;  %v912_v42 = vadd.f32 %v1776_v36, %v704_v30  ;;  %v729_v43 = vpop.f32.mrb[25].mxu0  ;;  %v903_v46 = vpop.f32.mrb[25].mxu1 }
 0x146   :  { %v1158_v44 = vadd.f32 %v2318_v26, %v1110_v34  ;;  %v904_v51 = vadd.f32 %v903_v46, %v696_v32  ;;  %v730_v52 = vpop.f32.mrb[26].mxu0  ;;  %v1777_v54 = vpop.f32.mrb[26].mxu1  ;;  %v728_v46 = vadd.f32 %v2303_v4, %v2325_v35 }
 0x147   :  { %v1607_v55 = vpack.c.bf16 %v1160_v40, %v1159_v39  ;;  %v1067_v58 = vmax.f32 %v912_v42, 0.0  ;;  %v915_v59 = vadd.f32 %v1777_v54, %v707_v38  ;;  %v732_v56 = vpop.f32.mrb[27].mxu0  ;;  %v906_v62 = vpop.f32.mrb[27].mxu1 }
 0x148   :  { %v1602_v63 = vpack.c.bf16 %v1158_v44, %v1157_v50  ;;  %v1065_v1 = vmax.f32 %v904_v51, 0.0  ;;  %v907_v2 = vadd.f32 %v906_v62, %v699_v47  ;;  %v731_v62 = vadd.f32 %v2303_v4, %v730_v52 }
 0x149   :  { %1704 = vst [vmem:[%s2542_s3 + $0x8] sm:$0xff] %v1607_v55   ;;  %v1115_v48 = vmul.f32 %v2312_v14, %v1067_v58  ;;  %v1068_v3 = vmax.f32 %v915_v59, 0.0 }
 0x14a   :  { %1603 = vst [vmem:[%s2542_s3] sm:$0xff] %v1602_v63   ;;  %v1113_v5 = vmul.f32 %v2312_v14, %v1065_v1  ;;  %v1066_v6 = vmax.f32 %v907_v2, 0.0 }
 0x14b   :  { %v1116_v9 = vmul.f32 %v2312_v14, %v1068_v3  ;;  %v1163_v17 = vadd.f32 %v2318_v26, %v1115_v48 }
 0x14c   :  { %v1114_v11 = vmul.f32 %v2312_v14, %v1066_v6  ;;  %v735_v12 = vpop.f32.mrb[28].mxu0  ;;  %v1780_v13 = vpop.f32.mrb[28].mxu1  ;;  %v1161_v22 = vadd.f32 %v2318_v26, %v1113_v5 }
 0x14d   :  { %v1164_v18 = vadd.f32 %v2318_v26, %v1116_v9  ;;  %v928_v19 = vadd.f32 %v1780_v13, %v720_v8  ;;  %v737_v20 = vpop.f32.mrb[29].mxu0  ;;  %v919_v21 = vpop.f32.mrb[29].mxu1  ;;  %v736_v42 = vadd.f32 %v2303_v4, %v735_v12 }
 0x14e   :  { %v1162_v60 = vadd.f32 %v2318_v26, %v1114_v11  ;;  %v920_v23 = vadd.f32 %v919_v21, %v712_v10  ;;  %v738_v24 = vpop.f32.mrb[30].mxu0  ;;  %v1781_v25 = vpop.f32.mrb[30].mxu1 }
 0x14f   :  { %v1617_v27 = vpack.c.bf16 %v1164_v18, %v1163_v17  ;;  %v1071_v28 = vmax.f32 %v928_v19, 0.0  ;;  %v931_v16 = vadd.f32 %v1781_v25, %v723_v15  ;;  %v740_v30 = vpop.f32.mrb[31].mxu0  ;;  %v922_v31 = vpop.f32.mrb[31].mxu1  ;;  %v739_v54 = vadd.f32 %v2303_v4, %v738_v24 }
 0x150   :  { %v1612_v32 = vpack.c.bf16 %v1162_v60, %v1161_v22  ;;  %v1069_v34 = vmax.f32 %v920_v23, 0.0  ;;  %v923_v36 = vadd.f32 %v922_v31, %v715_v7 }
 0x151   :  { %1706 = vst [vmem:[%s2542_s3 + $0x18] sm:$0xff] %v1617_v27   ;;  %v1119_v0 = vmul.f32 %v2312_v14, %v1071_v28  ;;  %v1072_v38 = vmax.f32 %v931_v16, 0.0 }
 0x152   :  { %1705 = vst [vmem:[%s2542_s3 + $0x10] sm:$0xff] %v1612_v32   ;;  %v1117_v39 = vmul.f32 %v2312_v14, %v1069_v34  ;;  %v1070_v40 = vmax.f32 %v923_v36, 0.0 }
 0x153   :  { %v1120_v43 = vmul.f32 %v2312_v14, %v1072_v38  ;;  %v1167_v51 = vadd.f32 %v2318_v26, %v1119_v0 }
 0x154   :  { %v1118_v47 = vmul.f32 %v2312_v14, %v1070_v40  ;;  %v743_v50 = vpop.f32.mrb[32].mxu0  ;;  %v1784_v44 = vpop.f32.mrb[32].mxu1  ;;  %v1165_v63 = vadd.f32 %v2318_v26, %v1117_v39 }
 0x155   :  { %v1168_v55 = vadd.f32 %v2318_v26, %v1120_v43  ;;  %v944_v58 = vadd.f32 %v1784_v44, %v736_v42  ;;  %v745_v59 = vpop.f32.mrb[33].mxu0  ;;  %v935_v56 = vpop.f32.mrb[33].mxu1  ;;  %v744_v19 = vadd.f32 %v2303_v4, %v743_v50 }
 0x156   :  { %v1166_v1 = vadd.f32 %v2318_v26, %v1118_v47  ;;  %v936_v35 = vadd.f32 %v935_v56, %v728_v46  ;;  %v746_v2 = vpop.f32.mrb[34].mxu0  ;;  %v1785_v48 = vpop.f32.mrb[34].mxu1 }
 0x157   :  { %v1627_v3 = vpack.c.bf16 %v1168_v55, %v1167_v51  ;;  %v1075_v5 = vmax.f32 %v944_v58, 0.0  ;;  %v947_v6 = vadd.f32 %v1785_v48, %v739_v54  ;;  %v748_v8 = vpop.f32.mrb[35].mxu0  ;;  %v938_v9 = vpop.f32.mrb[35].mxu1  ;;  %v747_v28 = vadd.f32 %v2303_v4, %v746_v2 }
 0x158   :  { %v1622_v10 = vpack.c.bf16 %v1166_v1, %v1165_v63  ;;  %v1073_v11 = vmax.f32 %v936_v35, 0.0  ;;  %v939_v12 = vadd.f32 %v938_v9, %v731_v62 }
 0x159   :  { %1708 = vst [vmem:[%s2542_s3 + $0x28] sm:$0xff] %v1627_v3   ;;  %v1123_v52 = vmul.f32 %v2312_v14, %v1075_v5  ;;  %v1076_v13 = vmax.f32 %v947_v6, 0.0 }
 0x15a   :  { %1707 = vst [vmem:[%s2542_s3 + $0x20] sm:$0xff] %v1622_v10   ;;  %v1121_v15 = vmul.f32 %v2312_v14, %v1073_v11  ;;  %v1074_v17 = vmax.f32 %v939_v12, 0.0 }
 0x15b   :  { %v1124_v18 = vmul.f32 %v2312_v14, %v1076_v13  ;;  %v1171_v22 = vadd.f32 %v2318_v26, %v1123_v52 }
 0x15c   :  { %v1122_v20 = vmul.f32 %v2312_v14, %v1074_v17  ;;  %v751_v21 = vpop.f32.mrb[36].mxu0  ;;  %v1788_v7 = vpop.f32.mrb[36].mxu1  ;;  %v1169_v27 = vadd.f32 %v2318_v26, %v1121_v15 }
 0x15d   :  { %v1172_v60 = vadd.f32 %v2318_v26, %v1124_v18  ;;  %v752_v23 = vadd.f32 %v2303_v4, %v751_v21  ;;  %v753_v24 = vpop.f32.mrb[37].mxu0  ;;  %v951_v25 = vpop.f32.mrb[37].mxu1 }
 0x15e   :  { %v1170_v16 = vadd.f32 %v2318_v26, %v1122_v20  ;;  %v952_v30 = vadd.f32 %v951_v25, %v744_v19  ;;  %v754_v31 = vpop.f32.mrb[38].mxu0  ;;  %v1789_v32 = vpop.f32.mrb[38].mxu1 }
 0x15f   :  { %v1637_v34 = vpack.c.bf16 %v1172_v60, %v1171_v22  ;;  %v960_v36 = vadd.f32 %v1788_v7, %v752_v23  ;;  %v755_v0 = vadd.f32 %v2303_v4, %v754_v31  ;;  %v756_v38 = vpop.f32.mrb[39].mxu0  ;;  %v954_v39 = vpop.f32.mrb[39].mxu1 }
 0x160   :  { %v1632_v40 = vpack.c.bf16 %v1170_v16, %v1169_v27  ;;  %v1077_v42 = vmax.f32 %v952_v30, 0.0  ;;  %v955_v43 = vadd.f32 %v954_v39, %v747_v28 }
 0x161   :  { %1710 = vst [vmem:[%s2542_s3 + $0x38] sm:$0xff] %v1637_v34   ;;  %v1079_v46 = vmax.f32 %v960_v36, 0.0  ;;  %v963_v47 = vadd.f32 %v1789_v32, %v755_v0 }
 0x162   :  { %1709 = vst [vmem:[%s2542_s3 + $0x30] sm:$0xff] %v1632_v40   ;;  %v1125_v50 = vmul.f32 %v2312_v14, %v1077_v42  ;;  %v1078_v44 = vmax.f32 %v955_v43, 0.0 }
 0x163   :  { %v1127_v51 = vmul.f32 %v2312_v14, %v1079_v46  ;;  %v1080_v54 = vmax.f32 %v963_v47, 0.0 }
 0x164   :  { %v1126_v55 = vmul.f32 %v2312_v14, %v1078_v44  ;;  %v759_v58 = vpop.f32.mrb[40].mxu0  ;;  %v1792_v59 = vpop.f32.mrb[40].mxu1  ;;  %v1173_v35 = vadd.f32 %v2318_v26, %v1125_v50 }
 0x165   :  { %v1128_v56 = vmul.f32 %v2312_v14, %v1080_v54  ;;  %v760_v62 = vadd.f32 %v2303_v4, %v759_v58  ;;  %v761_v63 = vpop.f32.mrb[41].mxu0  ;;  %v967_v1 = vpop.f32.mrb[41].mxu1  ;;  %v1175_v5 = vadd.f32 %v2318_v26, %v1127_v51 }
 0x166   :  { %v1174_v2 = vadd.f32 %v2318_v26, %v1126_v55  ;;  %v762_v48 = vpop.f32.mrb[42].mxu0  ;;  %v1793_v3 = vpop.f32.mrb[42].mxu1 }
 0x167   :  { %v1176_v6 = vadd.f32 %v2318_v26, %v1128_v56  ;;  %v763_v8 = vadd.f32 %v2303_v4, %v762_v48  ;;  %v968_v9 = vadd.f32 %v967_v1, %v760_v62  ;;  %v764_v10 = vpop.f32.mrb[43].mxu0  ;;  %v970_v11 = vpop.f32.mrb[43].mxu1 }
 0x168   :  { %v1642_v12 = vpack.c.bf16 %v1174_v2, %v1173_v35  ;;  %v816_v35 = vadd.f32 %v2303_v4, %v2278_v29  ;;  %v819_v29 = vadd.f32 %v2303_v4, %v2280_v33 }
 0x169   :  { %v1647_v52 = vpack.c.bf16 %v1176_v6, %v1175_v5  ;;  %v1081_v13 = vmax.f32 %v968_v9, 0.0  ;;  %v971_v15 = vadd.f32 %v970_v11, %v763_v8 }
 0x16a   :  { %1711 = vst [vmem:[%s2542_s3 + $0x40] sm:$0xff] %v1642_v12  }
 0x16b   :  { %1712 = vst [vmem:[%s2542_s3 + $0x48] sm:$0xff] %v1647_v52   ;;  %v1129_v17 = vmul.f32 %v2312_v14, %v1081_v13  ;;  %v1082_v18 = vmax.f32 %v971_v15, 0.0 }
 0x16c   :  { %v767_v19 = vpop.f32.mrb[44].mxu0  ;;  %v1796_v20 = vpop.f32.mrb[44].mxu1 }
 0x16d   :  { %v1130_v21 = vmul.f32 %v2312_v14, %v1082_v18  ;;  %v768_v7 = vadd.f32 %v2303_v4, %v767_v19  ;;  %v769_v22 = vpop.f32.mrb[45].mxu0  ;;  %v983_v60 = vpop.f32.mrb[45].mxu1  ;;  %v1177_v25 = vadd.f32 %v2318_v26, %v1129_v17 }
 0x16e   :  { %v770_v23 = vpop.f32.mrb[46].mxu0  ;;  %v1797_v24 = vpop.f32.mrb[46].mxu1 }
 0x16f   :  { %v1178_v27 = vadd.f32 %v2318_v26, %v1130_v21  ;;  %v976_v28 = vadd.f32 %v1792_v59, %v768_v7  ;;  %v771_v16 = vadd.f32 %v2303_v4, %v770_v23  ;;  %v772_v30 = vpop.f32.mrb[47].mxu0  ;;  %v986_v31 = vpop.f32.mrb[47].mxu1 }
 0x170   :  { %v824_v30 = vadd.f32 %v2303_v4, %v2282_v37 }
 0x171   :  { %v1652_v32 = vpack.c.bf16 %v1178_v27, %v1177_v25  ;;  %v1083_v34 = vmax.f32 %v976_v28, 0.0  ;;  %v979_v36 = vadd.f32 %v1793_v3, %v771_v16  ;;  %v832_v28 = vadd.f32 %v2303_v4, %v2286_v45 }
 0x172   :  { %v835_v45 = vadd.f32 %v2303_v4, %v2288_v49 }
 0x173   :  { %1713 = vst [vmem:[%s2542_s3 + $0x50] sm:$0xff] %v1652_v32   ;;  %v1131_v0 = vmul.f32 %v2312_v14, %v1083_v34  ;;  %v1084_v38 = vmax.f32 %v979_v36, 0.0 }
 0x174   :  { %v775_v39 = vpop.f32.mrb[48].mxu0  ;;  %v2422_v40 = vpop.f32.mrb[48].mxu1 }
 0x175   :  { %v1132_v42 = vmul.f32 %v2312_v14, %v1084_v38  ;;  %v776_v43 = vadd.f32 %v2303_v4, %v775_v39  ;;  %v777_v46 = vpop.f32.mrb[49].mxu0  ;;  %v999_v47 = vpop.f32.mrb[49].mxu1  ;;  %v1179_v51 = vadd.f32 %v2318_v26, %v1131_v0 }
 0x176   :  { %v778_v50 = vpop.f32.mrb[50].mxu0  ;;  %v2426_v44 = vpop.f32.mrb[50].mxu1 }
 0x177   :  { %v1180_v54 = vadd.f32 %v2318_v26, %v1132_v42  ;;  %v984_v55 = vadd.f32 %v983_v60, %v776_v43  ;;  %v779_v58 = vadd.f32 %v2303_v4, %v778_v50  ;;  %v780_v59 = vpop.f32.mrb[51].mxu0  ;;  %v2431_v56 = vpop.f32.mrb[51].mxu1 }
 0x179   :  { %v1657_v62 = vpack.c.bf16 %v1180_v54, %v1179_v51  ;;  %v1085_v63 = vmax.f32 %v984_v55, 0.0  ;;  %v987_v1 = vadd.f32 %v986_v31, %v779_v58  ;;  %v827_v31 = vadd.f32 %v2303_v4, %v2284_v41 }
 0x17b   :  { %1714 = vst [vmem:[%s2542_s3 + $0x58] sm:$0xff] %v1657_v62   ;;  %v1133_v2 = vmul.f32 %v2312_v14, %v1085_v63  ;;  %v1086_v48 = vmax.f32 %v987_v1, 0.0 }
 0x17c   :  { %v783_v3 = vpop.f32.mrb[52].mxu0  ;;  %v1804_v5 = vpop.f32.mrb[52].mxu1 }
 0x17d   :  { %v1134_v6 = vmul.f32 %v2312_v14, %v1086_v48  ;;  %v784_v8 = vadd.f32 %v2303_v4, %v783_v3  ;;  %v1024_v9 = vadd.f32 %v1804_v5, %v816_v35  ;;  %v785_v10 = vpop.f32.mrb[53].mxu0  ;;  %v2441_v11 = vpop.f32.mrb[53].mxu1  ;;  %v1181_v12 = vadd.f32 %v2318_v26, %v1133_v2 }
 0x17e   :  { %v786_v52 = vpop.f32.mrb[54].mxu0  ;;  %v1805_v13 = vpop.f32.mrb[54].mxu1  ;;  %v840_v10 = vadd.f32 %v2303_v4, %v2290_v53 }
 0x17f   :  { %v1182_v15 = vadd.f32 %v2318_v26, %v1134_v6  ;;  %v992_v17 = vadd.f32 %v1796_v20, %v784_v8  ;;  %v1095_v18 = vmax.f32 %v1024_v9, 0.0  ;;  %v787_v19 = vadd.f32 %v2303_v4, %v786_v52  ;;  %v788_v21 = vpop.f32.mrb[55].mxu0  ;;  %v2448_v7 = vpop.f32.mrb[55].mxu1 }
 0x180   :  { %v1027_v22 = vadd.f32 %v1805_v13, %v819_v29  ;;  %v848_v29 = vadd.f32 %v2303_v4, %v2296_v61  ;;  %v843_v52 = vadd.f32 %v2303_v4, %v2292_v57 }
 0x181   :  { %v1662_v60 = vpack.c.bf16 %v1182_v15, %v1181_v12  ;;  %v1087_v23 = vmax.f32 %v992_v17, 0.0  ;;  %v995_v25 = vadd.f32 %v1797_v24, %v787_v19  ;;  %v1143_v27 = vmul.f32 %v2312_v14, %v1095_v18 }
 0x182   :  { %v1096_v33 = vmax.f32 %v1027_v22, 0.0 }
 0x183   :  { %1715 = vst [vmem:[%s2542_s3 + $0x60] sm:$0xff] %v1662_v60   ;;  %v1135_v20 = vmul.f32 %v2312_v14, %v1087_v23  ;;  %v1088_v16 = vmax.f32 %v995_v25, 0.0  ;;  %v1191_v37 = vadd.f32 %v2318_v26, %v1143_v27 }
 0x184   :  { %v1144_v24 = vmul.f32 %v2312_v14, %v1096_v33  ;;  %v791_v32 = vpop.f32.mrb[56].mxu0  ;;  %v1808_v34 = vpop.f32.mrb[56].mxu1 }
 0x185   :  { %v1136_v36 = vmul.f32 %v2312_v14, %v1088_v16  ;;  %v792_v0 = vadd.f32 %v2303_v4, %v791_v32  ;;  %v1040_v38 = vadd.f32 %v1808_v34, %v832_v28  ;;  %v793_v39 = vpop.f32.mrb[57].mxu0  ;;  %v1031_v42 = vpop.f32.mrb[57].mxu1  ;;  %v1183_v43 = vadd.f32 %v2318_v26, %v1135_v20 }
 0x186   :  { %v1192_v41 = vadd.f32 %v2318_v26, %v1144_v24  ;;  %v1032_v46 = vadd.f32 %v1031_v42, %v824_v30  ;;  %v794_v50 = vpop.f32.mrb[58].mxu0  ;;  %v1809_v51 = vpop.f32.mrb[58].mxu1 }
 0x187   :  { %v1184_v54 = vadd.f32 %v2318_v26, %v1136_v36  ;;  %v1000_v55 = vadd.f32 %v999_v47, %v792_v0  ;;  %v1099_v49 = vmax.f32 %v1040_v38, 0.0  ;;  %v795_v58 = vadd.f32 %v2303_v4, %v794_v50  ;;  %v796_v59 = vpop.f32.mrb[59].mxu0  ;;  %v1034_v62 = vpop.f32.mrb[59].mxu1 }
 0x188   :  { %v1687_v63 = vpack.c.bf16 %v1192_v41, %v1191_v37  ;;  %v1097_v1 = vmax.f32 %v1032_v46, 0.0  ;;  %v1043_v35 = vadd.f32 %v1809_v51, %v835_v45  ;;  %v1035_v2 = vadd.f32 %v1034_v62, %v827_v31 }
 0x189   :  { %v1667_v48 = vpack.c.bf16 %v1184_v54, %v1183_v43  ;;  %v1089_v3 = vmax.f32 %v1000_v55, 0.0  ;;  %v1147_v5 = vmul.f32 %v2312_v14, %v1099_v49  ;;  %v1003_v6 = vadd.f32 %v2431_v56, %v795_v58 }
 0x18a   :  { %1720 = vst [vmem:[%s2542_s3 + $0x88] sm:$0xff] %v1687_v63   ;;  %v1145_v47 = vmul.f32 %v2312_v14, %v1097_v1  ;;  %v1100_v8 = vmax.f32 %v1043_v35, 0.0  ;;  %v1098_v9 = vmax.f32 %v1035_v2, 0.0 }
 0x18b   :  { %1716 = vst [vmem:[%s2542_s3 + $0x68] sm:$0xff] %v1667_v48   ;;  %v1137_v56 = vmul.f32 %v2312_v14, %v1089_v3  ;;  %v1090_v12 = vmax.f32 %v1003_v6, 0.0  ;;  %v1195_v13 = vadd.f32 %v2318_v26, %v1147_v5 }
 0x18c   :  { %v1148_v15 = vmul.f32 %v2312_v14, %v1100_v8  ;;  %v1146_v17 = vmul.f32 %v2312_v14, %v1098_v9  ;;  %v799_v53 = vpop.f32.mrb[60].mxu0  ;;  %v1812_v18 = vpop.f32.mrb[60].mxu1  ;;  %v1193_v61 = vadd.f32 %v2318_v26, %v1145_v47 }
 0x18d   :  { %v1138_v19 = vmul.f32 %v2312_v14, %v1090_v12  ;;  %v800_v21 = vadd.f32 %v2303_v4, %v799_v53  ;;  %v1056_v22 = vadd.f32 %v1812_v18, %v848_v29  ;;  %v801_v60 = vpop.f32.mrb[61].mxu0  ;;  %v1047_v23 = vpop.f32.mrb[61].mxu1  ;;  %v1185_v25 = vadd.f32 %v2318_v26, %v1137_v56 }
 0x18e   :  { %v1196_v57 = vadd.f32 %v2318_v26, %v1148_v15  ;;  %v1194_v27 = vadd.f32 %v2318_v26, %v1146_v17  ;;  %v1048_v33 = vadd.f32 %v1047_v23, %v840_v10  ;;  %v802_v28 = vpop.f32.mrb[62].mxu0  ;;  %v1813_v20 = vpop.f32.mrb[62].mxu1 }
 0x18f   :  { %v1186_v16 = vadd.f32 %v2318_v26, %v1138_v19  ;;  %v1008_v30 = vadd.f32 %v2422_v40, %v800_v21  ;;  %v1103_v31 = vmax.f32 %v1056_v22, 0.0  ;;  %v803_v24 = vadd.f32 %v2303_v4, %v802_v28  ;;  %v804_v32 = vpop.f32.mrb[63].mxu0  ;;  %v1050_v34 = vpop.f32.mrb[63].mxu1 }
 0x190   :  { %v1697_v45 = vpack.c.bf16 %v1196_v57, %v1195_v13  ;;  %v1692_v36 = vpack.c.bf16 %v1194_v27, %v1193_v61  ;;  %v1101_v0 = vmax.f32 %v1048_v33, 0.0  ;;  %v1051_v38 = vadd.f32 %v1050_v34, %v843_v52 }
 0x191   :  { %v1672_v39 = vpack.c.bf16 %v1186_v16, %v1185_v25  ;;  %v1091_v42 = vmax.f32 %v1008_v30, 0.0  ;;  %v1151_v43 = vmul.f32 %v2312_v14, %v1103_v31  ;;  %v1011_v37 = vadd.f32 %v2426_v44, %v803_v24 }
 0x192   :  { %1722 = vst [vmem:[%s2542_s3 + $0x98] sm:$0xff] %v1697_v45   ;;  %1721 = vst [vmem:[%s2542_s3 + $0x90] sm:$0xff] %v1692_v36   ;;  %v1149_v40 = vmul.f32 %v2312_v14, %v1101_v0  ;;  %v1102_v41 = vmax.f32 %v1051_v38, 0.0 }
 0x193   :  { %1717 = vst [vmem:[%s2542_s3 + $0x70] sm:$0xff] %v1672_v39   ;;  %v1139_v46 = vmul.f32 %v2312_v14, %v1091_v42  ;;  %v1199_v50 = vadd.f32 %v2318_v26, %v1151_v43  ;;  %v1092_v44 = vmax.f32 %v1011_v37, 0.0 }
 0x194   :  { %v1150_v51 = vmul.f32 %v2312_v14, %v1102_v41  ;;  %v807_v54 = vpop.f32.mrb[64].mxu0  ;;  %v1197_v62 = vadd.f32 %v2318_v26, %v1149_v40 }
 0x195   :  { %v1598_v55 = vpack.c.bf16 %v1199_v50, %v1199_v50  ;;  %v1140_v49 = vmul.f32 %v2312_v14, %v1092_v44  ;;  %v808_v58 = vadd.f32 %v2303_v4, %v807_v54  ;;  %v809_v59 = vpop.f32.mrb[65].mxu0  ;;  %v1187_v35 = vadd.f32 %v2318_v26, %v1139_v46 }
 0x196   :  { %v1198_v63 = vadd.f32 %v2318_v26, %v1150_v51  ;;  %v810_v1 = vpop.f32.mrb[66].mxu0 }
 0x197   :  { %1415 = vst [vmem:[%s2542_s3 + $0xa8] sm:$0xf] %v1598_v55  ;;  %v1188_v2 = vadd.f32 %v2318_v26, %v1140_v49  ;;  %v1016_v48 = vadd.f32 %v2441_v11, %v808_v58  ;;  %v811_v3 = vadd.f32 %v2303_v4, %v810_v1  ;;  %v812_v5 = vpop.f32.mrb[67].mxu0 }
 0x198   :  { %v1702_v6 = vpack.c.bf16 %v1198_v63, %v1197_v62 }
 0x199   :  { %v1677_v47 = vpack.c.bf16 %v1188_v2, %v1187_v35  ;;  %v1093_v8 = vmax.f32 %v1016_v48, 0.0  ;;  %v1019_v9 = vadd.f32 %v2448_v7, %v811_v3 }
 0x19a   :  { %1723 = vst [vmem:[%s2542_s3 + $0xa0] sm:$0xff] %v1702_v6  }
 0x19b   :  { %1718 = vst [vmem:[%s2542_s3 + $0x78] sm:$0xff] %v1677_v47   ;;  %v1141_v10 = vmul.f32 %v2312_v14, %v1093_v8  ;;  %v1094_v29 = vmax.f32 %v1019_v9, 0.0 }
 0x19d   :  { %v1142_v11 = vmul.f32 %v2312_v14, %v1094_v29  ;;  %v1189_v4 = vadd.f32 %v2318_v26, %v1141_v10 }
 0x19f   :  { %v1190_v56 = vadd.f32 %v2318_v26, %v1142_v11 }
 0x1a1   :  { %v1682_v12 = vpack.c.bf16 %v1190_v56, %v1189_v4 }
 0x1a3   :  { %1719 = vst [vmem:[%s2542_s3 + $0x80] sm:$0xff] %v1682_v12  }

// kernel: cnn_kaggle_forward.11
= control target key start
LH: loop header
LB: loop body
LE: loop exit
PB: predicated region body
PF: predicated region fallthrough
CT: control target
= control target key end

     0   :  { %v2791_v0 = vmov 0   ;;  %s3776_s1 = inlined_call_operand.vmem [shape: bf16[640,128], index: 1, kind: input, shape index: {}]   ;;  %s3777_s0 = inlined_call_operand.vmem [shape: bf16[344,640], index: 0, kind: input, shape index: {}]   ;;  %s3778_s2 = inlined_call_operand.vmem [shape: f32[3,128], index: 2, kind: input, shape index: {}]   ;;  %s3779_s3 = inlined_call_operand.vmem [shape: bf16[344,128], index: 3, kind: output, shape index: {}]  }
   0x1   :  { %1033 = vmatprep.subr.bf16.mxu0 %v2791_v0  ;;  %2470 = vmatprep.subr.bf16.mxu1 %v2791_v0  ;;  %v2599_v1 = vld [vmem:[%s3776_s1] sm:$0xff]   ;;  %v2601_v3 = vld [vmem:[%s3776_s1 + $0x8] sm:$0xff]   ;;  %v2603_v5 = vld [vmem:[%s3776_s1 + $0x10] sm:$0xff]  }
   0x2   :  { %v2820_v2 = vld [vmem:[%s3776_s1 + $0x80] sm:$0xff]   ;;  %1034 = vmatpush1.bf16.msra.mxu0 %v2599_v1  ;;  %v2830_v4 = vld [vmem:[%s3776_s1 + $0x88] sm:$0xff]   ;;  %v2841_v6 = vld [vmem:[%s3776_s1 + $0x90] sm:$0xff]  }
   0x3   :  { %2486 = vmatpush1.bf16.msra.mxu1 %v2820_v2  ;;  %1035 = vmatprep.subr.bf16.mxu0 %v2791_v0  ;;  %v2605_v7 = vld [vmem:[%s3776_s1 + $0x18] sm:$0xff]   ;;  %v2607_v9 = vld [vmem:[%s3776_s1 + $0x20] sm:$0xff]   ;;  %v2609_v11 = vld [vmem:[%s3776_s1 + $0x28] sm:$0xff]  }
   0x4   :  { %2471 = vmatprep.subr.bf16.mxu1 %v2791_v0  ;;  %v2852_v8 = vld [vmem:[%s3776_s1 + $0x98] sm:$0xff]   ;;  %v2863_v10 = vld [vmem:[%s3776_s1 + $0xa0] sm:$0xff]   ;;  %v2874_v12 = vld [vmem:[%s3776_s1 + $0xa8] sm:$0xff]  }
   0x5   :  { %v2611_v13 = vld [vmem:[%s3776_s1 + $0x30] sm:$0xff]   ;;  %v2613_v15 = vld [vmem:[%s3776_s1 + $0x38] sm:$0xff]   ;;  %v2615_v17 = vld [vmem:[%s3776_s1 + $0x40] sm:$0xff]  }
   0x6   :  { %1036 = vmatpush1.bf16.msra.mxu0 %v2601_v3  ;;  %v2885_v14 = vld [vmem:[%s3776_s1 + $0xb0] sm:$0xff]   ;;  %v2896_v16 = vld [vmem:[%s3776_s1 + $0xb8] sm:$0xff]   ;;  %v2907_v18 = vld [vmem:[%s3776_s1 + $0xc0] sm:$0xff]  }
   0x7   :  { %2487 = vmatpush1.bf16.msra.mxu1 %v2830_v4  ;;  %1037 = vmatprep.subr.bf16.mxu0 %v2791_v0  ;;  %v2633_v19 = vld [vmem:[%s3777_s0 + $0x4] ss:$20 sps:$4 sm:$0xff]   ;;  %v2617_v20 = vld [vmem:[%s3776_s1 + $0x48] sm:$0xff]   ;;  %v2636_v21 = vld [vmem:[%s3777_s0 + $0xfc] ss:$20 sps:$4 sm:$0xff]  }
   0x8   :  { %2472 = vmatprep.subr.bf16.mxu1 %v2791_v0  ;;  %v2924_v22 = vld [vmem:[%s3776_s1 + $0xc8] sm:$0xff]   ;;  %1065 = vmatprep.mubr.bf16.mxu0 %v2633_v19  ;;  %v2619_v23 = vld [vmem:[%s3776_s1 + $0x50] sm:$0xff]   ;;  %v2621_v25 = vld [vmem:[%s3776_s1 + $0x58] sm:$0xff]  }
   0x9   :  { %1321 = vmatprep.mubr.bf16.mxu1 %v2636_v21  ;;  %v2935_v24 = vld [vmem:[%s3776_s1 + $0xd0] sm:$0xff]   ;;  %v2946_v26 = vld [vmem:[%s3776_s1 + $0xd8] sm:$0xff]   ;;  %v2623_v27 = vld [vmem:[%s3776_s1 + $0x60] sm:$0xff]  }
   0xa   :  { %1038 = vmatpush1.bf16.msra.mxu0 %v2603_v5  ;;  %v2957_v28 = vld [vmem:[%s3776_s1 + $0xe0] sm:$0xff]   ;;  %v2625_v29 = vld [vmem:[%s3776_s1 + $0x68] sm:$0xff]   ;;  %v2627_v31 = vld [vmem:[%s3776_s1 + $0x70] sm:$0xff]  }
   0xb   :  { %2488 = vmatpush1.bf16.msra.mxu1 %v2841_v6  ;;  %1039 = vmatprep.subr.bf16.mxu0 %v2791_v0  ;;  %v2968_v30 = vld [vmem:[%s3776_s1 + $0xe8] sm:$0xff]   ;;  %v2979_v32 = vld [vmem:[%s3776_s1 + $0xf0] sm:$0xff]   ;;  %v2629_v33 = vld [vmem:[%s3776_s1 + $0x78] sm:$0xff]  }
   0xc   :  { %2473 = vmatprep.subr.bf16.mxu1 %v2791_v0  ;;  %v2990_v34 = vld [vmem:[%s3776_s1 + $0xf8] sm:$0xff]   ;;  %v2643_v35 = vld [vmem:[%s3776_s1 + $0x100] sm:$0xff]   ;;  %v2656_v40 = vld [vmem:[%s3776_s1 + $0x108] sm:$0xff]  }
   0xd   :  { %v2631_v36 = vld [vmem:[%s3777_s0] ss:$20 sps:$4 sm:$0xff]   ;;  %v2634_v37 = vld [vmem:[%s3777_s0 + $0xf8] ss:$20 sps:$4 sm:$0xff]   ;;  %v2641_v41 = vld [vmem:[%s3777_s0 + $0x28] ss:$20 sps:$4 sm:$0xff]  }
   0xe   :  { %1040 = vmatpush1.bf16.msra.mxu0 %v2605_v7  ;;  %v2637_v38 = vld [vmem:[%s3777_s0 + $0x2c] ss:$20 sps:$4 sm:$0xff]   ;;  %v2639_v39 = vld [vmem:[%s3777_s0 + $0x124] ss:$20 sps:$4 sm:$0xff]   ;;  %v2669_v43 = vld [vmem:[%s3776_s1 + $0x110] sm:$0xff]  }
   0xf   :  { %2489 = vmatpush1.bf16.msra.mxu1 %v2852_v8  ;;  %1041 = vmatprep.subr.bf16.mxu0 %v2791_v0  ;;  %v2642_v42 = vld [vmem:[%s3777_s0 + $0x120] ss:$20 sps:$4 sm:$0xff]   ;;  %v2682_v46 = vld [vmem:[%s3776_s1 + $0x118] sm:$0xff]   ;;  %v2648_v47 = vld [vmem:[%s3777_s0 + $0x50] ss:$20 sps:$4 sm:$0xff]  }
  0x10   :  { %2474 = vmatprep.subr.bf16.mxu1 %v2791_v0  ;;  %v2644_v44 = vld [vmem:[%s3777_s0 + $0x54] ss:$20 sps:$4 sm:$0xff]   ;;  %v2646_v45 = vld [vmem:[%s3777_s0 + $0x14c] ss:$20 sps:$4 sm:$0xff]   ;;  %v2650_v50 = vld [vmem:[%s3777_s0 + $0x7c] ss:$20 sps:$4 sm:$0xff]  }
  0x11   :  { %v2695_v48 = vld [vmem:[%s3776_s1 + $0x120] sm:$0xff]   ;;  %v2649_v49 = vld [vmem:[%s3777_s0 + $0x148] ss:$20 sps:$4 sm:$0xff]   ;;  %v2654_v53 = vld [vmem:[%s3777_s0 + $0x78] ss:$20 sps:$4 sm:$0xff]  }
  0x12   :  { %1042 = vmatpush1.bf16.msra.mxu0 %v2607_v9  ;;  %v2652_v51 = vld [vmem:[%s3777_s0 + $0x174] ss:$20 sps:$4 sm:$0xff]   ;;  %v2655_v54 = vld [vmem:[%s3777_s0 + $0x170] ss:$20 sps:$4 sm:$0xff]   ;;  %v2733_v58 = vld [vmem:[%s3776_s1 + $0x138] sm:$0xff]  }
  0x13   :  { %2490 = vmatpush1.bf16.msra.mxu1 %v2863_v10  ;;  %1043 = vmatprep.subr.bf16.mxu0 %v2791_v0  ;;  %v2708_v52 = vld [vmem:[%s3776_s1 + $0x128] sm:$0xff]   ;;  %v2721_v55 = vld [vmem:[%s3776_s1 + $0x130] sm:$0xff]   ;;  %v2657_v56 = vld [vmem:[%s3777_s0 + $0xa4] ss:$20 sps:$4 sm:$0xff]  }
  0x14   :  { %2475 = vmatprep.subr.bf16.mxu1 %v2791_v0  ;;  %v2659_v57 = vld [vmem:[%s3777_s0 + $0x19c] ss:$20 sps:$4 sm:$0xff]   ;;  %v2661_v59 = vld [vmem:[%s3777_s0 + $0xa0] ss:$20 sps:$4 sm:$0xff]   ;;  %v2662_v60 = vld [vmem:[%s3777_s0 + $0x198] ss:$20 sps:$4 sm:$0xff]  }
  0x15   :  { %v2663_v61 = vld [vmem:[%s3777_s0 + $0xcc] ss:$20 sps:$4 sm:$0xff]   ;;  %v2665_v62 = vld [vmem:[%s3777_s0 + $0x1c4] ss:$20 sps:$4 sm:$0xff]   ;;  %v2667_v63 = vld [vmem:[%s3777_s0 + $0xc8] ss:$20 sps:$4 sm:$0xff]  }
  0x16   :  { %1044 = vmatpush1.bf16.msra.mxu0 %v2609_v11  ;;  %v2668_v1 = vld [vmem:[%s3777_s0 + $0x1c0] ss:$20 sps:$4 sm:$0xff]   ;;  %v2675_v5 = vld [vmem:[%s3777_s0 + $0x1e8] ss:$20 sps:$4 sm:$0xff]   ;;  %v2681_v9 = vld [vmem:[%s3777_s0 + $0x210] ss:$20 sps:$4 sm:$0xff]  }
  0x17   :  { %2491 = vmatpush1.bf16.msra.mxu1 %v2874_v12  ;;  %1045 = vmatprep.subr.bf16.mxu0 %v2791_v0  ;;  %v2672_v3 = vld [vmem:[%s3777_s0 + $0x1ec] ss:$20 sps:$4 sm:$0xff]   ;;  %v2678_v7 = vld [vmem:[%s3777_s0 + $0x214] ss:$20 sps:$4 sm:$0xff]   ;;  %v2685_v11 = vld [vmem:[%s3777_s0 + $0x23c] ss:$20 sps:$4 sm:$0xff]  }
  0x18   :  { %2476 = vmatprep.subr.bf16.mxu1 %v2791_v0  ;;  %v2700_v19 = vld [vmem:[%s3777_s0 + $0x190] ss:$20 sps:$4 sm:$0xff]  }
  0x19   :  { %v2702_v21 = vld [vmem:[%s3777_s0 + $0x1bc] ss:$20 sps:$4 sm:$0xff]  }
  0x1a   :  { %1046 = vmatpush1.bf16.msra.mxu0 %v2611_v13  ;;  %v2688_v13 = vld [vmem:[%s3777_s0 + $0x238] ss:$20 sps:$4 sm:$0xff]  }
  0x1b   :  { %2492 = vmatpush1.bf16.msra.mxu1 %v2885_v14  ;;  %1047 = vmatprep.subr.bf16.mxu0 %v2791_v0 }
  0x1c   :  { %2477 = vmatprep.subr.bf16.mxu1 %v2791_v0 }
  0x1e   :  { %1048 = vmatpush1.bf16.msra.mxu0 %v2613_v15  ;;  %v2691_v15 = vld [vmem:[%s3777_s0 + $0x264] ss:$20 sps:$4 sm:$0xff]  }
  0x1f   :  { %2493 = vmatpush1.bf16.msra.mxu1 %v2896_v16  ;;  %1049 = vmatprep.subr.bf16.mxu0 %v2791_v0 }
  0x20   :  { %2478 = vmatprep.subr.bf16.mxu1 %v2791_v0 }
  0x22   :  { %1050 = vmatpush1.bf16.msra.mxu0 %v2615_v17  ;;  %v2696_v17 = vld [vmem:[%s3777_s0 + $0x194] ss:$20 sps:$4 sm:$0xff]  }
  0x23   :  { %2494 = vmatpush1.bf16.msra.mxu1 %v2907_v18  ;;  %1051 = vmatprep.subr.bf16.mxu0 %v2791_v0 }
  0x24   :  { %2479 = vmatprep.subr.bf16.mxu1 %v2791_v0 }
  0x26   :  { %1052 = vmatpush1.bf16.msra.mxu0 %v2617_v20  ;;  %v2701_v20 = vld [vmem:[%s3777_s0 + $0x288] ss:$20 sps:$4 sm:$0xff]  }
  0x27   :  { %2495 = vmatpush1.bf16.msra.mxu1 %v2924_v22  ;;  %1053 = vmatprep.subr.bf16.mxu0 %v2791_v0 }
  0x28   :  { %2480 = vmatprep.subr.bf16.mxu1 %v2791_v0 }
  0x2a   :  { %1054 = vmatpush1.bf16.msra.mxu0 %v2619_v23  ;;  %v2706_v23 = vld [vmem:[%s3777_s0 + $0x1b8] ss:$20 sps:$4 sm:$0xff]  }
  0x2b   :  { %2496 = vmatpush1.bf16.msra.mxu1 %v2935_v24  ;;  %1055 = vmatprep.subr.bf16.mxu0 %v2791_v0 }
  0x2c   :  { %2481 = vmatprep.subr.bf16.mxu1 %v2791_v0 }
  0x2e   :  { %1056 = vmatpush1.bf16.msra.mxu0 %v2621_v25  ;;  %v2709_v25 = vld [vmem:[%s3777_s0 + $0x1e4] ss:$20 sps:$4 sm:$0xff]  }
  0x2f   :  { %2497 = vmatpush1.bf16.msra.mxu1 %v2946_v26  ;;  %1057 = vmatprep.subr.bf16.mxu0 %v2791_v0 }
  0x30   :  { %2482 = vmatprep.subr.bf16.mxu1 %v2791_v0 }
  0x32   :  { %1058 = vmatpush1.bf16.msra.mxu0 %v2623_v27  ;;  %v2713_v27 = vld [vmem:[%s3777_s0 + $0x1e0] ss:$20 sps:$4 sm:$0xff]  }
  0x33   :  { %2498 = vmatpush1.bf16.msra.mxu1 %v2957_v28  ;;  %1059 = vmatprep.subr.bf16.mxu0 %v2791_v0 }
  0x34   :  { %2483 = vmatprep.subr.bf16.mxu1 %v2791_v0 }
  0x36   :  { %1060 = vmatpush1.bf16.msra.mxu0 %v2625_v29  ;;  %v2715_v29 = vld [vmem:[%s3777_s0 + $0x20c] ss:$20 sps:$4 sm:$0xff]  }
  0x37   :  { %2499 = vmatpush1.bf16.msra.mxu1 %v2968_v30  ;;  %1061 = vmatprep.subr.bf16.mxu0 %v2791_v0 }
  0x38   :  { %2484 = vmatprep.subr.bf16.mxu1 %v2791_v0 }
  0x3a   :  { %1062 = vmatpush1.bf16.msra.mxu0 %v2627_v31  ;;  %v2719_v31 = vld [vmem:[%s3777_s0 + $0x208] ss:$20 sps:$4 sm:$0xff]  }
  0x3b   :  { %2500 = vmatpush1.bf16.msra.mxu1 %v2979_v32  ;;  %1063 = vmatprep.subr.bf16.mxu0 %v2791_v0 }
  0x3c   :  { %2485 = vmatprep.subr.bf16.mxu1 %v2791_v0 }
  0x3e   :  { %1064 = vmatpush1.bf16.msra.mxu0 %v2629_v33  ;;  %v2722_v33 = vld [vmem:[%s3777_s0 + $0x234] ss:$20 sps:$4 sm:$0xff]  }
  0x3f   :  { %2501 = vmatpush1.bf16.msra.mxu1 %v2990_v34  ;;  %1241 = vmatprep.subr.bf16.mxu0 %v2791_v0 }
  0x40   :  { %2410 = vmatprep.subr.bf16.mxu1 %v2643_v35 }
  0x41   :  { %1066 = vmatmul.mubr.bf16.vlgmr.msra.gmra.mrb[0].mxu0 %v2631_v36  ;;  %v2726_v36 = vld [vmem:[%s3777_s0 + $0x230] ss:$20 sps:$4 sm:$0xff]  }
  0x42   :  { %1322 = vmatmul.mubr.bf16.vlgmr.msra.gmra.mrb[0].mxu1 %v2634_v37  ;;  %1242 = vmatpush1.bf16.msra.mxu0 %v2820_v2  ;;  %v2670_v2 = vld [vmem:[%s3777_s0 + $0xf4] ss:$20 sps:$4 sm:$0xff]  }
  0x43   :  { %1073 = vmatprep.mubr.bf16.mxu0 %v2637_v38  ;;  %1329 = vmatprep.mubr.bf16.mxu1 %v2639_v39  ;;  %v2727_v37 = vld [vmem:[%s3777_s0 + $0x328] ss:$20 sps:$4 sm:$0xff]  }
  0x44   :  { %2411 = vmatpush3.bf16.msra.mxu1 %v2643_v35  ;;  %1243 = vmatprep.subr.bf16.mxu0 %v2791_v0  ;;  %v142_v35 = vld [vmem:[%s3777_s0 + $0x350] sm:$0xff] }
  0x45   :  { %2412 = vmatprep.subr.bf16.mxu1 %v2656_v40  ;;  %v2728_v38 = vld [vmem:[%s3777_s0 + $0x25c] ss:$20 sps:$4 sm:$0xff]   ;;  %v2125_v39 = vcombine.high %v142_v35, %v142_v35 }
  0x46   :  { %1244 = vmatpush1.bf16.msra.mxu0 %v2830_v4  ;;  %v2674_v4 = vld [vmem:[%s3777_s0 + $0xf0] ss:$20 sps:$4 sm:$0xff]  }
  0x47   :  { %1245 = vmatprep.subr.bf16.mxu0 %v2791_v0 }
  0x48   :  { %2413 = vmatpush3.bf16.msra.mxu1 %v2656_v40  ;;  %v2731_v40 = vld [vmem:[%s3777_s0 + $0x258] ss:$20 sps:$4 sm:$0xff]  }
  0x49   :  { %1074 = vmatmul.mubr.bf16.gmra.mrb[4].mxu0 %v2641_v41  ;;  %2414 = vmatprep.subr.bf16.mxu1 %v2669_v43  ;;  %v2124_v41 = vcombine.low %v142_v35, %v142_v35 }
  0x4a   :  { %1330 = vmatmul.mubr.bf16.gmra.mrb[4].mxu1 %v2642_v42  ;;  %1081 = vmatprep.mubr.bf16.mxu0 %v2644_v44  ;;  %v2734_v42 = vld [vmem:[%s3777_s0 + $0x284] ss:$20 sps:$4 sm:$0xff]   ;;  %v2737_v44 = vld [vmem:[%s3777_s0 + $0x280] ss:$20 sps:$4 sm:$0xff]  }
  0x4b   :  { %1337 = vmatprep.mubr.bf16.mxu1 %v2646_v45  ;;  %1246 = vmatpush1.bf16.msra.mxu0 %v2841_v6  ;;  %v2676_v6 = vld [vmem:[%s3777_s0 + $0x11c] ss:$20 sps:$4 sm:$0xff]   ;;  %v2738_v45 = vld [vmem:[%s3777_s0 + $0x38] ss:$20 sps:$4 sm:$0xff]  }
  0x4c   :  { %1247 = vmatprep.subr.bf16.mxu0 %v2791_v0  ;;  %2415 = vmatpush3.bf16.msra.mxu1 %v2669_v43  ;;  %v2736_v43 = vld [vmem:[%s3777_s0 + $0x10] ss:$20 sps:$4 sm:$0xff]  }
  0x4d   :  { %2416 = vmatprep.subr.bf16.mxu1 %v2682_v46 }
  0x4f   :  { %1248 = vmatpush1.bf16.msra.mxu0 %v2852_v8  ;;  %v2680_v8 = vld [vmem:[%s3777_s0 + $0x118] ss:$20 sps:$4 sm:$0xff]  }
  0x50   :  { %1249 = vmatprep.subr.bf16.mxu0 %v2791_v0  ;;  %2417 = vmatpush3.bf16.msra.mxu1 %v2682_v46  ;;  %v2739_v46 = vld [vmem:[%s3777_s0 + $0x2ac] ss:$20 sps:$4 sm:$0xff]  }
  0x51   :  { %1082 = vmatmul.mubr.bf16.gmra.mrb[8].mxu0 %v2648_v47  ;;  %2418 = vmatprep.subr.bf16.mxu1 %v2695_v48  ;;  %v2741_v47 = vld [vmem:[%s3777_s0 + $0x60] ss:$20 sps:$4 sm:$0xff]  }
  0x52   :  { %1338 = vmatmul.mubr.bf16.gmra.mrb[8].mxu1 %v2649_v49  ;;  %1089 = vmatprep.mubr.bf16.mxu0 %v2650_v50  ;;  %v2743_v49 = vld [vmem:[%s3777_s0 + $0x88] ss:$20 sps:$4 sm:$0xff]  }
  0x53   :  { %1345 = vmatprep.mubr.bf16.mxu1 %v2652_v51  ;;  %1250 = vmatpush1.bf16.msra.mxu0 %v2863_v10  ;;  %v2683_v10 = vld [vmem:[%s3777_s0 + $0x144] ss:$20 sps:$4 sm:$0xff]   ;;  %v2744_v50 = vld [vmem:[%s3777_s0 + $0x2d4] ss:$20 sps:$4 sm:$0xff]  }
  0x54   :  { %1251 = vmatprep.subr.bf16.mxu0 %v2791_v0  ;;  %2419 = vmatpush3.bf16.msra.mxu1 %v2695_v48  ;;  %v2742_v48 = vld [vmem:[%s3777_s0 + $0x2a8] ss:$20 sps:$4 sm:$0xff]   ;;  %v2746_v51 = vld [vmem:[%s3777_s0 + $0xb0] ss:$20 sps:$4 sm:$0xff]  }
  0x55   :  { %2420 = vmatprep.subr.bf16.mxu1 %v2708_v52 }
  0x57   :  { %1252 = vmatpush1.bf16.msra.mxu0 %v2874_v12  ;;  %v2687_v12 = vld [vmem:[%s3777_s0 + $0x140] ss:$20 sps:$4 sm:$0xff]  }
  0x58   :  { %1253 = vmatprep.subr.bf16.mxu0 %v2791_v0  ;;  %2421 = vmatpush3.bf16.msra.mxu1 %v2708_v52  ;;  %v2747_v52 = vld [vmem:[%s3777_s0 + $0x2d0] ss:$20 sps:$4 sm:$0xff]  }
  0x59   :  { %1090 = vmatmul.mubr.bf16.gmra.mrb[12].mxu0 %v2654_v53  ;;  %2422 = vmatprep.subr.bf16.mxu1 %v2721_v55  ;;  %v2748_v53 = vld [vmem:[%s3777_s0 + $0xd8] ss:$20 sps:$4 sm:$0xff]  }
  0x5a   :  { %1346 = vmatmul.mubr.bf16.gmra.mrb[12].mxu1 %v2655_v54  ;;  %1097 = vmatprep.mubr.bf16.mxu0 %v2657_v56  ;;  %v2749_v54 = vld [vmem:[%s3777_s0 + $0x2fc] ss:$20 sps:$4 sm:$0xff]   ;;  %v2752_v56 = vld [vmem:[%s3777_s0 + $0x2f8] ss:$20 sps:$4 sm:$0xff]  }
  0x5b   :  { %1353 = vmatprep.mubr.bf16.mxu1 %v2659_v57  ;;  %1254 = vmatpush1.bf16.msra.mxu0 %v2885_v14  ;;  %v2689_v14 = vld [vmem:[%s3777_s0 + $0x16c] ss:$20 sps:$4 sm:$0xff]   ;;  %v2753_v57 = vld [vmem:[%s3777_s0 + $0x128] ss:$20 sps:$4 sm:$0xff]  }
  0x5c   :  { %1255 = vmatprep.subr.bf16.mxu0 %v2791_v0  ;;  %2423 = vmatpush3.bf16.msra.mxu1 %v2721_v55  ;;  %v2751_v55 = vld [vmem:[%s3777_s0 + $0x100] ss:$20 sps:$4 sm:$0xff]  }
  0x5d   :  { %2424 = vmatprep.subr.bf16.mxu1 %v2733_v58 }
  0x5f   :  { %1256 = vmatpush1.bf16.msra.mxu0 %v2896_v16  ;;  %v2694_v16 = vld [vmem:[%s3777_s0 + $0x260] ss:$20 sps:$4 sm:$0xff]  }
  0x60   :  { %1257 = vmatprep.subr.bf16.mxu0 %v2791_v0  ;;  %2425 = vmatpush3.bf16.msra.mxu1 %v2733_v58  ;;  %v2754_v58 = vld [vmem:[%s3777_s0 + $0x324] ss:$20 sps:$4 sm:$0xff]  }
  0x61   :  { %1098 = vmatmul.mubr.bf16.gmra.mrb[16].mxu0 %v2661_v59  ;;  %v2756_v59 = vld [vmem:[%s3777_s0 + $0x150] ss:$20 sps:$4 sm:$0xff]  }
  0x62   :  { %1354 = vmatmul.mubr.bf16.gmra.mrb[16].mxu1 %v2662_v60  ;;  %1105 = vmatprep.mubr.bf16.mxu0 %v2663_v61  ;;  %v141_v60 = vld [vmem:[%s3777_s0 + $0x348] sm:$0xff]  ;;  %v2757_v61 = vld [vmem:[%s3777_s0 + $0x320] ss:$20 sps:$4 sm:$0xff]  }
  0x63   :  { %1361 = vmatprep.mubr.bf16.mxu1 %v2665_v62  ;;  %1258 = vmatpush1.bf16.msra.mxu0 %v2907_v18  ;;  %v2698_v18 = vld [vmem:[%s3777_s0 + $0x28c] ss:$20 sps:$4 sm:$0xff]  }
  0x64   :  { %1259 = vmatprep.subr.bf16.mxu0 %v2791_v0  ;;  %v2758_v62 = vld [vmem:[%s3777_s0 + $0x178] ss:$20 sps:$4 sm:$0xff]  }
  0x67   :  { %1260 = vmatpush1.bf16.msra.mxu0 %v2924_v22  ;;  %v2704_v22 = vld [vmem:[%s3777_s0 + $0x2b4] ss:$20 sps:$4 sm:$0xff]  }
  0x68   :  { %1261 = vmatprep.subr.bf16.mxu0 %v2791_v0 }
  0x69   :  { %1106 = vmatmul.mubr.bf16.gmra.mrb[20].mxu0 %v2667_v63  ;;  %v2123_v63 = vcombine.high %v141_v60, %v141_v60 }
  0x6a   :  { %1362 = vmatmul.mubr.bf16.gmra.mrb[20].mxu1 %v2668_v1  ;;  %1113 = vmatprep.mubr.bf16.mxu0 %v2670_v2  ;;  %v2760_v1 = vld [vmem:[%s3777_s0 + $0x1a0] ss:$20 sps:$4 sm:$0xff]   ;;  %v2122_v2 = vcombine.low %v141_v60, %v141_v60 }
  0x6b   :  { %1369 = vmatprep.mubr.bf16.mxu1 %v2672_v3  ;;  %1262 = vmatpush1.bf16.msra.mxu0 %v2935_v24  ;;  %v2707_v24 = vld [vmem:[%s3777_s0 + $0x2b0] ss:$20 sps:$4 sm:$0xff]   ;;  %v2762_v3 = vld [vmem:[%s3777_s0 + $0x1c8] ss:$20 sps:$4 sm:$0xff]  }
  0x6c   :  { %1263 = vmatprep.subr.bf16.mxu0 %v2791_v0 }
  0x6f   :  { %1264 = vmatpush1.bf16.msra.mxu0 %v2946_v26  ;;  %v2711_v26 = vld [vmem:[%s3777_s0 + $0x2dc] ss:$20 sps:$4 sm:$0xff]  }
  0x70   :  { %1265 = vmatprep.subr.bf16.mxu0 %v2791_v0 }
  0x71   :  { %1114 = vmatmul.mubr.bf16.gmra.mrb[24].mxu0 %v2674_v4  ;;  %v2765_v4 = vld [vmem:[%s3777_s0 + $0xc] ss:$20 sps:$4 sm:$0xff]  }
  0x72   :  { %1370 = vmatmul.mubr.bf16.gmra.mrb[24].mxu1 %v2675_v5  ;;  %1121 = vmatprep.mubr.bf16.mxu0 %v2676_v6  ;;  %v2766_v5 = vld [vmem:[%s3777_s0 + $0x1f0] ss:$20 sps:$4 sm:$0xff]   ;;  %v2763_v6 = vld [vmem:[%s3777_s0 + $0x8] ss:$20 sps:$4 sm:$0xff]  }
  0x73   :  { %1377 = vmatprep.mubr.bf16.mxu1 %v2678_v7  ;;  %1266 = vmatpush1.bf16.msra.mxu0 %v2957_v28  ;;  %v2714_v28 = vld [vmem:[%s3777_s0 + $0x2d8] ss:$20 sps:$4 sm:$0xff]  }
  0x74   :  { %1267 = vmatprep.subr.bf16.mxu0 %v2791_v0  ;;  %v2767_v7 = vld [vmem:[%s3777_s0 + $0x218] ss:$20 sps:$4 sm:$0xff]  }
  0x77   :  { %1268 = vmatpush1.bf16.msra.mxu0 %v2968_v30  ;;  %v2717_v30 = vld [vmem:[%s3777_s0 + $0x304] ss:$20 sps:$4 sm:$0xff]  }
  0x78   :  { %1269 = vmatprep.subr.bf16.mxu0 %v2791_v0 }
  0x79   :  { %1122 = vmatmul.mubr.bf16.gmra.mrb[28].mxu0 %v2680_v8  ;;  %v2768_v8 = vld [vmem:[%s3777_s0 + $0x34] ss:$20 sps:$4 sm:$0xff]  }
  0x7a   :  { %1378 = vmatmul.mubr.bf16.gmra.mrb[28].mxu1 %v2681_v9  ;;  %1129 = vmatprep.mubr.bf16.mxu0 %v2683_v10  ;;  %v2770_v9 = vld [vmem:[%s3777_s0 + $0x240] ss:$20 sps:$4 sm:$0xff]   ;;  %v2771_v10 = vld [vmem:[%s3777_s0 + $0x30] ss:$20 sps:$4 sm:$0xff]  }
  0x7b   :  { %1385 = vmatprep.mubr.bf16.mxu1 %v2685_v11  ;;  %1270 = vmatpush1.bf16.msra.mxu0 %v2979_v32  ;;  %v2720_v32 = vld [vmem:[%s3777_s0 + $0x300] ss:$20 sps:$4 sm:$0xff]   ;;  %v2772_v11 = vld [vmem:[%s3777_s0 + $0x268] ss:$20 sps:$4 sm:$0xff]  }
  0x7c   :  { %1271 = vmatprep.subr.bf16.mxu0 %v2791_v0  ;;  %v2693_v0 = vld [vmem:[%s3777_s0 + $0x168] ss:$20 sps:$4 sm:$0xff]  }
  0x7f   :  { %1272 = vmatpush1.bf16.msra.mxu0 %v2990_v34  ;;  %v2724_v34 = vld [vmem:[%s3777_s0 + $0x32c] ss:$20 sps:$4 sm:$0xff]  }
  0x81   :  { %1130 = vmatmul.mubr.bf16.gmra.mrb[32].mxu0 %v2687_v12  ;;  %v2773_v12 = vld [vmem:[%s3777_s0 + $0x5c] ss:$20 sps:$4 sm:$0xff]  }
  0x82   :  { %1386 = vmatmul.mubr.bf16.gmra.mrb[32].mxu1 %v2688_v13  ;;  %1137 = vmatprep.mubr.bf16.mxu0 %v2689_v14  ;;  %v2775_v13 = vld [vmem:[%s3777_s0 + $0x290] ss:$20 sps:$4 sm:$0xff]   ;;  %v2776_v14 = vld [vmem:[%s3777_s0 + $0x58] ss:$20 sps:$4 sm:$0xff]  }
  0x83   :  { %1393 = vmatprep.mubr.bf16.mxu1 %v2691_v15  ;;  %v2777_v15 = vld [vmem:[%s3777_s0 + $0x2b8] ss:$20 sps:$4 sm:$0xff]  }
  0x89   :  { %1138 = vmatmul.mubr.bf16.gmra.mrb[36].mxu0 %v2693_v0  ;;  %v2778_v0 = vld [vmem:[%s3777_s0 + $0x84] ss:$20 sps:$4 sm:$0xff]  }
  0x8a   :  { %1394 = vmatmul.mubr.bf16.gmra.mrb[36].mxu1 %v2694_v16  ;;  %1145 = vmatprep.mubr.bf16.mxu0 %v2696_v17  ;;  %v2780_v16 = vld [vmem:[%s3777_s0 + $0x2e0] ss:$20 sps:$4 sm:$0xff]  }
  0x8b   :  { %1401 = vmatprep.mubr.bf16.mxu1 %v2698_v18  ;;  %v2781_v17 = vld [vmem:[%s3777_s0 + $0x80] ss:$20 sps:$4 sm:$0xff]   ;;  %v2782_v18 = vld [vmem:[%s3777_s0 + $0x308] ss:$20 sps:$4 sm:$0xff]  }
  0x91   :  { %1146 = vmatmul.mubr.bf16.gmra.mrb[40].mxu0 %v2700_v19  ;;  %v2783_v19 = vld [vmem:[%s3777_s0 + $0xac] ss:$20 sps:$4 sm:$0xff]  }
  0x92   :  { %1402 = vmatmul.mubr.bf16.gmra.mrb[40].mxu1 %v2701_v20  ;;  %1153 = vmatprep.mubr.bf16.mxu0 %v2702_v21  ;;  %v2785_v20 = vld [vmem:[%s3777_s0 + $0x330] ss:$20 sps:$4 sm:$0xff]   ;;  %v2786_v21 = vld [vmem:[%s3777_s0 + $0xa8] ss:$20 sps:$4 sm:$0xff]  }
  0x93   :  { %1409 = vmatprep.mubr.bf16.mxu1 %v2704_v22  ;;  %v2787_v22 = vld [vmem:[%s3777_s0 + $0x358] ss:$0 sps:$4 sm:$0xff]  }
  0x99   :  { %1154 = vmatmul.mubr.bf16.gmra.mrb[44].mxu0 %v2706_v23  ;;  %v2788_v23 = vld [vmem:[%s3777_s0 + $0xd4] ss:$20 sps:$4 sm:$0xff]  }
  0x9a   :  { %1410 = vmatmul.mubr.bf16.gmra.mrb[44].mxu1 %v2707_v24  ;;  %1161 = vmatprep.mubr.bf16.mxu0 %v2709_v25  ;;  %v2790_v24 = vld [vmem:[%s3777_s0 + $0xd0] ss:$20 sps:$4 sm:$0xff]  }
  0x9b   :  { %1417 = vmatprep.mubr.bf16.mxu1 %v2711_v26 }
  0xa1   :  { %1162 = vmatmul.mubr.bf16.gmra.mrb[48].mxu0 %v2713_v27 }
  0xa2   :  { %1418 = vmatmul.mubr.bf16.gmra.mrb[48].mxu1 %v2714_v28  ;;  %1169 = vmatprep.mubr.bf16.mxu0 %v2715_v29 }
  0xa3   :  { %1425 = vmatprep.mubr.bf16.mxu1 %v2717_v30 }
  0xa9   :  { %1170 = vmatmul.mubr.bf16.gmra.mrb[52].mxu0 %v2719_v31 }
  0xaa   :  { %1426 = vmatmul.mubr.bf16.gmra.mrb[52].mxu1 %v2720_v32  ;;  %1177 = vmatprep.mubr.bf16.mxu0 %v2722_v33 }
  0xab   :  { %1433 = vmatprep.mubr.bf16.mxu1 %v2724_v34 }
  0xb1   :  { %1178 = vmatmul.mubr.bf16.gmra.mrb[56].mxu0 %v2726_v36 }
  0xb2   :  { %1434 = vmatmul.mubr.bf16.gmra.mrb[56].mxu1 %v2727_v37  ;;  %1185 = vmatprep.mubr.bf16.mxu0 %v2728_v38 }
  0xb3   :  { %1441 = vmatprep.mubr.bf16.mxu1 %v2125_v39 }
  0xb9   :  { %1186 = vmatmul.mubr.bf16.gmra.mrb[60].mxu0 %v2731_v40 }
  0xba   :  { %1442 = vmatmul.mubr.bf16.gmra.mrb[60].mxu1 %v2124_v41  ;;  %1193 = vmatprep.mubr.bf16.mxu0 %v2734_v42 }
  0xbb   :  { %2426 = vmatprep.mubr.bf16.mxu1 %v2736_v43 }
  0xc1   :  { %1194 = vmatmul.mubr.bf16.gmra.mrb[64].mxu0 %v2737_v44 }
  0xc2   :  { %2427 = vmatmul.mubr.bf16.vlgmr.msra.gmra.mrb[64].mxu1 %v2738_v45  ;;  %1201 = vmatprep.mubr.bf16.mxu0 %v2739_v46 }
  0xc3   :  { %2430 = vmatprep.mubr.bf16.mxu1 %v2741_v47 }
  0xc9   :  { %1202 = vmatmul.mubr.bf16.gmra.mrb[68].mxu0 %v2742_v48 }
  0xca   :  { %2431 = vmatmul.mubr.bf16.gmra.mrb[68].mxu1 %v2743_v49  ;;  %1209 = vmatprep.mubr.bf16.mxu0 %v2744_v50  ;;  %v3379_v49 = vld [vmem:[%s3778_s2] ss:$0 sm:$0xff] }
  0xcb   :  { %2434 = vmatprep.mubr.bf16.mxu1 %v2746_v51 }
  0xd1   :  { %1210 = vmatmul.mubr.bf16.gmra.mrb[72].mxu0 %v2747_v52 }
  0xd2   :  { %2435 = vmatmul.mubr.bf16.gmra.mrb[72].mxu1 %v2748_v53  ;;  %1217 = vmatprep.mubr.bf16.mxu0 %v2749_v54 }
  0xd3   :  { %2438 = vmatprep.mubr.bf16.mxu1 %v2751_v55 }
  0xd9   :  { %1218 = vmatmul.mubr.bf16.gmra.mrb[76].mxu0 %v2752_v56 }
  0xda   :  { %2439 = vmatmul.mubr.bf16.gmra.mrb[76].mxu1 %v2753_v57  ;;  %1225 = vmatprep.mubr.bf16.mxu0 %v2754_v58 }
  0xdb   :  { %2442 = vmatprep.mubr.bf16.mxu1 %v2756_v59 }
  0xe1   :  { %1226 = vmatmul.mubr.bf16.gmra.mrb[80].mxu0 %v2757_v61 }
  0xe2   :  { %2443 = vmatmul.mubr.bf16.gmra.mrb[80].mxu1 %v2758_v62  ;;  %1233 = vmatprep.mubr.bf16.mxu0 %v2123_v63 }
  0xe3   :  { %2446 = vmatprep.mubr.bf16.mxu1 %v2760_v1 }
  0xe9   :  { %1234 = vmatmul.mubr.bf16.gmra.mrb[84].mxu0 %v2122_v2 }
  0xea   :  { %2447 = vmatmul.mubr.bf16.gmra.mrb[84].mxu1 %v2762_v3  ;;  %1273 = vmatprep.mubr.bf16.mxu0 %v2765_v4 }
  0xeb   :  { %2450 = vmatprep.mubr.bf16.mxu1 %v2766_v5 }
  0xf1   :  { %1274 = vmatmul.mubr.bf16.vlgmr.msra.gmra.mrb[0].mxu0 %v2763_v6 }
  0xf2   :  { %2451 = vmatmul.mubr.bf16.gmra.mrb[88].mxu1 %v2767_v7  ;;  %1281 = vmatprep.mubr.bf16.mxu0 %v2768_v8 }
  0xf3   :  { %2454 = vmatprep.mubr.bf16.mxu1 %v2770_v9 }
  0xf9   :  { %1282 = vmatmul.mubr.bf16.gmra.mrb[4].mxu0 %v2771_v10 }
  0xfa   :  { %2455 = vmatmul.mubr.bf16.gmra.mrb[92].mxu1 %v2772_v11  ;;  %1289 = vmatprep.mubr.bf16.mxu0 %v2773_v12 }
  0xfb   :  { %2458 = vmatprep.mubr.bf16.mxu1 %v2775_v13 }
 0x101   :  { %1290 = vmatmul.mubr.bf16.gmra.mrb[8].mxu0 %v2776_v14 }
 0x102   :  { %2459 = vmatmul.mubr.bf16.gmra.mrb[96].mxu1 %v2777_v15  ;;  %1297 = vmatprep.mubr.bf16.mxu0 %v2778_v0 }
 0x103   :  { %2462 = vmatprep.mubr.bf16.mxu1 %v2780_v16 }
 0x109   :  { %1298 = vmatmul.mubr.bf16.gmra.mrb[12].mxu0 %v2781_v17 }
 0x10a   :  { %2463 = vmatmul.mubr.bf16.gmra.mrb[100].mxu1 %v2782_v18  ;;  %1305 = vmatprep.mubr.bf16.mxu0 %v2783_v19 }
 0x10b   :  { %2466 = vmatprep.mubr.bf16.mxu1 %v2785_v20 }
 0x111   :  { %1306 = vmatmul.mubr.bf16.gmra.mrb[16].mxu0 %v2786_v21 }
 0x112   :  { %2467 = vmatmul.mubr.bf16.gmra.mrb[104].mxu1 %v2787_v22  ;;  %1313 = vmatprep.mubr.bf16.mxu0 %v2788_v23 }
 0x115   :  { %v1323_v25 = vpop.f32.mrb[0].mxu1 }
 0x116   :  { %v1325_v26 = vpop.f32.mrb[1].mxu1 }
 0x117   :  { %v1326_v27 = vpop.f32.mrb[2].mxu1 }
 0x118   :  { %v1328_v28 = vpop.f32.mrb[3].mxu1 }
 0x119   :  { %1314 = vmatmul.mubr.bf16.gmra.mrb[20].mxu0 %v2790_v24 }
 0x11d   :  { %v1331_v29 = vpop.f32.mrb[4].mxu1 }
 0x11e   :  { %v1333_v30 = vpop.f32.mrb[5].mxu1 }
 0x11f   :  { %v1334_v31 = vpop.f32.mrb[6].mxu1 }
 0x120   :  { %v1336_v32 = vpop.f32.mrb[7].mxu1 }
 0x125   :  { %v1339_v33 = vpop.f32.mrb[8].mxu1 }
 0x126   :  { %v1341_v34 = vpop.f32.mrb[9].mxu1 }
 0x127   :  { %v1342_v35 = vpop.f32.mrb[10].mxu1 }
 0x128   :  { %v1344_v36 = vpop.f32.mrb[11].mxu1 }
 0x12d   :  { %v1347_v37 = vpop.f32.mrb[12].mxu1 }
 0x12e   :  { %v1349_v38 = vpop.f32.mrb[13].mxu1 }
 0x12f   :  { %v1350_v39 = vpop.f32.mrb[14].mxu1 }
 0x130   :  { %v1352_v40 = vpop.f32.mrb[15].mxu1 }
 0x135   :  { %v3368_v41 = vpop.f32.mrb[16].mxu1 }
 0x136   :  { %v1357_v42 = vpop.f32.mrb[17].mxu1 }
 0x137   :  { %v3370_v43 = vpop.f32.mrb[18].mxu1 }
 0x138   :  { %v1360_v44 = vpop.f32.mrb[19].mxu1 }
 0x13d   :  { %v3372_v45 = vpop.f32.mrb[20].mxu1 }
 0x13e   :  { %v1365_v46 = vpop.f32.mrb[21].mxu1 }
 0x13f   :  { %v3374_v47 = vpop.f32.mrb[22].mxu1 }
 0x140   :  { %v1368_v48 = vpop.f32.mrb[23].mxu1 }
 0x144   :  { %v1115_v50 = vpop.f32.mrb[24].mxu0 }
 0x145   :  { %v1116_v51 = vadd.f32 %v3379_v49, %v1115_v50  ;;  %v1117_v52 = vpop.f32.mrb[25].mxu0  ;;  %v3382_v53 = vpop.f32.mrb[24].mxu1 }
 0x146   :  { %v1118_v54 = vpop.f32.mrb[26].mxu0  ;;  %v1373_v55 = vpop.f32.mrb[25].mxu1 }
 0x147   :  { %v1119_v56 = vadd.f32 %v3379_v49, %v1118_v54  ;;  %v1120_v57 = vpop.f32.mrb[27].mxu0  ;;  %v3385_v58 = vpop.f32.mrb[26].mxu1  ;;  %v3387_v59 = vadd.f32 %v1323_v25, %v1116_v51 }
 0x148   :  { %v1376_v60 = vpop.f32.mrb[27].mxu1 }
 0x149   :  { %v3389_v61 = vadd.f32 %v1326_v27, %v1119_v56 }
 0x14c   :  { %v1123_v62 = vpop.f32.mrb[28].mxu0 }
 0x14d   :  { %v1124_v63 = vadd.f32 %v3379_v49, %v1123_v62  ;;  %v1125_v1 = vpop.f32.mrb[29].mxu0  ;;  %v3392_v2 = vpop.f32.mrb[28].mxu1 }
 0x14e   :  { %v1126_v3 = vpop.f32.mrb[30].mxu0  ;;  %v1381_v4 = vpop.f32.mrb[29].mxu1 }
 0x14f   :  { %v1127_v5 = vadd.f32 %v3379_v49, %v1126_v3  ;;  %v1128_v6 = vpop.f32.mrb[31].mxu0  ;;  %v3395_v7 = vpop.f32.mrb[30].mxu1  ;;  %v3397_v8 = vadd.f32 %v1331_v29, %v1124_v63 }
 0x150   :  { %v1384_v9 = vpop.f32.mrb[31].mxu1 }
 0x151   :  { %v3399_v10 = vadd.f32 %v1334_v31, %v1127_v5 }
 0x154   :  { %v1131_v11 = vpop.f32.mrb[32].mxu0 }
 0x155   :  { %v1132_v12 = vadd.f32 %v3379_v49, %v1131_v11  ;;  %v1133_v13 = vpop.f32.mrb[33].mxu0  ;;  %v3402_v14 = vpop.f32.mrb[32].mxu1 }
 0x156   :  { %v1134_v15 = vpop.f32.mrb[34].mxu0  ;;  %v1389_v0 = vpop.f32.mrb[33].mxu1 }
 0x157   :  { %v1135_v16 = vadd.f32 %v3379_v49, %v1134_v15  ;;  %v1136_v17 = vpop.f32.mrb[35].mxu0  ;;  %v3405_v18 = vpop.f32.mrb[34].mxu1  ;;  %v3407_v19 = vadd.f32 %v1339_v33, %v1132_v12 }
 0x158   :  { %v1392_v20 = vpop.f32.mrb[35].mxu1 }
 0x159   :  { %v3409_v21 = vadd.f32 %v1342_v35, %v1135_v16 }
 0x15c   :  { %v1139_v22 = vpop.f32.mrb[36].mxu0 }
 0x15d   :  { %v1140_v23 = vadd.f32 %v3379_v49, %v1139_v22  ;;  %v1141_v24 = vpop.f32.mrb[37].mxu0  ;;  %v3412_v25 = vpop.f32.mrb[36].mxu1 }
 0x15e   :  { %v1142_v26 = vpop.f32.mrb[38].mxu0  ;;  %v1397_v27 = vpop.f32.mrb[37].mxu1 }
 0x15f   :  { %v1143_v28 = vadd.f32 %v3379_v49, %v1142_v26  ;;  %v1144_v29 = vpop.f32.mrb[39].mxu0  ;;  %v3415_v30 = vpop.f32.mrb[38].mxu1  ;;  %v3417_v31 = vadd.f32 %v1347_v37, %v1140_v23 }
 0x160   :  { %v1400_v32 = vpop.f32.mrb[39].mxu1 }
 0x161   :  { %v3419_v33 = vadd.f32 %v1350_v39, %v1143_v28 }
 0x164   :  { %v1147_v34 = vpop.f32.mrb[40].mxu0 }
 0x165   :  { %v1148_v35 = vadd.f32 %v3379_v49, %v1147_v34  ;;  %v1149_v36 = vpop.f32.mrb[41].mxu0  ;;  %v3422_v38 = vpop.f32.mrb[40].mxu1 }
 0x166   :  { %v1150_v40 = vpop.f32.mrb[42].mxu0  ;;  %v1405_v42 = vpop.f32.mrb[41].mxu1 }
 0x167   :  { %v1151_v44 = vadd.f32 %v3379_v49, %v1150_v40  ;;  %v1152_v46 = vpop.f32.mrb[43].mxu0  ;;  %v3425_v48 = vpop.f32.mrb[42].mxu1  ;;  %v3428_v50 = vadd.f32 %v3368_v41, %v1148_v35 }
 0x168   :  { %v1408_v37 = vpop.f32.mrb[43].mxu1 }
 0x169   :  { %v3431_v39 = vadd.f32 %v3370_v43, %v1151_v44 }
 0x16c   :  { %v1155_v51 = vpop.f32.mrb[44].mxu0 }
 0x16d   :  { %v1156_v52 = vadd.f32 %v3379_v49, %v1155_v51  ;;  %v1157_v54 = vpop.f32.mrb[45].mxu0  ;;  %v3434_v55 = vpop.f32.mrb[44].mxu1 }
 0x16e   :  { %v1158_v56 = vpop.f32.mrb[46].mxu0  ;;  %v1413_v57 = vpop.f32.mrb[45].mxu1 }
 0x16f   :  { %v1159_v60 = vadd.f32 %v3379_v49, %v1158_v56  ;;  %v1160_v62 = vpop.f32.mrb[47].mxu0  ;;  %v3437_v63 = vpop.f32.mrb[46].mxu1  ;;  %v3440_v41 = vadd.f32 %v3372_v45, %v1156_v52 }
 0x170   :  { %v1416_v1 = vpop.f32.mrb[47].mxu1 }
 0x171   :  { %v3443_v43 = vadd.f32 %v3374_v47, %v1159_v60 }
 0x174   :  { %v1163_v3 = vpop.f32.mrb[48].mxu0 }
 0x175   :  { %v1164_v4 = vadd.f32 %v3379_v49, %v1163_v3  ;;  %v1165_v5 = vpop.f32.mrb[49].mxu0  ;;  %v3446_v6 = vpop.f32.mrb[48].mxu1 }
 0x176   :  { %v1166_v9 = vpop.f32.mrb[50].mxu0  ;;  %v1421_v11 = vpop.f32.mrb[49].mxu1 }
 0x177   :  { %v1167_v12 = vadd.f32 %v3379_v49, %v1166_v9  ;;  %v1168_v13 = vpop.f32.mrb[51].mxu0  ;;  %v3449_v15 = vpop.f32.mrb[50].mxu1  ;;  %v3452_v45 = vadd.f32 %v3382_v53, %v1164_v4 }
 0x178   :  { %v1424_v0 = vpop.f32.mrb[51].mxu1 }
 0x179   :  { %v3455_v47 = vadd.f32 %v3385_v58, %v1167_v12 }
 0x17c   :  { %v1171_v16 = vpop.f32.mrb[52].mxu0 }
 0x17d   :  { %v1172_v17 = vadd.f32 %v3379_v49, %v1171_v16  ;;  %v1173_v20 = vpop.f32.mrb[53].mxu0  ;;  %v3458_v22 = vpop.f32.mrb[52].mxu1 }
 0x17e   :  { %v1174_v23 = vpop.f32.mrb[54].mxu0  ;;  %v1429_v24 = vpop.f32.mrb[53].mxu1 }
 0x17f   :  { %v1175_v26 = vadd.f32 %v3379_v49, %v1174_v23  ;;  %v1176_v27 = vpop.f32.mrb[55].mxu0  ;;  %v3461_v28 = vpop.f32.mrb[54].mxu1  ;;  %v3464_v53 = vadd.f32 %v3392_v2, %v1172_v17 }
 0x180   :  { %v1432_v29 = vpop.f32.mrb[55].mxu1 }
 0x181   :  { %v3467_v58 = vadd.f32 %v3395_v7, %v1175_v26 }
 0x184   :  { %v1179_v32 = vpop.f32.mrb[56].mxu0 }
 0x185   :  { %v1180_v34 = vadd.f32 %v3379_v49, %v1179_v32  ;;  %v1181_v35 = vpop.f32.mrb[57].mxu0  ;;  %v3470_v36 = vpop.f32.mrb[56].mxu1 }
 0x186   :  { %v1182_v40 = vpop.f32.mrb[58].mxu0  ;;  %v1437_v42 = vpop.f32.mrb[57].mxu1 }
 0x187   :  { %v1183_v44 = vadd.f32 %v3379_v49, %v1182_v40  ;;  %v1184_v46 = vpop.f32.mrb[59].mxu0  ;;  %v3473_v37 = vpop.f32.mrb[58].mxu1  ;;  %v3476_v2 = vadd.f32 %v3402_v14, %v1180_v34 }
 0x188   :  { %v1440_v51 = vpop.f32.mrb[59].mxu1 }
 0x189   :  { %v3479_v7 = vadd.f32 %v3405_v18, %v1183_v44 }
 0x18c   :  { %v1187_v52 = vpop.f32.mrb[60].mxu0 }
 0x18d   :  { %v1188_v54 = vadd.f32 %v3379_v49, %v1187_v52  ;;  %v1189_v56 = vpop.f32.mrb[61].mxu0  ;;  %v3482_v57 = vpop.f32.mrb[60].mxu1 }
 0x18e   :  { %v1190_v60 = vpop.f32.mrb[62].mxu0  ;;  %v1445_v62 = vpop.f32.mrb[61].mxu1 }
 0x18f   :  { %v1191_v1 = vadd.f32 %v3379_v49, %v1190_v60  ;;  %v1192_v3 = vpop.f32.mrb[63].mxu0  ;;  %v1446_v4 = vpop.f32.mrb[62].mxu1  ;;  %v3486_v5 = vadd.f32 %v3412_v25, %v1188_v54 }
 0x190   :  { %v1447_v14 = vpop.f32.mrb[63].mxu1 }
 0x191   :  { %v3489_v9 = vadd.f32 %v3415_v30, %v1191_v1 }
 0x194   :  { %v1195_v18 = vpop.f32.mrb[64].mxu0 }
 0x195   :  { %v1196_v11 = vadd.f32 %v3379_v49, %v1195_v18  ;;  %v1197_v12 = vpop.f32.mrb[65].mxu0  ;;  %v3492_v13 = vpop.f32.mrb[64].mxu1 }
 0x196   :  { %v1198_v0 = vpop.f32.mrb[66].mxu0  ;;  %v3494_v16 = vpop.f32.mrb[65].mxu1 }
 0x197   :  { %v1199_v17 = vadd.f32 %v3379_v49, %v1198_v0  ;;  %v1200_v20 = vpop.f32.mrb[67].mxu0  ;;  %v3497_v23 = vpop.f32.mrb[66].mxu1  ;;  %v3500_v25 = vadd.f32 %v3422_v38, %v1196_v11 }
 0x198   :  { %v3502_v24 = vpop.f32.mrb[67].mxu1 }
 0x199   :  { %v3505_v30 = vadd.f32 %v3425_v48, %v1199_v17 }
 0x19c   :  { %v1203_v26 = vpop.f32.mrb[68].mxu0 }
 0x19d   :  { %v1204_v27 = vadd.f32 %v3379_v49, %v1203_v26  ;;  %v1205_v29 = vpop.f32.mrb[69].mxu0  ;;  %v3508_v32 = vpop.f32.mrb[68].mxu1 }
 0x19e   :  { %v1206_v34 = vpop.f32.mrb[70].mxu0  ;;  %v3510_v35 = vpop.f32.mrb[69].mxu1 }
 0x19f   :  { %v1207_v40 = vadd.f32 %v3379_v49, %v1206_v34  ;;  %v1208_v42 = vpop.f32.mrb[71].mxu0  ;;  %v3513_v44 = vpop.f32.mrb[70].mxu1  ;;  %v3516_v38 = vadd.f32 %v3434_v55, %v1204_v27  ;;  %v3544_v27 = vld [vmem:[%s3778_s2 + $0x1] ss:$0 sm:$0xff] }
 0x1a0   :  { %v3518_v46 = vpop.f32.mrb[71].mxu1 }
 0x1a1   :  { %v3521_v48 = vadd.f32 %v3437_v63, %v1207_v40 }
 0x1a4   :  { %v1211_v51 = vpop.f32.mrb[72].mxu0 }
 0x1a5   :  { %v1212_v52 = vadd.f32 %v3379_v49, %v1211_v51  ;;  %v1213_v54 = vpop.f32.mrb[73].mxu0  ;;  %v3524_v56 = vpop.f32.mrb[72].mxu1 }
 0x1a6   :  { %v1214_v60 = vpop.f32.mrb[74].mxu0  ;;  %v3526_v62 = vpop.f32.mrb[73].mxu1 }
 0x1a7   :  { %v1215_v1 = vadd.f32 %v3379_v49, %v1214_v60  ;;  %v1216_v3 = vpop.f32.mrb[75].mxu0  ;;  %v3529_v4 = vpop.f32.mrb[74].mxu1  ;;  %v3532_v55 = vadd.f32 %v3446_v6, %v1212_v52 }
 0x1a8   :  { %v3534_v14 = vpop.f32.mrb[75].mxu1  ;;  %v3560_v3 = vld [vmem:[%s3778_s2 + $0x2] ss:$0 sm:$0xff] }
 0x1a9   :  { %v3537_v63 = vadd.f32 %v3449_v15, %v1215_v1 }
 0x1ac   :  { %v1219_v18 = vpop.f32.mrb[76].mxu0 }
 0x1ad   :  { %v1220_v11 = vadd.f32 %v3379_v49, %v1219_v18  ;;  %v2440_v12 = vpop.f32.mrb[76].mxu1  ;;  %v1221_v0 = vpop.f32.mrb[77].mxu0 }
 0x1ae   :  { %v1540_v17 = vadd.f32 %v2440_v12, %v3397_v8  ;;  %v1531_v20 = vpop.f32.mrb[77].mxu1  ;;  %v1222_v26 = vpop.f32.mrb[78].mxu0 }
 0x1af   :  { %v1532_v6 = vadd.f32 %v1531_v20, %v3387_v59  ;;  %v1223_v29 = vadd.f32 %v3379_v49, %v1222_v26  ;;  %v2441_v15 = vpop.f32.mrb[78].mxu1  ;;  %v1224_v34 = vpop.f32.mrb[79].mxu0  ;;  %v3549_v40 = vadd.f32 %v3458_v22, %v1220_v11 }
 0x1b0   :  { %v1671_v42 = vmax.f32 %v1540_v17, 0.0  ;;  %v1543_v51 = vadd.f32 %v2441_v15, %v3399_v10  ;;  %v1534_v8 = vpop.f32.mrb[79].mxu1 }
 0x1b1   :  { %v1669_v52 = vmax.f32 %v1532_v6, 0.0  ;;  %v1535_v54 = vadd.f32 %v1534_v8, %v3389_v61  ;;  %v3554_v60 = vadd.f32 %v3461_v28, %v1223_v29 }
 0x1b2   :  { %v1719_v1 = vmul.f32 %v3544_v27, %v1671_v42  ;;  %v1672_v59 = vmax.f32 %v1543_v51, 0.0 }
 0x1b3   :  { %v1717_v22 = vmul.f32 %v3544_v27, %v1669_v52  ;;  %v1670_v18 = vmax.f32 %v1535_v54, 0.0 }
 0x1b4   :  { %v1720_v10 = vmul.f32 %v3544_v27, %v1672_v59  ;;  %v1227_v11 = vpop.f32.mrb[80].mxu0  ;;  %v1767_v17 = vadd.f32 %v3560_v3, %v1719_v1 }
 0x1b5   :  { %v1718_v12 = vmul.f32 %v3544_v27, %v1670_v18  ;;  %v1228_v61 = vadd.f32 %v3379_v49, %v1227_v11  ;;  %v2444_v28 = vpop.f32.mrb[80].mxu1  ;;  %v1229_v0 = vpop.f32.mrb[81].mxu0  ;;  %v1765_v20 = vadd.f32 %v3560_v3, %v1717_v22 }
 0x1b6   :  { %v1768_v26 = vadd.f32 %v3560_v3, %v1720_v10  ;;  %v1556_v6 = vadd.f32 %v2444_v28, %v3417_v31  ;;  %v1547_v29 = vpop.f32.mrb[81].mxu1  ;;  %v1230_v15 = vpop.f32.mrb[82].mxu0 }
 0x1b7   :  { %v1766_v34 = vadd.f32 %v3560_v3, %v1718_v12  ;;  %v1548_v42 = vadd.f32 %v1547_v29, %v3407_v19  ;;  %v1231_v51 = vadd.f32 %v3379_v49, %v1230_v15  ;;  %v2445_v8 = vpop.f32.mrb[82].mxu1  ;;  %v1232_v52 = vpop.f32.mrb[83].mxu0  ;;  %v3574_v54 = vadd.f32 %v3470_v36, %v1228_v61 }
 0x1b8   :  { %v2293_v1 = vpack.c.bf16 %v1768_v26, %v1767_v17  ;;  %v1675_v59 = vmax.f32 %v1556_v6, 0.0  ;;  %v1559_v22 = vadd.f32 %v2445_v8, %v3419_v33  ;;  %v1550_v18 = vpop.f32.mrb[83].mxu1 }
 0x1b9   :  { %v2288_v10 = vpack.c.bf16 %v1766_v34, %v1765_v20  ;;  %v1673_v31 = vmax.f32 %v1548_v42, 0.0  ;;  %v1551_v11 = vadd.f32 %v1550_v18, %v3409_v21  ;;  %v3579_v12 = vadd.f32 %v3473_v37, %v1231_v51 }
 0x1ba   :  { %2366 = vst [vmem:[%s3779_s3 + $0x38] sm:$0xff] %v2293_v1   ;;  %v1723_v19 = vmul.f32 %v3544_v27, %v1675_v59  ;;  %v1676_v36 = vmax.f32 %v1559_v22, 0.0 }
 0x1bb   :  { %2365 = vst [vmem:[%s3779_s3 + $0x30] sm:$0xff] %v2288_v10   ;;  %v1721_v33 = vmul.f32 %v3544_v27, %v1673_v31  ;;  %v1674_v61 = vmax.f32 %v1551_v11, 0.0 }
 0x1bc   :  { %v1724_v28 = vmul.f32 %v3544_v27, %v1676_v36  ;;  %v1235_v21 = vpop.f32.mrb[84].mxu0  ;;  %v1771_v26 = vadd.f32 %v3560_v3, %v1723_v19 }
 0x1bd   :  { %v1722_v37 = vmul.f32 %v3544_v27, %v1674_v61  ;;  %v1236_v0 = vadd.f32 %v3379_v49, %v1235_v21  ;;  %v2448_v17 = vpop.f32.mrb[84].mxu1  ;;  %v1237_v20 = vpop.f32.mrb[85].mxu0  ;;  %v1769_v42 = vadd.f32 %v3560_v3, %v1721_v33 }
 0x1be   :  { %v1772_v6 = vadd.f32 %v3560_v3, %v1724_v28  ;;  %v1572_v29 = vadd.f32 %v2448_v17, %v3440_v41  ;;  %v1563_v15 = vpop.f32.mrb[85].mxu1  ;;  %v1238_v34 = vpop.f32.mrb[86].mxu0 }
 0x1bf   :  { %v1770_v51 = vadd.f32 %v3560_v3, %v1722_v37  ;;  %v1564_v8 = vadd.f32 %v1563_v15, %v3428_v50  ;;  %v2449_v52 = vpop.f32.mrb[86].mxu1  ;;  %v1239_v1 = vpop.f32.mrb[87].mxu0  ;;  %v3599_v59 = vadd.f32 %v3482_v57, %v1236_v0 }
 0x1c0   :  { %v2303_v22 = vpack.c.bf16 %v1772_v6, %v1771_v26  ;;  %v1679_v18 = vmax.f32 %v1572_v29, 0.0  ;;  %v1575_v10 = vadd.f32 %v2449_v52, %v3443_v43  ;;  %v1566_v31 = vpop.f32.mrb[87].mxu1 }
 0x1c1   :  { %v2298_v11 = vpack.c.bf16 %v1770_v51, %v1769_v42  ;;  %v1677_v41 = vmax.f32 %v1564_v8, 0.0  ;;  %v1567_v19 = vadd.f32 %v1566_v31, %v3431_v39 }
 0x1c2   :  { %2368 = vst [vmem:[%s3779_s3 + $0x48] sm:$0xff] %v2303_v22   ;;  %v1727_v50 = vmul.f32 %v3544_v27, %v1679_v18  ;;  %v1680_v36 = vmax.f32 %v1575_v10, 0.0 }
 0x1c3   :  { %2367 = vst [vmem:[%s3779_s3 + $0x40] sm:$0xff] %v2298_v11   ;;  %v1725_v57 = vmul.f32 %v3544_v27, %v1677_v41  ;;  %v1678_v33 = vmax.f32 %v1567_v19, 0.0 }
 0x1c4   :  { %v1728_v43 = vmul.f32 %v3544_v27, %v1680_v36  ;;  %v1275_v61 = vpop.f32.mrb[0].mxu0  ;;  %v1775_v0 = vadd.f32 %v3560_v3, %v1727_v50 }
 0x1c5   :  { %v1726_v28 = vmul.f32 %v3544_v27, %v1678_v33  ;;  %v2502_v39 = vadd.f32 %v3379_v49, %v1275_v61  ;;  %v2452_v21 = vpop.f32.mrb[88].mxu1  ;;  %v1277_v37 = vpop.f32.mrb[1].mxu0  ;;  %v1773_v17 = vadd.f32 %v3560_v3, %v1725_v57 }
 0x1c6   :  { %v1776_v20 = vadd.f32 %v3560_v3, %v1728_v43  ;;  %v1588_v26 = vadd.f32 %v2452_v21, %v3464_v53  ;;  %v1579_v6 = vpop.f32.mrb[89].mxu1  ;;  %v1278_v29 = vpop.f32.mrb[2].mxu0 }
 0x1c7   :  { %v1774_v15 = vadd.f32 %v3560_v3, %v1726_v28  ;;  %v1484_v34 = vadd.f32 %v2502_v39, %v3494_v16  ;;  %v1580_v42 = vadd.f32 %v1579_v6, %v3452_v45  ;;  %v2503_v51 = vadd.f32 %v3379_v49, %v1278_v29  ;;  %v2453_v8 = vpop.f32.mrb[90].mxu1  ;;  %v1280_v52 = vpop.f32.mrb[3].mxu0 }
 0x1c8   :  { %v2313_v1 = vpack.c.bf16 %v1776_v20, %v1775_v0  ;;  %v1683_v22 = vmax.f32 %v1588_v26, 0.0  ;;  %v1591_v18 = vadd.f32 %v2453_v8, %v3467_v58  ;;  %v1582_v10 = vpop.f32.mrb[91].mxu1 }
 0x1c9   :  { %v2308_v31 = vpack.c.bf16 %v1774_v15, %v1773_v17  ;;  %v1657_v11 = vmax.f32 %v1484_v34, 0.0  ;;  %v1681_v53 = vmax.f32 %v1580_v42, 0.0  ;;  %v1487_v41 = vadd.f32 %v2503_v51, %v3502_v24 }
 0x1ca   :  { %2370 = vst [vmem:[%s3779_s3 + $0x58] sm:$0xff] %v2313_v1   ;;  %v1731_v45 = vmul.f32 %v3544_v27, %v1683_v22  ;;  %v1684_v16 = vmax.f32 %v1591_v18, 0.0  ;;  %v1583_v19 = vadd.f32 %v1582_v10, %v3455_v47 }
 0x1cb   :  { %2369 = vst [vmem:[%s3779_s3 + $0x50] sm:$0xff] %v2308_v31   ;;  %v1705_v58 = vmul.f32 %v3544_v27, %v1657_v11  ;;  %v1729_v50 = vmul.f32 %v3544_v27, %v1681_v53  ;;  %v1658_v36 = vmax.f32 %v1487_v41, 0.0 }
 0x1cc   :  { %v1732_v24 = vmul.f32 %v3544_v27, %v1684_v16  ;;  %v1682_v57 = vmax.f32 %v1583_v19, 0.0  ;;  %v1283_v33 = vpop.f32.mrb[4].mxu0  ;;  %v1779_v61 = vadd.f32 %v3560_v3, %v1731_v45 }
 0x1cd   :  { %v1753_v43 = vadd.f32 %v3560_v3, %v1705_v58  ;;  %v1706_v28 = vmul.f32 %v3544_v27, %v1658_v36  ;;  %v2504_v47 = vadd.f32 %v3379_v49, %v1283_v33  ;;  %v2456_v39 = vpop.f32.mrb[92].mxu1  ;;  %v1285_v21 = vpop.f32.mrb[5].mxu0  ;;  %v1777_v37 = vadd.f32 %v3560_v3, %v1729_v50 }
 0x1ce   :  { %v1780_v0 = vadd.f32 %v3560_v3, %v1732_v24  ;;  %v1730_v17 = vmul.f32 %v3544_v27, %v1682_v57  ;;  %v1604_v20 = vadd.f32 %v2456_v39, %v3486_v5  ;;  %v1595_v26 = vpop.f32.mrb[93].mxu1  ;;  %v1286_v6 = vpop.f32.mrb[6].mxu0 }
 0x1cf   :  { %v1754_v29 = vadd.f32 %v3560_v3, %v1706_v28  ;;  %v1492_v15 = vadd.f32 %v2504_v47, %v3492_v13  ;;  %v1596_v34 = vadd.f32 %v1595_v26, %v3476_v2  ;;  %v2505_v42 = vadd.f32 %v3379_v49, %v1286_v6  ;;  %v2457_v51 = vpop.f32.mrb[94].mxu1  ;;  %v1288_v8 = vpop.f32.mrb[7].mxu0 }
 0x1d0   :  { %v2323_v52 = vpack.c.bf16 %v1780_v0, %v1779_v61  ;;  %v1778_v1 = vadd.f32 %v3560_v3, %v1730_v17  ;;  %v1687_v22 = vmax.f32 %v1604_v20, 0.0  ;;  %v1607_v18 = vadd.f32 %v2457_v51, %v3489_v9  ;;  %v1598_v10 = vpop.f32.mrb[95].mxu1 }
 0x1d1   :  { %v2258_v5 = vpack.c.bf16 %v1754_v29, %v1753_v43  ;;  %v1659_v31 = vmax.f32 %v1492_v15, 0.0  ;;  %v1685_v11 = vmax.f32 %v1596_v34, 0.0  ;;  %v1495_v53 = vadd.f32 %v2505_v42, %v3497_v23 }
 0x1d2   :  { %2372 = vst [vmem:[%s3779_s3 + $0x68] sm:$0xff] %v2323_v52   ;;  %v2318_v2 = vpack.c.bf16 %v1778_v1, %v1777_v37  ;;  %v1735_v13 = vmul.f32 %v3544_v27, %v1687_v22  ;;  %v1688_v41 = vmax.f32 %v1607_v18, 0.0  ;;  %v1599_v45 = vadd.f32 %v1598_v10, %v3479_v7 }
 0x1d3   :  { %2259 = vst [vmem:[%s3779_s3] sm:$0xff] %v2258_v5   ;;  %v1707_v9 = vmul.f32 %v3544_v27, %v1659_v31  ;;  %v1733_v16 = vmul.f32 %v3544_v27, %v1685_v11  ;;  %v1660_v19 = vmax.f32 %v1495_v53, 0.0 }
 0x1d4   :  { %2371 = vst [vmem:[%s3779_s3 + $0x60] sm:$0xff] %v2318_v2   ;;  %v1736_v23 = vmul.f32 %v3544_v27, %v1688_v41  ;;  %v1686_v58 = vmax.f32 %v1599_v45, 0.0  ;;  %v1291_v50 = vpop.f32.mrb[8].mxu0  ;;  %v1783_v7 = vadd.f32 %v3560_v3, %v1735_v13 }
 0x1d5   :  { %v1755_v36 = vadd.f32 %v3560_v3, %v1707_v9  ;;  %v1708_v24 = vmul.f32 %v3544_v27, %v1660_v19  ;;  %v2506_v57 = vadd.f32 %v3379_v49, %v1291_v50  ;;  %v2460_v33 = vpop.f32.mrb[96].mxu1  ;;  %v1293_v43 = vpop.f32.mrb[9].mxu0  ;;  %v1781_v61 = vadd.f32 %v3560_v3, %v1733_v16 }
 0x1d6   :  { %v1784_v28 = vadd.f32 %v3560_v3, %v1736_v23  ;;  %v1734_v47 = vmul.f32 %v3544_v27, %v1686_v58  ;;  %v1620_v39 = vadd.f32 %v2460_v33, %v3516_v38  ;;  %v1611_v21 = vpop.f32.mrb[97].mxu1  ;;  %v1294_v37 = vpop.f32.mrb[10].mxu0 }
 0x1d7   :  { %v1756_v0 = vadd.f32 %v3560_v3, %v1708_v24  ;;  %v1500_v17 = vadd.f32 %v2506_v57, %v3510_v35  ;;  %v1612_v20 = vadd.f32 %v1611_v21, %v3500_v25  ;;  %v2507_v26 = vadd.f32 %v3379_v49, %v1294_v37  ;;  %v2461_v6 = vpop.f32.mrb[98].mxu1  ;;  %v1296_v29 = vpop.f32.mrb[11].mxu0 }
 0x1d8   :  { %v2333_v15 = vpack.c.bf16 %v1784_v28, %v1783_v7  ;;  %v1782_v34 = vadd.f32 %v3560_v3, %v1734_v47  ;;  %v1691_v42 = vmax.f32 %v1620_v39, 0.0  ;;  %v1623_v51 = vadd.f32 %v2461_v6, %v3521_v48  ;;  %v1614_v8 = vpop.f32.mrb[99].mxu1 }
 0x1d9   :  { %v2263_v38 = vpack.c.bf16 %v1756_v0, %v1755_v36  ;;  %v1661_v52 = vmax.f32 %v1500_v17, 0.0  ;;  %v1689_v1 = vmax.f32 %v1612_v20, 0.0  ;;  %v1503_v22 = vadd.f32 %v2507_v26, %v3518_v46 }
 0x1da   :  { %2374 = vst [vmem:[%s3779_s3 + $0x78] sm:$0xff] %v2333_v15   ;;  %v2328_v25 = vpack.c.bf16 %v1782_v34, %v1781_v61  ;;  %v1739_v35 = vmul.f32 %v3544_v27, %v1691_v42  ;;  %v1692_v18 = vmax.f32 %v1623_v51, 0.0  ;;  %v1615_v10 = vadd.f32 %v1614_v8, %v3505_v30 }
 0x1db   :  { %2360 = vst [vmem:[%s3779_s3 + $0x8] sm:$0xff] %v2263_v38   ;;  %v1709_v48 = vmul.f32 %v3544_v27, %v1661_v52  ;;  %v1737_v5 = vmul.f32 %v3544_v27, %v1689_v1  ;;  %v1662_v31 = vmax.f32 %v1503_v22, 0.0 }
 0x1dc   :  { %2373 = vst [vmem:[%s3779_s3 + $0x70] sm:$0xff] %v2328_v25   ;;  %v1740_v46 = vmul.f32 %v3544_v27, %v1692_v18  ;;  %v1690_v11 = vmax.f32 %v1615_v10, 0.0  ;;  %v1299_v53 = vpop.f32.mrb[12].mxu0  ;;  %v1787_v30 = vadd.f32 %v3560_v3, %v1739_v35 }
 0x1dd   :  { %v1757_v2 = vadd.f32 %v3560_v3, %v1709_v48  ;;  %v1710_v13 = vmul.f32 %v3544_v27, %v1662_v31  ;;  %v2508_v41 = vadd.f32 %v3379_v49, %v1299_v53  ;;  %v2464_v45 = vpop.f32.mrb[100].mxu1  ;;  %v1301_v9 = vpop.f32.mrb[13].mxu0  ;;  %v1785_v16 = vadd.f32 %v3560_v3, %v1737_v5 }
 0x1de   :  { %v1788_v19 = vadd.f32 %v3560_v3, %v1740_v46  ;;  %v1738_v23 = vmul.f32 %v3544_v27, %v1690_v11  ;;  %v1636_v58 = vadd.f32 %v2464_v45, %v3549_v40  ;;  %v1627_v50 = vpop.f32.mrb[101].mxu1  ;;  %v1302_v36 = vpop.f32.mrb[14].mxu0 }
 0x1df   :  { %v1758_v7 = vadd.f32 %v3560_v3, %v1710_v13  ;;  %v1508_v24 = vadd.f32 %v2508_v41, %v3508_v32  ;;  %v1628_v57 = vadd.f32 %v1627_v50, %v3532_v55  ;;  %v2509_v33 = vadd.f32 %v3379_v49, %v1302_v36  ;;  %v2465_v43 = vpop.f32.mrb[102].mxu1  ;;  %v1304_v61 = vpop.f32.mrb[15].mxu0 }
 0x1e0   :  { %v2343_v28 = vpack.c.bf16 %v1788_v19, %v1787_v30  ;;  %v1786_v47 = vadd.f32 %v3560_v3, %v1738_v23  ;;  %v1695_v39 = vmax.f32 %v1636_v58, 0.0  ;;  %v1639_v21 = vadd.f32 %v2465_v43, %v3554_v60  ;;  %v1630_v37 = vpop.f32.mrb[103].mxu1 }
 0x1e1   :  { %v2268_v40 = vpack.c.bf16 %v1758_v7, %v1757_v2  ;;  %v1663_v0 = vmax.f32 %v1508_v24, 0.0  ;;  %v1693_v17 = vmax.f32 %v1628_v57, 0.0  ;;  %v1511_v20 = vadd.f32 %v2509_v33, %v3513_v44 }
 0x1e2   :  { %2376 = vst [vmem:[%s3779_s3 + $0x88] sm:$0xff] %v2343_v28   ;;  %v2338_v32 = vpack.c.bf16 %v1786_v47, %v1785_v16  ;;  %v1743_v55 = vmul.f32 %v3544_v27, %v1695_v39  ;;  %v1696_v26 = vmax.f32 %v1639_v21, 0.0  ;;  %v1631_v6 = vadd.f32 %v1630_v37, %v3537_v63 }
 0x1e3   :  { %2361 = vst [vmem:[%s3779_s3 + $0x10] sm:$0xff] %v2268_v40   ;;  %v1711_v60 = vmul.f32 %v3544_v27, %v1663_v0  ;;  %v1664_v29 = vmax.f32 %v1511_v20, 0.0  ;;  %v1741_v44 = vmul.f32 %v3544_v27, %v1693_v17 }
 0x1e4   :  { %2375 = vst [vmem:[%s3779_s3 + $0x80] sm:$0xff] %v2338_v32   ;;  %v1744_v15 = vmul.f32 %v3544_v27, %v1696_v26  ;;  %v1694_v34 = vmax.f32 %v1631_v6, 0.0  ;;  %v1307_v42 = vpop.f32.mrb[16].mxu0  ;;  %v1791_v51 = vadd.f32 %v3560_v3, %v1743_v55 }
 0x1e5   :  { %v1712_v63 = vmul.f32 %v3544_v27, %v1664_v29  ;;  %v2510_v8 = vadd.f32 %v3379_v49, %v1307_v42  ;;  %v2468_v38 = vpop.f32.mrb[104].mxu1  ;;  %v1309_v52 = vpop.f32.mrb[17].mxu0  ;;  %v1759_v1 = vadd.f32 %v3560_v3, %v1711_v60  ;;  %v1789_v2 = vadd.f32 %v3560_v3, %v1741_v44 }
 0x1e6   :  { %v1792_v22 = vadd.f32 %v3560_v3, %v1744_v15  ;;  %v1742_v25 = vmul.f32 %v3544_v27, %v1694_v34  ;;  %v1652_v35 = vadd.f32 %v2468_v38, %v3599_v59  ;;  %v1643_v18 = vpop.f32.mrb[105].mxu1  ;;  %v1310_v10 = vpop.f32.mrb[18].mxu0 }
 0x1e7   :  { %v1760_v48 = vadd.f32 %v3560_v3, %v1712_v63  ;;  %v1516_v5 = vadd.f32 %v2510_v8, %v3526_v62  ;;  %v1644_v31 = vadd.f32 %v1643_v18, %v3574_v54  ;;  %v2511_v46 = vadd.f32 %v3379_v49, %v1310_v10  ;;  %v2469_v11 = vpop.f32.mrb[106].mxu1  ;;  %v1312_v53 = vpop.f32.mrb[19].mxu0 }
 0x1e8   :  { %v2353_v30 = vpack.c.bf16 %v1792_v22, %v1791_v51  ;;  %v1790_v13 = vadd.f32 %v3560_v3, %v1742_v25  ;;  %v1699_v41 = vmax.f32 %v1652_v35, 0.0  ;;  %v1646_v45 = vpop.f32.mrb[107].mxu1 }
 0x1e9   :  { %v2273_v59 = vpack.c.bf16 %v1760_v48, %v1759_v1  ;;  %v1665_v9 = vmax.f32 %v1516_v5, 0.0  ;;  %v1697_v16 = vmax.f32 %v1644_v31, 0.0  ;;  %v1519_v19 = vadd.f32 %v2511_v46, %v3534_v14 }
 0x1ea   :  { %2378 = vst [vmem:[%s3779_s3 + $0x98] sm:$0xff] %v2353_v30   ;;  %v2348_v62 = vpack.c.bf16 %v1790_v13, %v1789_v2  ;;  %v1747_v54 = vmul.f32 %v3544_v27, %v1699_v41  ;;  %v1647_v23 = vadd.f32 %v1646_v45, %v3579_v12 }
 0x1eb   :  { %2362 = vst [vmem:[%s3779_s3 + $0x18] sm:$0xff] %v2273_v59   ;;  %v1713_v58 = vmul.f32 %v3544_v27, %v1665_v9  ;;  %v1666_v50 = vmax.f32 %v1519_v19, 0.0  ;;  %v1745_v36 = vmul.f32 %v3544_v27, %v1697_v16 }
 0x1ec   :  { %2377 = vst [vmem:[%s3779_s3 + $0x90] sm:$0xff] %v2348_v62   ;;  %v1795_v14 = vadd.f32 %v3560_v3, %v1747_v54  ;;  %v1698_v7 = vmax.f32 %v1647_v23, 0.0  ;;  %v1315_v24 = vpop.f32.mrb[20].mxu0 }
 0x1ed   :  { %v1714_v57 = vmul.f32 %v3544_v27, %v1666_v50  ;;  %v2512_v12 = vadd.f32 %v3379_v49, %v1315_v24  ;;  %v1317_v33 = vpop.f32.mrb[21].mxu0  ;;  %v1761_v47 = vadd.f32 %v3560_v3, %v1713_v58  ;;  %v1793_v0 = vadd.f32 %v3560_v3, %v1745_v36 }
 0x1ee   :  { %v2254_v43 = vpack.c.bf16 %v1795_v14, %v1795_v14  ;;  %v1746_v61 = vmul.f32 %v3544_v27, %v1698_v7  ;;  %v1318_v28 = vpop.f32.mrb[22].mxu0 }
 0x1ef   :  { %v1762_v39 = vadd.f32 %v3560_v3, %v1714_v57  ;;  %v1524_v21 = vadd.f32 %v2512_v12, %v3524_v56  ;;  %v2513_v37 = vadd.f32 %v3379_v49, %v1318_v28  ;;  %v1320_v40 = vpop.f32.mrb[23].mxu0 }
 0x1f0   :  { %2011 = vst [vmem:[%s3779_s3 + $0xa8] sm:$0xf] %v2254_v43  ;;  %v1794_v17 = vadd.f32 %v3560_v3, %v1746_v61 }
 0x1f1   :  { %v2278_v20 = vpack.c.bf16 %v1762_v39, %v1761_v47  ;;  %v1667_v32 = vmax.f32 %v1524_v21, 0.0  ;;  %v1527_v55 = vadd.f32 %v2513_v37, %v3529_v4 }
 0x1f2   :  { %v2358_v26 = vpack.c.bf16 %v1794_v17, %v1793_v0 }
 0x1f3   :  { %2363 = vst [vmem:[%s3779_s3 + $0x20] sm:$0xff] %v2278_v20   ;;  %v1715_v49 = vmul.f32 %v3544_v27, %v1667_v32  ;;  %v1668_v56 = vmax.f32 %v1527_v55, 0.0 }
 0x1f4   :  { %2379 = vst [vmem:[%s3779_s3 + $0xa0] sm:$0xff] %v2358_v26  }
 0x1f5   :  { %v1716_v6 = vmul.f32 %v3544_v27, %v1668_v56  ;;  %v1763_v60 = vadd.f32 %v3560_v3, %v1715_v49 }
 0x1f7   :  { %v1764_v29 = vadd.f32 %v3560_v3, %v1716_v6 }
 0x1f9   :  { %v2283_v44 = vpack.c.bf16 %v1764_v29, %v1763_v60 }
 0x1fb   :  { %2364 = vst [vmem:[%s3779_s3 + $0x28] sm:$0xff] %v2283_v44  }

// kernel: cnn_kaggle_forward.12
= control target key start
LH: loop header
LB: loop body
LE: loop exit
PB: predicated region body
PF: predicated region fallthrough
CT: control target
= control target key end

     0   :  { %vm2566_vm0 = vmmov 0   ;;  %s3204_s1 = inlined_call_operand.vmem [shape: bf16[1664,128], index: 1, kind: input, shape index: {}]   ;;  %s3205_s0 = inlined_call_operand.vmem [shape: bf16[72,1664], index: 0, kind: input, shape index: {}]   ;;  %s3206_s2 = inlined_call_operand.vmem [shape: f32[3,128], index: 2, kind: input, shape index: {}]   ;;  %s3207_s3 = inlined_call_operand.vmem [shape: bf16[72,128], index: 3, kind: output, shape index: {}]  }
   0x1   :  { %v2372_v0 = vld [vmem:[%s3204_s1 + $0x40] sm:$0xff]   ;;  %v2376_v4 = vld [vmem:[%s3204_s1 + $0x48] sm:$0xff]   ;;  %v2380_v8 = vld [vmem:[%s3204_s1 + $0x50] sm:$0xff]  }
   0x2   :  { %v2373_v1 = vld [vmem:[%s3204_s1 + $0xc0] sm:$0xff]   ;;  %2029 = vmatprep.subr.bf16.mxu0 %v2372_v0  ;;  %v2377_v5 = vld [vmem:[%s3204_s1 + $0xc8] sm:$0xff]   ;;  %v2381_v9 = vld [vmem:[%s3204_s1 + $0xd0] sm:$0xff]  }
   0x3   :  { %v2374_v2 = vld [vmem:[%s3204_s1] sm:$0xff]   ;;  %2075 = vmatprep.subr.bf16.mxu1 %v2373_v1  ;;  %v2378_v6 = vld [vmem:[%s3204_s1 + $0x8] sm:$0xff]   ;;  %v2382_v10 = vld [vmem:[%s3204_s1 + $0x10] sm:$0xff]  }
   0x4   :  { %v2375_v3 = vld [vmem:[%s3204_s1 + $0x80] sm:$0xff]   ;;  %2030 = vmatpush3.bf16.msra.mxu0 %v2374_v2  ;;  %v2379_v7 = vld [vmem:[%s3204_s1 + $0x88] sm:$0xff]   ;;  %v2383_v11 = vld [vmem:[%s3204_s1 + $0x90] sm:$0xff]  }
   0x5   :  { %2076 = vmatpush3.bf16.msra.mxu1 %v2375_v3  ;;  %2031 = vmatprep.subr.bf16.mxu0 %v2376_v4  ;;  %v2384_v12 = vld [vmem:[%s3204_s1 + $0x58] sm:$0xff]   ;;  %v2388_v16 = vld [vmem:[%s3204_s1 + $0x60] sm:$0xff]   ;;  %v2392_v20 = vld [vmem:[%s3204_s1 + $0x68] sm:$0xff]  }
   0x6   :  { %2077 = vmatprep.subr.bf16.mxu1 %v2377_v5  ;;  %v2385_v13 = vld [vmem:[%s3204_s1 + $0xd8] sm:$0xff]   ;;  %v2389_v17 = vld [vmem:[%s3204_s1 + $0xe0] sm:$0xff]   ;;  %v2393_v21 = vld [vmem:[%s3204_s1 + $0xe8] sm:$0xff]  }
   0x7   :  { %v2386_v14 = vld [vmem:[%s3204_s1 + $0x18] sm:$0xff]   ;;  %v2390_v18 = vld [vmem:[%s3204_s1 + $0x20] sm:$0xff]   ;;  %v2394_v22 = vld [vmem:[%s3204_s1 + $0x28] sm:$0xff]  }
   0x8   :  { %2032 = vmatpush3.bf16.msra.mxu0 %v2378_v6  ;;  %v2387_v15 = vld [vmem:[%s3204_s1 + $0x98] sm:$0xff]   ;;  %v2391_v19 = vld [vmem:[%s3204_s1 + $0xa0] sm:$0xff]   ;;  %v2395_v23 = vld [vmem:[%s3204_s1 + $0xa8] sm:$0xff]  }
   0x9   :  { %2078 = vmatpush3.bf16.msra.mxu1 %v2379_v7  ;;  %2033 = vmatprep.subr.bf16.mxu0 %v2380_v8  ;;  %v2396_v24 = vld [vmem:[%s3204_s1 + $0x70] sm:$0xff]   ;;  %v2400_v28 = vld [vmem:[%s3204_s1 + $0x78] sm:$0xff]   ;;  %v2409_v35 = vld [vmem:[%s3205_s0 + $0xc] ss:$52 sps:$4 sm:$0xff]  }
   0xa   :  { %2079 = vmatprep.subr.bf16.mxu1 %v2381_v9  ;;  %v2397_v25 = vld [vmem:[%s3204_s1 + $0xf0] sm:$0xff]   ;;  %v2401_v29 = vld [vmem:[%s3204_s1 + $0xf8] sm:$0xff]   ;;  %v2410_v36 = vld [vmem:[%s3204_s1 + $0x140] sm:$0xff]   ;;  %1329 = vmatprep.mubr.bf16.mxu1 %v2409_v35 }
   0xb   :  { %v2398_v26 = vld [vmem:[%s3204_s1 + $0x30] sm:$0xff]   ;;  %v2402_v30 = vld [vmem:[%s3204_s1 + $0x38] sm:$0xff]   ;;  %v2411_v37 = vld [vmem:[%s3204_s1 + $0x100] sm:$0xff]  }
   0xc   :  { %2034 = vmatpush3.bf16.msra.mxu0 %v2382_v10  ;;  %v2399_v27 = vld [vmem:[%s3204_s1 + $0xb0] sm:$0xff]   ;;  %v2403_v31 = vld [vmem:[%s3204_s1 + $0xb8] sm:$0xff]   ;;  %v2412_v38 = vld [vmem:[%s3204_s1 + $0x148] sm:$0xff]  }
   0xd   :  { %2080 = vmatpush3.bf16.msra.mxu1 %v2383_v11  ;;  %2035 = vmatprep.subr.bf16.mxu0 %v2384_v12  ;;  %v2404_v32 = vld [vmem:[%s3205_s0] ss:$52 sps:$4 sm:$0xff]   ;;  %v2406_v33 = vld [vmem:[%s3205_s0 + $0x4] ss:$52 sps:$4 sm:$0xff]   ;;  %v2407_v34 = vld [vmem:[%s3205_s0 + $0x8] ss:$52 sps:$4 sm:$0xff]  }
   0xe   :  { %2081 = vmatprep.subr.bf16.mxu1 %v2385_v13  ;;  %1257 = vmatprep.mubr.bf16.mxu0 %v2406_v33  ;;  %v2413_v39 = vld [vmem:[%s3204_s1 + $0x108] sm:$0xff]   ;;  %v2419_v43 = vld [vmem:[%s3205_s0 + $0x70] ss:$52 sps:$4 sm:$0xff]   ;;  %v2430_v52 = vld [vmem:[%s3204_s1 + $0x158] sm:$0xff]  }
   0xf   :  { %v2414_v40 = vld [vmem:[%s3205_s0 + $0x6c] ss:$52 sps:$4 sm:$0xff]   ;;  %v2416_v41 = vld [vmem:[%s3205_s0 + $0x74] ss:$52 sps:$4 sm:$0xff]   ;;  %v2428_v51 = vld [vmem:[%s3205_s0 + $0xdc] ss:$52 sps:$4 sm:$0xff]  }
  0x10   :  { %2036 = vmatpush3.bf16.msra.mxu0 %v2386_v14  ;;  %v2418_v42 = vld [vmem:[%s3205_s0 + $0x68] ss:$52 sps:$4 sm:$0xff]   ;;  %v2420_v44 = vld [vmem:[%s3204_s1 + $0x1c0] sm:$0xff]   ;;  %v2422_v46 = vld [vmem:[%s3204_s1 + $0x150] sm:$0xff]  }
  0x11   :  { %2082 = vmatpush3.bf16.msra.mxu1 %v2387_v15  ;;  %2037 = vmatprep.subr.bf16.mxu0 %v2388_v16  ;;  %v2421_v45 = vld [vmem:[%s3204_s1 + $0x180] sm:$0xff]   ;;  %v2423_v47 = vld [vmem:[%s3204_s1 + $0x110] sm:$0xff]   ;;  %v2424_v48 = vld [vmem:[%s3204_s1 + $0x1c8] sm:$0xff]  }
  0x12   :  { %2083 = vmatprep.subr.bf16.mxu1 %v2389_v17  ;;  %v2425_v49 = vld [vmem:[%s3204_s1 + $0x188] sm:$0xff]   ;;  %v2431_v53 = vld [vmem:[%s3205_s0 + $0xd0] ss:$52 sps:$4 sm:$0xff]   ;;  %v2433_v55 = vld [vmem:[%s3204_s1 + $0x118] sm:$0xff]  }
  0x13   :  { %v2426_v50 = vld [vmem:[%s3205_s0 + $0xd4] ss:$52 sps:$4 sm:$0xff]   ;;  %v2432_v54 = vld [vmem:[%s3205_s0 + $0xd8] ss:$52 sps:$4 sm:$0xff]   ;;  %v2436_v58 = vld [vmem:[%s3204_s1 + $0x160] sm:$0xff]  }
  0x14   :  { %2038 = vmatpush3.bf16.msra.mxu0 %v2390_v18  ;;  %v2434_v56 = vld [vmem:[%s3204_s1 + $0x1d0] sm:$0xff]   ;;  %v2437_v59 = vld [vmem:[%s3204_s1 + $0x1d8] sm:$0xff]   ;;  %v2438_v60 = vld [vmem:[%s3204_s1 + $0x120] sm:$0xff]  }
  0x15   :  { %2084 = vmatpush3.bf16.msra.mxu1 %v2391_v19  ;;  %2039 = vmatprep.subr.bf16.mxu0 %v2392_v20  ;;  %v2435_v57 = vld [vmem:[%s3204_s1 + $0x190] sm:$0xff]   ;;  %v2439_v61 = vld [vmem:[%s3204_s1 + $0x198] sm:$0xff]   ;;  %v2446_v2 = vld [vmem:[%s3204_s1 + $0x1e0] sm:$0xff]  }
  0x16   :  { %2085 = vmatprep.subr.bf16.mxu1 %v2393_v21  ;;  %v2440_v62 = vld [vmem:[%s3205_s0 + $0x13c] ss:$52 sps:$4 sm:$0xff]   ;;  %v2442_v63 = vld [vmem:[%s3205_s0 + $0x144] ss:$52 sps:$4 sm:$0xff]   ;;  %v2445_v1 = vld [vmem:[%s3205_s0 + $0x140] ss:$52 sps:$4 sm:$0xff]  }
  0x17   :  { %v2444_v0 = vld [vmem:[%s3205_s0 + $0x138] ss:$52 sps:$4 sm:$0xff]   ;;  %v2448_v4 = vld [vmem:[%s3204_s1 + $0x1a0] sm:$0xff]   ;;  %v2452_v8 = vld [vmem:[%s3204_s1 + $0x170] sm:$0xff]  }
  0x18   :  { %2040 = vmatpush3.bf16.msra.mxu0 %v2394_v22  ;;  %v2447_v3 = vld [vmem:[%s3204_s1 + $0x168] sm:$0xff]   ;;  %v71_v9 = vld [vmem:[%s3205_s0 + $0x1a0] sm:$0xff]  ;;  %v2455_v14 = vld [vmem:[%s3204_s1 + $0x130] sm:$0xff]  }
  0x19   :  { %2086 = vmatpush3.bf16.msra.mxu1 %v2395_v23  ;;  %2041 = vmatprep.subr.bf16.mxu0 %v2396_v24  ;;  %v2449_v5 = vld [vmem:[%s3204_s1 + $0x128] sm:$0xff]   ;;  %v1870_v10 = vcombine.high %v71_v9, %v71_v9  ;;  %v1869_v12 = vcombine.low %v71_v9, %v71_v9  ;;  %v2458_v16 = vld [vmem:[%s3204_s1 + $0x1f0] sm:$0xff]   ;;  %v2460_v18 = vld [vmem:[%s3204_s1 + $0x178] sm:$0xff]  }
  0x1a   :  { %2087 = vmatprep.subr.bf16.mxu1 %v2397_v25  ;;  %v2450_v6 = vld [vmem:[%s3204_s1 + $0x1e8] sm:$0xff]   ;;  %v2459_v17 = vld [vmem:[%s3204_s1 + $0x1b0] sm:$0xff]   ;;  %v2461_v19 = vld [vmem:[%s3204_s1 + $0x138] sm:$0xff]  }
  0x1b   :  { %v2451_v7 = vld [vmem:[%s3204_s1 + $0x1a8] sm:$0xff]   ;;  %v2462_v20 = vld [vmem:[%s3204_s1 + $0x1f8] sm:$0xff]   ;;  %v2464_v22 = vld [vmem:[%s3205_s0 + $0x10] ss:$52 sps:$4 sm:$0xff]  }
  0x1c   :  { %2042 = vmatpush3.bf16.msra.mxu0 %v2398_v26  ;;  %v72_v11 = vld [vmem:[%s3205_s0 + $0x1a8] sm:$0xff]  ;;  %v2463_v21 = vld [vmem:[%s3204_s1 + $0x1b8] sm:$0xff]   ;;  %v2470_v26 = vld [vmem:[%s3204_s1 + $0x240] sm:$0xff]  }
  0x1d   :  { %2088 = vmatpush3.bf16.msra.mxu1 %v2399_v27  ;;  %2043 = vmatprep.subr.bf16.mxu0 %v2400_v28  ;;  %v1872_v13 = vcombine.high %v72_v11, %v72_v11  ;;  %v1871_v15 = vcombine.low %v72_v11, %v72_v11  ;;  %v2466_v23 = vld [vmem:[%s3205_s0 + $0x14] ss:$52 sps:$4 sm:$0xff]   ;;  %v2467_v24 = vld [vmem:[%s3205_s0 + $0x18] ss:$52 sps:$4 sm:$0xff]   ;;  %v2469_v25 = vld [vmem:[%s3205_s0 + $0x1c] ss:$52 sps:$4 sm:$0xff]  }
  0x1e   :  { %2089 = vmatprep.subr.bf16.mxu1 %v2401_v29  ;;  %v2471_v27 = vld [vmem:[%s3204_s1 + $0x200] sm:$0xff]   ;;  %v2472_v28 = vld [vmem:[%s3204_s1 + $0x248] sm:$0xff]   ;;  %v2521_v9 = vld [vmem:[%s3204_s1 + $0x238] sm:$0xff]  }
  0x1f   :  { %v2473_v29 = vld [vmem:[%s3204_s1 + $0x208] sm:$0xff]   ;;  %v2479_v33 = vld [vmem:[%s3205_s0 + $0x80] ss:$52 sps:$4 sm:$0xff]   ;;  %v2523_v11 = vld [vmem:[%s3204_s1 + $0x2b8] sm:$0xff]  }
  0x20   :  { %2044 = vmatpush3.bf16.msra.mxu0 %v2402_v30  ;;  %v2474_v30 = vld [vmem:[%s3205_s0 + $0x7c] ss:$52 sps:$4 sm:$0xff]   ;;  %v2481_v35 = vld [vmem:[%s3204_s1 + $0x280] sm:$0xff]  }
  0x21   :  { %2090 = vmatpush3.bf16.msra.mxu1 %v2403_v31  ;;  %2121 = vmatprep.subr.bf16.mxu0 %v2410_v36  ;;  %v2476_v31 = vld [vmem:[%s3205_s0 + $0x84] ss:$52 sps:$4 sm:$0xff]   ;;  %v2482_v36 = vld [vmem:[%s3204_s1 + $0x250] sm:$0xff]  }
  0x22   :  { %2167 = vmatprep.subr.bf16.mxu1 %v2420_v44  ;;  %v2492_v44 = vld [vmem:[%s3205_s0 + $0xe8] ss:$52 sps:$4 sm:$0xff]  }
  0x23   :  { %1258 = vmatmul.mubr.bf16.vlgmr.msra.gmra.mrb[0].mxu0 %v2404_v32  ;;  %v2478_v32 = vld [vmem:[%s3205_s0 + $0x78] ss:$52 sps:$4 sm:$0xff]  }
  0x24   :  { %1330 = vmatmul.mubr.bf16.vlgmr.msra.gmra.mrb[0].mxu1 %v2407_v34  ;;  %2122 = vmatpush3.bf16.msra.mxu0 %v2411_v37  ;;  %v2480_v34 = vld [vmem:[%s3204_s1 + $0x2c0] sm:$0xff]   ;;  %v2483_v37 = vld [vmem:[%s3204_s1 + $0x210] sm:$0xff]  }
  0x25   :  { %2123 = vmatprep.subr.bf16.mxu0 %v2412_v38  ;;  %1265 = vmatprep.mubr.bf16.mxu0 %v2414_v40  ;;  %v2484_v38 = vld [vmem:[%s3204_s1 + $0x2c8] sm:$0xff]   ;;  %v2486_v40 = vld [vmem:[%s3205_s0 + $0xe4] ss:$52 sps:$4 sm:$0xff]  }
  0x26   :  { %1337 = vmatprep.mubr.bf16.mxu1 %v2416_v41  ;;  %2168 = vmatpush3.bf16.msra.mxu1 %v2421_v45  ;;  %v2488_v41 = vld [vmem:[%s3205_s0 + $0xec] ss:$52 sps:$4 sm:$0xff]   ;;  %v2493_v45 = vld [vmem:[%s3204_s1 + $0x218] sm:$0xff]  }
  0x27   :  { %2169 = vmatprep.subr.bf16.mxu1 %v2424_v48  ;;  %v2496_v48 = vld [vmem:[%s3204_s1 + $0x260] sm:$0xff]  }
  0x28   :  { %2124 = vmatpush3.bf16.msra.mxu0 %v2413_v39  ;;  %v2485_v39 = vld [vmem:[%s3204_s1 + $0x288] sm:$0xff]  }
  0x29   :  { %2125 = vmatprep.subr.bf16.mxu0 %v2422_v46  ;;  %v2494_v46 = vld [vmem:[%s3204_s1 + $0x2d0] sm:$0xff]  }
  0x2a   :  { %2170 = vmatpush3.bf16.msra.mxu1 %v2425_v49  ;;  %v2497_v49 = vld [vmem:[%s3204_s1 + $0x2d8] sm:$0xff]  }
  0x2b   :  { %1266 = vmatmul.mubr.bf16.gmra.mrb[4].mxu0 %v2418_v42  ;;  %2171 = vmatprep.subr.bf16.mxu1 %v2434_v56  ;;  %v2490_v42 = vld [vmem:[%s3204_s1 + $0x258] sm:$0xff]   ;;  %v2506_v56 = vld [vmem:[%s3204_s1 + $0x2e0] sm:$0xff]  }
  0x2c   :  { %1338 = vmatmul.mubr.bf16.gmra.mrb[4].mxu1 %v2419_v43  ;;  %2126 = vmatpush3.bf16.msra.mxu0 %v2423_v47  ;;  %v2491_v43 = vld [vmem:[%s3205_s0 + $0xe0] ss:$52 sps:$4 sm:$0xff]  }
  0x2d   :  { %1273 = vmatprep.mubr.bf16.mxu0 %v2426_v50  ;;  %1345 = vmatprep.mubr.bf16.mxu1 %v2428_v51  ;;  %v2495_v47 = vld [vmem:[%s3204_s1 + $0x290] sm:$0xff]   ;;  %v2498_v50 = vld [vmem:[%s3204_s1 + $0x220] sm:$0xff]   ;;  %v2499_v51 = vld [vmem:[%s3204_s1 + $0x298] sm:$0xff]  }
  0x2e   :  { %2127 = vmatprep.subr.bf16.mxu0 %v2430_v52  ;;  %2172 = vmatpush3.bf16.msra.mxu1 %v2435_v57  ;;  %v2500_v52 = vld [vmem:[%s3205_s0 + $0x14c] ss:$52 sps:$4 sm:$0xff]  }
  0x2f   :  { %2173 = vmatprep.subr.bf16.mxu1 %v2437_v59  ;;  %v2507_v57 = vld [vmem:[%s3204_s1 + $0x268] sm:$0xff]  }
  0x30   :  { %2128 = vmatpush3.bf16.msra.mxu0 %v2433_v55  ;;  %v2505_v55 = vld [vmem:[%s3205_s0 + $0x150] ss:$52 sps:$4 sm:$0xff]   ;;  %v2509_v59 = vld [vmem:[%s3204_s1 + $0x228] sm:$0xff]  }
  0x31   :  { %2129 = vmatprep.subr.bf16.mxu0 %v2436_v58  ;;  %v2508_v58 = vld [vmem:[%s3204_s1 + $0x2a0] sm:$0xff]  }
  0x32   :  { %2174 = vmatpush3.bf16.msra.mxu1 %v2439_v61  ;;  %v2511_v61 = vld [vmem:[%s3204_s1 + $0x2a8] sm:$0xff]  }
  0x33   :  { %1274 = vmatmul.mubr.bf16.gmra.mrb[8].mxu0 %v2431_v53  ;;  %2175 = vmatprep.subr.bf16.mxu1 %v2446_v2  ;;  %v2502_v53 = vld [vmem:[%s3205_s0 + $0x154] ss:$52 sps:$4 sm:$0xff]  }
  0x34   :  { %1346 = vmatmul.mubr.bf16.gmra.mrb[8].mxu1 %v2432_v54  ;;  %2130 = vmatpush3.bf16.msra.mxu0 %v2438_v60  ;;  %v2504_v54 = vld [vmem:[%s3205_s0 + $0x148] ss:$52 sps:$4 sm:$0xff]  }
  0x35   :  { %1281 = vmatprep.mubr.bf16.mxu0 %v2440_v62  ;;  %1353 = vmatprep.mubr.bf16.mxu1 %v2442_v63  ;;  %v2510_v60 = vld [vmem:[%s3204_s1 + $0x2e8] sm:$0xff]   ;;  %v2512_v62 = vld [vmem:[%s3204_s1 + $0x270] sm:$0xff]  }
  0x36   :  { %2131 = vmatprep.subr.bf16.mxu0 %v2447_v3  ;;  %2176 = vmatpush3.bf16.msra.mxu1 %v2448_v4  ;;  %v73_v63 = vld [vmem:[%s3205_s0 + $0x1b0] sm:$0xff] }
  0x37   :  { %2177 = vmatprep.subr.bf16.mxu1 %v2450_v6  ;;  %v2515_v3 = vld [vmem:[%s3204_s1 + $0x230] sm:$0xff]   ;;  %v1873_v4 = vcombine.low %v73_v63, %v73_v63 }
  0x38   :  { %2132 = vmatpush3.bf16.msra.mxu0 %v2449_v5  ;;  %v2518_v6 = vld [vmem:[%s3204_s1 + $0x2f0] sm:$0xff]  }
  0x39   :  { %2133 = vmatprep.subr.bf16.mxu0 %v2452_v8  ;;  %v2520_v8 = vld [vmem:[%s3204_s1 + $0x278] sm:$0xff]  }
  0x3a   :  { %2178 = vmatpush3.bf16.msra.mxu1 %v2451_v7  ;;  %v2519_v7 = vld [vmem:[%s3204_s1 + $0x2b0] sm:$0xff]  }
  0x3b   :  { %1282 = vmatmul.mubr.bf16.gmra.mrb[12].mxu0 %v2444_v0  ;;  %2179 = vmatprep.subr.bf16.mxu1 %v2458_v16  ;;  %v74_v0 = vld [vmem:[%s3205_s0 + $0x1b8] sm:$0xff]  ;;  %v2529_v16 = vld [vmem:[%s3205_s0 + $0x2c] ss:$52 sps:$4 sm:$0xff]  }
  0x3c   :  { %1354 = vmatmul.mubr.bf16.gmra.mrb[12].mxu1 %v2445_v1  ;;  %1289 = vmatprep.mubr.bf16.mxu0 %v1870_v10  ;;  %v1874_v1 = vcombine.high %v73_v63, %v73_v63  ;;  %v1876_v2 = vcombine.high %v74_v0, %v74_v0  ;;  %v1875_v5 = vcombine.low %v74_v0, %v74_v0  ;;  %v2522_v10 = vld [vmem:[%s3204_s1 + $0x2f8] sm:$0xff]  }
  0x3d   :  { %1361 = vmatprep.mubr.bf16.mxu1 %v1872_v13  ;;  %2134 = vmatpush3.bf16.msra.mxu0 %v2455_v14  ;;  %v2526_v13 = vld [vmem:[%s3205_s0 + $0x24] ss:$52 sps:$4 sm:$0xff]   ;;  %v2527_v14 = vld [vmem:[%s3205_s0 + $0x28] ss:$52 sps:$4 sm:$0xff]  }
  0x3e   :  { %2180 = vmatpush3.bf16.msra.mxu1 %v2459_v17  ;;  %2135 = vmatprep.subr.bf16.mxu0 %v2460_v18  ;;  %v2530_v17 = vld [vmem:[%s3204_s1 + $0x300] sm:$0xff]  }
  0x3f   :  { %2181 = vmatprep.subr.bf16.mxu1 %v2462_v20  ;;  %v2532_v18 = vld [vmem:[%s3205_s0 + $0x8c] ss:$52 sps:$4 sm:$0xff]   ;;  %v2534_v20 = vld [vmem:[%s3205_s0 + $0x94] ss:$52 sps:$4 sm:$0xff]  }
  0x41   :  { %2136 = vmatpush3.bf16.msra.mxu0 %v2461_v19  ;;  %v2531_v19 = vld [vmem:[%s3204_s1 + $0x308] sm:$0xff]  }
  0x42   :  { %2182 = vmatpush3.bf16.msra.mxu1 %v2463_v21  ;;  %2213 = vmatprep.subr.bf16.mxu0 %v2470_v26  ;;  %v2536_v21 = vld [vmem:[%s3205_s0 + $0x88] ss:$52 sps:$4 sm:$0xff]  }
  0x43   :  { %1290 = vmatmul.mubr.bf16.gmra.mrb[16].mxu0 %v1869_v12  ;;  %2259 = vmatprep.subr.bf16.mxu1 %v2480_v34  ;;  %v2524_v12 = vld [vmem:[%s3205_s0 + $0x20] ss:$52 sps:$4 sm:$0xff]   ;;  %v2545_v26 = vld [vmem:[%s3204_s1 + $0x318] sm:$0xff]   ;;  %v76_v34 = vld [vmem:[%s3205_s0 + $0x1c8] sm:$0xff] }
  0x44   :  { %1362 = vmatmul.mubr.bf16.gmra.mrb[16].mxu1 %v1871_v15  ;;  %1401 = vmatprep.mubr.bf16.mxu0 %v2466_v23  ;;  %v2565_v15 = vmov 0.0   ;;  %v2538_v23 = vld [vmem:[%s3204_s1 + $0x310] sm:$0xff]  }
  0x45   :  { %1473 = vmatprep.mubr.bf16.mxu1 %v2469_v25  ;;  %v2541_v25 = vld [vmem:[%s3205_s0 + $0xfc] ss:$52 sps:$4 sm:$0xff]  }
  0x4b   :  { %1402 = vmatmul.mubr.bf16.vlgmr.msra.gmra.mrb[20].mxu0 %v2464_v22  ;;  %v2537_v22 = vld [vmem:[%s3205_s0 + $0x90] ss:$52 sps:$4 sm:$0xff]  }
  0x4c   :  { %1474 = vmatmul.mubr.bf16.vlgmr.msra.gmra.mrb[20].mxu1 %v2467_v24  ;;  %2214 = vmatpush3.bf16.msra.mxu0 %v2471_v27  ;;  %v2539_v24 = vld [vmem:[%s3205_s0 + $0xf4] ss:$52 sps:$4 sm:$0xff]   ;;  %v2543_v27 = vld [vmem:[%s3205_s0 + $0xf0] ss:$52 sps:$4 sm:$0xff]  }
  0x4d   :  { %2215 = vmatprep.subr.bf16.mxu0 %v2472_v28  ;;  %1409 = vmatprep.mubr.bf16.mxu0 %v2474_v30  ;;  %v2544_v28 = vld [vmem:[%s3205_s0 + $0xf8] ss:$52 sps:$4 sm:$0xff]   ;;  %v2547_v30 = vld [vmem:[%s3205_s0 + $0x15c] ss:$52 sps:$4 sm:$0xff]  }
  0x4e   :  { %1481 = vmatprep.mubr.bf16.mxu1 %v2476_v31  ;;  %2260 = vmatpush3.bf16.msra.mxu1 %v2481_v35  ;;  %v2549_v31 = vld [vmem:[%s3205_s0 + $0x164] ss:$52 sps:$4 sm:$0xff]  }
  0x4f   :  { %2261 = vmatprep.subr.bf16.mxu1 %v2484_v38  ;;  %v2551_v35 = vld [vmem:[%s3205_s0 + $0x158] ss:$52 sps:$4 sm:$0xff]   ;;  %v1880_v38 = vcombine.high %v76_v34, %v76_v34 }
  0x50   :  { %2216 = vmatpush3.bf16.msra.mxu0 %v2473_v29  ;;  %v2546_v29 = vld [vmem:[%s3204_s1 + $0x320] sm:$0xff]  }
  0x51   :  { %2217 = vmatprep.subr.bf16.mxu0 %v2482_v36  ;;  %v2552_v36 = vld [vmem:[%s3205_s0 + $0x160] ss:$52 sps:$4 sm:$0xff]  }
  0x52   :  { %2262 = vmatpush3.bf16.msra.mxu1 %v2485_v39  ;;  %v2556_v39 = vld [vmem:[%s3204_s1 + $0x330] sm:$0xff]  }
  0x53   :  { %1410 = vmatmul.mubr.bf16.gmra.mrb[24].mxu0 %v2478_v32  ;;  %2263 = vmatprep.subr.bf16.mxu1 %v2494_v46  ;;  %v2553_v32 = vld [vmem:[%s3204_s1 + $0x328] sm:$0xff]   ;;  %v2563_v46 = vld [vmem:[%s3205_s0 + $0x1d0] ss:$0 sps:$4 sm:$0xff]  }
  0x54   :  { %1482 = vmatmul.mubr.bf16.gmra.mrb[24].mxu1 %v2479_v33  ;;  %2218 = vmatpush3.bf16.msra.mxu0 %v2483_v37  ;;  %v75_v33 = vld [vmem:[%s3205_s0 + $0x1c0] sm:$0xff] }
  0x55   :  { %1417 = vmatprep.mubr.bf16.mxu0 %v2486_v40  ;;  %1489 = vmatprep.mubr.bf16.mxu1 %v2488_v41  ;;  %v1878_v37 = vcombine.high %v75_v33, %v75_v33  ;;  %v2559_v40 = vld [vmem:[%s3204_s1 + $0x338] sm:$0xff]   ;;  %v1877_v41 = vcombine.low %v75_v33, %v75_v33 }
  0x56   :  { %2219 = vmatprep.subr.bf16.mxu0 %v2490_v42  ;;  %2264 = vmatpush3.bf16.msra.mxu1 %v2495_v47  ;;  %v1879_v42 = vcombine.low %v76_v34, %v76_v34  ;;  %v2564_v47 = vld [vmem:[%s3205_s0 + $0x100] ss:$52 sps:$4 sm:$0xff]  }
  0x57   :  { %2265 = vmatprep.subr.bf16.mxu1 %v2497_v49  ;;  %v3100_v49 = vld [vmem:[%s3206_s2] ss:$0 sm:$0xff] }
  0x58   :  { %2220 = vmatpush3.bf16.msra.mxu0 %v2493_v45  ;;  %v2562_v45 = vld [vmem:[%s3205_s0 + $0x98] ss:$52 sps:$4 sm:$0xff]  }
  0x59   :  { %2221 = vmatprep.subr.bf16.mxu0 %v2496_v48 }
  0x5a   :  { %2266 = vmatpush3.bf16.msra.mxu1 %v2499_v51 }
  0x5b   :  { %1418 = vmatmul.mubr.bf16.gmra.mrb[28].mxu0 %v2491_v43  ;;  %2267 = vmatprep.subr.bf16.mxu1 %v2506_v56  ;;  %v2560_v43 = vld [vmem:[%s3205_s0 + $0x30] ss:$52 sps:$4 sm:$0xff]  }
  0x5c   :  { %1490 = vmatmul.mubr.bf16.gmra.mrb[28].mxu1 %v2492_v44  ;;  %2222 = vmatpush3.bf16.msra.mxu0 %v2498_v50  ;;  %v2561_v44 = vld [vmem:[%s3205_s0 + $0x168] ss:$52 sps:$4 sm:$0xff]  }
  0x5d   :  { %1425 = vmatprep.mubr.bf16.mxu0 %v2500_v52  ;;  %1497 = vmatprep.mubr.bf16.mxu1 %v2502_v53 }
  0x5e   :  { %2223 = vmatprep.subr.bf16.mxu0 %v2507_v57  ;;  %2268 = vmatpush3.bf16.msra.mxu1 %v2508_v58 }
  0x5f   :  { %2269 = vmatprep.subr.bf16.mxu1 %v2510_v60 }
  0x60   :  { %2224 = vmatpush3.bf16.msra.mxu0 %v2509_v59 }
  0x61   :  { %2225 = vmatprep.subr.bf16.mxu0 %v2512_v62 }
  0x62   :  { %2270 = vmatpush3.bf16.msra.mxu1 %v2511_v61 }
  0x63   :  { %1426 = vmatmul.mubr.bf16.gmra.mrb[32].mxu0 %v2504_v54  ;;  %2271 = vmatprep.subr.bf16.mxu1 %v2518_v6 }
  0x64   :  { %1498 = vmatmul.mubr.bf16.gmra.mrb[32].mxu1 %v2505_v55  ;;  %1433 = vmatprep.mubr.bf16.mxu0 %v1874_v1 }
  0x65   :  { %1505 = vmatprep.mubr.bf16.mxu1 %v1876_v2  ;;  %2226 = vmatpush3.bf16.msra.mxu0 %v2515_v3 }
  0x66   :  { %2272 = vmatpush3.bf16.msra.mxu1 %v2519_v7  ;;  %2227 = vmatprep.subr.bf16.mxu0 %v2520_v8 }
  0x67   :  { %2273 = vmatprep.subr.bf16.mxu1 %v2522_v10 }
  0x69   :  { %2228 = vmatpush3.bf16.msra.mxu0 %v2521_v9 }
  0x6a   :  { %2318 = vmatprep.subr.bf16.mxu0 %v2565_v15  ;;  %2274 = vmatpush3.bf16.msra.mxu1 %v2523_v11 }
  0x6b   :  { %1434 = vmatmul.mubr.bf16.gmra.mrb[36].mxu0 %v1873_v4  ;;  %2354 = vmatprep.subr.bf16.mxu1 %v2565_v15 }
  0x6c   :  { %1506 = vmatmul.mubr.bf16.gmra.mrb[36].mxu1 %v1875_v5  ;;  %1545 = vmatprep.mubr.bf16.mxu0 %v2526_v13 }
  0x6d   :  { %1617 = vmatprep.mubr.bf16.mxu1 %v2529_v16 }
  0x73   :  { %1546 = vmatmul.mubr.bf16.vlgmr.msra.gmra.mrb[40].mxu0 %v2524_v12 }
  0x74   :  { %1618 = vmatmul.mubr.bf16.vlgmr.msra.gmra.mrb[40].mxu1 %v2527_v14  ;;  %2319 = vmatpush3.bf16.msra.mxu0 %v2530_v17 }
  0x75   :  { %2362 = vmatpush3.bf16.msra.mxu1 %v2530_v17  ;;  %2320 = vmatprep.subr.bf16.mxu0 %v2565_v15 }
  0x76   :  { %1553 = vmatprep.mubr.bf16.mxu0 %v2532_v18  ;;  %1625 = vmatprep.mubr.bf16.mxu1 %v2534_v20 }
  0x77   :  { %2355 = vmatprep.subr.bf16.mxu1 %v2565_v15 }
  0x78   :  { %2321 = vmatpush3.bf16.msra.mxu0 %v2531_v19 }
  0x79   :  { %2363 = vmatpush3.bf16.msra.mxu1 %v2531_v19  ;;  %2322 = vmatprep.subr.bf16.mxu0 %v2565_v15 }
  0x7a   :  { %2356 = vmatprep.subr.bf16.mxu1 %v2565_v15 }
  0x7b   :  { %1554 = vmatmul.mubr.bf16.gmra.mrb[44].mxu0 %v2536_v21 }
  0x7c   :  { %1626 = vmatmul.mubr.bf16.gmra.mrb[44].mxu1 %v2537_v22  ;;  %2323 = vmatpush3.bf16.msra.mxu0 %v2538_v23 }
  0x7d   :  { %1561 = vmatprep.mubr.bf16.mxu0 %v2539_v24  ;;  %1633 = vmatprep.mubr.bf16.mxu1 %v2541_v25 }
  0x7e   :  { %2324 = vmatprep.subr.bf16.mxu0 %v2565_v15  ;;  %2364 = vmatpush3.bf16.msra.mxu1 %v2538_v23 }
  0x7f   :  { %2357 = vmatprep.subr.bf16.mxu1 %v2565_v15 }
  0x80   :  { %2325 = vmatpush3.bf16.msra.mxu0 %v2545_v26 }
  0x81   :  { %2326 = vmatprep.subr.bf16.mxu0 %v2565_v15 }
  0x82   :  { %2365 = vmatpush3.bf16.msra.mxu1 %v2545_v26 }
  0x83   :  { %1562 = vmatmul.mubr.bf16.gmra.mrb[48].mxu0 %v2543_v27  ;;  %2358 = vmatprep.subr.bf16.mxu1 %v2565_v15 }
  0x84   :  { %1634 = vmatmul.mubr.bf16.gmra.mrb[48].mxu1 %v2544_v28  ;;  %2327 = vmatpush3.bf16.msra.mxu0 %v2546_v29 }
  0x85   :  { %1569 = vmatprep.mubr.bf16.mxu0 %v2547_v30  ;;  %1641 = vmatprep.mubr.bf16.mxu1 %v2549_v31 }
  0x86   :  { %2366 = vmatpush3.bf16.msra.mxu1 %v2546_v29  ;;  %2328 = vmatprep.subr.bf16.mxu0 %v2565_v15 }
  0x87   :  { %2359 = vmatprep.subr.bf16.mxu1 %v2565_v15 }
  0x88   :  { %2329 = vmatpush3.bf16.msra.mxu0 %v2553_v32 }
  0x89   :  { %2330 = vmatprep.subr.bf16.mxu0 %v2565_v15 }
  0x8a   :  { %2367 = vmatpush3.bf16.msra.mxu1 %v2553_v32 }
  0x8b   :  { %1570 = vmatmul.mubr.bf16.gmra.mrb[52].mxu0 %v2551_v35  ;;  %2360 = vmatprep.subr.bf16.mxu1 %v2565_v15 }
  0x8c   :  { %1642 = vmatmul.mubr.bf16.gmra.mrb[52].mxu1 %v2552_v36  ;;  %1577 = vmatprep.mubr.bf16.mxu0 %v1878_v37 }
  0x8d   :  { %1649 = vmatprep.mubr.bf16.mxu1 %v1880_v38  ;;  %2331 = vmatpush3.bf16.msra.mxu0 %v2556_v39 }
  0x8e   :  { %2368 = vmatpush3.bf16.msra.mxu1 %v2556_v39  ;;  %2332 = vmatprep.subr.bf16.mxu0 %v2565_v15 }
  0x8f   :  { %2361 = vmatprep.subr.bf16.mxu1 %v2565_v15 }
  0x91   :  { %2333 = vmatpush3.bf16.msra.mxu0 %v2559_v40 }
  0x92   :  { %2369 = vmatpush3.bf16.msra.mxu1 %v2559_v40 }
  0x93   :  { %1578 = vmatmul.mubr.bf16.gmra.mrb[56].mxu0 %v1877_v41 }
  0x94   :  { %1650 = vmatmul.mubr.bf16.gmra.mrb[56].mxu1 %v1879_v42  ;;  %2334 = vmatprep.mubr.msk.bf16.mxu0 %vm2566_vm0, %v2565_v15 }
  0x95   :  { %2346 = vmatprep.mubr.msk.bf16.mxu1 %vm2566_vm0, %v2565_v15 }
  0x9b   :  { %2335 = vmatmul.mubr.bf16.vlgmr.msra.gmra.mrb[60].mxu0 %v2560_v43 }
  0x9c   :  { %2347 = vmatmul.mubr.bf16.vlgmr.msra.gmra.mrb[60].mxu1 %v2561_v44  ;;  %2338 = vmatprep.mubr.msk.bf16.mxu0 %vm2566_vm0, %v2565_v15 }
  0x9d   :  { %2350 = vmatprep.mubr.msk.bf16.mxu1 %vm2566_vm0, %v2565_v15 }
  0xa3   :  { %2339 = vmatmul.mubr.bf16.gmra.mrb[64].mxu0 %v2562_v45 }
  0xa4   :  { %2351 = vmatmul.mubr.bf16.gmra.mrb[64].mxu1 %v2563_v46  ;;  %2342 = vmatprep.mubr.msk.bf16.mxu0 %vm2566_vm0, %v2565_v15 }
  0xab   :  { %2343 = vmatmul.mubr.bf16.gmra.mrb[68].mxu0 %v2564_v47 }
  0xf6   :  { %v2045_v48 = vpop.f32.mrb[0].mxu0 }
  0xf7   :  { %v2046_v50 = vpop.f32.mrb[1].mxu0  ;;  %v2091_v51 = vpop.f32.mrb[0].mxu1 }
  0xf8   :  { %v2047_v52 = vadd.f32 %v2046_v50, %v2045_v48  ;;  %v2048_v53 = vpop.f32.mrb[2].mxu0  ;;  %v2092_v54 = vpop.f32.mrb[1].mxu1 }
  0xf9   :  { %v2049_v55 = vpop.f32.mrb[3].mxu0  ;;  %v2093_v56 = vadd.f32 %v2092_v54, %v2091_v51  ;;  %v2094_v57 = vpop.f32.mrb[2].mxu1 }
  0xfa   :  { %v1260_v58 = vadd.f32 %v2047_v52, %v3100_v49  ;;  %v2050_v59 = vadd.f32 %v2049_v55, %v2048_v53  ;;  %v2095_v60 = vpop.f32.mrb[3].mxu1 }
  0xfb   :  { %v2096_v61 = vadd.f32 %v2095_v60, %v2094_v57 }
  0xfc   :  { %v1263_v62 = vadd.f32 %v2050_v59, %v3100_v49  ;;  %v3104_v63 = vadd.f32 %v2093_v56, %v1260_v58 }
  0xfe   :  { %v3106_v0 = vadd.f32 %v2096_v61, %v1263_v62  ;;  %v2051_v1 = vpop.f32.mrb[4].mxu0 }
  0xff   :  { %v2052_v2 = vpop.f32.mrb[5].mxu0  ;;  %v2097_v3 = vpop.f32.mrb[4].mxu1 }
 0x100   :  { %v2053_v4 = vadd.f32 %v2052_v2, %v2051_v1  ;;  %v2054_v5 = vpop.f32.mrb[6].mxu0  ;;  %v2098_v6 = vpop.f32.mrb[5].mxu1 }
 0x101   :  { %v2055_v7 = vpop.f32.mrb[7].mxu0  ;;  %v2099_v8 = vadd.f32 %v2098_v6, %v2097_v3  ;;  %v2100_v9 = vpop.f32.mrb[6].mxu1 }
 0x102   :  { %v1268_v10 = vadd.f32 %v2053_v4, %v3100_v49  ;;  %v2056_v11 = vadd.f32 %v2055_v7, %v2054_v5  ;;  %v2101_v12 = vpop.f32.mrb[7].mxu1 }
 0x103   :  { %v2102_v13 = vadd.f32 %v2101_v12, %v2100_v9 }
 0x104   :  { %v1271_v14 = vadd.f32 %v2056_v11, %v3100_v49  ;;  %v3110_v15 = vadd.f32 %v2099_v8, %v1268_v10 }
 0x106   :  { %v3112_v16 = vadd.f32 %v2102_v13, %v1271_v14  ;;  %v2057_v17 = vpop.f32.mrb[8].mxu0 }
 0x107   :  { %v2058_v18 = vpop.f32.mrb[9].mxu0  ;;  %v2103_v19 = vpop.f32.mrb[8].mxu1 }
 0x108   :  { %v2059_v20 = vadd.f32 %v2058_v18, %v2057_v17  ;;  %v2060_v21 = vpop.f32.mrb[10].mxu0  ;;  %v2104_v22 = vpop.f32.mrb[9].mxu1 }
 0x109   :  { %v2061_v23 = vpop.f32.mrb[11].mxu0  ;;  %v2105_v24 = vadd.f32 %v2104_v22, %v2103_v19  ;;  %v2106_v25 = vpop.f32.mrb[10].mxu1 }
 0x10a   :  { %v1276_v26 = vadd.f32 %v2059_v20, %v3100_v49  ;;  %v2062_v27 = vadd.f32 %v2061_v23, %v2060_v21  ;;  %v2107_v28 = vpop.f32.mrb[11].mxu1 }
 0x10b   :  { %v2108_v29 = vadd.f32 %v2107_v28, %v2106_v25 }
 0x10c   :  { %v1279_v30 = vadd.f32 %v2062_v27, %v3100_v49  ;;  %v3116_v31 = vadd.f32 %v2105_v24, %v1276_v26 }
 0x10e   :  { %v3118_v32 = vadd.f32 %v2108_v29, %v1279_v30  ;;  %v2063_v33 = vpop.f32.mrb[12].mxu0 }
 0x10f   :  { %v2109_v34 = vpop.f32.mrb[12].mxu1  ;;  %v2064_v35 = vpop.f32.mrb[13].mxu0 }
 0x110   :  { %v2110_v36 = vpop.f32.mrb[13].mxu1  ;;  %v2065_v37 = vadd.f32 %v2064_v35, %v2063_v33  ;;  %v2066_v38 = vpop.f32.mrb[14].mxu0 }
 0x111   :  { %v2111_v39 = vadd.f32 %v2110_v36, %v2109_v34  ;;  %v2112_v40 = vpop.f32.mrb[14].mxu1  ;;  %v2067_v41 = vpop.f32.mrb[15].mxu0 }
 0x112   :  { %v2113_v42 = vpop.f32.mrb[15].mxu1  ;;  %v1284_v43 = vadd.f32 %v2065_v37, %v3100_v49  ;;  %v2068_v44 = vadd.f32 %v2067_v41, %v2066_v38 }
 0x113   :  { %v2114_v45 = vadd.f32 %v2113_v42, %v2112_v40 }
 0x114   :  { %v1287_v46 = vadd.f32 %v2068_v44, %v3100_v49  ;;  %v3122_v47 = vadd.f32 %v2111_v39, %v1284_v43 }
 0x116   :  { %v3124_v48 = vadd.f32 %v2114_v45, %v1287_v46  ;;  %v2069_v50 = vpop.f32.mrb[16].mxu0 }
 0x117   :  { %v2115_v51 = vpop.f32.mrb[16].mxu1  ;;  %v2070_v52 = vpop.f32.mrb[17].mxu0 }
 0x118   :  { %v2116_v53 = vpop.f32.mrb[17].mxu1  ;;  %v2071_v54 = vadd.f32 %v2070_v52, %v2069_v50  ;;  %v2072_v55 = vpop.f32.mrb[18].mxu0 }
 0x119   :  { %v2117_v56 = vadd.f32 %v2116_v53, %v2115_v51  ;;  %v2118_v57 = vpop.f32.mrb[18].mxu1  ;;  %v2073_v58 = vpop.f32.mrb[19].mxu0 }
 0x11a   :  { %v2119_v59 = vpop.f32.mrb[19].mxu1  ;;  %v1292_v60 = vadd.f32 %v2071_v54, %v3100_v49 }
 0x11c   :  { %v3127_v61 = vadd.f32 %v2117_v56, %v1292_v60 }
 0x11e   :  { %v2137_v62 = vpop.f32.mrb[20].mxu0 }
 0x11f   :  { %v2138_v1 = vpop.f32.mrb[21].mxu0  ;;  %v2183_v2 = vpop.f32.mrb[20].mxu1 }
 0x120   :  { %v2139_v3 = vadd.f32 %v2138_v1, %v2137_v62  ;;  %v2140_v4 = vpop.f32.mrb[22].mxu0  ;;  %v2184_v5 = vpop.f32.mrb[21].mxu1 }
 0x121   :  { %v2141_v6 = vpop.f32.mrb[23].mxu0  ;;  %v2185_v7 = vadd.f32 %v2184_v5, %v2183_v2  ;;  %v2186_v8 = vpop.f32.mrb[22].mxu1 }
 0x122   :  { %v1404_v9 = vadd.f32 %v2139_v3, %v3104_v63  ;;  %v2142_v10 = vadd.f32 %v2141_v6, %v2140_v4  ;;  %v2187_v11 = vpop.f32.mrb[23].mxu1 }
 0x123   :  { %v2188_v12 = vadd.f32 %v2187_v11, %v2186_v8 }
 0x124   :  { %v1407_v13 = vadd.f32 %v2142_v10, %v3106_v0  ;;  %v3131_v14 = vadd.f32 %v2185_v7, %v1404_v9 }
 0x126   :  { %v3133_v49 = vadd.f32 %v2188_v12, %v1407_v13  ;;  %v2143_v17 = vpop.f32.mrb[24].mxu0 }
 0x127   :  { %v2144_v18 = vpop.f32.mrb[25].mxu0  ;;  %v2189_v19 = vpop.f32.mrb[24].mxu1 }
 0x128   :  { %v2145_v20 = vadd.f32 %v2144_v18, %v2143_v17  ;;  %v2146_v21 = vpop.f32.mrb[26].mxu0  ;;  %v2190_v22 = vpop.f32.mrb[25].mxu1 }
 0x129   :  { %v2147_v23 = vpop.f32.mrb[27].mxu0  ;;  %v2191_v24 = vadd.f32 %v2190_v22, %v2189_v19  ;;  %v2192_v25 = vpop.f32.mrb[26].mxu1 }
 0x12a   :  { %v1412_v63 = vadd.f32 %v2145_v20, %v3110_v15  ;;  %v2148_v26 = vadd.f32 %v2147_v23, %v2146_v21  ;;  %v2193_v27 = vpop.f32.mrb[27].mxu1 }
 0x12b   :  { %v2194_v28 = vadd.f32 %v2193_v27, %v2192_v25 }
 0x12c   :  { %v1415_v0 = vadd.f32 %v2148_v26, %v3112_v16  ;;  %v3137_v29 = vadd.f32 %v2191_v24, %v1412_v63 }
 0x12e   :  { %v3139_v30 = vadd.f32 %v2194_v28, %v1415_v0  ;;  %v2149_v33 = vpop.f32.mrb[28].mxu0 }
 0x12f   :  { %v2150_v34 = vpop.f32.mrb[29].mxu0  ;;  %v2195_v35 = vpop.f32.mrb[28].mxu1 }
 0x130   :  { %v2151_v36 = vadd.f32 %v2150_v34, %v2149_v33  ;;  %v2152_v37 = vpop.f32.mrb[30].mxu0  ;;  %v2196_v38 = vpop.f32.mrb[29].mxu1 }
 0x131   :  { %v2153_v39 = vpop.f32.mrb[31].mxu0  ;;  %v2197_v40 = vadd.f32 %v2196_v38, %v2195_v35  ;;  %v2198_v41 = vpop.f32.mrb[30].mxu1 }
 0x132   :  { %v1420_v15 = vadd.f32 %v2151_v36, %v3116_v31  ;;  %v2154_v42 = vadd.f32 %v2153_v39, %v2152_v37  ;;  %v2199_v43 = vpop.f32.mrb[31].mxu1 }
 0x133   :  { %v2200_v44 = vadd.f32 %v2199_v43, %v2198_v41 }
 0x134   :  { %v1423_v16 = vadd.f32 %v2154_v42, %v3118_v32  ;;  %v3143_v45 = vadd.f32 %v2197_v40, %v1420_v15 }
 0x136   :  { %v3145_v46 = vadd.f32 %v2200_v44, %v1423_v16  ;;  %v2155_v50 = vpop.f32.mrb[32].mxu0 }
 0x137   :  { %v2156_v51 = vpop.f32.mrb[33].mxu0  ;;  %v2201_v52 = vpop.f32.mrb[32].mxu1 }
 0x138   :  { %v2157_v53 = vadd.f32 %v2156_v51, %v2155_v50  ;;  %v2158_v54 = vpop.f32.mrb[34].mxu0  ;;  %v2202_v55 = vpop.f32.mrb[33].mxu1 }
 0x139   :  { %v2159_v56 = vpop.f32.mrb[35].mxu0  ;;  %v2203_v57 = vadd.f32 %v2202_v55, %v2201_v52  ;;  %v2204_v58 = vpop.f32.mrb[34].mxu1 }
 0x13a   :  { %v1428_v31 = vadd.f32 %v2157_v53, %v3122_v47  ;;  %v2160_v59 = vadd.f32 %v2159_v56, %v2158_v54  ;;  %v2205_v60 = vpop.f32.mrb[35].mxu1 }
 0x13b   :  { %v2206_v62 = vadd.f32 %v2205_v60, %v2204_v58 }
 0x13c   :  { %v1431_v32 = vadd.f32 %v2160_v59, %v3124_v48  ;;  %v3149_v1 = vadd.f32 %v2203_v57, %v1428_v31 }
 0x13e   :  { %v3151_v2 = vadd.f32 %v2206_v62, %v1431_v32  ;;  %v2161_v4 = vpop.f32.mrb[36].mxu0 }
 0x13f   :  { %v2207_v3 = vpop.f32.mrb[36].mxu1  ;;  %v2162_v6 = vpop.f32.mrb[37].mxu0 }
 0x140   :  { %v2208_v5 = vpop.f32.mrb[37].mxu1  ;;  %v2163_v9 = vadd.f32 %v2162_v6, %v2161_v4  ;;  %v2164_v10 = vpop.f32.mrb[38].mxu0 }
 0x141   :  { %v2209_v7 = vadd.f32 %v2208_v5, %v2207_v3  ;;  %v2210_v8 = vpop.f32.mrb[38].mxu1  ;;  %v2165_v12 = vpop.f32.mrb[39].mxu0 }
 0x142   :  { %v2211_v11 = vpop.f32.mrb[39].mxu1  ;;  %v1436_v47 = vadd.f32 %v2163_v9, %v3127_v61 }
 0x144   :  { %v3154_v13 = vadd.f32 %v2209_v7, %v1436_v47 }
 0x146   :  { %v2229_v17 = vpop.f32.mrb[40].mxu0 }
 0x147   :  { %v2275_v48 = vpop.f32.mrb[40].mxu1  ;;  %v2230_v18 = vpop.f32.mrb[41].mxu0 }
 0x148   :  { %v2276_v19 = vpop.f32.mrb[41].mxu1  ;;  %v2231_v20 = vadd.f32 %v2230_v18, %v2229_v17  ;;  %v2232_v21 = vpop.f32.mrb[42].mxu0 }
 0x149   :  { %v2277_v22 = vadd.f32 %v2276_v19, %v2275_v48  ;;  %v2278_v23 = vpop.f32.mrb[42].mxu1  ;;  %v2233_v24 = vpop.f32.mrb[43].mxu0 }
 0x14a   :  { %v2279_v25 = vpop.f32.mrb[43].mxu1  ;;  %v1548_v63 = vadd.f32 %v2231_v20, %v3131_v14  ;;  %v2234_v26 = vadd.f32 %v2233_v24, %v2232_v21 }
 0x14b   :  { %v2280_v27 = vadd.f32 %v2279_v25, %v2278_v23 }
 0x14c   :  { %v1551_v28 = vadd.f32 %v2234_v26, %v3133_v49  ;;  %v3158_v0 = vadd.f32 %v2277_v22, %v1548_v63 }
 0x14e   :  { %v2235_v61 = vpop.f32.mrb[44].mxu0  ;;  %v3160_v34 = vadd.f32 %v2280_v27, %v1551_v28 }
 0x14f   :  { %v2281_v33 = vpop.f32.mrb[44].mxu1  ;;  %v2236_v35 = vpop.f32.mrb[45].mxu0 }
 0x150   :  { %v2282_v36 = vpop.f32.mrb[45].mxu1  ;;  %v2237_v37 = vadd.f32 %v2236_v35, %v2235_v61  ;;  %v2238_v38 = vpop.f32.mrb[46].mxu0 }
 0x151   :  { %v2283_v39 = vadd.f32 %v2282_v36, %v2281_v33  ;;  %v2284_v40 = vpop.f32.mrb[46].mxu1  ;;  %v2239_v41 = vpop.f32.mrb[47].mxu0 }
 0x152   :  { %v2285_v15 = vpop.f32.mrb[47].mxu1  ;;  %v1556_v14 = vadd.f32 %v2237_v37, %v3137_v29  ;;  %v2240_v42 = vadd.f32 %v2239_v41, %v2238_v38  ;;  %v1986_v38 = vld [vmem:[%s3206_s2 + $0x1] ss:$0 sm:$0xff] }
 0x153   :  { %v2286_v43 = vadd.f32 %v2285_v15, %v2284_v40 }
 0x154   :  { %v1559_v49 = vadd.f32 %v2240_v42, %v3139_v30  ;;  %v3164_v44 = vadd.f32 %v2283_v39, %v1556_v14 }
 0x156   :  { %v2241_v16 = vpop.f32.mrb[48].mxu0  ;;  %v3166_v51 = vadd.f32 %v2286_v43, %v1559_v49 }
 0x157   :  { %v2287_v50 = vpop.f32.mrb[48].mxu1  ;;  %v2242_v52 = vpop.f32.mrb[49].mxu0 }
 0x158   :  { %v2288_v53 = vpop.f32.mrb[49].mxu1  ;;  %v2243_v54 = vadd.f32 %v2242_v52, %v2241_v16  ;;  %v2244_v55 = vpop.f32.mrb[50].mxu0 }
 0x159   :  { %v2289_v56 = vadd.f32 %v2288_v53, %v2287_v50  ;;  %v2290_v57 = vpop.f32.mrb[50].mxu1  ;;  %v2245_v58 = vpop.f32.mrb[51].mxu0 }
 0x15a   :  { %v2291_v31 = vpop.f32.mrb[51].mxu1  ;;  %v1564_v29 = vadd.f32 %v2243_v54, %v3143_v45  ;;  %v2246_v59 = vadd.f32 %v2245_v58, %v2244_v55 }
 0x15b   :  { %v2292_v60 = vadd.f32 %v2291_v31, %v2290_v57 }
 0x15c   :  { %v1567_v30 = vadd.f32 %v2246_v59, %v3145_v46  ;;  %v3170_v62 = vadd.f32 %v2289_v56, %v1564_v29 }
 0x15e   :  { %v2247_v32 = vpop.f32.mrb[52].mxu0  ;;  %v3172_v4 = vadd.f32 %v2292_v60, %v1567_v30 }
 0x15f   :  { %v2293_v3 = vpop.f32.mrb[52].mxu1  ;;  %v2248_v5 = vpop.f32.mrb[53].mxu0 }
 0x160   :  { %v2294_v6 = vpop.f32.mrb[53].mxu1  ;;  %v2249_v7 = vadd.f32 %v2248_v5, %v2247_v32  ;;  %v2250_v8 = vpop.f32.mrb[54].mxu0 }
 0x161   :  { %v2295_v9 = vadd.f32 %v2294_v6, %v2293_v3  ;;  %v2296_v10 = vpop.f32.mrb[54].mxu1  ;;  %v2251_v11 = vpop.f32.mrb[55].mxu0 }
 0x162   :  { %v2297_v12 = vpop.f32.mrb[55].mxu1  ;;  %v1572_v45 = vadd.f32 %v2249_v7, %v3149_v1  ;;  %v2252_v47 = vadd.f32 %v2251_v11, %v2250_v8 }
 0x163   :  { %v2298_v17 = vadd.f32 %v2297_v12, %v2296_v10 }
 0x164   :  { %v1575_v46 = vadd.f32 %v2252_v47, %v3151_v2  ;;  %v1644_v48 = vadd.f32 %v2295_v9, %v1572_v45 }
 0x166   :  { %v2253_v18 = vpop.f32.mrb[56].mxu0  ;;  %v1647_v20 = vadd.f32 %v2298_v17, %v1575_v46 }
 0x167   :  { %v2299_v19 = vpop.f32.mrb[56].mxu1  ;;  %v2254_v21 = vpop.f32.mrb[57].mxu0 }
 0x168   :  { %v2300_v22 = vpop.f32.mrb[57].mxu1  ;;  %v2255_v23 = vadd.f32 %v2254_v21, %v2253_v18  ;;  %v2256_v24 = vpop.f32.mrb[58].mxu0 }
 0x169   :  { %v2301_v25 = vadd.f32 %v2300_v22, %v2299_v19  ;;  %v2302_v63 = vpop.f32.mrb[58].mxu1  ;;  %v2257_v26 = vpop.f32.mrb[59].mxu0 }
 0x16a   :  { %v2303_v27 = vpop.f32.mrb[59].mxu1  ;;  %v1580_v28 = vadd.f32 %v2255_v23, %v3154_v13 }
 0x16c   :  { %v1652_v61 = vadd.f32 %v2301_v25, %v1580_v28 }
 0x16e   :  { %v1691_v1 = vpop.f32.mrb[60].mxu0 }
 0x16f   :  { %v1715_v33 = vpop.f32.mrb[60].mxu1  ;;  %v1692_v35 = vadd.f32 %v1691_v1, %v3158_v0  ;;  %v2336_v36 = vpop.f32.mrb[61].mxu0  ;;  %v1987_v0 = vld [vmem:[%s3206_s2 + $0x2] ss:$0 sm:$0xff] }
 0x170   :  { %v1716_v2 = vadd.f32 %v1715_v33, %v1644_v48  ;;  %v2348_v37 = vpop.f32.mrb[61].mxu1  ;;  %v1694_v39 = vpop.f32.mrb[62].mxu0 }
 0x171   :  { %v1718_v40 = vpop.f32.mrb[62].mxu1  ;;  %v1729_v41 = vmax.f32 %v1692_v35, 0.0  ;;  %v1695_v14 = vadd.f32 %v1694_v39, %v3160_v34  ;;  %v2337_v13 = vpop.f32.mrb[63].mxu0 }
 0x172   :  { %v1735_v15 = vmax.f32 %v1716_v2, 0.0  ;;  %v1719_v42 = vadd.f32 %v1718_v40, %v1647_v20  ;;  %v2349_v43 = vpop.f32.mrb[63].mxu1 }
 0x173   :  { %v1743_v49 = vmul.f32 %v1986_v38, %v1729_v41  ;;  %v1730_v50 = vmax.f32 %v1695_v14, 0.0 }
 0x174   :  { %v1749_v16 = vmul.f32 %v1986_v38, %v1735_v15  ;;  %v1736_v52 = vmax.f32 %v1719_v42, 0.0 }
 0x175   :  { %v1744_v53 = vmul.f32 %v1986_v38, %v1730_v50  ;;  %v1757_v55 = vadd.f32 %v1987_v0, %v1743_v49 }
 0x176   :  { %v1750_v54 = vmul.f32 %v1986_v38, %v1736_v52  ;;  %v1763_v56 = vadd.f32 %v1987_v0, %v1749_v16  ;;  %v1699_v57 = vpop.f32.mrb[64].mxu0 }
 0x177   :  { %v1723_v58 = vpop.f32.mrb[64].mxu1  ;;  %v1758_v31 = vadd.f32 %v1987_v0, %v1744_v53  ;;  %v1700_v34 = vadd.f32 %v1699_v57, %v3164_v44  ;;  %v2340_v60 = vpop.f32.mrb[65].mxu0 }
 0x178   :  { %v1764_v29 = vadd.f32 %v1987_v0, %v1750_v54  ;;  %v1724_v59 = vadd.f32 %v1723_v58, %v1652_v61  ;;  %v2352_v30 = vpop.f32.mrb[65].mxu1  ;;  %v1702_v32 = vpop.f32.mrb[66].mxu0 }
 0x179   :  { %v1726_v3 = vpop.f32.mrb[66].mxu1  ;;  %v2009_v5 = vpack.c.bf16 %v1758_v31, %v1757_v55  ;;  %v1731_v7 = vmax.f32 %v1700_v34, 0.0  ;;  %v2341_v9 = vpop.f32.mrb[67].mxu0  ;;  %v1703_v11 = vadd.f32 %v1702_v32, %v3166_v51 }
 0x17a   :  { %v2024_v6 = vpack.c.bf16 %v1764_v29, %v1763_v56  ;;  %v1737_v8 = vmax.f32 %v1724_v59, 0.0  ;;  %v2353_v10 = vpop.f32.mrb[67].mxu1 }
 0x17b   :  { %2010 = vst [vmem:[%s3207_s3] sm:$0xff] %v2009_v5   ;;  %v1745_v12 = vmul.f32 %v1986_v38, %v1731_v7  ;;  %v1732_v45 = vmax.f32 %v1703_v11, 0.0 }
 0x17c   :  { %2028 = vst [vmem:[%s3207_s3 + $0x18] sm:$0xff] %v2024_v6   ;;  %v1751_v44 = vmul.f32 %v1986_v38, %v1737_v8 }
 0x17d   :  { %v1746_v17 = vmul.f32 %v1986_v38, %v1732_v45  ;;  %v1759_v20 = vadd.f32 %v1987_v0, %v1745_v12 }
 0x17e   :  { %v1765_v47 = vadd.f32 %v1987_v0, %v1751_v44  ;;  %v1707_v46 = vpop.f32.mrb[68].mxu0 }
 0x17f   :  { %v1708_v18 = vadd.f32 %v1707_v46, %v3170_v62  ;;  %v2344_v19 = vpop.f32.mrb[69].mxu0  ;;  %v1760_v51 = vadd.f32 %v1987_v0, %v1746_v17 }
 0x180   :  { %v2005_v48 = vpack.c.bf16 %v1765_v47, %v1765_v47  ;;  %v1710_v21 = vpop.f32.mrb[70].mxu0 }
 0x181   :  { %v1733_v22 = vmax.f32 %v1708_v18, 0.0  ;;  %v1711_v23 = vadd.f32 %v1710_v21, %v3172_v4  ;;  %v2345_v24 = vpop.f32.mrb[71].mxu0  ;;  %v2014_v25 = vpack.c.bf16 %v1760_v51, %v1759_v20 }
 0x182   :  { %1811 = vst [vmem:[%s3207_s3 + $0x20] sm:$0xf] %v2005_v48 }
 0x183   :  { %v1747_v63 = vmul.f32 %v1986_v38, %v1733_v22  ;;  %v1734_v26 = vmax.f32 %v1711_v23, 0.0  ;;  %2026 = vst [vmem:[%s3207_s3 + $0x8] sm:$0xff] %v2014_v25  }
 0x185   :  { %v1748_v62 = vmul.f32 %v1986_v38, %v1734_v26  ;;  %v1761_v27 = vadd.f32 %v1987_v0, %v1747_v63 }
 0x187   :  { %v1762_v28 = vadd.f32 %v1987_v0, %v1748_v62 }
 0x189   :  { %v2019_v61 = vpack.c.bf16 %v1762_v28, %v1761_v27 }
 0x18b   :  { %2027 = vst [vmem:[%s3207_s3 + $0x10] sm:$0xff] %v2019_v61  }

// kernel: cnn_kaggle_forward.13
= control target key start
LH: loop header
LB: loop body
LE: loop exit
PB: predicated region body
PF: predicated region fallthrough
CT: control target
= control target key end

     0   :  { %vm2314_vm0 = vmmov 0   ;;  %s2843_s1 = inlined_call_operand.vmem [shape: bf16[2304,128], index: 1, kind: input, shape index: {}]   ;;  %s2844_s0 = inlined_call_operand.vmem [shape: bf16[8,2304], index: 0, kind: input, shape index: {}]   ;;  %s2845_s3 = inlined_call_operand.vmem [shape: bf16[128,128], index: 3, kind: input, shape index: {}]   ;;  %s2846_s2 = inlined_call_operand.vmem [shape: f32[3,128], index: 2, kind: input, shape index: {}]   ;;  %s2847_s4 = inlined_call_operand.vmem [shape: f32[1,128], index: 4, kind: input, shape index: {}]   ;;  %s2848_s5 = inlined_call_operand.vmem [shape: f32[8,128], index: 5, kind: output, shape index: {}]  }
   0x1   :  { %v2143_v0 = vld [vmem:[%s2843_s1 + $0x40] sm:$0xff]   ;;  %v2147_v4 = vld [vmem:[%s2843_s1 + $0x48] sm:$0xff]   ;;  %v2151_v8 = vld [vmem:[%s2843_s1 + $0x50] sm:$0xff]  }
   0x2   :  { %v2144_v1 = vld [vmem:[%s2843_s1] sm:$0xff]   ;;  %1914 = vmatprep.subr.bf16.mxu0 %v2143_v0  ;;  %v2148_v5 = vld [vmem:[%s2843_s1 + $0x8] sm:$0xff]   ;;  %v2152_v9 = vld [vmem:[%s2843_s1 + $0x10] sm:$0xff]  }
   0x3   :  { %v2145_v2 = vld [vmem:[%s2843_s1 + $0xc0] sm:$0xff]   ;;  %1915 = vmatpush3.bf16.msra.mxu0 %v2144_v1  ;;  %v2149_v6 = vld [vmem:[%s2843_s1 + $0xc8] sm:$0xff]   ;;  %v2153_v10 = vld [vmem:[%s2843_s1 + $0xd0] sm:$0xff]  }
   0x4   :  { %v2146_v3 = vld [vmem:[%s2843_s1 + $0x80] sm:$0xff]   ;;  %1936 = vmatprep.subr.bf16.mxu1 %v2145_v2  ;;  %1916 = vmatprep.subr.bf16.mxu0 %v2147_v4  ;;  %v2150_v7 = vld [vmem:[%s2843_s1 + $0x88] sm:$0xff]   ;;  %v2154_v11 = vld [vmem:[%s2843_s1 + $0x90] sm:$0xff]  }
   0x5   :  { %1937 = vmatpush3.bf16.msra.mxu1 %v2146_v3  ;;  %v2155_v12 = vld [vmem:[%s2843_s1 + $0x58] sm:$0xff]   ;;  %v2159_v16 = vld [vmem:[%s2843_s1 + $0x60] sm:$0xff]   ;;  %v2163_v20 = vld [vmem:[%s2843_s1 + $0x68] sm:$0xff]  }
   0x6   :  { %1938 = vmatprep.subr.bf16.mxu1 %v2149_v6  ;;  %v2156_v13 = vld [vmem:[%s2843_s1 + $0x18] sm:$0xff]   ;;  %v2160_v17 = vld [vmem:[%s2843_s1 + $0x20] sm:$0xff]   ;;  %v2164_v21 = vld [vmem:[%s2843_s1 + $0x28] sm:$0xff]  }
   0x7   :  { %1917 = vmatpush3.bf16.msra.mxu0 %v2148_v5  ;;  %v2157_v14 = vld [vmem:[%s2843_s1 + $0xd8] sm:$0xff]   ;;  %v2161_v18 = vld [vmem:[%s2843_s1 + $0xe0] sm:$0xff]   ;;  %v2165_v22 = vld [vmem:[%s2843_s1 + $0xe8] sm:$0xff]  }
   0x8   :  { %1918 = vmatprep.subr.bf16.mxu0 %v2151_v8  ;;  %v2158_v15 = vld [vmem:[%s2843_s1 + $0x98] sm:$0xff]   ;;  %v2162_v19 = vld [vmem:[%s2843_s1 + $0xa0] sm:$0xff]   ;;  %v2166_v23 = vld [vmem:[%s2843_s1 + $0xa8] sm:$0xff]  }
   0x9   :  { %1939 = vmatpush3.bf16.msra.mxu1 %v2150_v7  ;;  %v2167_v24 = vld [vmem:[%s2843_s1 + $0x70] sm:$0xff]   ;;  %v2171_v28 = vld [vmem:[%s2843_s1 + $0x78] sm:$0xff]   ;;  %v21_v31 = vld [vmem:[%s2844_s0] sm:$0xff] }
   0xa   :  { %1940 = vmatprep.subr.bf16.mxu1 %v2153_v10  ;;  %v2168_v25 = vld [vmem:[%s2843_s1 + $0x30] sm:$0xff]   ;;  %v2172_v29 = vld [vmem:[%s2843_s1 + $0x38] sm:$0xff]   ;;  %v1741_v32 = vcombine.low %v21_v31, %v21_v31  ;;  %v1742_v33 = vcombine.high %v21_v31, %v21_v31  ;;  %v2177_v35 = vld [vmem:[%s2843_s1 + $0x140] sm:$0xff]  }
   0xb   :  { %1919 = vmatpush3.bf16.msra.mxu0 %v2152_v9  ;;  %v2169_v26 = vld [vmem:[%s2843_s1 + $0xf0] sm:$0xff]   ;;  %v2173_v30 = vld [vmem:[%s2843_s1 + $0xf8] sm:$0xff]   ;;  %v22_v36 = vld [vmem:[%s2844_s0 + $0x8] sm:$0xff] }
   0xc   :  { %1920 = vmatprep.subr.bf16.mxu0 %v2155_v12  ;;  %v2170_v27 = vld [vmem:[%s2843_s1 + $0xb0] sm:$0xff]   ;;  %v2176_v34 = vld [vmem:[%s2843_s1 + $0xb8] sm:$0xff]   ;;  %1282 = vmatprep.mubr.bf16.mxu0 %v1742_v33  ;;  %v1743_v37 = vcombine.low %v22_v36, %v22_v36  ;;  %v1744_v38 = vcombine.high %v22_v36, %v22_v36  ;;  %v2180_v39 = vld [vmem:[%s2843_s1 + $0x100] sm:$0xff]  }
   0xd   :  { %1941 = vmatpush3.bf16.msra.mxu1 %v2154_v11  ;;  %v2181_v40 = vld [vmem:[%s2843_s1 + $0x1c0] sm:$0xff]   ;;  %v2183_v42 = vld [vmem:[%s2843_s1 + $0x148] sm:$0xff]   ;;  %v2187_v46 = vld [vmem:[%s2843_s1 + $0x150] sm:$0xff]  }
   0xe   :  { %1942 = vmatprep.subr.bf16.mxu1 %v2157_v14  ;;  %1322 = vmatprep.mubr.bf16.mxu1 %v1744_v38  ;;  %v2182_v41 = vld [vmem:[%s2843_s1 + $0x180] sm:$0xff]   ;;  %v2184_v43 = vld [vmem:[%s2843_s1 + $0x108] sm:$0xff]   ;;  %v2188_v47 = vld [vmem:[%s2843_s1 + $0x110] sm:$0xff]  }
   0xf   :  { %1921 = vmatpush3.bf16.msra.mxu0 %v2156_v13  ;;  %v2185_v44 = vld [vmem:[%s2843_s1 + $0x1c8] sm:$0xff]   ;;  %v2189_v48 = vld [vmem:[%s2843_s1 + $0x1d0] sm:$0xff]   ;;  %v2191_v50 = vld [vmem:[%s2843_s1 + $0x158] sm:$0xff]  }
  0x10   :  { %1922 = vmatprep.subr.bf16.mxu0 %v2159_v16  ;;  %v2186_v45 = vld [vmem:[%s2843_s1 + $0x188] sm:$0xff]   ;;  %v2190_v49 = vld [vmem:[%s2843_s1 + $0x190] sm:$0xff]   ;;  %v2192_v51 = vld [vmem:[%s2843_s1 + $0x118] sm:$0xff]  }
  0x11   :  { %1943 = vmatpush3.bf16.msra.mxu1 %v2158_v15  ;;  %v2193_v52 = vld [vmem:[%s2843_s1 + $0x1d8] sm:$0xff]   ;;  %v2195_v54 = vld [vmem:[%s2843_s1 + $0x160] sm:$0xff]   ;;  %v2199_v58 = vld [vmem:[%s2843_s1 + $0x168] sm:$0xff]  }
  0x12   :  { %1944 = vmatprep.subr.bf16.mxu1 %v2161_v18  ;;  %v2194_v53 = vld [vmem:[%s2843_s1 + $0x198] sm:$0xff]   ;;  %v2196_v55 = vld [vmem:[%s2843_s1 + $0x120] sm:$0xff]   ;;  %v2200_v59 = vld [vmem:[%s2843_s1 + $0x128] sm:$0xff]  }
  0x13   :  { %1923 = vmatpush3.bf16.msra.mxu0 %v2160_v17  ;;  %v2197_v56 = vld [vmem:[%s2843_s1 + $0x1e0] sm:$0xff]   ;;  %v2201_v60 = vld [vmem:[%s2843_s1 + $0x1e8] sm:$0xff]   ;;  %v2203_v62 = vld [vmem:[%s2843_s1 + $0x170] sm:$0xff]  }
  0x14   :  { %1924 = vmatprep.subr.bf16.mxu0 %v2163_v20  ;;  %v2198_v57 = vld [vmem:[%s2843_s1 + $0x1a0] sm:$0xff]   ;;  %v2202_v61 = vld [vmem:[%s2843_s1 + $0x1a8] sm:$0xff]   ;;  %v2204_v63 = vld [vmem:[%s2843_s1 + $0x130] sm:$0xff]  }
  0x15   :  { %1945 = vmatpush3.bf16.msra.mxu1 %v2162_v19  ;;  %v2205_v0 = vld [vmem:[%s2843_s1 + $0x1f0] sm:$0xff]   ;;  %v2207_v2 = vld [vmem:[%s2843_s1 + $0x178] sm:$0xff]   ;;  %v2213_v9 = vld [vmem:[%s2843_s1 + $0x240] sm:$0xff]  }
  0x16   :  { %1946 = vmatprep.subr.bf16.mxu1 %v2165_v22  ;;  %v2206_v1 = vld [vmem:[%s2843_s1 + $0x1b0] sm:$0xff]   ;;  %v2208_v3 = vld [vmem:[%s2843_s1 + $0x138] sm:$0xff]   ;;  %v2216_v13 = vld [vmem:[%s2843_s1 + $0x200] sm:$0xff]  }
  0x17   :  { %1925 = vmatpush3.bf16.msra.mxu0 %v2164_v21  ;;  %v2209_v4 = vld [vmem:[%s2843_s1 + $0x1f8] sm:$0xff]   ;;  %v23_v5 = vld [vmem:[%s2844_s0 + $0x10] sm:$0xff]  ;;  %v2217_v14 = vld [vmem:[%s2843_s1 + $0x2c0] sm:$0xff]  }
  0x18   :  { %1926 = vmatprep.subr.bf16.mxu0 %v2167_v24  ;;  %v1745_v6 = vcombine.low %v23_v5, %v23_v5  ;;  %v1746_v7 = vcombine.high %v23_v5, %v23_v5  ;;  %v2212_v8 = vld [vmem:[%s2843_s1 + $0x1b8] sm:$0xff]   ;;  %v2218_v15 = vld [vmem:[%s2843_s1 + $0x280] sm:$0xff]   ;;  %v2219_v16 = vld [vmem:[%s2843_s1 + $0x248] sm:$0xff]  }
  0x19   :  { %1947 = vmatpush3.bf16.msra.mxu1 %v2166_v23  ;;  %v24_v10 = vld [vmem:[%s2844_s0 + $0x18] sm:$0xff]  ;;  %v2220_v17 = vld [vmem:[%s2843_s1 + $0x208] sm:$0xff]   ;;  %v2223_v20 = vld [vmem:[%s2843_s1 + $0x250] sm:$0xff]  }
  0x1a   :  { %1948 = vmatprep.subr.bf16.mxu1 %v2169_v26  ;;  %v1747_v11 = vcombine.low %v24_v10, %v24_v10  ;;  %v1748_v12 = vcombine.high %v24_v10, %v24_v10  ;;  %v2221_v18 = vld [vmem:[%s2843_s1 + $0x2c8] sm:$0xff]   ;;  %v2224_v21 = vld [vmem:[%s2843_s1 + $0x210] sm:$0xff]   ;;  %v2227_v24 = vld [vmem:[%s2843_s1 + $0x258] sm:$0xff]  }
  0x1b   :  { %1927 = vmatpush3.bf16.msra.mxu0 %v2168_v25  ;;  %v2222_v19 = vld [vmem:[%s2843_s1 + $0x288] sm:$0xff]   ;;  %v2225_v22 = vld [vmem:[%s2843_s1 + $0x2d0] sm:$0xff]   ;;  %v2228_v25 = vld [vmem:[%s2843_s1 + $0x218] sm:$0xff]  }
  0x1c   :  { %1928 = vmatprep.subr.bf16.mxu0 %v2171_v28  ;;  %v2226_v23 = vld [vmem:[%s2843_s1 + $0x290] sm:$0xff]   ;;  %v2229_v26 = vld [vmem:[%s2843_s1 + $0x2d8] sm:$0xff]   ;;  %v2231_v28 = vld [vmem:[%s2843_s1 + $0x260] sm:$0xff]  }
  0x1d   :  { %1949 = vmatpush3.bf16.msra.mxu1 %v2170_v27  ;;  %v2230_v27 = vld [vmem:[%s2843_s1 + $0x298] sm:$0xff]   ;;  %v2234_v31 = vld [vmem:[%s2843_s1 + $0x2a0] sm:$0xff]   ;;  %v2236_v33 = vld [vmem:[%s2843_s1 + $0x228] sm:$0xff]  }
  0x1e   :  { %1950 = vmatprep.subr.bf16.mxu1 %v2173_v30  ;;  %v2233_v30 = vld [vmem:[%s2843_s1 + $0x2e0] sm:$0xff]   ;;  %v2239_v36 = vld [vmem:[%s2843_s1 + $0x270] sm:$0xff]  }
  0x1f   :  { %1929 = vmatpush3.bf16.msra.mxu0 %v2172_v29  ;;  %v2232_v29 = vld [vmem:[%s2843_s1 + $0x220] sm:$0xff]   ;;  %v2241_v38 = vld [vmem:[%s2843_s1 + $0x2f0] sm:$0xff]  }
  0x20   :  { %1958 = vmatprep.subr.bf16.mxu0 %v2177_v35  ;;  %v2238_v35 = vld [vmem:[%s2843_s1 + $0x2a8] sm:$0xff]   ;;  %v2270_v5 = vld [vmem:[%s2843_s1 + $0x3a0] sm:$0xff]   ;;  %v2275_v10 = vld [vmem:[%s2843_s1 + $0x370] sm:$0xff]  }
  0x21   :  { %1951 = vmatpush3.bf16.msra.mxu1 %v2176_v34  ;;  %v2237_v34 = vld [vmem:[%s2843_s1 + $0x2e8] sm:$0xff]  }
  0x22   :  { %1283 = vmatmul.mubr.bf16.vlgmr.msra.gmra.mrb[0].mxu0 %v1741_v32  ;;  %1980 = vmatprep.subr.bf16.mxu1 %v2181_v40  ;;  %v2235_v32 = vld [vmem:[%s2843_s1 + $0x268] sm:$0xff]   ;;  %v2243_v40 = vld [vmem:[%s2843_s1 + $0x278] sm:$0xff]  }
  0x23   :  { %1959 = vmatpush3.bf16.msra.mxu0 %v2180_v39  ;;  %1362 = vmatprep.mubr.bf16.mxu0 %v1746_v7  ;;  %v2242_v39 = vld [vmem:[%s2843_s1 + $0x2b0] sm:$0xff]   ;;  %v2272_v7 = vld [vmem:[%s2843_s1 + $0x328] sm:$0xff]  }
  0x24   :  { %1323 = vmatmul.mubr.bf16.vlgmr.msra.gmra.mrb[0].mxu1 %v1743_v37  ;;  %1960 = vmatprep.subr.bf16.mxu0 %v2183_v42  ;;  %v2240_v37 = vld [vmem:[%s2843_s1 + $0x230] sm:$0xff]   ;;  %v2245_v42 = vld [vmem:[%s2843_s1 + $0x2f8] sm:$0xff]  }
  0x25   :  { %1981 = vmatpush3.bf16.msra.mxu1 %v2182_v41  ;;  %1402 = vmatprep.mubr.bf16.mxu1 %v1748_v12  ;;  %v2244_v41 = vld [vmem:[%s2843_s1 + $0x238] sm:$0xff]   ;;  %v2277_v12 = vld [vmem:[%s2843_s1 + $0x3f0] sm:$0xff]  }
  0x26   :  { %1982 = vmatprep.subr.bf16.mxu1 %v2185_v44 }
  0x27   :  { %1961 = vmatpush3.bf16.msra.mxu0 %v2184_v43  ;;  %v25_v43 = vld [vmem:[%s2844_s0 + $0x20] sm:$0xff] }
  0x28   :  { %1962 = vmatprep.subr.bf16.mxu0 %v2187_v46  ;;  %v1749_v44 = vcombine.low %v25_v43, %v25_v43  ;;  %v2248_v46 = vld [vmem:[%s2843_s1 + $0x2b8] sm:$0xff]  }
  0x29   :  { %1983 = vmatpush3.bf16.msra.mxu1 %v2186_v45  ;;  %v1750_v45 = vcombine.high %v25_v43, %v25_v43  ;;  %v2313_v43 = vmov 0.0  }
  0x2a   :  { %1984 = vmatprep.subr.bf16.mxu1 %v2189_v48  ;;  %v26_v48 = vld [vmem:[%s2844_s0 + $0x28] sm:$0xff] }
  0x2b   :  { %1963 = vmatpush3.bf16.msra.mxu0 %v2188_v47  ;;  %v2249_v47 = vld [vmem:[%s2843_s1 + $0x340] sm:$0xff]  }
  0x2c   :  { %1964 = vmatprep.subr.bf16.mxu0 %v2191_v50  ;;  %v1752_v50 = vcombine.high %v26_v48, %v26_v48 }
  0x2d   :  { %1985 = vmatpush3.bf16.msra.mxu1 %v2190_v49  ;;  %v1751_v49 = vcombine.low %v26_v48, %v26_v48  ;;  %v2309_v48 = vld [vmem:[%s2845_s3 + $0x20] sm:$0xff]  }
  0x2e   :  { %1986 = vmatprep.subr.bf16.mxu1 %v2193_v52  ;;  %v2253_v52 = vld [vmem:[%s2843_s1 + $0x3c0] sm:$0xff]  }
  0x2f   :  { %1965 = vmatpush3.bf16.msra.mxu0 %v2192_v51  ;;  %v2252_v51 = vld [vmem:[%s2843_s1 + $0x300] sm:$0xff]  }
  0x30   :  { %1966 = vmatprep.subr.bf16.mxu0 %v2195_v54  ;;  %v2255_v54 = vld [vmem:[%s2843_s1 + $0x348] sm:$0xff]  }
  0x31   :  { %1987 = vmatpush3.bf16.msra.mxu1 %v2194_v53  ;;  %v2254_v53 = vld [vmem:[%s2843_s1 + $0x380] sm:$0xff]  }
  0x32   :  { %1988 = vmatprep.subr.bf16.mxu1 %v2197_v56  ;;  %v2257_v56 = vld [vmem:[%s2843_s1 + $0x3c8] sm:$0xff]  }
  0x33   :  { %1967 = vmatpush3.bf16.msra.mxu0 %v2196_v55  ;;  %v2256_v55 = vld [vmem:[%s2843_s1 + $0x308] sm:$0xff]  }
  0x34   :  { %1968 = vmatprep.subr.bf16.mxu0 %v2199_v58  ;;  %v2259_v58 = vld [vmem:[%s2843_s1 + $0x350] sm:$0xff]  }
  0x35   :  { %1989 = vmatpush3.bf16.msra.mxu1 %v2198_v57  ;;  %v2258_v57 = vld [vmem:[%s2843_s1 + $0x388] sm:$0xff]  }
  0x36   :  { %1990 = vmatprep.subr.bf16.mxu1 %v2201_v60  ;;  %v2261_v60 = vld [vmem:[%s2843_s1 + $0x3d0] sm:$0xff]  }
  0x37   :  { %1969 = vmatpush3.bf16.msra.mxu0 %v2200_v59  ;;  %v2260_v59 = vld [vmem:[%s2843_s1 + $0x310] sm:$0xff]  }
  0x38   :  { %1970 = vmatprep.subr.bf16.mxu0 %v2203_v62  ;;  %v2263_v62 = vld [vmem:[%s2843_s1 + $0x358] sm:$0xff]  }
  0x39   :  { %1991 = vmatpush3.bf16.msra.mxu1 %v2202_v61  ;;  %v2262_v61 = vld [vmem:[%s2843_s1 + $0x390] sm:$0xff]  }
  0x3a   :  { %1992 = vmatprep.subr.bf16.mxu1 %v2205_v0  ;;  %v2265_v0 = vld [vmem:[%s2843_s1 + $0x3d8] sm:$0xff]  }
  0x3b   :  { %1971 = vmatpush3.bf16.msra.mxu0 %v2204_v63  ;;  %v2264_v63 = vld [vmem:[%s2843_s1 + $0x318] sm:$0xff]  }
  0x3c   :  { %1972 = vmatprep.subr.bf16.mxu0 %v2207_v2  ;;  %v2267_v2 = vld [vmem:[%s2843_s1 + $0x360] sm:$0xff]  }
  0x3d   :  { %1993 = vmatpush3.bf16.msra.mxu1 %v2206_v1  ;;  %v2266_v1 = vld [vmem:[%s2843_s1 + $0x398] sm:$0xff]  }
  0x3e   :  { %1994 = vmatprep.subr.bf16.mxu1 %v2209_v4  ;;  %v2269_v4 = vld [vmem:[%s2843_s1 + $0x3e0] sm:$0xff]  }
  0x3f   :  { %1973 = vmatpush3.bf16.msra.mxu0 %v2208_v3  ;;  %v2268_v3 = vld [vmem:[%s2843_s1 + $0x320] sm:$0xff]  }
  0x40   :  { %2002 = vmatprep.subr.bf16.mxu0 %v2213_v9  ;;  %v2274_v9 = vld [vmem:[%s2843_s1 + $0x3a8] sm:$0xff]  }
  0x41   :  { %1995 = vmatpush3.bf16.msra.mxu1 %v2212_v8  ;;  %v2273_v8 = vld [vmem:[%s2843_s1 + $0x3e8] sm:$0xff]  }
  0x42   :  { %1363 = vmatmul.mubr.bf16.vlgmr.msra.gmra.mrb[4].mxu0 %v1745_v6  ;;  %2024 = vmatprep.subr.bf16.mxu1 %v2217_v14  ;;  %v2271_v6 = vld [vmem:[%s2843_s1 + $0x368] sm:$0xff]   ;;  %v2279_v14 = vld [vmem:[%s2843_s1 + $0x378] sm:$0xff]  }
  0x43   :  { %2003 = vmatpush3.bf16.msra.mxu0 %v2216_v13  ;;  %1442 = vmatprep.mubr.bf16.mxu0 %v1750_v45  ;;  %v2278_v13 = vld [vmem:[%s2843_s1 + $0x3b0] sm:$0xff]   ;;  %v2306_v45 = vld [vmem:[%s2845_s3 + $0x8] sm:$0xff]  }
  0x44   :  { %1403 = vmatmul.mubr.bf16.vlgmr.msra.gmra.mrb[4].mxu1 %v1747_v11  ;;  %2004 = vmatprep.subr.bf16.mxu0 %v2219_v16  ;;  %v2276_v11 = vld [vmem:[%s2843_s1 + $0x330] sm:$0xff]   ;;  %v2281_v16 = vld [vmem:[%s2843_s1 + $0x3f8] sm:$0xff]  }
  0x45   :  { %2025 = vmatpush3.bf16.msra.mxu1 %v2218_v15  ;;  %1482 = vmatprep.mubr.bf16.mxu1 %v1752_v50  ;;  %v2280_v15 = vld [vmem:[%s2843_s1 + $0x338] sm:$0xff]   ;;  %v1740_v50 = vld [vmem:[%s2846_s2] ss:$0 sm:$0xff] }
  0x46   :  { %2026 = vmatprep.subr.bf16.mxu1 %v2221_v18 }
  0x47   :  { %2005 = vmatpush3.bf16.msra.mxu0 %v2220_v17  ;;  %v27_v17 = vld [vmem:[%s2844_s0 + $0x30] sm:$0xff] }
  0x48   :  { %2006 = vmatprep.subr.bf16.mxu0 %v2223_v20  ;;  %v1753_v18 = vcombine.low %v27_v17, %v27_v17  ;;  %v2284_v20 = vld [vmem:[%s2843_s1 + $0x3b8] sm:$0xff]  }
  0x49   :  { %2027 = vmatpush3.bf16.msra.mxu1 %v2222_v19  ;;  %v1754_v19 = vcombine.high %v27_v17, %v27_v17 }
  0x4a   :  { %2028 = vmatprep.subr.bf16.mxu1 %v2225_v22  ;;  %v28_v22 = vld [vmem:[%s2844_s0 + $0x38] sm:$0xff] }
  0x4b   :  { %2007 = vmatpush3.bf16.msra.mxu0 %v2224_v21  ;;  %v2285_v21 = vld [vmem:[%s2843_s1 + $0x440] sm:$0xff]  }
  0x4c   :  { %2008 = vmatprep.subr.bf16.mxu0 %v2227_v24  ;;  %v1756_v24 = vcombine.high %v28_v22, %v28_v22 }
  0x4d   :  { %2029 = vmatpush3.bf16.msra.mxu1 %v2226_v23  ;;  %v1755_v23 = vcombine.low %v28_v22, %v28_v22 }
  0x4e   :  { %2030 = vmatprep.subr.bf16.mxu1 %v2229_v26  ;;  %v2289_v26 = vld [vmem:[%s2843_s1 + $0x448] sm:$0xff]  }
  0x4f   :  { %2009 = vmatpush3.bf16.msra.mxu0 %v2228_v25  ;;  %v2288_v25 = vld [vmem:[%s2843_s1 + $0x400] sm:$0xff]  }
  0x50   :  { %2010 = vmatprep.subr.bf16.mxu0 %v2231_v28  ;;  %v2291_v28 = vld [vmem:[%s2843_s1 + $0x450] sm:$0xff]  }
  0x51   :  { %2031 = vmatpush3.bf16.msra.mxu1 %v2230_v27  ;;  %v2290_v27 = vld [vmem:[%s2843_s1 + $0x408] sm:$0xff]  }
  0x52   :  { %2032 = vmatprep.subr.bf16.mxu1 %v2233_v30  ;;  %v2293_v30 = vld [vmem:[%s2843_s1 + $0x458] sm:$0xff]  }
  0x53   :  { %2011 = vmatpush3.bf16.msra.mxu0 %v2232_v29  ;;  %v2292_v29 = vld [vmem:[%s2843_s1 + $0x410] sm:$0xff]  }
  0x54   :  { %2012 = vmatprep.subr.bf16.mxu0 %v2235_v32  ;;  %v2295_v32 = vld [vmem:[%s2843_s1 + $0x460] sm:$0xff]  }
  0x55   :  { %2033 = vmatpush3.bf16.msra.mxu1 %v2234_v31  ;;  %v2294_v31 = vld [vmem:[%s2843_s1 + $0x418] sm:$0xff]  }
  0x56   :  { %2034 = vmatprep.subr.bf16.mxu1 %v2237_v34  ;;  %v29_v34 = vld [vmem:[%s2844_s0 + $0x40] sm:$0xff] }
  0x57   :  { %2013 = vmatpush3.bf16.msra.mxu0 %v2236_v33  ;;  %v2296_v33 = vld [vmem:[%s2843_s1 + $0x420] sm:$0xff]  }
  0x58   :  { %2014 = vmatprep.subr.bf16.mxu0 %v2239_v36  ;;  %v1758_v36 = vcombine.high %v29_v34, %v29_v34 }
  0x59   :  { %2035 = vmatpush3.bf16.msra.mxu1 %v2238_v35  ;;  %v2297_v35 = vld [vmem:[%s2843_s1 + $0x468] sm:$0xff]  }
  0x5a   :  { %2036 = vmatprep.subr.bf16.mxu1 %v2241_v38  ;;  %v2299_v38 = vld [vmem:[%s2843_s1 + $0x470] sm:$0xff]  }
  0x5b   :  { %2015 = vmatpush3.bf16.msra.mxu0 %v2240_v37  ;;  %v2298_v37 = vld [vmem:[%s2843_s1 + $0x428] sm:$0xff]  }
  0x5c   :  { %2016 = vmatprep.subr.bf16.mxu0 %v2243_v40  ;;  %v2301_v40 = vld [vmem:[%s2843_s1 + $0x478] sm:$0xff]  }
  0x5d   :  { %2037 = vmatpush3.bf16.msra.mxu1 %v2242_v39  ;;  %v2300_v39 = vld [vmem:[%s2843_s1 + $0x430] sm:$0xff]  }
  0x5e   :  { %2038 = vmatprep.subr.bf16.mxu1 %v2245_v42  ;;  %v1757_v42 = vcombine.low %v29_v34, %v29_v34 }
  0x5f   :  { %2017 = vmatpush3.bf16.msra.mxu0 %v2244_v41  ;;  %v2302_v41 = vld [vmem:[%s2843_s1 + $0x438] sm:$0xff]  }
  0x60   :  { %2046 = vmatprep.subr.bf16.mxu0 %v2249_v47  ;;  %v2308_v47 = vld [vmem:[%s2845_s3 + $0x18] sm:$0xff]  }
  0x61   :  { %2039 = vmatpush3.bf16.msra.mxu1 %v2248_v46  ;;  %v2307_v46 = vld [vmem:[%s2845_s3 + $0x10] sm:$0xff]  }
  0x62   :  { %1443 = vmatmul.mubr.bf16.vlgmr.msra.gmra.mrb[8].mxu0 %v1749_v44  ;;  %2068 = vmatprep.subr.bf16.mxu1 %v2253_v52  ;;  %v2305_v44 = vld [vmem:[%s2845_s3] sm:$0xff]  }
  0x63   :  { %2047 = vmatpush3.bf16.msra.mxu0 %v2252_v51  ;;  %1522 = vmatprep.mubr.bf16.mxu0 %v1754_v19 }
  0x64   :  { %1483 = vmatmul.mubr.bf16.vlgmr.msra.gmra.mrb[8].mxu1 %v1751_v49  ;;  %2048 = vmatprep.subr.bf16.mxu0 %v2255_v54 }
  0x65   :  { %2069 = vmatpush3.bf16.msra.mxu1 %v2254_v53  ;;  %1562 = vmatprep.mubr.bf16.mxu1 %v1756_v24 }
  0x66   :  { %2070 = vmatprep.subr.bf16.mxu1 %v2257_v56 }
  0x67   :  { %2049 = vmatpush3.bf16.msra.mxu0 %v2256_v55 }
  0x68   :  { %2050 = vmatprep.subr.bf16.mxu0 %v2259_v58 }
  0x69   :  { %2071 = vmatpush3.bf16.msra.mxu1 %v2258_v57  ;;  %v2310_v57 = vld [vmem:[%s2845_s3 + $0x28] sm:$0xff]  }
  0x6a   :  { %2072 = vmatprep.subr.bf16.mxu1 %v2261_v60 }
  0x6b   :  { %2051 = vmatpush3.bf16.msra.mxu0 %v2260_v59 }
  0x6c   :  { %2052 = vmatprep.subr.bf16.mxu0 %v2263_v62 }
  0x6d   :  { %2073 = vmatpush3.bf16.msra.mxu1 %v2262_v61 }
  0x6e   :  { %2074 = vmatprep.subr.bf16.mxu1 %v2265_v0  ;;  %v2312_v0 = vld [vmem:[%s2845_s3 + $0x38] sm:$0xff]  }
  0x6f   :  { %2053 = vmatpush3.bf16.msra.mxu0 %v2264_v63  ;;  %v2311_v63 = vld [vmem:[%s2845_s3 + $0x30] sm:$0xff]  }
  0x70   :  { %2054 = vmatprep.subr.bf16.mxu0 %v2267_v2 }
  0x71   :  { %2075 = vmatpush3.bf16.msra.mxu1 %v2266_v1 }
  0x72   :  { %2076 = vmatprep.subr.bf16.mxu1 %v2269_v4 }
  0x73   :  { %2055 = vmatpush3.bf16.msra.mxu0 %v2268_v3 }
  0x74   :  { %2056 = vmatprep.subr.bf16.mxu0 %v2271_v6 }
  0x75   :  { %2077 = vmatpush3.bf16.msra.mxu1 %v2270_v5 }
  0x76   :  { %2078 = vmatprep.subr.bf16.mxu1 %v2273_v8 }
  0x77   :  { %2057 = vmatpush3.bf16.msra.mxu0 %v2272_v7 }
  0x78   :  { %2058 = vmatprep.subr.bf16.mxu0 %v2275_v10 }
  0x79   :  { %2079 = vmatpush3.bf16.msra.mxu1 %v2274_v9 }
  0x7a   :  { %2080 = vmatprep.subr.bf16.mxu1 %v2277_v12 }
  0x7b   :  { %2059 = vmatpush3.bf16.msra.mxu0 %v2276_v11 }
  0x7c   :  { %2060 = vmatprep.subr.bf16.mxu0 %v2279_v14 }
  0x7d   :  { %2081 = vmatpush3.bf16.msra.mxu1 %v2278_v13 }
  0x7e   :  { %2082 = vmatprep.subr.bf16.mxu1 %v2281_v16 }
  0x7f   :  { %2061 = vmatpush3.bf16.msra.mxu0 %v2280_v15 }
  0x80   :  { %2090 = vmatprep.subr.bf16.mxu0 %v2285_v21 }
  0x81   :  { %2083 = vmatpush3.bf16.msra.mxu1 %v2284_v20 }
  0x82   :  { %1523 = vmatmul.mubr.bf16.vlgmr.msra.gmra.mrb[12].mxu0 %v1753_v18  ;;  %2121 = vmatprep.subr.bf16.mxu1 %v2313_v43 }
  0x83   :  { %2091 = vmatpush3.bf16.msra.mxu0 %v2288_v25  ;;  %1602 = vmatprep.mubr.bf16.mxu0 %v1758_v36 }
  0x84   :  { %1563 = vmatmul.mubr.bf16.vlgmr.msra.gmra.mrb[12].mxu1 %v1755_v23  ;;  %2092 = vmatprep.subr.bf16.mxu0 %v2289_v26 }
  0x85   :  { %2122 = vmatpush3.bf16.msra.mxu1 %v2305_v44  ;;  %2137 = vmatprep.mubr.msk.bf16.mxu1 %vm2314_vm0, %v2313_v43 }
  0x86   :  { %2123 = vmatprep.subr.bf16.mxu1 %v2313_v43 }
  0x87   :  { %2093 = vmatpush3.bf16.msra.mxu0 %v2290_v27 }
  0x88   :  { %2094 = vmatprep.subr.bf16.mxu0 %v2291_v28 }
  0x89   :  { %2124 = vmatpush3.bf16.msra.mxu1 %v2306_v45  ;;  %v1904_v45 = vld [vmem:[%s2846_s2 + $0x2] ss:$0 sm:$0xff] }
  0x8a   :  { %2125 = vmatprep.subr.bf16.mxu1 %v2313_v43 }
  0x8b   :  { %2095 = vmatpush3.bf16.msra.mxu0 %v2292_v29 }
  0x8c   :  { %2096 = vmatprep.subr.bf16.mxu0 %v2293_v30 }
  0x8d   :  { %2126 = vmatpush3.bf16.msra.mxu1 %v2307_v46 }
  0x8e   :  { %2127 = vmatprep.subr.bf16.mxu1 %v2313_v43 }
  0x8f   :  { %2097 = vmatpush3.bf16.msra.mxu0 %v2294_v31 }
  0x90   :  { %2098 = vmatprep.subr.bf16.mxu0 %v2295_v32 }
  0x91   :  { %2128 = vmatpush3.bf16.msra.mxu1 %v2308_v47 }
  0x92   :  { %2129 = vmatprep.subr.bf16.mxu1 %v2313_v43 }
  0x93   :  { %2099 = vmatpush3.bf16.msra.mxu0 %v2296_v33 }
  0x94   :  { %2100 = vmatprep.subr.bf16.mxu0 %v2297_v35 }
  0x95   :  { %2130 = vmatpush3.bf16.msra.mxu1 %v2309_v48 }
  0x96   :  { %2131 = vmatprep.subr.bf16.mxu1 %v2313_v43 }
  0x97   :  { %2101 = vmatpush3.bf16.msra.mxu0 %v2298_v37 }
  0x98   :  { %2102 = vmatprep.subr.bf16.mxu0 %v2299_v38 }
  0x99   :  { %2132 = vmatpush3.bf16.msra.mxu1 %v2310_v57 }
  0x9a   :  { %2133 = vmatprep.subr.bf16.mxu1 %v2313_v43 }
  0x9b   :  { %2103 = vmatpush3.bf16.msra.mxu0 %v2300_v39 }
  0x9c   :  { %2104 = vmatprep.subr.bf16.mxu0 %v2301_v40 }
  0x9d   :  { %2134 = vmatpush3.bf16.msra.mxu1 %v2311_v63 }
  0x9e   :  { %2135 = vmatprep.subr.bf16.mxu1 %v2313_v43  ;;  %v1903_v43 = vld [vmem:[%s2846_s2 + $0x1] ss:$0 sm:$0xff] }
  0x9f   :  { %2105 = vmatpush3.bf16.msra.mxu0 %v2302_v41 }
  0xa1   :  { %2136 = vmatpush3.bf16.msra.mxu1 %v2312_v0 }
  0xa2   :  { %1603 = vmatmul.mubr.bf16.vlgmr.msra.gmra.mrb[16].mxu0 %v1757_v42 }
  0xf5   :  { %v1930_v49 = vpop.f32.mrb[0].mxu0 }
  0xf6   :  { %v1931_v51 = vpop.f32.mrb[1].mxu0 }
  0xf7   :  { %v1932_v52 = vadd.f32 %v1931_v51, %v1930_v49  ;;  %v1933_v53 = vpop.f32.mrb[2].mxu0  ;;  %v1952_v54 = vpop.f32.mrb[0].mxu1  ;;  %v1905_v49 = vld [vmem:[%s2847_s4] ss:$0 sm:$0xff] }
  0xf8   :  { %v1934_v55 = vpop.f32.mrb[3].mxu0  ;;  %v1953_v56 = vpop.f32.mrb[1].mxu1 }
  0xf9   :  { %v1285_v58 = vadd.f32 %v1932_v52, %v1740_v50  ;;  %v1954_v59 = vadd.f32 %v1953_v56, %v1952_v54  ;;  %v1955_v60 = vpop.f32.mrb[2].mxu1 }
  0xfa   :  { %v1956_v61 = vpop.f32.mrb[3].mxu1 }
  0xfb   :  { %v1325_v62 = vadd.f32 %v1954_v59, %v1285_v58 }
 0x115   :  { %v1974_v1 = vpop.f32.mrb[4].mxu0 }
 0x116   :  { %v1975_v2 = vpop.f32.mrb[5].mxu0 }
 0x117   :  { %v1976_v3 = vadd.f32 %v1975_v2, %v1974_v1  ;;  %v1977_v4 = vpop.f32.mrb[6].mxu0  ;;  %v1996_v5 = vpop.f32.mrb[4].mxu1 }
 0x118   :  { %v1978_v6 = vpop.f32.mrb[7].mxu0  ;;  %v1997_v8 = vpop.f32.mrb[5].mxu1 }
 0x119   :  { %v1365_v7 = vadd.f32 %v1976_v3, %v1325_v62  ;;  %v1998_v9 = vadd.f32 %v1997_v8, %v1996_v5  ;;  %v1999_v10 = vpop.f32.mrb[6].mxu1 }
 0x11a   :  { %v2000_v11 = vpop.f32.mrb[7].mxu1 }
 0x11b   :  { %v1405_v12 = vadd.f32 %v1998_v9, %v1365_v7 }
 0x135   :  { %v2018_v13 = vpop.f32.mrb[8].mxu0 }
 0x136   :  { %v2019_v14 = vpop.f32.mrb[9].mxu0 }
 0x137   :  { %v2020_v15 = vadd.f32 %v2019_v14, %v2018_v13  ;;  %v2021_v16 = vpop.f32.mrb[10].mxu0  ;;  %v2040_v17 = vpop.f32.mrb[8].mxu1 }
 0x138   :  { %v2022_v18 = vpop.f32.mrb[11].mxu0  ;;  %v2041_v19 = vpop.f32.mrb[9].mxu1 }
 0x139   :  { %v1445_v20 = vadd.f32 %v2020_v15, %v1405_v12  ;;  %v2042_v21 = vadd.f32 %v2041_v19, %v2040_v17  ;;  %v2043_v22 = vpop.f32.mrb[10].mxu1 }
 0x13a   :  { %v2044_v23 = vpop.f32.mrb[11].mxu1 }
 0x13b   :  { %v1485_v24 = vadd.f32 %v2042_v21, %v1445_v20 }
 0x155   :  { %v2062_v25 = vpop.f32.mrb[12].mxu0 }
 0x156   :  { %v2063_v26 = vpop.f32.mrb[13].mxu0 }
 0x157   :  { %v2064_v27 = vadd.f32 %v2063_v26, %v2062_v25  ;;  %v2065_v28 = vpop.f32.mrb[14].mxu0  ;;  %v2084_v29 = vpop.f32.mrb[12].mxu1 }
 0x158   :  { %v2066_v30 = vpop.f32.mrb[15].mxu0  ;;  %v2085_v31 = vpop.f32.mrb[13].mxu1 }
 0x159   :  { %v1525_v32 = vadd.f32 %v2064_v27, %v1485_v24  ;;  %v2086_v33 = vadd.f32 %v2085_v31, %v2084_v29  ;;  %v2087_v34 = vpop.f32.mrb[14].mxu1 }
 0x15a   :  { %v2088_v35 = vpop.f32.mrb[15].mxu1 }
 0x15b   :  { %v1565_v36 = vadd.f32 %v2086_v33, %v1525_v32 }
 0x175   :  { %v2106_v37 = vpop.f32.mrb[16].mxu0 }
 0x176   :  { %v2107_v38 = vpop.f32.mrb[17].mxu0 }
 0x177   :  { %v2108_v39 = vadd.f32 %v2107_v38, %v2106_v37  ;;  %v2109_v40 = vpop.f32.mrb[18].mxu0 }
 0x178   :  { %v2110_v41 = vpop.f32.mrb[19].mxu0 }
 0x179   :  { %v1605_v42 = vadd.f32 %v2108_v39, %v1565_v36 }
 0x17b   :  { %v1610_v44 = vmax.f32 %v1605_v42, 0.0 }
 0x17d   :  { %v1616_v46 = vmul.f32 %v1903_v43, %v1610_v44 }
 0x17f   :  { %v1622_v47 = vadd.f32 %v1904_v45, %v1616_v46 }
 0x181   :  { %v1623_v48 = vpack.c.bf16 %v1622_v47, %v1622_v47 }
 0x183   :  { %2138 = vmatmul.mubr.bf16.vlgmr.msra.gmra.mrb[16].mxu1 %v1623_v48 }
 0x256   :  { %v1729_v50 = vpop.f32.mrb[16].mxu1 }
 0x257   :  { %v1730_v51 = vadd.f32 %v1905_v49, %v1729_v50  ;;  %v2139_v52 = vpop.f32.mrb[17].mxu1 }
 0x258   :  { %v1732_v53 = vpop.f32.mrb[18].mxu1 }
 0x259   :  { %1735 = vst [vmem:[%s2848_s5] sm:$0xff] %v1730_v51  ;;  %v2140_v54 = vpop.f32.mrb[19].mxu1 }

</bundles_post_ra>
